<compile_context>
chip_gen: v6e
topology: v6e:2x2x1
jax: 0.10.0
libtpu: 0.0.40
codegen_flags: <defaults>
</compile_context>

<pallas_src>
import functools

import jax
import jax.numpy as jnp
from jax import lax
from jax.experimental import pallas as pl
from jax.experimental.pallas import tpu as pltpu

EPS = 1e-5


def _stem_kernel(a1e_ref, w1_ref, b1_ref, wskip_ref, bskip_ref, w2_ref, b2_ref,
                 wse1_ref, wse2_ref, mask_ref, o_ref, hbuf_ref,
                 *, Ho, Wo, He, We, Cout, Cr):
    # a1e_ref : (1, Pe, 9*Cin)  im2col of x on the extended (Ho+2, Wo+2) grid
    # w1_ref  : (9*Cin, Cout)   conv1 weights, BN1 scale folded in
    # b1_ref  : (1, Cout)       folded conv1 bias + BN1 shift
    # wskip   : (9*Cin, Cout)   1x1 skip conv (BN2 folded), embedded at centre tap
    # bskip   : (1, Cout)
    # w2_ref  : (9, Cout, Cout) second 3x3 conv, tap-major
    # b2_ref  : (1, Cout)
    # wse1    : (Cout, Cr)      SE first linear (transposed torch weight)
    # wse2    : (Cr, Cout)      SE second linear (transposed torch weight)
    # mask    : (Pe, 1)         1.0 on the interior Ho x Wo grid, 0.0 on the ring
    # o_ref   : (1, Ho, Wo, Cout)
    # hbuf_ref: (He, We, Cout)  VMEM scratch holding the zero-ringed intermediate
    P = Ho * Wo
    a1e = a1e_ref[0]                                                  # (Pe, 9*Cin)

    # ---- branch c1, first conv (+BN folded) + ReLU on the extended grid
    h1e = jnp.dot(a1e, w1_ref[...], preferred_element_type=jnp.float32)
    h1e = jnp.maximum(h1e + b1_ref[...], 0.0)
    h1e = h1e * mask_ref[...]                       # zero the 1-pixel ring
    hbuf_ref[...] = h1e.reshape(He, We, Cout)       # spill to VMEM scratch

    # ---- branch c2 (1x1 conv, stride + BN folded; shares the im2col LHS)
    skipe = jnp.dot(a1e, wskip_ref[...], preferred_element_type=jnp.float32)
    skipe = (skipe + bskip_ref[...]).reshape(He, We, Cout)
    skip = skipe[1:Ho + 1, 1:Wo + 1, :].reshape(P, Cout)

    # ---- branch c1, second 3x3 "same" conv over the zero-ringed feature map
    acc = jnp.zeros((P, Cout), jnp.float32)
    for ky in range(3):
        for kx in range(3):
            tap = hbuf_ref[ky:ky + Ho, kx:kx + Wo, :].reshape(P, Cout)
            acc = acc + jnp.dot(tap, w2_ref[ky * 3 + kx],
                                preferred_element_type=jnp.float32)
    z = acc + b2_ref[...] + skip                                      # (P, Cout)

    # ---- squeeze-excitation: mean-pool -> Linear -> ReLU -> Linear -> sigmoid
    # mean commutes with the first (linear) layer, so no M=1 matmuls are needed.
    t = jnp.dot(z, wse1_ref[...], preferred_element_type=jnp.float32)  # (P, Cr)
    g1 = jnp.maximum(jnp.mean(t, axis=0, keepdims=True), 0.0)          # (1, Cr)
    g1 = jnp.broadcast_to(g1, (P, Cr))
    logits = jnp.dot(g1, wse2_ref[...], preferred_element_type=jnp.float32)
    gate = 1.0 / (1.0 + jnp.exp(-logits))                              # (P, Cout)
    o_ref[0] = (z * gate).reshape(Ho, Wo, Cout).astype(o_ref.dtype)


def _padded_bytes(shape, itemsize=4):
    """Approximate VMEM footprint of a block: last dim ->128, 2nd-last ->8."""
    s = list(shape)
    if len(s) == 1:
        s = [1] + s
    s[-1] = -(-s[-1] // 128) * 128
    s[-2] = -(-s[-2] // 8) * 8
    n = 1
    for d in s:
        n *= d
    return n * itemsize


@functools.partial(jax.jit, static_argnames=("stride",))
def stem_block_pallas(x_nchw, params, stride=1):
    N, Cin, H, W = x_nchw.shape
    Cout = params["b1"].shape[0]
    Cr = params["wse1"].shape[0]
    Ho = (H - 1) // stride + 1
    Wo = (W - 1) // stride + 1
    He, We = Ho + 2, Wo + 2
    Pe, P = He * We, Ho * Wo
    K1 = 9 * Cin

    # ---------- wrapper-side layout plumbing: NHWC + extended-grid im2col ----------
    x_nhwc = jnp.transpose(x_nchw, (0, 2, 3, 1)).astype(jnp.float32)
    pad_tl = stride + 1
    pad_b_h = Ho * stride + 2 - H
    pad_b_w = Wo * stride + 2 - W
    xp = jnp.pad(x_nhwc, ((0, 0), (pad_tl, pad_b_h), (pad_tl, pad_b_w), (0, 0)))
    taps = []
    for ky in range(3):
        for kx in range(3):
            taps.append(xp[:, ky: ky + (He - 1) * stride + 1: stride,
                              kx: kx + (We - 1) * stride + 1: stride, :])
    a1e = jnp.concatenate(taps, axis=-1).reshape(N, Pe, K1)          # (N, Pe, 9*Cin)

    # ---------- fold conv biases + inference-mode BatchNorm into the weights ------
    scale1 = params["gamma1"] / jnp.sqrt(params["var1"] + EPS)
    w1_mat = (jnp.transpose(params["w1"], (2, 3, 1, 0)).reshape(K1, Cout)
              * scale1[None, :])
    b1_eff = (params["beta1"] + scale1 * (params["b1"] - params["mean1"])
              ).reshape(1, Cout)

    scale2 = params["gamma2"] / jnp.sqrt(params["var2"] + EPS)
    wskip_c = params["wc2"][:, :, 0, 0].T * scale2[None, :]          # (Cin, Cout)
    wskip_mat = jnp.zeros((K1, Cout), jnp.float32).at[4 * Cin:5 * Cin, :].set(wskip_c)
    bskip_eff = (params["beta2"] + scale2 * (params["bc2"] - params["mean2"])
                 ).reshape(1, Cout)

    w2_mat = jnp.transpose(params["w2"], (2, 3, 1, 0)).reshape(9, Cout, Cout)
    b2_eff = params["b2"].reshape(1, Cout)

    wse1 = params["wse1"].T                                          # (Cout, Cr)
    wse2 = params["wse2"].T                                          # (Cr, Cout)

    ring_mask = (jnp.zeros((He, We), jnp.float32)
                 .at[1:Ho + 1, 1:Wo + 1].set(1.0)).reshape(Pe, 1)

    # ---------- explicit scoped-VMEM budget (double-buffered blocks + scratch) ----
    block_shapes = [(1, Pe, K1), (K1, Cout), (1, Cout), (K1, Cout), (1, Cout),
                    (9, Cout, Cout), (1, Cout), (Cout, Cr), (Cr, Cout), (Pe, 1),
                    (1, Ho, Wo, Cout)]
    vmem_need = 2 * sum(_padded_bytes(s) for s in block_shapes)
    vmem_need += _padded_bytes((He, We, Cout))
    vmem_limit = int(min(max(2 * vmem_need, 8 << 20), 32 << 20))

    kernel = functools.partial(_stem_kernel, Ho=Ho, Wo=Wo, He=He, We=We,
                               Cout=Cout, Cr=Cr)

    out_nhwc = pl.pallas_call(
        kernel,
        out_shape=jax.ShapeDtypeStruct((N, Ho, Wo, Cout), x_nchw.dtype),
        grid_spec=pltpu.PrefetchScalarGridSpec(
            num_scalar_prefetch=0,
            grid=(N,),
            in_specs=[
                pl.BlockSpec((1, Pe, K1), lambda n: (n, 0, 0)),
                pl.BlockSpec((K1, Cout), lambda n: (0, 0)),
                pl.BlockSpec((1, Cout), lambda n: (0, 0)),
                pl.BlockSpec((K1, Cout), lambda n: (0, 0)),
                pl.BlockSpec((1, Cout), lambda n: (0, 0)),
                pl.BlockSpec((9, Cout, Cout), lambda n: (0, 0, 0)),
                pl.BlockSpec((1, Cout), lambda n: (0, 0)),
                pl.BlockSpec((Cout, Cr), lambda n: (0, 0)),
                pl.BlockSpec((Cr, Cout), lambda n: (0, 0)),
                pl.BlockSpec((Pe, 1), lambda n: (0, 0)),
            ],
            out_specs=pl.BlockSpec((1, Ho, Wo, Cout), lambda n: (n, 0, 0, 0)),
            scratch_shapes=[pltpu.VMEM((He, We, Cout), jnp.float32)]),
        compiler_params=pltpu.CompilerParams(
            dimension_semantics=("parallel",),
            vmem_limit_bytes=vmem_limit),
    )(a1e, w1_mat, b1_eff, wskip_mat, bskip_eff, w2_mat, b2_eff, wse1, wse2,
      ring_mask)
    return jnp.transpose(out_nhwc, (0, 3, 1, 2))                     # NCHW


# ------------------------------ pure-JAX reference ------------------------------
def _bn(x, gamma, beta, mean, var):
    inv = gamma / jnp.sqrt(var + EPS)
    return (x - mean[None, :, None, None]) * inv[None, :, None, None] \
        + beta[None, :, None, None]


def stem_block_reference(x, params, stride=1):
    dn = ("NCHW", "OIHW", "NCHW")
    y = lax.conv_general_dilated(x, params["w1"], (stride, stride),
                                 [(1, 1), (1, 1)], dimension_numbers=dn)
    y = y + params["b1"][None, :, None, None]
    y = _bn(y, params["gamma1"], params["beta1"], params["mean1"], params["var1"])
    y = jnp.maximum(y, 0.0)
    y = lax.conv_general_dilated(y, params["w2"], (1, 1),
                                 [(1, 1), (1, 1)], dimension_numbers=dn)
    y = y + params["b2"][None, :, None, None]

    s = lax.conv_general_dilated(x, params["wc2"], (stride, stride),
                                 [(0, 0), (0, 0)], dimension_numbers=dn)
    s = s + params["bc2"][None, :, None, None]
    s = _bn(s, params["gamma2"], params["beta2"], params["mean2"], params["var2"])

    z = y + s
    p = jnp.mean(z, axis=(2, 3))                             # (N, C)
    h = jnp.maximum(p @ params["wse1"].T, 0.0)               # (N, Cr)
    g = 1.0 / (1.0 + jnp.exp(-(h @ params["wse2"].T)))       # (N, C)
    return z * g[:, :, None, None]


def make_params(key, in_c, out_c, r=8):
    ks = jax.random.split(key, 16)
    cr = out_c // r
    f32 = jnp.float32
    return {
        "w1": 0.1 * jax.random.normal(ks[0], (out_c, in_c, 3, 3), f32),
        "b1": 0.1 * jax.random.normal(ks[1], (out_c,), f32),
        "gamma1": 0.5 + jax.random.uniform(ks[2], (out_c,), f32),
        "beta1": 0.1 * jax.random.normal(ks[3], (out_c,), f32),
        "mean1": 0.1 * jax.random.normal(ks[4], (out_c,), f32),
        "var1": 0.5 + jax.random.uniform(ks[5], (out_c,), f32),
        "w2": 0.1 * jax.random.normal(ks[6], (out_c, out_c, 3, 3), f32),
        "b2": 0.1 * jax.random.normal(ks[7], (out_c,), f32),
        "wc2": 0.1 * jax.random.normal(ks[8], (out_c, in_c, 1, 1), f32),
        "bc2": 0.1 * jax.random.normal(ks[9], (out_c,), f32),
        "gamma2": 0.5 + jax.random.uniform(ks[10], (out_c,), f32),
        "beta2": 0.1 * jax.random.normal(ks[11], (out_c,), f32),
        "mean2": 0.1 * jax.random.normal(ks[12], (out_c,), f32),
        "var2": 0.5 + jax.random.uniform(ks[13], (out_c,), f32),
        "wse1": 0.3 * jax.random.normal(ks[14], (cr, out_c), f32),
        "wse2": 0.3 * jax.random.normal(ks[15], (out_c, cr), f32),
    }


if __name__ == "__main__":
    key = jax.random.PRNGKey(0)
    k_x, k_p = jax.random.split(key)

    N, in_c, out_c, H, W, stride = 2, 4, 16, 16, 16, 1
    x = jax.random.normal(k_x, (N, in_c, H, W), jnp.float32)
    params = make_params(k_p, in_c, out_c)

    out = stem_block_pallas(x, params, stride=stride)
    out = jax.block_until_ready(out)

    ref = stem_block_reference(x, params, stride=stride)
    Ho = (H - 1) // stride + 1
    Wo = (W - 1) // stride + 1
    assert out.shape == (N, out_c, Ho, Wo)
    assert jnp.allclose(out, ref, rtol=1e-3, atol=1e-3), \
        f"max abs err = {jnp.max(jnp.abs(out - ref))}"

    print("KERNEL_OK")
</pallas_src>

<mosaic_0001>
module attributes {stable_mosaic.version = 11 : i64} {
  func.func @_stem_kernel(%arg0: i32, %arg1: memref<1x324x36xf32, #tpu.memory_space<vmem>>, %arg2: memref<36x16xf32, #tpu.memory_space<vmem>>, %arg3: memref<1x16xf32, #tpu.memory_space<vmem>>, %arg4: memref<36x16xf32, #tpu.memory_space<vmem>>, %arg5: memref<1x16xf32, #tpu.memory_space<vmem>>, %arg6: memref<9x16x16xf32, #tpu.memory_space<vmem>>, %arg7: memref<1x16xf32, #tpu.memory_space<vmem>>, %arg8: memref<16x2xf32, #tpu.memory_space<vmem>>, %arg9: memref<2x16xf32, #tpu.memory_space<vmem>>, %arg10: memref<324x1xf32, #tpu.memory_space<vmem>>, %arg11: memref<1x16x16x16xf32, #tpu.memory_space<vmem>>, %arg12: memref<18x18x16xf32, #tpu.memory_space<vmem>>) attributes {dimension_semantics = [#tpu.dimension_semantics<parallel>], iteration_bounds = array<i64: 2>, scalar_prefetch = 0 : i64, scratch_operands = 1 : i64, tpu.core_type = #tpu.core_type<tc>, window_params = [{transform_indices = @transform_0, window_bounds = array<i64: 1, 324, 36>}, {pipeline_mode = #tpu.pipeline_mode<synchronous>, transform_indices = @transform_1, window_bounds = array<i64: 36, 16>}, {pipeline_mode = #tpu.pipeline_mode<synchronous>, transform_indices = @transform_2, window_bounds = array<i64: 1, 16>}, {pipeline_mode = #tpu.pipeline_mode<synchronous>, transform_indices = @transform_3, window_bounds = array<i64: 36, 16>}, {pipeline_mode = #tpu.pipeline_mode<synchronous>, transform_indices = @transform_4, window_bounds = array<i64: 1, 16>}, {pipeline_mode = #tpu.pipeline_mode<synchronous>, transform_indices = @transform_5, window_bounds = array<i64: 9, 16, 16>}, {pipeline_mode = #tpu.pipeline_mode<synchronous>, transform_indices = @transform_6, window_bounds = array<i64: 1, 16>}, {pipeline_mode = #tpu.pipeline_mode<synchronous>, transform_indices = @transform_7, window_bounds = array<i64: 16, 2>}, {pipeline_mode = #tpu.pipeline_mode<synchronous>, transform_indices = @transform_8, window_bounds = array<i64: 2, 16>}, {pipeline_mode = #tpu.pipeline_mode<synchronous>, transform_indices = @transform_9, window_bounds = array<i64: 324, 1>}, {transform_indices = @transform_10, window_bounds = array<i64: 1, 16, 16, 16>}]} {
    %c0 = arith.constant 0 : index
    %c0_0 = arith.constant 0 : index
    %c0_1 = arith.constant 0 : index
    %0 = vector.load %arg1[%c0, %c0_0, %c0_1] : memref<1x324x36xf32, #tpu.memory_space<vmem>>, vector<1x324x36xf32>
    %1 = vector.shape_cast %0 : vector<1x324x36xf32> to vector<324x36xf32>
    %c0_2 = arith.constant 0 : index
    %c0_3 = arith.constant 0 : index
    %2 = vector.load %arg2[%c0_2, %c0_3] : memref<36x16xf32, #tpu.memory_space<vmem>>, vector<36x16xf32>
    %cst = arith.constant dense<0.000000e+00> : vector<324x16xf32>
    %3 = tpu.matmul %1, %2, %cst {dimension_numbers = #tpu.dot_dimension_numbers<[1], [0], [0], [1], [0, 0, 1, 1], [], []>} : vector<324x36xf32>, vector<36x16xf32>, vector<324x16xf32> -> vector<324x16xf32>
    %c0_4 = arith.constant 0 : index
    %c0_5 = arith.constant 0 : index
    %4 = vector.load %arg3[%c0_4, %c0_5] : memref<1x16xf32, #tpu.memory_space<vmem>>, vector<1x16xf32>
    %5 = vector.broadcast %4 : vector<1x16xf32> to vector<324x16xf32>
    %6 = arith.addf %3, %5 : vector<324x16xf32>
    %cst_6 = arith.constant 0.000000e+00 : f32
    %7 = vector.broadcast %cst_6 : f32 to vector<324x16xf32>
    %8 = arith.maximumf %6, %7 : vector<324x16xf32>
    %c0_7 = arith.constant 0 : index
    %c0_8 = arith.constant 0 : index
    %9 = vector.load %arg10[%c0_7, %c0_8] : memref<324x1xf32, #tpu.memory_space<vmem>>, vector<324x1xf32>
    %10 = vector.broadcast %9 : vector<324x1xf32> to vector<324x16xf32>
    %11 = arith.mulf %8, %10 : vector<324x16xf32>
    %12 = vector.shape_cast %11 : vector<324x16xf32> to vector<18x18x16xf32>
    %c0_9 = arith.constant 0 : index
    %c0_10 = arith.constant 0 : index
    %c0_11 = arith.constant 0 : index
    %13 = vector.load %arg12[%c0_9, %c0_10, %c0_11] : memref<18x18x16xf32, #tpu.memory_space<vmem>>, vector<18x18x16xf32>
    tpu.vector_store %arg12[%c0_9, %c0_10, %c0_11], %12 {strides = array<i32>} : memref<18x18x16xf32, #tpu.memory_space<vmem>>, vector<18x18x16xf32>,
    %c0_12 = arith.constant 0 : index
    %c0_13 = arith.constant 0 : index
    %14 = vector.load %arg4[%c0_12, %c0_13] : memref<36x16xf32, #tpu.memory_space<vmem>>, vector<36x16xf32>
    %cst_14 = arith.constant dense<0.000000e+00> : vector<324x16xf32>
    %15 = tpu.matmul %1, %14, %cst_14 {dimension_numbers = #tpu.dot_dimension_numbers<[1], [0], [0], [1], [0, 0, 1, 1], [], []>} : vector<324x36xf32>, vector<36x16xf32>, vector<324x16xf32> -> vector<324x16xf32>
    %c0_15 = arith.constant 0 : index
    %c0_16 = arith.constant 0 : index
    %16 = vector.load %arg5[%c0_15, %c0_16] : memref<1x16xf32, #tpu.memory_space<vmem>>, vector<1x16xf32>
    %17 = vector.broadcast %16 : vector<1x16xf32> to vector<324x16xf32>
    %18 = arith.addf %15, %17 : vector<324x16xf32>
    %19 = vector.shape_cast %18 : vector<324x16xf32> to vector<18x18x16xf32>
    %20 = vector.extract_strided_slice %19 {offsets = [1, 1, 0], sizes = [16, 16, 16], strides = [1, 1, 1]} : vector<18x18x16xf32> to vector<16x16x16xf32>
    %21 = vector.shape_cast %20 : vector<16x16x16xf32> to vector<256x16xf32>
    %cst_17 = arith.constant 0.000000e+00 : f32
    %22 = vector.broadcast %cst_17 : f32 to vector<256x16xf32>
    %c0_18 = arith.constant 0 : index
    %c0_19 = arith.constant 0 : index
    %c0_20 = arith.constant 0 : index
    %23 = vector.load %arg12[%c0_18, %c0_19, %c0_20] : memref<18x18x16xf32, #tpu.memory_space<vmem>>, vector<16x16x16xf32>
    %24 = vector.shape_cast %23 : vector<16x16x16xf32> to vector<256x16xf32>
    %c0_21 = arith.constant 0 : index
    %c0_22 = arith.constant 0 : index
    %c0_23 = arith.constant 0 : index
    %25 = vector.load %arg6[%c0_21, %c0_22, %c0_23] : memref<9x16x16xf32, #tpu.memory_space<vmem>>, vector<1x16x16xf32>
    %26 = vector.shape_cast %25 : vector<1x16x16xf32> to vector<16x16xf32>
    %cst_24 = arith.constant dense<0.000000e+00> : vector<256x16xf32>
    %27 = tpu.matmul %24, %26, %cst_24 {dimension_numbers = #tpu.dot_dimension_numbers<[1], [0], [0], [1], [0, 0, 1, 1], [], []>} : vector<256x16xf32>, vector<16x16xf32>, vector<256x16xf32> -> vector<256x16xf32>
    %28 = arith.addf %22, %27 : vector<256x16xf32>
    %c0_25 = arith.constant 0 : index
    %c1 = arith.constant 1 : index
    %c0_26 = arith.constant 0 : index
    %29 = vector.load %arg12[%c0_25, %c1, %c0_26] : memref<18x18x16xf32, #tpu.memory_space<vmem>>, vector<16x16x16xf32>
    %30 = vector.shape_cast %29 : vector<16x16x16xf32> to vector<256x16xf32>
    %c1_27 = arith.constant 1 : index
    %c0_28 = arith.constant 0 : index
    %c0_29 = arith.constant 0 : index
    %31 = vector.load %arg6[%c1_27, %c0_28, %c0_29] : memref<9x16x16xf32, #tpu.memory_space<vmem>>, vector<1x16x16xf32>
    %32 = vector.shape_cast %31 : vector<1x16x16xf32> to vector<16x16xf32>
    %cst_30 = arith.constant dense<0.000000e+00> : vector<256x16xf32>
    %33 = tpu.matmul %30, %32, %cst_30 {dimension_numbers = #tpu.dot_dimension_numbers<[1], [0], [0], [1], [0, 0, 1, 1], [], []>} : vector<256x16xf32>, vector<16x16xf32>, vector<256x16xf32> -> vector<256x16xf32>
    %34 = arith.addf %28, %33 : vector<256x16xf32>
    %c0_31 = arith.constant 0 : index
    %c2 = arith.constant 2 : index
    %c0_32 = arith.constant 0 : index
    %35 = vector.load %arg12[%c0_31, %c2, %c0_32] : memref<18x18x16xf32, #tpu.memory_space<vmem>>, vector<16x16x16xf32>
    %36 = vector.shape_cast %35 : vector<16x16x16xf32> to vector<256x16xf32>
    %c2_33 = arith.constant 2 : index
    %c0_34 = arith.constant 0 : index
    %c0_35 = arith.constant 0 : index
    %37 = vector.load %arg6[%c2_33, %c0_34, %c0_35] : memref<9x16x16xf32, #tpu.memory_space<vmem>>, vector<1x16x16xf32>
    %38 = vector.shape_cast %37 : vector<1x16x16xf32> to vector<16x16xf32>
    %cst_36 = arith.constant dense<0.000000e+00> : vector<256x16xf32>
    %39 = tpu.matmul %36, %38, %cst_36 {dimension_numbers = #tpu.dot_dimension_numbers<[1], [0], [0], [1], [0, 0, 1, 1], [], []>} : vector<256x16xf32>, vector<16x16xf32>, vector<256x16xf32> -> vector<256x16xf32>
    %40 = arith.addf %34, %39 : vector<256x16xf32>
    %c1_37 = arith.constant 1 : index
    %c0_38 = arith.constant 0 : index
    %c0_39 = arith.constant 0 : index
    %41 = vector.load %arg12[%c1_37, %c0_38, %c0_39] : memref<18x18x16xf32, #tpu.memory_space<vmem>>, vector<16x16x16xf32>
    %42 = vector.shape_cast %41 : vector<16x16x16xf32> to vector<256x16xf32>
    %c3 = arith.constant 3 : index
    %c0_40 = arith.constant 0 : index
    %c0_41 = arith.constant 0 : index
    %43 = vector.load %arg6[%c3, %c0_40, %c0_41] : memref<9x16x16xf32, #tpu.memory_space<vmem>>, vector<1x16x16xf32>
    %44 = vector.shape_cast %43 : vector<1x16x16xf32> to vector<16x16xf32>
    %cst_42 = arith.constant dense<0.000000e+00> : vector<256x16xf32>
    %45 = tpu.matmul %42, %44, %cst_42 {dimension_numbers = #tpu.dot_dimension_numbers<[1], [0], [0], [1], [0, 0, 1, 1], [], []>} : vector<256x16xf32>, vector<16x16xf32>, vector<256x16xf32> -> vector<256x16xf32>
    %46 = arith.addf %40, %45 : vector<256x16xf32>
    %c1_43 = arith.constant 1 : index
    %c1_44 = arith.constant 1 : index
    %c0_45 = arith.constant 0 : index
    %47 = vector.load %arg12[%c1_43, %c1_44, %c0_45] : memref<18x18x16xf32, #tpu.memory_space<vmem>>, vector<16x16x16xf32>
    %48 = vector.shape_cast %47 : vector<16x16x16xf32> to vector<256x16xf32>
    %c4 = arith.constant 4 : index
    %c0_46 = arith.constant 0 : index
    %c0_47 = arith.constant 0 : index
    %49 = vector.load %arg6[%c4, %c0_46, %c0_47] : memref<9x16x16xf32, #tpu.memory_space<vmem>>, vector<1x16x16xf32>
    %50 = vector.shape_cast %49 : vector<1x16x16xf32> to vector<16x16xf32>
    %cst_48 = arith.constant dense<0.000000e+00> : vector<256x16xf32>
    %51 = tpu.matmul %48, %50, %cst_48 {dimension_numbers = #tpu.dot_dimension_numbers<[1], [0], [0], [1], [0, 0, 1, 1], [], []>} : vector<256x16xf32>, vector<16x16xf32>, vector<256x16xf32> -> vector<256x16xf32>
    %52 = arith.addf %46, %51 : vector<256x16xf32>
    %c1_49 = arith.constant 1 : index
    %c2_50 = arith.constant 2 : index
    %c0_51 = arith.constant 0 : index
    %53 = vector.load %arg12[%c1_49, %c2_50, %c0_51] : memref<18x18x16xf32, #tpu.memory_space<vmem>>, vector<16x16x16xf32>
    %54 = vector.shape_cast %53 : vector<16x16x16xf32> to vector<256x16xf32>
    %c5 = arith.constant 5 : index
    %c0_52 = arith.constant 0 : index
    %c0_53 = arith.constant 0 : index
    %55 = vector.load %arg6[%c5, %c0_52, %c0_53] : memref<9x16x16xf32, #tpu.memory_space<vmem>>, vector<1x16x16xf32>
    %56 = vector.shape_cast %55 : vector<1x16x16xf32> to vector<16x16xf32>
    %cst_54 = arith.constant dense<0.000000e+00> : vector<256x16xf32>
    %57 = tpu.matmul %54, %56, %cst_54 {dimension_numbers = #tpu.dot_dimension_numbers<[1], [0], [0], [1], [0, 0, 1, 1], [], []>} : vector<256x16xf32>, vector<16x16xf32>, vector<256x16xf32> -> vector<256x16xf32>
    %58 = arith.addf %52, %57 : vector<256x16xf32>
    %c2_55 = arith.constant 2 : index
    %c0_56 = arith.constant 0 : index
    %c0_57 = arith.constant 0 : index
    %59 = vector.load %arg12[%c2_55, %c0_56, %c0_57] : memref<18x18x16xf32, #tpu.memory_space<vmem>>, vector<16x16x16xf32>
    %60 = vector.shape_cast %59 : vector<16x16x16xf32> to vector<256x16xf32>
    %c6 = arith.constant 6 : index
    %c0_58 = arith.constant 0 : index
    %c0_59 = arith.constant 0 : index
    %61 = vector.load %arg6[%c6, %c0_58, %c0_59] : memref<9x16x16xf32, #tpu.memory_space<vmem>>, vector<1x16x16xf32>
    %62 = vector.shape_cast %61 : vector<1x16x16xf32> to vector<16x16xf32>
    %cst_60 = arith.constant dense<0.000000e+00> : vector<256x16xf32>
    %63 = tpu.matmul %60, %62, %cst_60 {dimension_numbers = #tpu.dot_dimension_numbers<[1], [0], [0], [1], [0, 0, 1, 1], [], []>} : vector<256x16xf32>, vector<16x16xf32>, vector<256x16xf32> -> vector<256x16xf32>
    %64 = arith.addf %58, %63 : vector<256x16xf32>
    %c2_61 = arith.constant 2 : index
    %c1_62 = arith.constant 1 : index
    %c0_63 = arith.constant 0 : index
    %65 = vector.load %arg12[%c2_61, %c1_62, %c0_63] : memref<18x18x16xf32, #tpu.memory_space<vmem>>, vector<16x16x16xf32>
    %66 = vector.shape_cast %65 : vector<16x16x16xf32> to vector<256x16xf32>
    %c7 = arith.constant 7 : index
    %c0_64 = arith.constant 0 : index
    %c0_65 = arith.constant 0 : index
    %67 = vector.load %arg6[%c7, %c0_64, %c0_65] : memref<9x16x16xf32, #tpu.memory_space<vmem>>, vector<1x16x16xf32>
    %68 = vector.shape_cast %67 : vector<1x16x16xf32> to vector<16x16xf32>
    %cst_66 = arith.constant dense<0.000000e+00> : vector<256x16xf32>
    %69 = tpu.matmul %66, %68, %cst_66 {dimension_numbers = #tpu.dot_dimension_numbers<[1], [0], [0], [1], [0, 0, 1, 1], [], []>} : vector<256x16xf32>, vector<16x16xf32>, vector<256x16xf32> -> vector<256x16xf32>
    %70 = arith.addf %64, %69 : vector<256x16xf32>
    %c2_67 = arith.constant 2 : index
    %c2_68 = arith.constant 2 : index
    %c0_69 = arith.constant 0 : index
    %71 = vector.load %arg12[%c2_67, %c2_68, %c0_69] : memref<18x18x16xf32, #tpu.memory_space<vmem>>, vector<16x16x16xf32>
    %72 = vector.shape_cast %71 : vector<16x16x16xf32> to vector<256x16xf32>
    %c8 = arith.constant 8 : index
    %c0_70 = arith.constant 0 : index
    %c0_71 = arith.constant 0 : index
    %73 = vector.load %arg6[%c8, %c0_70, %c0_71] : memref<9x16x16xf32, #tpu.memory_space<vmem>>, vector<1x16x16xf32>
    %74 = vector.shape_cast %73 : vector<1x16x16xf32> to vector<16x16xf32>
    %cst_72 = arith.constant dense<0.000000e+00> : vector<256x16xf32>
    %75 = tpu.matmul %72, %74, %cst_72 {dimension_numbers = #tpu.dot_dimension_numbers<[1], [0], [0], [1], [0, 0, 1, 1], [], []>} : vector<256x16xf32>, vector<16x16xf32>, vector<256x16xf32> -> vector<256x16xf32>
    %76 = arith.addf %70, %75 : vector<256x16xf32>
    %c0_73 = arith.constant 0 : index
    %c0_74 = arith.constant 0 : index
    %77 = vector.load %arg7[%c0_73, %c0_74] : memref<1x16xf32, #tpu.memory_space<vmem>>, vector<1x16xf32>
    %78 = vector.broadcast %77 : vector<1x16xf32> to vector<256x16xf32>
    %79 = arith.addf %76, %78 : vector<256x16xf32>
    %80 = arith.addf %79, %21 : vector<256x16xf32>
    %c0_75 = arith.constant 0 : index
    %c0_76 = arith.constant 0 : index
    %81 = vector.load %arg8[%c0_75, %c0_76] : memref<16x2xf32, #tpu.memory_space<vmem>>, vector<16x2xf32>
    %cst_77 = arith.constant dense<0.000000e+00> : vector<256x2xf32>
    %82 = tpu.matmul %80, %81, %cst_77 {dimension_numbers = #tpu.dot_dimension_numbers<[1], [0], [0], [1], [0, 0, 1, 1], [], []>} : vector<256x16xf32>, vector<16x2xf32>, vector<256x2xf32> -> vector<256x2xf32>
    %cst_78 = arith.constant dense<0.000000e+00> : vector<2xf32>
    %83 = vector.multi_reduction <add>, %82, %cst_78 [0] : vector<256x2xf32> to vector<2xf32>
    %84 = vector.shape_cast %83 : vector<2xf32> to vector<1x2xf32>
    %cst_79 = arith.constant 2.560000e+02 : f32
    %85 = vector.broadcast %cst_79 : f32 to vector<1x2xf32>
    %86 = arith.divf %84, %85 : vector<1x2xf32>
    %cst_80 = arith.constant 0.000000e+00 : f32
    %87 = vector.broadcast %cst_80 : f32 to vector<1x2xf32>
    %88 = arith.maximumf %86, %87 : vector<1x2xf32>
    %89 = vector.shape_cast %88 : vector<1x2xf32> to vector<1x2xf32>
    %90 = vector.broadcast %89 : vector<1x2xf32> to vector<256x2xf32>
    %c0_81 = arith.constant 0 : index
    %c0_82 = arith.constant 0 : index
    %91 = vector.load %arg9[%c0_81, %c0_82] : memref<2x16xf32, #tpu.memory_space<vmem>>, vector<2x16xf32>
    %cst_83 = arith.constant dense<0.000000e+00> : vector<256x16xf32>
    %92 = tpu.matmul %90, %91, %cst_83 {dimension_numbers = #tpu.dot_dimension_numbers<[1], [0], [0], [1], [0, 0, 1, 1], [], []>} : vector<256x2xf32>, vector<2x16xf32>, vector<256x16xf32> -> vector<256x16xf32>
    %cst_84 = arith.constant 0.000000e+00 : f32
    %93 = vector.broadcast %cst_84 : f32 to vector<256x16xf32>
    %94 = arith.subf %93, %92 : vector<256x16xf32>
    %95 = math.exp %94 : vector<256x16xf32>
    %cst_85 = arith.constant 1.000000e+00 : f32
    %96 = vector.broadcast %cst_85 : f32 to vector<256x16xf32>
    %97 = arith.addf %96, %95 : vector<256x16xf32>
    %cst_86 = arith.constant 1.000000e+00 : f32
    %98 = vector.broadcast %cst_86 : f32 to vector<256x16xf32>
    %99 = arith.divf %98, %97 : vector<256x16xf32>
    %100 = arith.mulf %80, %99 : vector<256x16xf32>
    %101 = vector.shape_cast %100 : vector<256x16xf32> to vector<16x16x16xf32>
    %c0_87 = arith.constant 0 : index
    %c0_88 = arith.constant 0 : index
    %c0_89 = arith.constant 0 : index
    %c0_90 = arith.constant 0 : index
    %102 = vector.load %arg11[%c0_87, %c0_88, %c0_89, %c0_90] : memref<1x16x16x16xf32, #tpu.memory_space<vmem>>, vector<1x16x16x16xf32>
    %103 = vector.shape_cast %102 : vector<1x16x16x16xf32> to vector<16x16x16xf32>
    %104 = vector.shape_cast %101 : vector<16x16x16xf32> to vector<1x16x16x16xf32>
    tpu.vector_store %arg11[%c0_87, %c0_88, %c0_89, %c0_90], %104 {strides = array<i32>} : memref<1x16x16x16xf32, #tpu.memory_space<vmem>>, vector<1x16x16x16xf32>,
    return
  }
  func.func @transform_0(%arg0: i32) -> (i32, i32, i32) {
    %c0_i32 = arith.constant 0 : i32
    %c0_i32_0 = arith.constant 0 : i32
    %c0_i32_1 = arith.constant 0 : i32
    return %arg0, %c0_i32, %c0_i32_0 : i32, i32, i32
  }
  func.func @transform_1(%arg0: i32) -> (i32, i32) {
    %c0_i32 = arith.constant 0 : i32
    %c0_i32_0 = arith.constant 0 : i32
    %c0_i32_1 = arith.constant 0 : i32
    return %c0_i32, %c0_i32_0 : i32, i32
  }
  func.func @transform_2(%arg0: i32) -> (i32, i32) {
    %c0_i32 = arith.constant 0 : i32
    %c0_i32_0 = arith.constant 0 : i32
    %c0_i32_1 = arith.constant 0 : i32
    return %c0_i32, %c0_i32_0 : i32, i32
  }
  func.func @transform_3(%arg0: i32) -> (i32, i32) {
    %c0_i32 = arith.constant 0 : i32
    %c0_i32_0 = arith.constant 0 : i32
    %c0_i32_1 = arith.constant 0 : i32
    return %c0_i32, %c0_i32_0 : i32, i32
  }
  func.func @transform_4(%arg0: i32) -> (i32, i32) {
    %c0_i32 = arith.constant 0 : i32
    %c0_i32_0 = arith.constant 0 : i32
    %c0_i32_1 = arith.constant 0 : i32
    return %c0_i32, %c0_i32_0 : i32, i32
  }
  func.func @transform_5(%arg0: i32) -> (i32, i32, i32) {
    %c0_i32 = arith.constant 0 : i32
    %c0_i32_0 = arith.constant 0 : i32
    %c0_i32_1 = arith.constant 0 : i32
    %c0_i32_2 = arith.constant 0 : i32
    return %c0_i32, %c0_i32_0, %c0_i32_1 : i32, i32, i32
  }
  func.func @transform_6(%arg0: i32) -> (i32, i32) {
    %c0_i32 = arith.constant 0 : i32
    %c0_i32_0 = arith.constant 0 : i32
    %c0_i32_1 = arith.constant 0 : i32
    return %c0_i32, %c0_i32_0 : i32, i32
  }
  func.func @transform_7(%arg0: i32) -> (i32, i32) {
    %c0_i32 = arith.constant 0 : i32
    %c0_i32_0 = arith.constant 0 : i32
    %c0_i32_1 = arith.constant 0 : i32
    return %c0_i32, %c0_i32_0 : i32, i32
  }
  func.func @transform_8(%arg0: i32) -> (i32, i32) {
    %c0_i32 = arith.constant 0 : i32
    %c0_i32_0 = arith.constant 0 : i32
    %c0_i32_1 = arith.constant 0 : i32
    return %c0_i32, %c0_i32_0 : i32, i32
  }
  func.func @transform_9(%arg0: i32) -> (i32, i32) {
    %c0_i32 = arith.constant 0 : i32
    %c0_i32_0 = arith.constant 0 : i32
    %c0_i32_1 = arith.constant 0 : i32
    return %c0_i32, %c0_i32_0 : i32, i32
  }
  func.func @transform_10(%arg0: i32) -> (i32, i32, i32, i32) {
    %c0_i32 = arith.constant 0 : i32
    %c0_i32_0 = arith.constant 0 : i32
    %c0_i32_1 = arith.constant 0 : i32
    %c0_i32_2 = arith.constant 0 : i32
    return %arg0, %c0_i32, %c0_i32_0, %c0_i32_1 : i32, i32, i32, i32
  }
}

</mosaic_0001>

<bundles_post_ra>
// kernel: stem_block_pallas.1
= control target key start
LH: loop header
LB: loop body
LE: loop exit
PB: predicated region body
PF: predicated region fallthrough
CT: control target
= control target key end

     0   :  { %s11083_s13 = smov 0   ;;  %s15289_s0 = inlined_call_operand.vmem [shape: f32[2,324,36], index: 0, kind: input, shape index: {}]   ;;  %s15290_s1 = inlined_call_operand.vmem [shape: f32[36,16], index: 1, kind: input, shape index: {}]   ;;  %s15291_s2 = inlined_call_operand.vmem [shape: f32[1,16], index: 2, kind: input, shape index: {}]   ;;  %s15292_s3 = inlined_call_operand.vmem [shape: f32[36,16], index: 3, kind: input, shape index: {}]   ;;  %s15293_s4 = inlined_call_operand.vmem [shape: f32[1,16], index: 4, kind: input, shape index: {}]   ;;  %s15294_s5 = inlined_call_operand.vmem [shape: f32[9,16,16], index: 5, kind: input, shape index: {}]   ;;  %s15295_s6 = inlined_call_operand.vmem [shape: f32[1,16], index: 6, kind: input, shape index: {}]   ;;  %s15296_s7 = inlined_call_operand.vmem [shape: f32[16,2], index: 7, kind: input, shape index: {}]   ;;  %s15297_s8 = inlined_call_operand.vmem [shape: f32[2,16], index: 8, kind: input, shape index: {}]   ;;  %s15298_s9 = inlined_call_operand.vmem [shape: f32[324,1], index: 9, kind: input, shape index: {}]   ;;  %s15299_s10 = inlined_call_operand.vmem [shape: f32[2,16,16,16], index: 10, kind: output, shape index: {}]  }
   0x1 LB: > { %s9076_s14 = sadd.s32 4294967295, %s11022_s13   ;;  %p9080_p0 = scmp.ge.s32.totalorder %s11022_s13, 1  ;;  %s11022_s13 = sphi %s11083_s13, %s20_s13  }
   0x2   : > { %p312_p1 = scmp.lt.s32.totalorder %s11022_s13, 3 }
   0x4   : > { %p313_p2 = pnand %p9080_p0, %p312_p1 }
   0x6   : > { %316 = sbr.rel (%p313_p2) target bundleno = 1407 (0x57f), region = 60 }
   0xb   : > { %v405_v0 = vld [vmem:[%s15290_s1 + $0x20] sm:$0xf]  ;;  %vm537_vm0 = vcmask 1043456   ;;  %v11024_v1 = vmov 0.0   ;;  %v404_v2 = vld [vmem:[%s15290_s1 + $0x18] sm:$0xff]  ;;  %p350_p3 = scmp.lt.s32.totalorder %s9076_s14, 1 }
   0xc   : > { %10024 = vmatprep.subr.mxu0 %v11024_v1  ;;  %10860 = vmatprep.subr.mxu1 %v11024_v1  ;;  %vm11025_vm1 = vmmov 0   ;;  %v403_v3 = vld [vmem:[%s15290_s1 + $0x10] sm:$0xff]  ;;  %v402_v4 = vld [vmem:[%s15290_s1 + $0x8] sm:$0xff]  ;;  %v401_v5 = vld [vmem:[%s15290_s1] sm:$0xff]  ;;  %vm413_vm2 = vcmask 293888   ;;  %v11026_v15 = vmov 0  }
   0xd   : > { %10025 = vmatpush3.msk.msra.mxu0 %vm537_vm0, %v405_v0  ;;  %10034 = vmatprep.mubr.msk.f32.mxu0 %vm11025_vm1, %v11024_v1  ;;  %s15999_s14 = smov (!%p350_p3, %s9076_s14), 1  ;;  %v2720_v8 = vld [vmem:[%s15292_s3 + $0x20] sm:$0xf]  ;;  %v2719_v10 = vld [vmem:[%s15292_s3 + $0x18] sm:$0xff]  ;;  %v2718_v12 = vld [vmem:[%s15292_s3 + $0x10] sm:$0xff]  ;;  %vm2660_vm3 = vcmask 130048  }
   0xe   : > { %10026 = vmatprep.subr.mxu0 %v11024_v1  ;;  %10865 = vmatpush3.msk.msra.mxu1 %vm537_vm0, %v405_v0  ;;  %s10870_s23 = smul.u32 328, %s15999_s14  ;;  %v854_v16 = vld [vmem:[%s15298_s9 + $0x10] sm:$0xff]  ;;  %v852_v18 = vld [vmem:[%s15298_s9] sm:$0xff]  ;;  %v2717_v19 = vld [vmem:[%s15292_s3 + $0x8] sm:$0xff]  ;;  %vm2663_vm4 = vcmask 123904   ;;  %vm3653_vm5 = vcmask 1040384  }
   0xf   : > { %10027 = vmatpush3.msra.mxu0 %v404_v2  ;;  %10861 = vmatprep.subr.mxu1 %v11024_v1  ;;  %v2716_v21 = vld [vmem:[%s15292_s3] sm:$0xff]  ;;  %v855_v23 = vld [vmem:[%s15298_s9 + $0x18] sm:$0xff]  ;;  %v853_v24 = vld [vmem:[%s15298_s9 + $0x8] sm:$0xff]  ;;  %vm3654_vm6 = vcmask 1042434   ;;  %vm3656_vm8 = vcmask 1044484   ;;  %vm3658_vm10 = vcmask 1046534  }
  0x10   : > { %10028 = vmatprep.subr.mxu0 %v11024_v1  ;;  %10866 = vmatpush3.msra.mxu1 %v404_v2  ;;  %s11123_s28 = scalar_lea.vmem %s15289_s0, %s10870_s23  ;;  %v857_v27 = vld [vmem:[%s15298_s9 + $0x28] sm:$0xff]  ;;  %v856_v28 = vld [vmem:[%s15298_s9 + $0x20] sm:$0xff]  ;;  %v9187_v30 = vld [vmem:[%s15294_s5 + $0x18] sm:$0xff]  ;;  %vm8536_vm12 = vcmask 1041408   ;;  %vm8459_vm13 = vcmask 15360   ;;  %s9558_s18 = sshll.u32 %s15999_s14, 8 }
  0x11   : > { %10029 = vmatpush3.msra.mxu0 %v403_v3  ;;  %10862 = vmatprep.subr.mxu1 %v11024_v1  ;;  %v11126_v6 = vld [vmem:[%s11123_s28] sm:$0xff]  ;;  %v11132_v7 = vld [vmem:[%s11123_s28 + $0x108] sm:$0xff]  ;;  %v11155_v11 = vld [vmem:[%s11123_s28 + $0x110] sm:$0xff]  ;;  %s15188_s21 = scalar_lea.vmem %s15299_s10, %s9558_s18 }
  0x12   : > { %10030 = vmatprep.subr.mxu0 %v11024_v1  ;;  %10867 = vmatpush3.msra.mxu1 %v403_v3  ;;  %v11142_v9 = vld [vmem:[%s11123_s28 + $0x8] sm:$0xff]  ;;  %v11167_v13 = vld [vmem:[%s11123_s28 + $0x10] sm:$0xff]  ;;  %v11175_v14 = vld [vmem:[%s11123_s28 + $0x118] sm:$0xff] }
  0x13   : > { %10031 = vmatpush3.msra.mxu0 %v402_v4  ;;  %10863 = vmatprep.subr.mxu1 %v11024_v1  ;;  %v11185_v17 = vld [vmem:[%s11123_s28 + $0x18] sm:$0xff]  ;;  %v11199_v20 = vld [vmem:[%s11123_s28 + $0x120] sm:$0xff]  ;;  %v11223_v25 = vld [vmem:[%s11123_s28 + $0x128] sm:$0xff] }
  0x14   : > { %10032 = vmatprep.subr.mxu0 %v11024_v1  ;;  %10868 = vmatpush3.msra.mxu1 %v402_v4  ;;  %v11209_v22 = vld [vmem:[%s11123_s28 + $0x20] sm:$0xff]  ;;  %v11230_v26 = vld [vmem:[%s11123_s28 + $0x28] sm:$0xff]  ;;  %v11243_v29 = vld [vmem:[%s11123_s28 + $0x130] sm:$0xff] }
  0x15   : > { %10033 = vmatpush3.msra.mxu0 %v401_v5  ;;  %10864 = vmatprep.subr.mxu1 %v11024_v1  ;;  %v11253_v31 = vld [vmem:[%s11123_s28 + $0x30] sm:$0xff]  ;;  %v859_v32 = vld [vmem:[%s15298_s9 + $0x38] sm:$0xff]  ;;  %v861_v36 = vld [vmem:[%s15298_s9 + $0x48] sm:$0xff] }
  0x16   : > { %10035 = vmatmul.mubr.msk.f32.vlgmr.msra.gmra.mxu0 %vm413_vm2, %v11126_v6  ;;  %10869 = vmatpush3.msra.mxu1 %v401_v5  ;;  %v858_v33 = vld [vmem:[%s15298_s9 + $0x30] sm:$0xff]  ;;  %v11266_v34 = vld [vmem:[%s11123_s28 + $0x138] sm:$0xff]  ;;  %v860_v37 = vld [vmem:[%s15298_s9 + $0x40] sm:$0xff] }
  0x17   : > { %10037 = vmatprep.mubr.msk.f32.mxu0 %vm11025_vm1, %v11024_v1  ;;  %10133 = vmatprep.mubr.msk.f32.mxu1 %vm11025_vm1, %v11024_v1  ;;  %v11273_v35 = vld [vmem:[%s11123_s28 + $0x38] sm:$0xff]  ;;  %v11286_v38 = vld [vmem:[%s11123_s28 + $0x140] sm:$0xf]  ;;  %v862_v41 = vld [vmem:[%s15298_s9 + $0x50] sm:$0xff] }
  0x18   : > { %10134 = vmatmul.mubr.msk.f32.vlgmr.msra.gmra.mxu1 %vm413_vm2, %v11132_v7  ;;  %10157 = vmatprep.subr.mxu1 %v11024_v1  ;;  %v11293_v39 = vld [vmem:[%s11123_s28 + $0x40] sm:$0xff]  ;;  %v863_v40 = vld [vmem:[%s15298_s9 + $0x58] sm:$0xff]  ;;  %v11310_v42 = vld [vmem:[%s11123_s28 + $0x48] sm:$0xff] }
  0x19   : > { %10136 = vmatprep.mubr.msk.f32.mxu1 %vm11025_vm1, %v11024_v1  ;;  %10158 = vmatpush3.msk.msra.mxu1 %vm537_vm0, %v2720_v8  ;;  %v865_v43 = vld [vmem:[%s15298_s9 + $0x68] sm:$0xff]  ;;  %v864_v44 = vld [vmem:[%s15298_s9 + $0x60] sm:$0xff]  ;;  %v11330_v46 = vld [vmem:[%s11123_s28 + $0x50] sm:$0xff] }
  0x1a   : > { %10038 = vmatmul.mubr.msk.f32.gmra.mxu0 %vm413_vm2, %v11142_v9  ;;  %10159 = vmatprep.subr.mxu1 %v11024_v1  ;;  %v4093_v45 = vld [vmem:[%s15294_s5 + $0x8] sm:$0xff]  ;;  %v867_v47 = vld [vmem:[%s15298_s9 + $0x78] sm:$0xff]  ;;  %v866_v48 = vld [vmem:[%s15298_s9 + $0x70] sm:$0xff] }
  0x1b   : > { %10040 = vmatprep.mubr.msk.f32.mxu0 %vm11025_vm1, %v11024_v1  ;;  %10160 = vmatpush3.msra.mxu1 %v2719_v10  ;;  %v11347_v49 = vld [vmem:[%s11123_s28 + $0x58] sm:$0xff]  ;;  %v869_v50 = vld [vmem:[%s15298_s9 + $0x88] sm:$0xff]  ;;  %v868_v51 = vld [vmem:[%s15298_s9 + $0x80] sm:$0xff] }
  0x1c   : > { %10137 = vmatmul.mubr.msk.f32.gmra.mxu1 %vm413_vm2, %v11155_v11  ;;  %10161 = vmatprep.subr.mxu1 %v11024_v1  ;;  %v11364_v52 = vld [vmem:[%s11123_s28 + $0x60] sm:$0xff]  ;;  %v871_v53 = vld [vmem:[%s15298_s9 + $0x98] sm:$0xff]  ;;  %v870_v54 = vld [vmem:[%s15298_s9 + $0x90] sm:$0xff] }
  0x1d   : > { %10139 = vmatprep.mubr.msk.f32.mxu1 %vm11025_vm1, %v11024_v1  ;;  %10162 = vmatpush3.msra.mxu1 %v2718_v12  ;;  %v11381_v55 = vld [vmem:[%s11123_s28 + $0x68] sm:$0xff]  ;;  %v872_v57 = vld [vmem:[%s15298_s9 + $0xa0] sm:$0xff]  ;;  %v11398_v58 = vld [vmem:[%s11123_s28 + $0x70] sm:$0xff] }
  0x1e   : > { %10041 = vmatmul.mubr.msk.f32.gmra.mxu0 %vm413_vm2, %v11167_v13  ;;  %10884 = vset.pattern.permute.xlu1 %v11026_v15  ;;  %v873_v56 = vld [vmem:[%s15298_s9 + $0xa8] sm:$0xff]  ;;  %v875_v59 = vld [vmem:[%s15298_s9 + $0xb8] sm:$0xff]  ;;  %v874_v60 = vld [vmem:[%s15298_s9 + $0xb0] sm:$0xff] }
  0x1f   : > { %10043 = vmatprep.mubr.msk.f32.mxu0 %vm11025_vm1, %v11024_v1  ;;  %10883 = vset.pattern.permute.xlu0 %v11026_v15  ;;  %v11415_v61 = vld [vmem:[%s11123_s28 + $0x78] sm:$0xff]  ;;  %v877_v62 = vld [vmem:[%s15298_s9 + $0xc8] sm:$0xff]  ;;  %v876_v63 = vld [vmem:[%s15298_s9 + $0xc0] sm:$0xff] }
  0x20   : > { %10140 = vmatmul.mubr.msk.f32.gmra.mxu1 %vm413_vm2, %v11175_v14  ;;  %10163 = vmatprep.subr.mxu1 %v11024_v1  ;;  %v11432_v0 = vld [vmem:[%s11123_s28 + $0x80] sm:$0xff]  ;;  %v879_v2 = vld [vmem:[%s15298_s9 + $0xd8] sm:$0xff]  ;;  %v878_v3 = vld [vmem:[%s15298_s9 + $0xd0] sm:$0xff] }
  0x21   : > { %10142 = vmatprep.mubr.msk.f32.mxu1 %vm11025_vm1, %v11024_v1  ;;  %905 = vperm.xlu1 %10884, %v854_v16   ;;  %v11449_v4 = vld [vmem:[%s11123_s28 + $0x88] sm:$0xff]  ;;  %v11466_v8 = vld [vmem:[%s11123_s28 + $0x90] sm:$0xff]  ;;  %v11483_v12 = vld [vmem:[%s11123_s28 + $0x98] sm:$0xff] }
  0x22   : > { %10044 = vmatmul.mubr.msk.f32.gmra.mxu0 %vm413_vm2, %v11185_v17  ;;  %895 = vperm.xlu0 %10883, %v852_v18   ;;  %v881_v5 = vld [vmem:[%s15298_s9 + $0xe8] sm:$0xff]  ;;  %v882_v10 = vld [vmem:[%s15298_s9 + $0xf0] sm:$0xff]  ;;  %v884_v15 = vld [vmem:[%s15298_s9 + $0x100] sm:$0xff] }
  0x23   : > { %10046 = vmatprep.mubr.msk.f32.mxu0 %vm11025_vm1, %v11024_v1  ;;  %10164 = vmatpush3.msra.mxu1 %v2717_v19  ;;  %v11500_v16 = vld [vmem:[%s11123_s28 + $0xa0] sm:$0xff]  ;;  %v886_v18 = vld [vmem:[%s15298_s9 + $0x110] sm:$0xff]  ;;  %v11517_v19 = vld [vmem:[%s11123_s28 + $0xa8] sm:$0xff] }
  0x24   : > { %10143 = vmatmul.mubr.msk.f32.gmra.mxu1 %vm413_vm2, %v11199_v20  ;;  %10165 = vmatprep.subr.mxu1 %v11024_v1  ;;  %vm3655_vm7 = vmor %vm3653_vm5, %vm3654_vm6 }
  0x25   : > { %10145 = vmatprep.mubr.msk.f32.mxu1 %vm11025_vm1, %v11024_v1  ;;  %10166 = vmatpush3.msra.mxu1 %v2716_v21  ;;  %v889_v21 = vld [vmem:[%s15298_s9 + $0x128] sm:$0xff]  ;;  %vm12086_vm9 = vmor %vm3655_vm7, %vm3656_vm8 }
  0x26   : > { %10047 = vmatmul.mubr.msk.f32.gmra.mxu0 %vm413_vm2, %v11209_v22  ;;  %910 = vperm.xlu1 %10884, %v855_v23   ;;  %v382_v23 = vld [vmem:[%s11123_s28 + $0xb0] sm:$0xff]  ;;  %vm12113_vm11 = vmor %vm12086_vm9, %vm3658_vm10 }
  0x27   : > { %10049 = vmatprep.mubr.msk.f32.mxu0 %vm11025_vm1, %v11024_v1  ;;  %900 = vperm.xlu0 %10883, %v853_v24   ;;  %v891_v24 = vld [vmem:[%s15298_s9 + $0x138] sm:$0xff] }
  0x28   : > { %10146 = vmatmul.mubr.msk.f32.gmra.mxu1 %vm413_vm2, %v11223_v25  ;;  %10290 = vmatprep.subr.mxu0 %v9187_v30 }
  0x29   : > { %10148 = vmatprep.mubr.msk.f32.mxu1 %vm11025_vm1, %v11024_v1  ;;  %10291 = vmatpush3.msra.mxu0 %v9187_v30  ;;  %v384_v30 = vld [vmem:[%s11123_s28 + $0xc0] sm:$0xff] }
  0x2a   : > { %10050 = vmatmul.mubr.msk.f32.gmra.mxu0 %vm413_vm2, %v11230_v26  ;;  %920 = vperm.xlu1 %10884, %v857_v27   ;;  %v383_v27 = vld [vmem:[%s11123_s28 + $0xb8] sm:$0xff] }
  0x2b   : > { %10052 = vmatprep.mubr.msk.f32.mxu0 %vm11025_vm1, %v11024_v1  ;;  %915 = vperm.xlu0 %10883, %v856_v28   ;;  %v892_v28 = vld [vmem:[%s15298_s9 + $0x140] sm:$0xf] }
  0x2c   : > { %10149 = vmatmul.mubr.msk.f32.gmra.mxu1 %vm413_vm2, %v11243_v29  ;;  %10342 = vmatprep.subr.mxu1 %v4093_v45 }
  0x2d   : > { %10151 = vmatprep.mubr.msk.f32.mxu1 %vm11025_vm1, %v11024_v1 }
  0x2e   : > { %10053 = vmatmul.mubr.msk.f32.gmra.mxu0 %vm413_vm2, %v11253_v31  ;;  %930 = vperm.xlu1 %10884, %v859_v32   ;;  %v9186_v32 = vld [vmem:[%s15294_s5 + $0x10] sm:$0xff] }
  0x2f   : > { %10055 = vmatprep.mubr.msk.f32.mxu0 %vm11025_vm1, %v11024_v1  ;;  %925 = vperm.xlu0 %10883, %v858_v33   ;;  %v385_v33 = vld [vmem:[%s11123_s28 + $0xc8] sm:$0xff] }
  0x30   : > { %10152 = vmatmul.mubr.msk.f32.gmra.mxu1 %vm413_vm2, %v11266_v34  ;;  %10292 = vmatprep.subr.mxu0 %v9186_v32 }
  0x31   : > { %10154 = vmatprep.mubr.msk.f32.mxu1 %vm11025_vm1, %v11024_v1  ;;  %10293 = vmatpush3.msra.mxu0 %v9186_v32 }
  0x32   : > { %10056 = vmatmul.mubr.msk.f32.gmra.mxu0 %vm413_vm2, %v11273_v35  ;;  %940 = vperm.xlu1 %10884, %v861_v36   ;;  %v387_v36 = vld [vmem:[%s11123_s28 + $0xd8] sm:$0xff] }
  0x33   : > { %10058 = vmatprep.mubr.msk.f32.mxu0 %vm11025_vm1, %v11024_v1  ;;  %935 = vperm.xlu0 %10883, %v860_v37   ;;  %v388_v37 = vld [vmem:[%s11123_s28 + $0xe0] sm:$0xff] }
  0x34   : > { %10155 = vmatmul.mubr.msk.f32.gmra.mxu1 %vm413_vm2, %v11286_v38 }
  0x35   : > { %10167 = vmatprep.mubr.msk.f32.mxu1 %vm11025_vm1, %v11024_v1 }
  0x36   : > { %10059 = vmatmul.mubr.msk.f32.gmra.mxu0 %vm413_vm2, %v11293_v39  ;;  %950 = vperm.xlu1 %10884, %v863_v40   ;;  %v390_v40 = vld [vmem:[%s11123_s28 + $0xf0] sm:$0xff] }
  0x37   : > { %10061 = vmatprep.mubr.msk.f32.mxu0 %vm11025_vm1, %v11024_v1  ;;  %945 = vperm.xlu0 %10883, %v862_v41   ;;  %v391_v41 = vld [vmem:[%s11123_s28 + $0xf8] sm:$0xff] }
  0x38   : > { %10168 = vmatmul.mubr.msk.f32.vlgmr.msra.gmra.mxu1 %vm413_vm2, %v11126_v6  ;;  %v880_v6 = vld [vmem:[%s15298_s9 + $0xe0] sm:$0xff] }
  0x39   : > { %10170 = vmatprep.mubr.msk.f32.mxu1 %vm11025_vm1, %v11024_v1  ;;  %10343 = vmatpush3.msra.mxu1 %v4093_v45 }
  0x3a   : > { %10062 = vmatmul.mubr.msk.f32.gmra.mxu0 %vm413_vm2, %v11310_v42  ;;  %960 = vperm.xlu1 %10884, %v865_v43  }
  0x3b   : > { %10064 = vmatprep.mubr.msk.f32.mxu0 %vm11025_vm1, %v11024_v1  ;;  %955 = vperm.xlu0 %10883, %v864_v44  }
  0x3c   : > { %10171 = vmatmul.mubr.msk.f32.gmra.mxu1 %vm413_vm2, %v11142_v9  ;;  %v883_v9 = vld [vmem:[%s15298_s9 + $0xf8] sm:$0xff] }
  0x3d   : > { %10173 = vmatprep.mubr.msk.f32.mxu1 %vm11025_vm1, %v11024_v1 }
  0x3e   : > { %10065 = vmatmul.mubr.msk.f32.gmra.mxu0 %vm413_vm2, %v11330_v46  ;;  %970 = vperm.xlu1 %10884, %v867_v47  }
  0x3f   : > { %10067 = vmatprep.mubr.msk.f32.mxu0 %vm11025_vm1, %v11024_v1  ;;  %965 = vperm.xlu0 %10883, %v866_v48  }
  0x40   : > { %10174 = vmatmul.mubr.msk.f32.gmra.mxu1 %vm413_vm2, %v11167_v13  ;;  %v885_v13 = vld [vmem:[%s15298_s9 + $0x108] sm:$0xff] }
  0x41   : > { %10176 = vmatprep.mubr.msk.f32.mxu1 %vm11025_vm1, %v11024_v1 }
  0x42   : > { %10068 = vmatmul.mubr.msk.f32.gmra.mxu0 %vm413_vm2, %v11347_v49  ;;  %980 = vperm.xlu1 %10884, %v869_v50  }
  0x43   : > { %10070 = vmatprep.mubr.msk.f32.mxu0 %vm11025_vm1, %v11024_v1  ;;  %975 = vperm.xlu0 %10883, %v868_v51  }
  0x44   : > { %10177 = vmatmul.mubr.msk.f32.gmra.mxu1 %vm413_vm2, %v11185_v17  ;;  %v887_v17 = vld [vmem:[%s15298_s9 + $0x118] sm:$0xff] }
  0x45   : > { %10179 = vmatprep.mubr.msk.f32.mxu1 %vm11025_vm1, %v11024_v1 }
  0x46   : > { %10071 = vmatmul.mubr.msk.f32.gmra.mxu0 %vm413_vm2, %v11364_v52  ;;  %990 = vperm.xlu1 %10884, %v871_v53  }
  0x47   : > { %10073 = vmatprep.mubr.msk.f32.mxu0 %vm11025_vm1, %v11024_v1  ;;  %985 = vperm.xlu0 %10883, %v870_v54  }
  0x48   : > { %10180 = vmatmul.mubr.msk.f32.gmra.mxu1 %vm413_vm2, %v11209_v22  ;;  %v888_v22 = vld [vmem:[%s15298_s9 + $0x120] sm:$0xff] }
  0x49   : > { %10182 = vmatprep.mubr.msk.f32.mxu1 %vm11025_vm1, %v11024_v1 }
  0x4a   : > { %10074 = vmatmul.mubr.msk.f32.gmra.mxu0 %vm413_vm2, %v11381_v55  ;;  %1000 = vperm.xlu1 %10884, %v873_v56  }
  0x4b   : > { %10076 = vmatprep.mubr.msk.f32.mxu0 %vm11025_vm1, %v11024_v1  ;;  %995 = vperm.xlu0 %10883, %v872_v57  }
  0x4c   : > { %10183 = vmatmul.mubr.msk.f32.gmra.mxu1 %vm413_vm2, %v11230_v26  ;;  %v890_v26 = vld [vmem:[%s15298_s9 + $0x130] sm:$0xff] }
  0x4d   : > { %10185 = vmatprep.mubr.msk.f32.mxu1 %vm11025_vm1, %v11024_v1 }
  0x4e   : > { %10077 = vmatmul.mubr.msk.f32.gmra.mxu0 %vm413_vm2, %v11398_v58  ;;  %1010 = vperm.xlu1 %10884, %v875_v59  }
  0x4f   : > { %10079 = vmatprep.mubr.msk.f32.mxu0 %vm11025_vm1, %v11024_v1  ;;  %1005 = vperm.xlu0 %10883, %v874_v60  }
  0x50   : > { %10186 = vmatmul.mubr.msk.f32.gmra.mxu1 %vm413_vm2, %v11253_v31  ;;  %v4092_v31 = vld [vmem:[%s15294_s5] sm:$0xff] }
  0x51   : > { %10188 = vmatprep.mubr.msk.f32.mxu1 %vm11025_vm1, %v11024_v1  ;;  %10344 = vmatprep.subr.mxu1 %v4092_v31 }
  0x52   : > { %10080 = vmatmul.mubr.msk.f32.gmra.mxu0 %vm413_vm2, %v11415_v61  ;;  %1020 = vperm.xlu1 %10884, %v877_v62  }
  0x53   : > { %10082 = vmatprep.mubr.msk.f32.mxu0 %vm11025_vm1, %v11024_v1  ;;  %1015 = vperm.xlu0 %10883, %v876_v63  }
  0x54   : > { %10189 = vmatmul.mubr.msk.f32.gmra.mxu1 %vm413_vm2, %v11273_v35  ;;  %v386_v35 = vld [vmem:[%s11123_s28 + $0xd0] sm:$0xff] }
  0x55   : > { %10191 = vmatprep.mubr.msk.f32.mxu1 %vm11025_vm1, %v11024_v1  ;;  %10345 = vmatpush3.msra.mxu1 %v4092_v31 }
  0x56   : > { %10083 = vmatmul.mubr.msk.f32.gmra.mxu0 %vm413_vm2, %v11432_v0  ;;  %1030 = vperm.xlu1 %10884, %v879_v2  }
  0x57   : > { %10085 = vmatprep.mubr.msk.f32.mxu0 %vm11025_vm1, %v11024_v1  ;;  %1025 = vperm.xlu0 %10883, %v878_v3  }
  0x58   : > { %10192 = vmatmul.mubr.msk.f32.gmra.mxu1 %vm413_vm2, %v11293_v39  ;;  %v389_v39 = vld [vmem:[%s11123_s28 + $0xe8] sm:$0xff] }
  0x59   : > { %10194 = vmatprep.mubr.msk.f32.mxu1 %vm11025_vm1, %v11024_v1 }
  0x5a   : > { %10086 = vmatmul.mubr.msk.f32.gmra.mxu0 %vm413_vm2, %v11449_v4  ;;  %1040 = vperm.xlu1 %10884, %v881_v5  }
  0x5b   : > { %10088 = vmatprep.mubr.msk.f32.mxu0 %vm11025_vm1, %v11024_v1  ;;  %1035 = vperm.xlu0 %10883, %v880_v6  }
  0x5c   : > { %10195 = vmatmul.mubr.msk.f32.gmra.mxu1 %vm413_vm2, %v11310_v42  ;;  %v392_v42 = vld [vmem:[%s11123_s28 + $0x100] sm:$0xff] }
  0x5d   : > { %10197 = vmatprep.mubr.msk.f32.mxu1 %vm11025_vm1, %v11024_v1 }
  0x5e   : > { %10089 = vmatmul.mubr.msk.f32.gmra.mxu0 %vm413_vm2, %v11466_v8  ;;  %1050 = vperm.xlu1 %10884, %v883_v9  }
  0x5f   : > { %10091 = vmatprep.mubr.msk.f32.mxu0 %vm11025_vm1, %v11024_v1  ;;  %1045 = vperm.xlu0 %10883, %v882_v10  }
  0x60   : > { %10198 = vmatmul.mubr.msk.f32.gmra.mxu1 %vm413_vm2, %v11330_v46 }
  0x61   : > { %10200 = vmatprep.mubr.msk.f32.mxu1 %vm11025_vm1, %v11024_v1 }
  0x62   : > { %10092 = vmatmul.mubr.msk.f32.gmra.mxu0 %vm413_vm2, %v11483_v12  ;;  %1060 = vperm.xlu1 %10884, %v885_v13  }
  0x63   : > { %10094 = vmatprep.mubr.msk.f32.mxu0 %vm11025_vm1, %v11024_v1  ;;  %1055 = vperm.xlu0 %10883, %v884_v15  }
  0x64   : > { %10201 = vmatmul.mubr.msk.f32.gmra.mxu1 %vm413_vm2, %v11347_v49 }
  0x65   : > { %10203 = vmatprep.mubr.msk.f32.mxu1 %vm11025_vm1, %v11024_v1 }
  0x66   : > { %10095 = vmatmul.mubr.msk.f32.gmra.mxu0 %vm413_vm2, %v11500_v16  ;;  %1070 = vperm.xlu1 %10884, %v887_v17  }
  0x67   : > { %10097 = vmatprep.mubr.msk.f32.mxu0 %vm11025_vm1, %v11024_v1  ;;  %1065 = vperm.xlu0 %10883, %v886_v18  }
  0x68   : > { %10204 = vmatmul.mubr.msk.f32.gmra.mxu1 %vm413_vm2, %v11364_v52 }
  0x69   : > { %10206 = vmatprep.mubr.msk.f32.mxu1 %vm11025_vm1, %v11024_v1 }
  0x6a   : > { %10098 = vmatmul.mubr.msk.f32.gmra.mxu0 %vm413_vm2, %v11517_v19  ;;  %1080 = vperm.xlu1 %10884, %v889_v21  }
  0x6b   : > { %10100 = vmatprep.mubr.msk.f32.mxu0 %vm11025_vm1, %v11024_v1  ;;  %1075 = vperm.xlu0 %10883, %v888_v22  }
  0x6c   : > { %10207 = vmatmul.mubr.msk.f32.gmra.mxu1 %vm413_vm2, %v11381_v55 }
  0x6d   : > { %10209 = vmatprep.mubr.msk.f32.mxu1 %vm11025_vm1, %v11024_v1 }
  0x6e   : > { %10101 = vmatmul.mubr.msk.f32.gmra.mxu0 %vm413_vm2, %v382_v23  ;;  %1090 = vperm.xlu1 %10884, %v891_v24  }
  0x6f   : > { %10103 = vmatprep.mubr.msk.f32.mxu0 %vm11025_vm1, %v11024_v1  ;;  %1085 = vperm.xlu0 %10883, %v890_v26  }
  0x70   : > { %10210 = vmatmul.mubr.msk.f32.gmra.mxu1 %vm413_vm2, %v11398_v58 }
  0x71   : > { %10212 = vmatprep.mubr.msk.f32.mxu1 %vm11025_vm1, %v11024_v1 }
  0x72   : > { %10104 = vmatmul.mubr.msk.f32.gmra.mxu0 %vm413_vm2, %v383_v27 }
  0x73   : > { %10106 = vmatprep.mubr.msk.f32.mxu0 %vm11025_vm1, %v11024_v1  ;;  %1095 = vperm.xlu0 %10883, %v892_v28  }
  0x74   : > { %10213 = vmatmul.mubr.msk.f32.gmra.mxu1 %vm413_vm2, %v11415_v61 }
  0x75   : > { %10215 = vmatprep.mubr.msk.f32.mxu1 %vm11025_vm1, %v11024_v1 }
  0x76   : > { %10107 = vmatmul.mubr.msk.f32.gmra.mxu0 %vm413_vm2, %v384_v30 }
  0x77   : > { %10109 = vmatprep.mubr.msk.f32.mxu0 %vm11025_vm1, %v11024_v1 }
  0x78   : > { %10216 = vmatmul.mubr.msk.f32.gmra.mxu1 %vm413_vm2, %v11432_v0  ;;  %v1184_v0 = vlaneseq }
  0x79   : > { %10218 = vmatprep.mubr.msk.f32.mxu1 %vm11025_vm1, %v11024_v1 }
  0x7a   : > { %10110 = vmatmul.mubr.msk.f32.gmra.mxu0 %vm413_vm2, %v385_v33 }
  0x7b   : > { %10112 = vmatprep.mubr.msk.f32.mxu0 %vm11025_vm1, %v11024_v1 }
  0x7c   : > { %10219 = vmatmul.mubr.msk.f32.gmra.mxu1 %vm413_vm2, %v11449_v4  ;;  %v1185_v4 = vshrl.u32 %v1184_v0, 7 }
  0x7d   : > { %10221 = vmatprep.mubr.msk.f32.mxu1 %vm11025_vm1, %v11024_v1 }
  0x7e   : > { %10113 = vmatmul.mubr.msk.f32.gmra.mxu0 %vm413_vm2, %v386_v35 }
  0x7f   : > { %10115 = vmatprep.mubr.msk.f32.mxu0 %vm11025_vm1, %v11024_v1 }
  0x80   : > { %10222 = vmatmul.mubr.msk.f32.gmra.mxu1 %vm413_vm2, %v11466_v8 }
  0x81   : > { %10224 = vmatprep.mubr.msk.f32.mxu1 %vm11025_vm1, %v11024_v1 }
  0x82   : > { %10116 = vmatmul.mubr.msk.f32.gmra.mxu0 %vm413_vm2, %v387_v36 }
  0x83   : > { %10118 = vmatprep.mubr.msk.f32.mxu0 %vm11025_vm1, %v11024_v1 }
  0x84   : > { %10225 = vmatmul.mubr.msk.f32.gmra.mxu1 %vm413_vm2, %v11483_v12 }
  0x85   : > { %10227 = vmatprep.mubr.msk.f32.mxu1 %vm11025_vm1, %v11024_v1 }
  0x86   : > { %10119 = vmatmul.mubr.msk.f32.gmra.mxu0 %vm413_vm2, %v388_v37 }
  0x87   : > { %10121 = vmatprep.mubr.msk.f32.mxu0 %vm11025_vm1, %v11024_v1 }
  0x88   : > { %10228 = vmatmul.mubr.msk.f32.gmra.mxu1 %vm413_vm2, %v11500_v16 }
  0x89   : > { %10230 = vmatprep.mubr.msk.f32.mxu1 %vm11025_vm1, %v11024_v1 }
  0x8a   : > { %10122 = vmatmul.mubr.msk.f32.gmra.mxu0 %vm413_vm2, %v389_v39 }
  0x8b   : > { %10124 = vmatprep.mubr.msk.f32.mxu0 %vm11025_vm1, %v11024_v1 }
  0x8c   : > { %10231 = vmatmul.mubr.msk.f32.gmra.mxu1 %vm413_vm2, %v11517_v19 }
  0x8d   : > { %10233 = vmatprep.mubr.msk.f32.mxu1 %vm11025_vm1, %v11024_v1 }
  0x8e   : > { %10125 = vmatmul.mubr.msk.f32.gmra.mxu0 %vm413_vm2, %v390_v40 }
  0x8f   : > { %10127 = vmatprep.mubr.msk.f32.mxu0 %vm11025_vm1, %v11024_v1 }
  0x90   : > { %10234 = vmatmul.mubr.msk.f32.gmra.mxu1 %vm413_vm2, %v382_v23 }
  0x91   : > { %10236 = vmatprep.mubr.msk.f32.mxu1 %vm11025_vm1, %v11024_v1 }
  0x92   : > { %10128 = vmatmul.mubr.msk.f32.gmra.mxu0 %vm413_vm2, %v391_v41 }
  0x93   : > { %10130 = vmatprep.mubr.msk.f32.mxu0 %vm11025_vm1, %v11024_v1 }
  0x94   : > { %10237 = vmatmul.mubr.msk.f32.gmra.mxu1 %vm413_vm2, %v383_v27 }
  0x95   : > { %10239 = vmatprep.mubr.msk.f32.mxu1 %vm11025_vm1, %v11024_v1 }
  0x96   : > { %10131 = vmatmul.mubr.msk.f32.gmra.mxu0 %vm413_vm2, %v392_v42 }
  0x98   : > { %10240 = vmatmul.mubr.msk.f32.gmra.mxu1 %vm413_vm2, %v384_v30 }
  0x99   : > { %10242 = vmatprep.mubr.msk.f32.mxu1 %vm11025_vm1, %v11024_v1 }
  0x9c   : > { %10243 = vmatmul.mubr.msk.f32.gmra.mxu1 %vm413_vm2, %v385_v33  ;;  %v11636_v43 = vpop.permute.xlu1 %905 }
  0x9d   : > { %10245 = vmatprep.mubr.msk.f32.mxu1 %vm11025_vm1, %v11024_v1  ;;  %v11640_v44 = vpop.permute.xlu0 %895 }
  0xa0   : > { %10246 = vmatmul.mubr.msk.f32.gmra.mxu1 %vm413_vm2, %v386_v35 }
  0xa1   : > { %10248 = vmatprep.mubr.msk.f32.mxu1 %vm11025_vm1, %v11024_v1  ;;  %v11645_v45 = vpop.permute.xlu1 %910 }
  0xa2   : > { %v11647_v46 = vpop.permute.xlu0 %900 }
  0xa4   : > { %10249 = vmatmul.mubr.msk.f32.gmra.mxu1 %vm413_vm2, %v387_v36 }
  0xa5   : > { %10251 = vmatprep.mubr.msk.f32.mxu1 %vm11025_vm1, %v11024_v1  ;;  %v11652_v47 = vpop.permute.xlu1 %920 }
  0xa6   : > { %v11654_v48 = vpop.permute.xlu0 %915 }
  0xa8   : > { %10252 = vmatmul.mubr.msk.f32.gmra.mxu1 %vm413_vm2, %v388_v37 }
  0xa9   : > { %10254 = vmatprep.mubr.msk.f32.mxu1 %vm11025_vm1, %v11024_v1  ;;  %v11659_v49 = vpop.permute.xlu1 %930 }
  0xaa   : > { %v11661_v50 = vpop.permute.xlu0 %925 }
  0xac   : > { %10255 = vmatmul.mubr.msk.f32.gmra.mxu1 %vm413_vm2, %v389_v39 }
  0xad   : > { %10257 = vmatprep.mubr.msk.f32.mxu1 %vm11025_vm1, %v11024_v1  ;;  %v11666_v51 = vpop.permute.xlu1 %940 }
  0xae   : > { %v11671_v52 = vpop.permute.xlu0 %935 }
  0xb0   : > { %10258 = vmatmul.mubr.msk.f32.gmra.mxu1 %vm413_vm2, %v390_v40 }
  0xb1   : > { %10260 = vmatprep.mubr.msk.f32.mxu1 %vm11025_vm1, %v11024_v1  ;;  %v11673_v53 = vpop.permute.xlu1 %950 }
  0xb2   : > { %v11680_v55 = vpop.permute.xlu0 %945 }
  0xb4   : > { %10261 = vmatmul.mubr.msk.f32.gmra.mxu1 %vm413_vm2, %v391_v41 }
  0xb5   : > { %10263 = vmatprep.mubr.msk.f32.mxu1 %vm11025_vm1, %v11024_v1  ;;  %v11678_v54 = vpop.permute.xlu1 %960 }
  0xb6   : > { %v11691_v57 = vpop.permute.xlu0 %955 }
  0xb8   : > { %10264 = vmatmul.mubr.msk.f32.gmra.mxu1 %vm413_vm2, %v392_v42 }
  0xb9   : > { %10266 = vmatprep.mubr.msk.f32.mxu1 %vm11025_vm1, %v11024_v1  ;;  %v11685_v56 = vpop.permute.xlu1 %970 }
  0xba   : > { %v11701_v60 = vpop.permute.xlu0 %965 }
  0xbc   : > { %10267 = vmatmul.mubr.msk.f32.gmra.mxu1 %vm413_vm2, %v11132_v7 }
  0xbd   : > { %10269 = vmatprep.mubr.msk.f32.mxu1 %vm11025_vm1, %v11024_v1  ;;  %v11693_v58 = vpop.permute.xlu1 %980 }
  0xc0   : > { %10270 = vmatmul.mubr.msk.f32.gmra.mxu1 %vm413_vm2, %v11155_v11  ;;  %v11713_v11 = vpop.permute.xlu0 %975 }
  0xc1   : > { %10272 = vmatprep.mubr.msk.f32.mxu1 %vm11025_vm1, %v11024_v1  ;;  %v11699_v59 = vpop.permute.xlu1 %990 }
  0xc4   : > { %10273 = vmatmul.mubr.msk.f32.gmra.mxu1 %vm413_vm2, %v11175_v14  ;;  %v11723_v62 = vpop.permute.xlu0 %985 }
  0xc5   : > { %10275 = vmatprep.mubr.msk.f32.mxu1 %vm11025_vm1, %v11024_v1  ;;  %v11707_v7 = vpop.permute.xlu1 %1000 }
  0xc8   : > { %10276 = vmatmul.mubr.msk.f32.gmra.mxu1 %vm413_vm2, %v11199_v20  ;;  %v11027_v20 = vmov 1983009808  }
  0xc9   : > { %10278 = vmatprep.mubr.msk.f32.mxu1 %vm11025_vm1, %v11024_v1  ;;  %v11715_v61 = vpop.permute.xlu1 %1010  ;;  %v1182_v63 = vunpack.c.l.s4 %v11027_v20 }
  0xcb   : > { %v1183_v3 = vunpack.c.0.s8 %v1182_v63 }
  0xcc   : > { %10279 = vmatmul.mubr.msk.f32.gmra.mxu1 %vm413_vm2, %v11223_v25  ;;  %v11734_v25 = vld [vmem:[%s15291_s2] ss:$0 sm:$0xff] }
  0xcd   : > { %10281 = vmatprep.mubr.msk.f32.mxu1 %vm11025_vm1, %v11024_v1  ;;  %v11721_v14 = vpop.permute.xlu1 %1020  ;;  %v11747_v13 = vsub.s32 %v1183_v3, %v1185_v4 }
  0xd0   : > { %10282 = vmatmul.mubr.msk.f32.gmra.mxu1 %vm413_vm2, %v11243_v29  ;;  %v11740_v29 = vpop.permute.xlu0 %995 }
  0xd1   : > { %10284 = vmatprep.mubr.msk.f32.mxu1 %vm11025_vm1, %v11024_v1  ;;  %v11729_v2 = vpop.permute.xlu1 %1030 }
  0xd4   : > { %10285 = vmatmul.mubr.msk.f32.gmra.mxu1 %vm413_vm2, %v11266_v34  ;;  %v11754_v19 = vpop.permute.xlu0 %1005 }
  0xd5   : > { %10287 = vmatprep.mubr.msk.f32.mxu1 %vm11025_vm1, %v11024_v1  ;;  %v11742_v5 = vpop.permute.xlu1 %1040 }
  0xd6   : > { %v607_v6 = vpop.f32.mrf.mxu0 }
  0xd7   : > { %v608_v8 = vadd.f32 %v11734_v25, %v607_v6 }
  0xd8   : > { %v10036_v9 = vpop.f32.mrf.mxu0  ;;  %10288 = vmatmul.mubr.msk.f32.gmra.mxu1 %vm413_vm2, %v11286_v38  ;;  %v772_v10 = vpop.f32.mrf.mxu1 }
  0xd9   : > { %v811_v12 = vmax.f32 %v608_v8, 0.0  ;;  %v773_v34 = vadd.f32 %v11734_v25, %v772_v10  ;;  %v11750_v15 = vpop.permute.xlu1 %1050  ;;  %v11766_v63 = vpop.permute.xlu0 %1015 }
  0xda   : > { %v612_v1 = vpop.f32.mrf.mxu0  ;;  %v10135_v16 = vpop.f32.mrf.mxu1 }
  0xdb   : > { %v1098_v17 = vmul.f32 %v11640_v44, %v811_v12  ;;  %v613_v18 = vadd.f32 %v11734_v25, %v612_v1  ;;  %v844_v22 = vmax.f32 %v773_v34, 0.0 }
  0xdc   : > { %v10039_v21 = vpop.f32.mrf.mxu0  ;;  %v777_v23 = vpop.f32.mrf.mxu1 }
  0xdd   : > { %v1180_v38 = vcombine.high %v1098_v17, %v1098_v17  ;;  %v1187_v24 = vrot.slane %v1098_v17, %v11747_v13  ;;  %v812_v26 = vmax.f32 %v613_v18, 0.0  ;;  %v1061_v35 = vpop.permute.xlu1 %1060  ;;  %v11761_v37 = vadd.f32 %v11734_v25, %v777_v23 }
  0xde   : > { %v617_v27 = vpop.f32.mrf.mxu0  ;;  %v10138_v28 = vpop.f32.mrf.mxu1  ;;  %v11763_v40 = vmul.f32 %v1061_v35, %v844_v22 }
  0xdf   : > { %v1194_v30 = vrot.slane %v1180_v38, %v11747_v13  ;;  %v1195_v31 = vcombine.high %v1187_v24, %v1187_v24  ;;  %v1099_v32 = vmul.f32 %v11647_v46, %v812_v26  ;;  %v618_v33 = vadd.f32 %v11734_v25, %v617_v27 }
  0xe0   : > { %v10042_v36 = vpop.f32.mrf.mxu0  ;;  %v782_v39 = vpop.f32.mrf.mxu1  ;;  %v845_v34 = vmax.f32 %v11761_v37, 0.0  ;;  %v1741_v16 = vcombine.high %v11763_v40, %v11763_v40 }
  0xe1   : > { %v1196_v41 = vcombine.high %v1194_v30, %v1194_v30  ;;  %v1868_v42 = vcombine.low %v1187_v24, %v1195_v31  ;;  %v1197_v44 = vcombine.high %v1099_v32, %v1099_v32  ;;  %v1204_v20 = vrot.slane %v1099_v32, %v11747_v13  ;;  %v11781_v32 = vpop.permute.xlu0 %1025 }
  0xe2   : > { %v813_v0 = vmax.f32 %v618_v33, 0.0  ;;  %v622_v46 = vpop.f32.mrf.mxu0  ;;  %v10141_v3 = vpop.f32.mrf.mxu1  ;;  %v11778_v26 = vadd.f32 %v11734_v25, %v782_v39 }
  0xe3   : > { %v1869_v4 = vcombine.low %v1194_v30, %v1196_v41  ;;  %v1211_v6 = vrot.slane %v1197_v44, %v11747_v13  ;;  %v1212_v8 = vcombine.high %v1204_v20, %v1204_v20  ;;  %v623_v10 = vadd.f32 %v11734_v25, %v622_v46 }
  0xe4   : > { %v1100_v9 = vmul.f32 %v11636_v43, %v813_v0  ;;  %v10045_v12 = vpop.f32.mrf.mxu0  ;;  %v787_v1 = vpop.f32.mrf.mxu1  ;;  %v1876_v17 = vrot.slane %v1868_v42, %v11747_v13  ;;  %v11793_v3 = vrot.slane %v1741_v16, %v11747_v13 }
  0xe5   : > { %v1883_v18 = vrot.slane %v1869_v4, %v11747_v13  ;;  %v1213_v21 = vcombine.high %v1211_v6, %v1211_v6  ;;  %v1885_v22 = vcombine.low %v1204_v20, %v1212_v8  ;;  %v814_v24 = vmax.f32 %v623_v10, 0.0 }
  0xe6   : > { %v1214_v23 = vcombine.high %v1100_v9, %v1100_v9  ;;  %v1221_v38 = vrot.slane %v1100_v9, %v11747_v13  ;;  %v627_v43 = vpop.f32.mrf.mxu0  ;;  %v10144_v27 = vpop.f32.mrf.mxu1  ;;  %v11784_v33 = vadd.f32 %v11734_v25, %v787_v1 }
  0xe7   : > { %v1884_v28 = vcombine.low %v1876_v17, %v1883_v18  ;;  %v1886_v30 = vcombine.low %v1211_v6, %v1213_v21  ;;  %v628_v31 = vadd.f32 %v11734_v25, %v627_v43  ;;  %v1101_v42 = vmul.f32 %v11645_v45, %v814_v24 }
  0xe8   : > { %v1228_v35 = vrot.slane %v1214_v23, %v11747_v13  ;;  %v1229_v36 = vcombine.high %v1221_v38, %v1221_v38  ;;  %v1908_v41 = vrot.slane %v1221_v38, %v11747_v13  ;;  %v10048_v44 = vpop.f32.mrf.mxu0  ;;  %v792_v39 = vpop.f32.mrf.mxu1  ;;  %v1893_v20 = vrot.slane %v1885_v22, %v11747_v13 }
  0xe9   : > { %2661 = vst.msk [vmem:[#allocation2] sm:$0xff] %vm2660_vm3, %v1884_v28  ;;  %v1900_v0 = vrot.slane %v1886_v30, %v11747_v13  ;;  %v815_v46 = vmax.f32 %v628_v31, 0.0  ;;  %v1231_v8 = vcombine.high %v1101_v42, %v1101_v42  ;;  %v1238_v9 = vrot.slane %v1101_v42, %v11747_v13  ;;  %v11805_v30 = vpop.permute.xlu0 %1035 }
  0xea   : > { %v1909_v4 = vcombine.low %v1229_v36, %v1228_v35  ;;  %2664 = vst.msk [vmem:[#allocation2 + $0x10] sm:$0x3] %vm2663_vm4, %v1908_v41  ;;  %v1230_v6 = vcombine.high %v1228_v35, %v1228_v35  ;;  %v632_v45 = vpop.f32.mrf.mxu0  ;;  %v10147_v10 = vpop.f32.mrf.mxu1  ;;  %v846_v18 = vmax.f32 %v11778_v26, 0.0  ;;  %v2482_v42 = vrot.slane %v11793_v3, %v11747_v13 }
  0xeb   : > { %v1901_v12 = vcombine.low %v1893_v20, %v1900_v0  ;;  %v1102_v1 = vmul.f32 %v11654_v48, %v815_v46  ;;  %v633_v17 = vadd.f32 %v11734_v25, %v632_v45  ;;  %v1245_v21 = vrot.slane %v1231_v8, %v11747_v13 }
  0xec   : > { %v1246_v16 = vcombine.high %v1238_v9, %v1238_v9  ;;  %v1910_v22 = vcombine.low %v1230_v6, %v1238_v9  ;;  %v10051_v23 = vpop.f32.mrf.mxu0  ;;  %v797_v24 = vpop.f32.mrf.mxu1  ;;  %v1917_v43 = vrot.slane %v1909_v4, %v11747_v13  ;;  %v11814_v45 = vadd.f32 %v11734_v25, %v792_v39  ;;  %2706 = vst.msk [vmem:[#allocation2 + $0x160] sm:$0x3] %vm2663_vm4, %v2482_v42 }
  0xed   : > { %2662 = vst.msk [vmem:[#allocation2 + $0x8] sm:$0xff] %vm2660_vm3, %v1901_v12  ;;  %v1248_v27 = vcombine.high %v1102_v1, %v1102_v1  ;;  %v1255_v28 = vrot.slane %v1102_v1, %v11747_v13  ;;  %v816_v48 = vmax.f32 %v633_v17, 0.0  ;;  %v1247_v35 = vcombine.high %v1245_v21, %v1245_v21  ;;  %v9253_v1 = vld [vmem:[%s15294_s5 + $0x28] sm:$0xff]  ;;  %v1071_v39 = vpop.permute.xlu1 %1070 }
  0xee   : > { %v1924_v26 = vrot.slane %v1910_v22, %v11747_v13  ;;  %v1926_v31 = vcombine.low %v1246_v16, %v1245_v21  ;;  %v637_v36 = vpop.f32.mrf.mxu0  ;;  %v10150_v41 = vpop.f32.mrf.mxu1  ;;  %v11817_v10 = vadd.f32 %v11734_v25, %v797_v24  ;;  %10394 = vmatprep.subr.mxu0 %v9253_v1 }
  0xef   : > { %v1262_v44 = vrot.slane %v1248_v27, %v11747_v13  ;;  %v1263_v20 = vcombine.high %v1255_v28, %v1255_v28  ;;  %v1103_v0 = vmul.f32 %v11652_v47, %v816_v48  ;;  %v638_v46 = vadd.f32 %v11734_v25, %v637_v36  ;;  %v11832_v41 = vpop.permute.xlu0 %1045 }
  0xf0   : > { %v1925_v4 = vcombine.low %v1917_v43, %v1924_v26  ;;  %v1927_v6 = vcombine.low %v1247_v35, %v1255_v28  ;;  %v10054_v8 = vpop.f32.mrf.mxu0  ;;  %v4060_v9 = vld [vmem:[#allocation2] sm:$0xff]  ;;  %v802_v12 = vpop.f32.mrf.mxu1  ;;  %v1934_v22 = vrot.slane %v1926_v31, %v11747_v13  ;;  %v1133_v28 = vmul.f32 %v1071_v39, %v846_v18 }
  0xf1   : > { %v1264_v47 = vcombine.high %v1262_v44, %v1262_v44  ;;  %v1949_v17 = vrot.slane %v1263_v20, %v11747_v13  ;;  %v1265_v21 = vcombine.high %v1103_v0, %v1103_v0  ;;  %v1272_v16 = vrot.slane %v1103_v0, %v11747_v13  ;;  %10346 = vmatprep.mubr.msk.f32.mxu1 %vm2660_vm3, %v4060_v9 }
  0xf2   : > { %2665 = vst.msk [vmem:[#allocation2 + $0x18] sm:$0xff] %vm2660_vm3, %v1925_v4  ;;  %v1941_v23 = vrot.slane %v1927_v6, %v11747_v13  ;;  %v817_v24 = vmax.f32 %v638_v46, 0.0  ;;  %v642_v43 = vpop.f32.mrf.mxu0  ;;  %v10153_v27 = vpop.f32.mrf.mxu1  ;;  %v11836_v18 = vadd.f32 %v11734_v25, %v802_v12  ;;  %v11847_v12 = vrot.slane %v1133_v28, %v11747_v13 }
  0xf3   : > { %v1950_v48 = vcombine.low %v1262_v44, %v1264_v47  ;;  %2667 = vst.msk [vmem:[#allocation2 + $0x28] sm:$0x3] %vm2663_vm4, %v1949_v17  ;;  %v1279_v26 = vrot.slane %v1265_v21, %v11747_v13  ;;  %v1280_v35 = vcombine.high %v1272_v16, %v1272_v16  ;;  %v643_v36 = vadd.f32 %v11734_v25, %v642_v43 }
  0xf4   : > { %v1942_v31 = vcombine.low %v1934_v22, %v1941_v23  ;;  %v1104_v42 = vmul.f32 %v11661_v50, %v817_v24  ;;  %v10057_v20 = vpop.f32.mrf.mxu0  ;;  %v4094_v0 = vld [vmem:[#allocation2 + $0x1] sm:$0xff]  ;;  %v4095_v4 = vld [vmem:[#allocation2 + $0x9] sm:$0xff]  ;;  %v1775_v44 = vcombine.high %v1133_v28, %v1133_v28  ;;  %v11838_v6 = vpop.f32.mrf.mxu1 }
  0xf5   : > { %v4061_v46 = vld [vmem:[#allocation2 + $0x8] sm:$0xff]  ;;  %v1958_v8 = vrot.slane %v1950_v48, %v11747_v13  ;;  %v1281_v9 = vcombine.high %v1279_v26, %v1279_v26  ;;  %v1951_v47 = vcombine.low %v1272_v16, %v1280_v35  ;;  %v818_v17 = vmax.f32 %v643_v36, 0.0  ;;  %10294 = vmatprep.mubr.msk.f32.mxu0 %vm2660_vm3, %v4094_v0 }
  0xf6   : > { %10347 = vmatmul.mubr.msk.f32.vlgmr.msra.gmra.mxu1 %vm2660_vm3, %v4061_v46  ;;  %2666 = vst.msk [vmem:[#allocation2 + $0x20] sm:$0xff] %vm2660_vm3, %v1942_v31  ;;  %v1282_v50 = vcombine.high %v1104_v42, %v1104_v42  ;;  %v1289_v21 = vrot.slane %v1104_v42, %v11747_v13  ;;  %v647_v39 = vpop.f32.mrf.mxu0  ;;  %10295 = vmatmul.mubr.msk.f32.vlgmr.msra.gmra.mxu0 %vm2660_vm3, %v4095_v4  ;;  %v10156_v23 = vpop.f32.mrf.mxu1 }
  0xf7   : > { %v1789_v22 = vrot.slane %v1775_v44, %v11747_v13  ;;  %v1965_v16 = vrot.slane %v1951_v47, %v11747_v13  ;;  %v1967_v24 = vcombine.low %v1279_v26, %v1281_v9  ;;  %v1105_v43 = vmul.f32 %v11659_v49, %v818_v17  ;;  %10395 = vmatpush3.msra.mxu0 %v9253_v1  ;;  %v11858_v49 = vpop.permute.xlu0 %1055 }
  0xf8   : > { %v648_v27 = vadd.f32 %v11734_v25, %v647_v39  ;;  %v1296_v48 = vrot.slane %v1282_v50, %v11747_v13  ;;  %v1297_v35 = vcombine.high %v1289_v21, %v1289_v21  ;;  %v10060_v36 = vpop.f32.mrf.mxu0  ;;  %v1790_v31 = vcombine.high %v11847_v12, %v11847_v12  ;;  %v2797_v42 = vpop.f32.mrf.mxu1 }
  0xf9   : > { %v1791_v28 = vcombine.high %v1789_v22, %v1789_v22  ;;  %v1966_v20 = vcombine.low %v1958_v8, %v1965_v16  ;;  %v1975_v0 = vrot.slane %v1967_v24, %v11747_v13  ;;  %v1299_v46 = vcombine.high %v1105_v43, %v1105_v43  ;;  %v4062_v4 = vld [vmem:[#allocation2 + $0x18] sm:$0xff] }
  0xfa   : > { %v1306_v26 = vrot.slane %v1105_v43, %v11747_v13  ;;  %v1968_v44 = vcombine.low %v1289_v21, %v1297_v35  ;;  %v1990_v1 = vrot.slane %v1296_v48, %v11747_v13  ;;  %v1298_v9 = vcombine.high %v1296_v48, %v1296_v48  ;;  %10349 = vmatprep.mubr.msk.f32.mxu1 %vm2660_vm3, %v4062_v4  ;;  %v652_v17 = vpop.f32.mrf.mxu0  ;;  %v10169_v50 = vpop.f32.mrf.mxu1 }
  0xfb   : > { %v819_v47 = vmax.f32 %v648_v27, 0.0  ;;  %2668 = vst.msk [vmem:[#allocation2 + $0x30] sm:$0xff] %vm2660_vm3, %v1966_v20  ;;  %v1313_v8 = vrot.slane %v1299_v46, %v11747_v13  ;;  %v653_v23 = vadd.f32 %v11734_v25, %v652_v17  ;;  %v11865_v16 = vcombine.low %v1790_v31, %v1789_v22 }
  0xfc   : > { %v1314_v39 = vcombine.high %v1306_v26, %v1306_v26  ;;  %v1982_v24 = vrot.slane %v1968_v44, %v11747_v13  ;;  %2670 = vst.msk [vmem:[#allocation2 + $0x40] sm:$0x3] %vm2663_vm4, %v1990_v1  ;;  %v1991_v21 = vcombine.low %v1298_v9, %v1306_v26  ;;  %v10063_v27 = vpop.f32.mrf.mxu0  ;;  %v2523_v48 = vrot.slane %v1791_v28, %v11747_v13  ;;  %v2801_v35 = vpop.f32.mrf.mxu1 }
  0xfd   : > { %v1106_v43 = vmul.f32 %v11671_v52, %v819_v47  ;;  %v1315_v42 = vcombine.high %v1313_v8, %v1313_v8  ;;  %v820_v20 = vmax.f32 %v653_v23, 0.0  ;;  %v4096_v46 = vld [vmem:[#allocation2 + $0x19] sm:$0xff]  ;;  %v4097_v50 = vld [vmem:[#allocation2 + $0x21] sm:$0xff]  ;;  %v2515_v22 = vrot.slane %v11865_v16, %v11747_v13 }
  0xfe   : > { %v1992_v36 = vcombine.low %v1314_v39, %v1313_v8  ;;  %v4063_v4 = vld [vmem:[#allocation2 + $0x20] sm:$0xff]  ;;  %v1983_v31 = vcombine.low %v1975_v0, %v1982_v24  ;;  %v1999_v44 = vrot.slane %v1991_v21, %v11747_v13  ;;  %10297 = vmatprep.mubr.msk.f32.mxu0 %vm2660_vm3, %v4096_v46  ;;  %v657_v52 = vpop.f32.mrf.mxu0  ;;  %2709 = vst.msk [vmem:[#allocation2 + $0x178] sm:$0x3] %vm2663_vm4, %v2523_v48  ;;  %v10172_v28 = vpop.f32.mrf.mxu1  ;;  %v848_v0 = vmax.f32 %v11814_v45, 0.0 }
  0xff   : > { %v1316_v1 = vcombine.high %v1106_v43, %v1106_v43  ;;  %v1323_v26 = vrot.slane %v1106_v43, %v11747_v13  ;;  %v1107_v47 = vmul.f32 %v11666_v51, %v820_v20  ;;  %10350 = vmatmul.mubr.msk.f32.gmra.mxu1 %vm2660_vm3, %v4063_v4  ;;  %v658_v17 = vadd.f32 %v11734_v25, %v657_v52  ;;  %v1066_v8 = vpop.permute.xlu0 %1065 }
 0x100   : > { %v2006_v9 = vrot.slane %v1992_v36, %v11747_v13  ;;  %10298 = vmatmul.mubr.msk.f32.gmra.mxu0 %vm2660_vm3, %v4097_v50  ;;  %2669 = vst.msk [vmem:[#allocation2 + $0x38] sm:$0xff] %vm2660_vm3, %v1983_v31  ;;  %v10066_v21 = vpop.f32.mrf.mxu0  ;;  %v1132_v43 = vmul.f32 %v1066_v8, %v845_v34  ;;  %v11887_v51 = vpop.f32.mrf.mxu1 }
 0x101   : > { %v1330_v39 = vrot.slane %v1316_v1, %v11747_v13  ;;  %v1331_v23 = vcombine.high %v1323_v26, %v1323_v26  ;;  %v2008_v24 = vcombine.low %v1315_v42, %v1323_v26  ;;  %v1333_v48 = vcombine.high %v1107_v47, %v1107_v47 }
 0x102   : > { %v2007_v27 = vcombine.low %v1999_v44, %v2006_v9  ;;  %v1340_v35 = vrot.slane %v1107_v47, %v11747_v13  ;;  %v821_v36 = vmax.f32 %v658_v17, 0.0  ;;  %v662_v50 = vpop.f32.mrf.mxu0  ;;  %v4064_v31 = vld [vmem:[#allocation2 + $0x30] sm:$0xff]  ;;  %v1757_v42 = vcombine.high %v11793_v3, %v11793_v3  ;;  %v10175_v1 = vpop.f32.mrf.mxu1 }
 0x103   : > { %v1332_v20 = vcombine.high %v1330_v39, %v1330_v39  ;;  %v2009_v46 = vcombine.low %v1331_v23, %v1330_v39  ;;  %v2016_v4 = vrot.slane %v2008_v24, %v11747_v13  ;;  %v1347_v37 = vrot.slane %v1333_v48, %v11747_v13  ;;  %10352 = vmatprep.mubr.msk.f32.mxu1 %vm2660_vm3, %v4064_v31 }
 0x104   : > { %2671 = vst.msk [vmem:[#allocation2 + $0x48] sm:$0xff] %vm2660_vm3, %v2007_v27  ;;  %v1348_v34 = vcombine.high %v1340_v35, %v1340_v35  ;;  %v1108_v44 = vmul.f32 %v11680_v55, %v821_v36  ;;  %v663_v26 = vadd.f32 %v11734_v25, %v662_v50  ;;  %v10069_v9 = vpop.f32.mrf.mxu0  ;;  %v1758_v47 = vcombine.high %v1132_v43, %v1132_v43  ;;  %v11901_v17 = vpop.f32.mrf.mxu1 }
 0x105   : > { %v2023_v52 = vrot.slane %v2009_v46, %v11747_v13  ;;  %v2031_v28 = vrot.slane %v1332_v20, %v11747_v13  ;;  %v1765_v3 = vrot.slane %v1132_v43, %v11747_v13  ;;  %v1349_v8 = vcombine.high %v1347_v37, %v1347_v37 }
 0x106   : > { %v2032_v39 = vcombine.low %v1340_v35, %v1348_v34  ;;  %v1350_v23 = vcombine.high %v1108_v44, %v1108_v44  ;;  %v1357_v24 = vrot.slane %v1108_v44, %v11747_v13  ;;  %v822_v21 = vmax.f32 %v663_v26, 0.0  ;;  %v667_v27 = vpop.f32.mrf.mxu0  ;;  %v10178_v20 = vpop.f32.mrf.mxu1 }
 0x107   : > { %v2024_v55 = vcombine.low %v2016_v4, %v2023_v52  ;;  %2673 = vst.msk [vmem:[#allocation2 + $0x58] sm:$0x3] %vm2663_vm4, %v2031_v28  ;;  %v1772_v48 = vrot.slane %v1758_v47, %v11747_v13  ;;  %v1773_v36 = vcombine.high %v1765_v3, %v1765_v3  ;;  %v2033_v46 = vcombine.low %v1347_v37, %v1349_v8  ;;  %v4098_v1 = vld [vmem:[#allocation2 + $0x31] sm:$0xff]  ;;  %v4099_v34 = vld [vmem:[#allocation2 + $0x39] sm:$0xff] }
 0x108   : > { %v2040_v50 = vrot.slane %v2032_v39, %v11747_v13  ;;  %v1364_v43 = vrot.slane %v1350_v23, %v11747_v13  ;;  %v1365_v31 = vcombine.high %v1357_v24, %v1357_v24  ;;  %v4065_v35 = vld [vmem:[#allocation2 + $0x38] sm:$0xff]  ;;  %v1109_v4 = vmul.f32 %v11673_v53, %v822_v21  ;;  %10300 = vmatprep.mubr.msk.f32.mxu0 %vm2660_vm3, %v4098_v1  ;;  %v10072_v37 = vpop.f32.mrf.mxu0  ;;  %v11914_v28 = vpop.f32.mrf.mxu1 }
 0x109   : > { %2672 = vst.msk [vmem:[#allocation2 + $0x50] sm:$0xff] %vm2660_vm3, %v2024_v55  ;;  %v668_v26 = vadd.f32 %v11734_v25, %v667_v27  ;;  %10353 = vmatmul.mubr.msk.f32.gmra.mxu1 %vm2660_vm3, %v4065_v35  ;;  %v1774_v52 = vcombine.high %v1772_v48, %v1772_v48  ;;  %v2047_v9 = vrot.slane %v2033_v46, %v11747_v13 }
 0x10a   : > { %v1366_v47 = vcombine.high %v1364_v43, %v1364_v43  ;;  %v2049_v8 = vcombine.low %v1357_v24, %v1365_v31  ;;  %10301 = vmatmul.mubr.msk.f32.gmra.mxu0 %vm2660_vm3, %v4099_v34  ;;  %v2483_v39 = vcombine.low %v1757_v42, %v1765_v3  ;;  %v1367_v53 = vcombine.high %v1109_v4, %v1109_v4  ;;  %v672_v21 = vpop.f32.mrf.mxu0  ;;  %v10181_v1 = vpop.f32.mrf.mxu1 }
 0x10b   : > { %v1374_v23 = vrot.slane %v1109_v4, %v11747_v13  ;;  %v823_v55 = vmax.f32 %v668_v26, 0.0  ;;  %v4066_v27 = vld [vmem:[#allocation2 + $0x48] sm:$0xff]  ;;  %v2484_v20 = vcombine.low %v1773_v36, %v1772_v48  ;;  %v2048_v35 = vcombine.low %v2040_v50, %v2047_v9  ;;  %v1081_v4 = vpop.permute.xlu1 %1080 }
 0x10c   : > { %v2050_v37 = vcombine.low %v1364_v43, %v1366_v47  ;;  %v2057_v44 = vrot.slane %v2049_v8, %v11747_v13  ;;  %v673_v38 = vadd.f32 %v11734_v25, %v672_v21  ;;  %10355 = vmatprep.mubr.msk.f32.mxu1 %vm2660_vm3, %v4066_v27  ;;  %v1381_v24 = vrot.slane %v1367_v53, %v11747_v13  ;;  %v10075_v31 = vpop.f32.mrf.mxu0  ;;  %v11925_v34 = vpop.f32.mrf.mxu1 }
 0x10d   : > { %v1382_v46 = vcombine.high %v1374_v23, %v1374_v23  ;;  %v2072_v42 = vrot.slane %v1374_v23, %v11747_v13  ;;  %v1110_v3 = vmul.f32 %v11691_v57, %v823_v55  ;;  %2674 = vst.msk [vmem:[#allocation2 + $0x60] sm:$0xff] %vm2660_vm3, %v2048_v35  ;;  %v2491_v50 = vrot.slane %v2483_v39, %v11747_v13 }
 0x10e   : > { %v2064_v48 = vrot.slane %v2050_v37, %v11747_v13  ;;  %v824_v36 = vmax.f32 %v673_v38, 0.0  ;;  %v2498_v43 = vrot.slane %v2484_v20, %v11747_v13  ;;  %v1383_v9 = vcombine.high %v1381_v24, %v1381_v24  ;;  %v677_v8 = vpop.f32.mrf.mxu0  ;;  %v10184_v53 = vpop.f32.mrf.mxu1 }
 0x10f   : > { %v2073_v26 = vcombine.low %v1382_v46, %v1381_v24  ;;  %2676 = vst.msk [vmem:[#allocation2 + $0x70] sm:$0x3] %vm2663_vm4, %v2072_v42  ;;  %v1384_v47 = vcombine.high %v1110_v3, %v1110_v3  ;;  %v1391_v57 = vrot.slane %v1110_v3, %v11747_v13  ;;  %v2500_v38 = vcombine.low %v1774_v52, %v11847_v12  ;;  %v1091_v53 = vpop.permute.xlu1 %1090 }
 0x110   : > { %v2065_v23 = vcombine.low %v2057_v44, %v2064_v48  ;;  %v1111_v55 = vmul.f32 %v11678_v54, %v824_v36  ;;  %v2499_v21 = vcombine.low %v2491_v50, %v2498_v43  ;;  %v4100_v27 = vld [vmem:[#allocation2 + $0x49] sm:$0xff]  ;;  %v4101_v1 = vld [vmem:[#allocation2 + $0x51] sm:$0xff]  ;;  %v10078_v46 = vpop.f32.mrf.mxu0  ;;  %v11938_v42 = vpop.f32.mrf.mxu1  ;;  %v11946_v52 = vadd.f32 %v11734_v25, %v11838_v6 }
 0x111   : > { %v4067_v39 = vld [vmem:[#allocation2 + $0x50] sm:$0xff]  ;;  %v2081_v20 = vrot.slane %v2073_v26, %v11747_v13  ;;  %v1398_v35 = vrot.slane %v1384_v47, %v11747_v13  ;;  %v1399_v37 = vcombine.high %v1391_v57, %v1391_v57  ;;  %v2074_v24 = vcombine.low %v1383_v9, %v1391_v57  ;;  %10303 = vmatprep.mubr.msk.f32.mxu0 %vm2660_vm3, %v4100_v27  ;;  %v1076_v57 = vpop.permute.xlu0 %1075 }
 0x112   : > { %2675 = vst.msk [vmem:[#allocation2 + $0x68] sm:$0xff] %vm2660_vm3, %v2065_v23  ;;  %v1401_v54 = vcombine.high %v1111_v55, %v1111_v55  ;;  %v1408_v44 = vrot.slane %v1111_v55, %v11747_v13  ;;  %v2508_v12 = vrot.slane %v2500_v38, %v11747_v13  ;;  %2707 = vst.msk [vmem:[#allocation2 + $0x168] sm:$0xff] %vm2660_vm3, %v2499_v21  ;;  %10356 = vmatmul.mubr.msk.f32.gmra.mxu1 %vm2660_vm3, %v4067_v39  ;;  %v682_v50 = vpop.f32.mrf.mxu0  ;;  %v10187_v43 = vpop.f32.mrf.mxu1 }
 0x113   : > { %v2088_v3 = vrot.slane %v2074_v24, %v11747_v13  ;;  %v2090_v31 = vcombine.low %v1399_v37, %v1398_v35  ;;  %v1400_v48 = vcombine.high %v1398_v35, %v1398_v35  ;;  %v678_v36 = vadd.f32 %v11734_v25, %v677_v8  ;;  %10304 = vmatmul.mubr.msk.f32.gmra.mxu0 %vm2660_vm3, %v4101_v1 }
 0x114   : > { %v850_v26 = vmax.f32 %v11836_v18, 0.0  ;;  %v1415_v9 = vrot.slane %v1401_v54, %v11747_v13  ;;  %v1416_v47 = vcombine.high %v1408_v44, %v1408_v44  ;;  %v2516_v6 = vcombine.low %v2508_v12, %v2515_v22  ;;  %v10081_v38 = vpop.f32.mrf.mxu0  ;;  %v4068_v27 = vld [vmem:[#allocation2 + $0x60] sm:$0xff]  ;;  %v11958_v39 = vpop.f32.mrf.mxu1 }
 0x115   : > { %v2089_v23 = vcombine.low %v2081_v20, %v2088_v3  ;;  %v2091_v55 = vcombine.low %v1400_v48, %v1408_v44  ;;  %v851_v21 = vmax.f32 %v11946_v52, 0.0  ;;  %v825_v8 = vmax.f32 %v678_v36, 0.0  ;;  %10358 = vmatprep.mubr.msk.f32.mxu1 %vm2660_vm3, %v4068_v27 }
 0x116   : > { %v1417_v1 = vcombine.high %v1415_v9, %v1415_v9  ;;  %v2113_v18 = vrot.slane %v1416_v47, %v11747_v13  ;;  %2708 = vst.msk [vmem:[#allocation2 + $0x170] sm:$0xff] %vm2660_vm3, %v2516_v6  ;;  %v1135_v16 = vmul.f32 %v1081_v4, %v848_v0  ;;  %v15384_v22 = vmax.f32 %v11784_v33, 0.0  ;;  %v11972_v54 = vpop.f32.mrf.mxu0  ;;  %v10190_v44 = vpop.f32.mrf.mxu1 }
 0x117   : > { %v2098_v20 = vrot.slane %v2090_v31, %v11747_v13  ;;  %2677 = vst.msk [vmem:[#allocation2 + $0x78] sm:$0xff] %vm2660_vm3, %v2089_v23  ;;  %v2105_v37 = vrot.slane %v2091_v55, %v11747_v13  ;;  %v1112_v24 = vmul.f32 %v11701_v60, %v825_v8  ;;  %v683_v46 = vadd.f32 %v11734_v25, %v682_v50  ;;  %v1086_v8 = vpop.permute.xlu0 %1085 }
 0x118   : > { %v1134_v35 = vmul.f32 %v1076_v57, %v15384_v22  ;;  %2679 = vst.msk [vmem:[#allocation2 + $0x88] sm:$0x3] %vm2663_vm4, %v2113_v18  ;;  %v1809_v45 = vcombine.high %v1135_v16, %v1135_v16  ;;  %v1816_v33 = vrot.slane %v1135_v16, %v11747_v13  ;;  %v1137_v4 = vmul.f32 %v1091_v53, %v850_v26  ;;  %v10084_v36 = vpop.f32.mrf.mxu0  ;;  %v11978_v47 = vpop.f32.mrf.mxu1 }
 0x119   : > { %v2106_v12 = vcombine.low %v2098_v20, %v2105_v37  ;;  %v1418_v3 = vcombine.high %v1112_v24, %v1112_v24  ;;  %v1425_v31 = vrot.slane %v1112_v24, %v11747_v13  ;;  %v4102_v60 = vld [vmem:[#allocation2 + $0x61] sm:$0xff]  ;;  %v4103_v50 = vld [vmem:[#allocation2 + $0x69] sm:$0xff]  ;;  %v2114_v6 = vcombine.low %v1415_v9, %v1417_v1 }
 0x11a   : > { %v1792_v0 = vcombine.high %v1134_v35, %v1134_v35  ;;  %v1799_v48 = vrot.slane %v1134_v35, %v11747_v13  ;;  %v4069_v43 = vld [vmem:[#allocation2 + $0x68] sm:$0xff]  ;;  %v1823_v57 = vrot.slane %v1809_v45, %v11747_v13  ;;  %v1824_v23 = vcombine.high %v1816_v33, %v1816_v33  ;;  %10306 = vmatprep.mubr.msk.f32.mxu0 %vm2660_vm3, %v4102_v60  ;;  %v11986_v18 = vpop.f32.mrf.mxu0  ;;  %v10193_v9 = vpop.f32.mrf.mxu1 }
 0x11b   : > { %2678 = vst.msk [vmem:[#allocation2 + $0x80] sm:$0xff] %vm2660_vm3, %v2106_v12  ;;  %v1432_v26 = vrot.slane %v1418_v3, %v11747_v13  ;;  %v1433_v53 = vcombine.high %v1425_v31, %v1425_v31  ;;  %v826_v27 = vmax.f32 %v683_v46, 0.0  ;;  %10359 = vmatmul.mubr.msk.f32.gmra.mxu1 %vm2660_vm3, %v4069_v43  ;;  %10307 = vmatmul.mubr.msk.f32.gmra.mxu0 %vm2660_vm3, %v4103_v50 }
 0x11c   : > { %v1806_v55 = vrot.slane %v1792_v0, %v11747_v13  ;;  %v1807_v38 = vcombine.high %v1799_v48, %v1799_v48  ;;  %v1825_v1 = vcombine.high %v1823_v57, %v1823_v57  ;;  %v2541_v16 = vcombine.low %v1816_v33, %v1824_v23  ;;  %v10087_v45 = vpop.f32.mrf.mxu0  ;;  %v11990_v0 = vpop.f32.mrf.mxu1 }
 0x11d   : > { %v1843_v35 = vcombine.high %v1137_v4, %v1137_v4  ;;  %v1434_v20 = vcombine.high %v1432_v26, %v1432_v26  ;;  %v2115_v37 = vcombine.low %v1425_v31, %v1433_v53  ;;  %v1113_v44 = vmul.f32 %v11685_v56, %v826_v27  ;;  %v1096_v53 = vpop.permute.xlu0 %1095 }
 0x11e   : > { %v1808_v22 = vcombine.high %v1806_v55, %v1806_v55  ;;  %v2524_v24 = vcombine.low %v1799_v48, %v1807_v38  ;;  %v2542_v46 = vcombine.low %v1823_v57, %v1825_v1  ;;  %v2549_v12 = vrot.slane %v2541_v16, %v11747_v13  ;;  %v4070_v60 = vld [vmem:[#allocation2 + $0x78] sm:$0xff]  ;;  %v12000_v56 = vpop.f32.mrf.mxu0  ;;  %v10196_v50 = vpop.f32.mrf.mxu1 }
 0x11f   : > { %v11994_v36 = vrot.slane %v1137_v4, %v11747_v13  ;;  %v2122_v33 = vrot.slane %v2114_v6, %v11747_v13  ;;  %v2129_v43 = vrot.slane %v2115_v37, %v11747_v13  ;;  %v1435_v48 = vcombine.high %v1113_v44, %v1113_v44  ;;  %10361 = vmatprep.mubr.msk.f32.mxu1 %vm2660_vm3, %v4070_v60 }
 0x120   : > { %v2525_v3 = vcombine.low %v1806_v55, %v1808_v22  ;;  %v2532_v31 = vrot.slane %v2524_v24, %v11747_v13  ;;  %v2131_v57 = vcombine.low %v1432_v26, %v1434_v20  ;;  %v2556_v23 = vrot.slane %v2542_v46, %v11747_v13  ;;  %v12014_v26 = vld [vmem:[%s15293_s4] ss:$0 sm:$0xff]  ;;  %v10090_v1 = vpop.f32.mrf.mxu0  ;;  %v12016_v16 = vpop.f32.mrf.mxu1 }
 0x121   : > { %v1442_v4 = vrot.slane %v1113_v44, %v11747_v13  ;;  %v2130_v38 = vcombine.low %v2122_v33, %v2129_v43  ;;  %v12006_v6 = vrot.slane %v1435_v48, %v11747_v13  ;;  %v1857_v27 = vrot.slane %v1843_v35, %v11747_v13 }
 0x122   : > { %v2539_v55 = vrot.slane %v2525_v3, %v11747_v13  ;;  %v1858_v9 = vcombine.high %v11994_v36, %v11994_v36  ;;  %v2557_v22 = vcombine.low %v2549_v12, %v2556_v23  ;;  %v15385_v24 = vmax.f32 %v11817_v10, 0.0  ;;  %v4104_v45 = vld [vmem:[#allocation2 + $0x79] sm:$0xff]  ;;  %v4105_v46 = vld [vmem:[#allocation2 + $0x81] sm:$0xff]  ;;  %v12026_v12 = vpop.f32.mrf.mxu0  ;;  %v10199_v43 = vpop.f32.mrf.mxu1 }
 0x123   : > { %v1450_v37 = vcombine.high %v1442_v4, %v1442_v4  ;;  %v4071_v35 = vld [vmem:[#allocation2 + $0x80] sm:$0xff]  ;;  %2680 = vst.msk [vmem:[#allocation2 + $0x90] sm:$0xff] %vm2660_vm3, %v2130_v38  ;;  %v2154_v3 = vrot.slane %v12006_v6, %v11747_v13  ;;  %v688_v33 = vadd.f32 %v11734_v25, %v11972_v54  ;;  %10309 = vmatprep.mubr.msk.f32.mxu0 %vm2660_vm3, %v4104_v45 }
 0x124   : > { %v2540_v20 = vcombine.low %v2532_v31, %v2539_v55  ;;  %v1136_v44 = vmul.f32 %v1086_v8, %v15385_v24  ;;  %v2582_v60 = vcombine.low %v1858_v9, %v1857_v27  ;;  %2711 = vst.msk [vmem:[#allocation2 + $0x188] sm:$0xff] %vm2660_vm3, %v2557_v22  ;;  %v1138_v48 = vmul.f32 %v1096_v53, %v851_v21  ;;  %v12041_v38 = vpop.f32.mrf.mxu1 }
 0x125   : > { %v2132_v10 = vcombine.low %v1442_v4, %v1450_v37  ;;  %10362 = vmatmul.mubr.msk.f32.gmra.mxu1 %vm2660_vm3, %v4071_v35  ;;  %v2139_v54 = vrot.slane %v2131_v57, %v11747_v13  ;;  %2682 = vst.msk [vmem:[#allocation2 + $0xa0] sm:$0x3] %vm2663_vm4, %v2154_v3  ;;  %v827_v50 = vmax.f32 %v688_v33, 0.0  ;;  %v1859_v23 = vcombine.high %v1857_v27, %v1857_v27  ;;  %v10093_v4 = vpop.f32.mrf.mxu0 }
 0x126   : > { %2710 = vst.msk [vmem:[#allocation2 + $0x180] sm:$0xff] %vm2660_vm3, %v2540_v20  ;;  %v1826_v8 = vcombine.high %v1136_v44, %v1136_v44  ;;  %v1833_v31 = vrot.slane %v1136_v44, %v11747_v13  ;;  %v12038_v55 = vadd.f32 %v12014_v26, %v11887_v51  ;;  %10310 = vmatmul.mubr.msk.f32.gmra.mxu0 %vm2660_vm3, %v4105_v46  ;;  %15386 = vst [vmem:[#allocation3_spill] sm:$0xff] %v12041_v38  ;;  %v10202_v20 = vpop.f32.mrf.mxu1 }
 0x127   : > { %v2146_v52 = vrot.slane %v2132_v10, %v11747_v13  ;;  %v1114_v9 = vmul.f32 %v11713_v11, %v827_v50  ;;  %v1451_v27 = vcombine.high %v12006_v6, %v12006_v6  ;;  %v1866_v51 = vrot.slane %v1138_v48, %v11747_v13  ;;  %v12052_v22 = vpop.f32.mrf.mxu0 }
 0x128   : > { %v1840_v21 = vrot.slane %v1826_v8, %v11747_v13  ;;  %v1841_v53 = vcombine.high %v1833_v31, %v1833_v31  ;;  %v2564_v57 = vrot.slane %v1833_v31, %v11747_v13  ;;  %v3034_v1 = vcombine.high %v12038_v55, %v12038_v55  ;;  %v12057_v33 = vpop.f32.mrf.mxu1 }
 0x129   : > { %v2147_v37 = vcombine.low %v2139_v54, %v2146_v52  ;;  %v2590_v24 = vrot.slane %v2582_v60, %v11747_v13  ;;  %v1452_v35 = vcombine.high %v1114_v9, %v1114_v9  ;;  %v1459_v11 = vrot.slane %v1114_v9, %v11747_v13  ;;  %v10096_v3 = vpop.f32.mrf.mxu0  ;;  %15387 = vst [vmem:[#allocation4_spill] sm:$0xff] %v12057_v33 }
 0x12a   : > { %v1842_v44 = vcombine.high %v1840_v21, %v1840_v21  ;;  %v2565_v45 = vcombine.low %v1841_v53, %v1840_v21  ;;  %2712 = vst.msk [vmem:[#allocation2 + $0x190] sm:$0x3] %vm2663_vm4, %v2564_v57  ;;  %v1867_v46 = vcombine.high %v1866_v51, %v1866_v51  ;;  %v2583_v6 = vcombine.low %v1859_v23, %v1866_v51  ;;  %v4072_v31 = vld [vmem:[#allocation2 + $0x90] sm:$0xff]  ;;  %v12102_v3 = vld [vmem:[%s15291_s2] ss:$0 sm:$0xff] }
 0x12b   : > { %2681 = vst.msk [vmem:[#allocation2 + $0x98] sm:$0xff] %vm2660_vm3, %v2147_v37  ;;  %v12063_v60 = vrot.slane %v3034_v1, %v11747_v13  ;;  %v693_v8 = vadd.f32 %v11734_v25, %v11986_v18  ;;  %v1466_v48 = vrot.slane %v1452_v35, %v11747_v13  ;;  %v1467_v54 = vcombine.high %v1459_v11, %v1459_v11  ;;  %v12070_v4 = vpop.f32.mrf.mxu0 }
 0x12c   : > { %v2566_v43 = vcombine.low %v1842_v44, %v11994_v36  ;;  %v2573_v10 = vrot.slane %v2565_v45, %v11747_v13  ;;  %v2155_v50 = vcombine.low %v1451_v27, %v1459_v11  ;;  %v2597_v23 = vrot.slane %v2583_v6, %v11747_v13  ;;  %10364 = vmatprep.mubr.msk.f32.mxu1 %vm2660_vm3, %v4072_v31  ;;  %v10205_v36 = vpop.f32.mrf.mxu1  ;;  %v9252_v11 = vld [vmem:[%s15294_s5 + $0x20] sm:$0xff] }
 0x12d   : > { %v2605_v21 = vrot.slane %v1867_v46, %v11747_v13  ;;  %v3050_v53 = vcombine.high %v12063_v60, %v12063_v60  ;;  %v2156_v25 = vcombine.low %v1467_v54, %v1466_v48  ;;  %v10099_v57 = vpop.f32.mrf.mxu0  ;;  %v828_v1 = vmax.f32 %v693_v8, 0.0  ;;  %10396 = vmatprep.subr.mxu0 %v9252_v11 }
 0x12e   : > { %v2580_v52 = vrot.slane %v2566_v43, %v11747_v13  ;;  %v2598_v18 = vcombine.low %v2590_v24, %v2597_v23  ;;  %v12078_v9 = vpop.f32.mrf.mxu1  ;;  %v2163_v20 = vrot.slane %v2155_v50, %v11747_v13  ;;  %v2811_v24 = vadd.f32 %v12014_v26, %v11901_v17  ;;  %10397 = vmatpush3.msra.mxu0 %v9252_v11 }
 0x12f   : > { %15388 = vst [vmem:[#allocation5_spill] sm:$0xff] %v12078_v9  ;;  %2715 = vst.msk [vmem:[#allocation2 + $0x1a8] sm:$0x3] %vm2663_vm4, %v2605_v21  ;;  %v12081_v51 = vrot.slane %v3050_v53, 7  ;;  %v2170_v37 = vrot.slane %v2156_v25, %v11747_v13  ;;  %v12092_v45 = vpop.f32.mrf.mxu0  ;;  %v1115_v46 = vmul.f32 %v11693_v58, %v828_v1  ;;  %v1468_v6 = vcombine.high %v1466_v48, %v1466_v48 }
 0x130   : > { %v2581_v27 = vcombine.low %v2573_v10, %v2580_v52  ;;  %2714 = vst.msk [vmem:[#allocation2 + $0x1a0] sm:$0xff] %vm2660_vm3, %v2598_v18  ;;  %v10208_v35 = vpop.f32.mrf.mxu1  ;;  %v698_v17 = vadd.f32 %v12102_v3, %v12000_v56  ;;  %v3051_v8 = vcombine.high %v2811_v24, %v2811_v24  ;;  %v3058_v31 = vrot.slane %v2811_v24, %v11747_v13 }
 0x131   : > { %v2171_v43 = vcombine.low %v2163_v20, %v2170_v37  ;;  %v3667_v10 = vrot.slane %v12081_v51, 2  ;;  %v10102_v58 = vpop.f32.mrf.mxu0  ;;  %v1469_v56 = vcombine.high %v1115_v46, %v1115_v46  ;;  %v1476_v52 = vrot.slane %v1115_v46, %v11747_v13 }
 0x132   : > { %2713 = vst.msk [vmem:[#allocation2 + $0x198] sm:$0xff] %vm2660_vm3, %v2581_v27  ;;  %v4106_v54 = vld [vmem:[#allocation2 + $0x91] sm:$0xff]  ;;  %v4107_v23 = vld [vmem:[#allocation2 + $0x99] sm:$0xff]  ;;  %v12108_v48 = vpop.f32.mrf.mxu1  ;;  %v829_v21 = vmax.f32 %v698_v17, 0.0  ;;  %v2816_v53 = vadd.f32 %v12014_v26, %v11914_v28  ;;  %v12124_v25 = vrot.slane %v3051_v8, %v11747_v13  ;;  %v3066_v18 = vcombine.high %v3058_v31, %v3058_v31 }
 0x133   : > { %v4073_v50 = vld [vmem:[#allocation2 + $0x98] sm:$0xff]  ;;  %15391 = vst [vmem:[#allocation6_spill] sm:$0xff] %v12108_v48  ;;  %10312 = vmatprep.mubr.msk.f32.mxu0 %vm2660_vm3, %v4106_v54  ;;  %2683 = vst.msk [vmem:[#allocation2 + $0xa8] sm:$0xff] %vm2660_vm3, %v2171_v43  ;;  %v3668_v57 = vrot.slane %v3058_v31, 7  ;;  %v12127_v27 = vpop.f32.mrf.mxu0  ;;  %v1483_v20 = vrot.slane %v1469_v56, %v11747_v13  ;;  %v1484_v37 = vcombine.high %v1476_v52, %v1476_v52 }
 0x134   : > { %10365 = vmatmul.mubr.msk.f32.gmra.mxu1 %vm2660_vm3, %v4073_v50  ;;  %10313 = vmatmul.mubr.msk.f32.gmra.mxu0 %vm2660_vm3, %v4107_v23  ;;  %v10211_v1 = vpop.f32.mrf.mxu1  ;;  %v2172_v28 = vcombine.low %v1468_v6, %v1476_v52  ;;  %v1116_v44 = vmul.f32 %v11723_v62, %v829_v21  ;;  %v3067_v24 = vcombine.high %v12124_v25, %v12124_v25  ;;  %v12135_v46 = vrot.slane %v3066_v18, 7 }
 0x135   : > { %v3669_v35 = vsel %vm12113_vm11, %v3667_v10, %v3668_v57  ;;  %v3670_v11 = vrot.slane %v3668_v57, 2  ;;  %v10105_v17 = vpop.f32.mrf.mxu0  ;;  %v1485_v8 = vcombine.high %v1483_v20, %v1483_v20  ;;  %v2173_v31 = vcombine.low %v1484_v37, %v1483_v20 }
 0x136   : > { %v12137_v43 = vpop.f32.mrf.mxu1  ;;  %v3068_v54 = vcombine.high %v2816_v53, %v2816_v53  ;;  %v12142_v62 = vrot.slane %v3067_v24, 7  ;;  %v1486_v50 = vcombine.high %v1116_v44, %v1116_v44  ;;  %v2180_v10 = vrot.slane %v2172_v28, %v11747_v13 }
 0x137   : > { %15394 = vst [vmem:[#allocation7_spill] sm:$0xff] %v12137_v43  ;;  %v3672_v6 = vsel %vm12113_vm11, %v3670_v11, %v12135_v46  ;;  %v12144_v23 = vpop.f32.mrf.mxu0  ;;  %v2187_v56 = vrot.slane %v2173_v31, %v11747_v13  ;;  %v2195_v52 = vrot.slane %v1485_v8, %v11747_v13  ;;  %v1493_v57 = vrot.slane %v1116_v44, %v11747_v13  ;;  %v9287_v44 = vld [vmem:[%s15294_s5 + $0x38] sm:$0xff] }
 0x138   : > { %v10214_v58 = vpop.f32.mrf.mxu1  ;;  %v12149_v21 = vcombine.low %v3669_v35, %v3672_v6  ;;  %v3679_v18 = vrot.slane %v12142_v62, 2  ;;  %v1500_v1 = vrot.slane %v1486_v50, %v11747_v13  ;;  %v3075_v28 = vrot.slane %v2816_v53, %v11747_v13  ;;  %10446 = vmatprep.subr.mxu1 %v9287_v44 }
 0x139   : > { %v10108_v20 = vpop.f32.mrf.mxu0  ;;  %v2188_v24 = vcombine.low %v2180_v10, %v2187_v56  ;;  %2685 = vst.msk [vmem:[#allocation2 + $0xb8] sm:$0x3] %vm2663_vm4, %v2195_v52  ;;  %v3082_v11 = vrot.slane %v3068_v54, %v11747_v13  ;;  %v703_v35 = vadd.f32 %v12102_v3, %v12026_v12  ;;  %v1501_v8 = vcombine.high %v1493_v57, %v1493_v57  ;;  %v9286_v56 = vld [vmem:[%s15294_s5 + $0x30] sm:$0xff] }
 0x13a   : > { %15395 = vst [vmem:[#allocation8_spill] sm:$0xff] %v12149_v21  ;;  %v12154_v37 = vpop.f32.mrf.mxu1  ;;  %v4074_v17 = vld [vmem:[#allocation2 + $0xa8] sm:$0xff]  ;;  %v1502_v31 = vcombine.high %v1500_v1, %v1500_v1  ;;  %v2821_v6 = vadd.f32 %v12014_v26, %v11925_v34  ;;  %v3083_v54 = vcombine.high %v3075_v28, %v3075_v28  ;;  %v3680_v12 = vrot.slane %v3075_v28, 7  ;;  %10447 = vmatpush3.msra.mxu1 %v9287_v44 }
 0x13b   : > { %15396 = vst [vmem:[#allocation9_spill] sm:$0xff] %v12154_v37  ;;  %10367 = vmatprep.mubr.msk.f32.mxu1 %vm2660_vm3, %v4074_v17  ;;  %v12167_v50 = vpop.f32.mrf.mxu0  ;;  %2684 = vst.msk [vmem:[#allocation2 + $0xb0] sm:$0xff] %vm2660_vm3, %v2188_v24  ;;  %v3084_v58 = vcombine.high %v3082_v11, %v3082_v11  ;;  %v9171_v10 = vrot.slane %v3082_v11, 9  ;;  %v2196_v52 = vcombine.low %v1493_v57, %v1501_v8  ;;  %v830_v37 = vmax.f32 %v703_v35, 0.0 }
 0x13c   : > { %v10217_v53 = vpop.f32.mrf.mxu1  ;;  %v2197_v20 = vcombine.low %v1500_v1, %v1502_v31  ;;  %v3085_v34 = vcombine.high %v2821_v6, %v2821_v6  ;;  %v3681_v24 = vsel %vm12113_vm11, %v3679_v18, %v3680_v12  ;;  %v3683_v48 = vrot.slane %v3083_v54, 7  ;;  %10448 = vmatprep.subr.mxu1 %v9286_v56 }
 0x13d   : > { %v10111_v43 = vpop.f32.mrf.mxu0  ;;  %v3682_v53 = vrot.slane %v3680_v12, 2  ;;  %v3687_v28 = vrot.slane %v3084_v58, 7  ;;  %v2204_v11 = vrot.slane %v2196_v52, %v11747_v13  ;;  %v1117_v57 = vmul.f32 %v11699_v59, %v830_v37  ;;  %10449 = vmatpush3.msra.mxu1 %v9286_v56 }
 0x13e   : > { %v12173_v17 = vpop.f32.mrf.mxu1  ;;  %v2211_v9 = vrot.slane %v2197_v20, %v11747_v13  ;;  %v708_v1 = vadd.f32 %v12102_v3, %v12052_v22  ;;  %v12187_v8 = vrot.slane %v2821_v6, %v11747_v13  ;;  %v12190_v31 = vrot.slane %v3085_v34, %v11747_v13 }
 0x13f   : > { %15397 = vst [vmem:[#allocation10_spill] sm:$0xff] %v12173_v17  ;;  %v12182_v43 = vpop.f32.mrf.mxu0  ;;  %v3684_v18 = vsel %vm12113_vm11, %v3682_v53, %v3683_v48  ;;  %v3689_v44 = vrot.slane %v3687_v28, 2  ;;  %v1503_v59 = vcombine.high %v1117_v57, %v1117_v57  ;;  %v1510_v22 = vrot.slane %v1117_v57, %v11747_v13 }
 0x140   : > { %v10220_v35 = vpop.f32.mrf.mxu1  ;;  %v2212_v54 = vcombine.low %v2204_v11, %v2211_v9  ;;  %v12192_v58 = vcombine.low %v3681_v24, %v3684_v18  ;;  %v3101_v56 = vcombine.high %v12190_v31, %v12190_v31  ;;  %v12201_v48 = vsel %vm12113_vm11, %v9171_v10, %v3687_v28 }
 0x141   : > { %v10114_v37 = vpop.f32.mrf.mxu0  ;;  %15400 = vst [vmem:[#allocation13_spill] sm:$0xff] %v12201_v48  ;;  %v15300_v6 = vrot.slane %v12187_v8, 7  ;;  %v15301_v52 = vrot.slane %v12190_v31, 7  ;;  %v1517_v9 = vrot.slane %v1503_v59, %v11747_v13  ;;  %v1518_v20 = vcombine.high %v1510_v22, %v1510_v22 }
 0x142   : > { %15398 = vst [vmem:[#allocation11_spill] sm:$0xff] %v12192_v58  ;;  %v12195_v12 = vpop.f32.mrf.mxu1  ;;  %2686 = vst.msk [vmem:[#allocation2 + $0xc0] sm:$0xff] %vm2660_vm3, %v2212_v54  ;;  %v831_v34 = vmax.f32 %v708_v1, 0.0  ;;  %v2826_v24 = vadd.f32 %v12014_v26, %v11938_v42  ;;  %v4108_v53 = vld [vmem:[#allocation2 + $0xa9] sm:$0xff]  ;;  %v4109_v57 = vld [vmem:[#allocation2 + $0xb1] sm:$0xff]  ;;  %v3699_v54 = vrot.slane %v3101_v56, 7 }
 0x143   : > { %15399 = vst [vmem:[#allocation12_spill] sm:$0xff] %v12195_v12  ;;  %v4075_v11 = vld [vmem:[#allocation2 + $0xb0] sm:$0xff]  ;;  %v12209_v35 = vpop.f32.mrf.mxu0  ;;  %v12215_v28 = vsel %vm12113_vm11, %v3689_v44, %v15300_v6  ;;  %v3698_v18 = vrot.slane %v15301_v52, 2  ;;  %10315 = vmatprep.mubr.msk.f32.mxu0 %vm2660_vm3, %v4108_v53  ;;  %v1519_v42 = vcombine.high %v1517_v9, %v1517_v9  ;;  %v2213_v1 = vcombine.low %v1510_v22, %v1518_v20 }
 0x144   : > { %v10223_v10 = vpop.f32.mrf.mxu1  ;;  %15401 = vst [vmem:[#allocation14_spill] sm:$0xff] %v12215_v28  ;;  %10368 = vmatmul.mubr.msk.f32.gmra.mxu1 %vm2660_vm3, %v4075_v11  ;;  %10316 = vmatmul.mubr.msk.f32.gmra.mxu0 %vm2660_vm3, %v4109_v57  ;;  %v1118_v44 = vmul.f32 %v11740_v29, %v831_v34  ;;  %v3102_v6 = vcombine.high %v2826_v24, %v2826_v24  ;;  %v3701_v52 = vrot.slane %v3699_v54, 2 }
 0x145   : > { %v10117_v37 = vpop.f32.mrf.mxu0  ;;  %v2214_v12 = vcombine.low %v1517_v9, %v1519_v42  ;;  %v12228_v53 = vrot.slane %v2826_v24, %v11747_v13  ;;  %v2221_v59 = vrot.slane %v2213_v1, %v11747_v13 }
 0x146   : > { %v12224_v10 = vpop.f32.mrf.mxu1  ;;  %v1520_v56 = vcombine.high %v1118_v44, %v1118_v44  ;;  %v1527_v20 = vrot.slane %v1118_v44, %v11747_v13  ;;  %v3700_v37 = vsel %vm12113_vm11, %v3698_v18, %v3699_v54 }
 0x147   : > { %15402 = vst [vmem:[#allocation15_spill] sm:$0xff] %v12224_v10  ;;  %v12230_v11 = vpop.f32.mrf.mxu0  ;;  %v2228_v57 = vrot.slane %v2214_v12, %v11747_v13  ;;  %v15302_v29 = vrot.slane %v12228_v53, 7  ;;  %v12243_v10 = vrot.slane %v3102_v6, %v11747_v13 }
 0x148   : > { %v10226_v22 = vpop.f32.mrf.mxu1  ;;  %v1534_v24 = vrot.slane %v1520_v56, %v11747_v13  ;;  %v1535_v42 = vcombine.high %v1527_v20, %v1527_v20 }
 0x149   : > { %v10120_v9 = vpop.f32.mrf.mxu0  ;;  %v2236_v22 = vrot.slane %v1527_v20, %v11747_v13  ;;  %v4076_v44 = vld [vmem:[#allocation2 + $0xc0] sm:$0xff]  ;;  %v2229_v1 = vcombine.low %v2221_v59, %v2228_v57  ;;  %v3703_v12 = vsel %vm12113_vm11, %v3701_v52, %v15302_v29  ;;  %v3118_v56 = vcombine.high %v12243_v10, %v12243_v10 }
 0x14a   : > { %v12238_v34 = vpop.f32.mrf.mxu1  ;;  %10370 = vmatprep.mubr.msk.f32.mxu1 %vm2660_vm3, %v4076_v44  ;;  %v12255_v20 = vcombine.low %v3700_v37, %v3703_v12  ;;  %v2237_v6 = vcombine.low %v1535_v42, %v1534_v24  ;;  %v713_v59 = vadd.f32 %v12102_v3, %v12070_v4  ;;  %v2831_v9 = vadd.f32 %v12014_v26, %v11958_v39  ;;  %v12269_v37 = vld [vmem:[%s15294_s5 + $0x48] sm:$0xff] }
 0x14b   : > { %15403 = vst [vmem:[#allocation16_spill] sm:$0xff] %v12238_v34  ;;  %v12250_v18 = vpop.f32.mrf.mxu0  ;;  %2688 = vst.msk [vmem:[#allocation2 + $0xd0] sm:$0x3] %vm2663_vm4, %v2236_v22  ;;  %v718_v22 = vadd.f32 %v12102_v3, %v12092_v45  ;;  %v12273_v42 = vadd.f32 %v12014_v26, %v11978_v47  ;;  %10498 = vmatprep.subr.mxu0 %v12269_v37  ;;  %v9172_v12 = vrot.slane %v3118_v56, 9 }
 0x14c   : > { %v10229_v54 = vpop.f32.mrf.mxu1  ;;  %15404 = vst [vmem:[#allocation17_spill] sm:$0xff] %v12255_v20  ;;  %2687 = vst.msk [vmem:[#allocation2 + $0xc8] sm:$0xff] %vm2660_vm3, %v2229_v1  ;;  %v832_v44 = vmax.f32 %v713_v59, 0.0  ;;  %v3119_v39 = vcombine.high %v2831_v9, %v2831_v9  ;;  %v723_v59 = vadd.f32 %v12102_v3, %v12127_v27 }
 0x14d   : > { %v10123_v57 = vpop.f32.mrf.mxu0  ;;  %v3126_v54 = vrot.slane %v2831_v9, %v11747_v13  ;;  %v833_v45 = vmax.f32 %v718_v22, 0.0 }
 0x14e   : > { %v12260_v52 = vpop.f32.mrf.mxu1  ;;  %v2245_v57 = vrot.slane %v2237_v6, %v11747_v13  ;;  %v1119_v29 = vmul.f32 %v11707_v7, %v832_v44  ;;  %v3143_v7 = vrot.slane %v12273_v42, %v11747_v13  ;;  %v834_v48 = vmax.f32 %v723_v59, 0.0 }
 0x14f   : > { %15405 = vst [vmem:[#allocation18_spill] sm:$0xff] %v12260_v52  ;;  %v12275_v4 = vpop.f32.mrf.mxu0  ;;  %v1536_v52 = vcombine.high %v1534_v24, %v1534_v24  ;;  %v3134_v17 = vcombine.high %v3126_v54, %v3126_v54  ;;  %v3712_v56 = vrot.slane %v3126_v54, 7  ;;  %v1120_v33 = vmul.f32 %v11754_v19, %v833_v45 }
 0x150   : > { %v10232_v1 = vpop.f32.mrf.mxu1  ;;  %v1537_v9 = vcombine.high %v1119_v29, %v1119_v29  ;;  %v1544_v22 = vrot.slane %v1119_v29, %v11747_v13  ;;  %v12294_v24 = vadd.f32 %v12014_v26, %v11990_v0 }
 0x151   : > { %v10126_v47 = vpop.f32.mrf.mxu0  ;;  %v12286_v1 = vrot.slane %v3119_v39, %v11747_v13  ;;  %v3713_v39 = vsel %vm12113_vm11, %v9172_v12, %v3712_v56  ;;  %v3714_v19 = vrot.slane %v3712_v56, 2  ;;  %v12302_v54 = vrot.slane %v3134_v17, 7 }
 0x152   : > { %v12283_v34 = vpop.f32.mrf.mxu1  ;;  %v1552_v38 = vcombine.high %v1544_v22, %v1544_v22  ;;  %v2238_v0 = vcombine.low %v1536_v52, %v1544_v22  ;;  %v1554_v56 = vcombine.high %v1120_v33, %v1120_v33 }
 0x153   : > { %15406 = vst [vmem:[#allocation19_spill] sm:$0xff] %v12283_v34  ;;  %v12296_v27 = vpop.f32.mrf.mxu0  ;;  %v3135_v44 = vcombine.high %v12286_v1, %v12286_v1  ;;  %v4110_v29 = vld [vmem:[#allocation2 + $0xc1] sm:$0xff]  ;;  %v4111_v47 = vld [vmem:[#allocation2 + $0xc9] sm:$0xff]  ;;  %v1551_v34 = vrot.slane %v1537_v9, %v11747_v13  ;;  %v3716_v12 = vsel %vm12113_vm11, %v3714_v19, %v12302_v54  ;;  %v1561_v19 = vrot.slane %v1120_v33, %v11747_v13 }
 0x154   : > { %v10235_v6 = vpop.f32.mrf.mxu1  ;;  %v4077_v45 = vld [vmem:[#allocation2 + $0xc8] sm:$0xff]  ;;  %10318 = vmatprep.mubr.msk.f32.mxu0 %vm2660_vm3, %v4110_v29  ;;  %v2252_v9 = vrot.slane %v2238_v0, %v11747_v13  ;;  %v12316_v22 = vcombine.low %v3713_v39, %v3716_v12  ;;  %v3151_v29 = vcombine.high %v3143_v7, %v3143_v7  ;;  %v1568_v21 = vrot.slane %v1554_v56, %v11747_v13 }
 0x155   : > { %10371 = vmatmul.mubr.msk.f32.gmra.mxu1 %vm2660_vm3, %v4077_v45  ;;  %v10129_v6 = vpop.f32.mrf.mxu0  ;;  %v12312_v17 = vrot.slane %v3135_v44, 7  ;;  %10319 = vmatmul.mubr.msk.f32.gmra.mxu0 %vm2660_vm3, %v4111_v47  ;;  %v2254_v52 = vcombine.low %v1552_v38, %v1551_v34  ;;  %v1553_v20 = vcombine.high %v1551_v34, %v1551_v34  ;;  %v1569_v47 = vcombine.high %v1561_v19, %v1561_v19 }
 0x156   : > { %v12307_v28 = vpop.f32.mrf.mxu1  ;;  %v2253_v44 = vcombine.low %v2245_v57, %v2252_v9  ;;  %v3724_v38 = vrot.slane %v3143_v7, 7  ;;  %v3153_v39 = vcombine.high %v12294_v24, %v12294_v24  ;;  %v12329_v34 = vrot.slane %v3151_v29, 7 }
 0x157   : > { %15407 = vst [vmem:[#allocation20_spill] sm:$0xff] %v12307_v28  ;;  %v12318_v45 = vpop.f32.mrf.mxu0  ;;  %v3723_v28 = vrot.slane %v12312_v17, 2  ;;  %v2255_v0 = vcombine.low %v1553_v20, %v1561_v19  ;;  %v2262_v12 = vrot.slane %v2254_v52, %v11747_v13  ;;  %v1121_v33 = vmul.f32 %v11715_v61, %v834_v48 }
 0x158   : > { %v10238_v6 = vpop.f32.mrf.mxu1  ;;  %2689 = vst.msk [vmem:[#allocation2 + $0xd8] sm:$0xff] %vm2660_vm3, %v2253_v44  ;;  %v2277_v9 = vrot.slane %v1569_v47, %v11747_v13  ;;  %v3726_v7 = vrot.slane %v3724_v38, 2 }
 0x159   : > { %v10132_v59 = vpop.f32.mrf.mxu0  ;;  %v1570_v6 = vcombine.high %v1568_v21, %v1568_v21  ;;  %v2269_v56 = vrot.slane %v2255_v0, %v11747_v13  ;;  %v3725_v20 = vsel %vm12113_vm11, %v3723_v28, %v3724_v38  ;;  %v1571_v19 = vcombine.high %v1121_v33, %v1121_v33 }
 0x15a   : > { %v12323_v58 = vpop.f32.mrf.mxu1  ;;  %2691 = vst.msk [vmem:[#allocation2 + $0xe8] sm:$0x3] %vm2663_vm4, %v2277_v9  ;;  %v3728_v29 = vsel %vm12113_vm11, %v3726_v7, %v12329_v34  ;;  %v1578_v61 = vrot.slane %v1121_v33, %v11747_v13  ;;  %v12348_v38 = vrot.slane %v3153_v39, %v11747_v13 }
 0x15b   : > { %15408 = vst [vmem:[#allocation21_spill] sm:$0xff] %v12323_v58  ;;  %v2270_v52 = vcombine.low %v2262_v12, %v2269_v56  ;;  %v12343_v48 = vcombine.low %v3725_v20, %v3728_v29  ;;  %v2278_v47 = vcombine.low %v1568_v21, %v1570_v6  ;;  %v1585_v28 = vrot.slane %v1571_v19, %v11747_v13 }
 0x15c   : > { %v10241_v57 = vpop.f32.mrf.mxu1  ;;  %v1586_v0 = vcombine.high %v1578_v61, %v1578_v61  ;;  %v728_v12 = vadd.f32 %v12102_v3, %v12144_v23  ;;  %v3169_v21 = vcombine.high %v12348_v38, %v12348_v38  ;;  %v15305_v6 = vrot.slane %v12348_v38, 7 }
 0x15d   : > { %2690 = vst.msk [vmem:[#allocation2 + $0xe0] sm:$0xff] %vm2660_vm3, %v2270_v52  ;;  %v12354_v57 = vadd.f32 %v12014_v26, %v12016_v16  ;;  %v2286_v26 = vrot.slane %v2278_v47, %v11747_v13  ;;  %v1587_v16 = vcombine.high %v1585_v28, %v1585_v28  ;;  %v733_v47 = vadd.f32 %v12102_v3, %v12167_v50 }
 0x15e   : > { %v12336_v59 = vpop.f32.mrf.mxu1  ;;  %v2279_v56 = vcombine.low %v1578_v61, %v1586_v0  ;;  %v835_v20 = vmax.f32 %v728_v12, 0.0  ;;  %v3742_v19 = vrot.slane %v15305_v6, 2  ;;  %v3743_v52 = vrot.slane %v3169_v21, 7 }
 0x15f   : > { %15409 = vst [vmem:[#allocation22_spill] sm:$0xff] %v12336_v59  ;;  %15410 = vst [vmem:[#allocation23_spill] sm:$0xff] %v12354_v57  ;;  %v4078_v9 = vld [vmem:[#allocation2 + $0xd8] sm:$0xff]  ;;  %v12363_v39 = vrot.slane %v12354_v57, %v11747_v13  ;;  %v2295_v6 = vcombine.low %v1585_v28, %v1587_v16 }
 0x160   : > { %v10244_v44 = vpop.f32.mrf.mxu1  ;;  %10373 = vmatprep.mubr.msk.f32.mxu1 %vm2660_vm3, %v4078_v9  ;;  %v2293_v7 = vrot.slane %v2279_v56, %v11747_v13  ;;  %v1122_v29 = vmul.f32 %v11766_v63, %v835_v20  ;;  %v3745_v12 = vrot.slane %v3743_v52, 2  ;;  %v3744_v63 = vsel %vm12113_vm11, %v3742_v19, %v3743_v52 }
 0x161   : > { %15412 = vst [vmem:[#allocation25_spill] sm:$0xff] %v12363_v39  ;;  %v15306_v0 = vrot.slane %v12363_v39, 7  ;;  %v2303_v52 = vrot.slane %v2295_v6, %v11747_v13 }
 0x162   : > { %v12356_v33 = vpop.f32.mrf.mxu1  ;;  %v2294_v44 = vcombine.low %v2286_v26, %v2293_v7  ;;  %v1595_v9 = vrot.slane %v1122_v29, %v11747_v13  ;;  %v836_v7 = vmax.f32 %v733_v47, 0.0 }
 0x163   : > { %15411 = vst [vmem:[#allocation24_spill] sm:$0xff] %v12356_v33  ;;  %v1588_v33 = vcombine.high %v1122_v29, %v1122_v29  ;;  %v3747_v50 = vsel %vm12113_vm11, %v3745_v12, %v15306_v0 }
 0x164   : > { %v10247_v23 = vpop.f32.mrf.mxu1  ;;  %v4079_v56 = vld [vmem:[#allocation2 + $0xe0] sm:$0xff]  ;;  %2692 = vst.msk [vmem:[#allocation2 + $0xf0] sm:$0xff] %vm2660_vm3, %v2294_v44  ;;  %v1603_v20 = vcombine.high %v1595_v9, %v1595_v9  ;;  %v12390_v28 = vcombine.low %v3744_v63, %v3747_v50  ;;  %v1123_v29 = vmul.f32 %v11721_v14, %v836_v7 }
 0x165   : > { %v4112_v23 = vld [vmem:[#allocation2 + $0xd9] sm:$0xff]  ;;  %v4113_v59 = vld [vmem:[#allocation2 + $0xe1] sm:$0xff]  ;;  %10374 = vmatmul.mubr.msk.f32.gmra.mxu1 %vm2660_vm3, %v4079_v56  ;;  %v1602_v21 = vrot.slane %v1588_v33, %v11747_v13 }
 0x166   : > { %v12371_v61 = vpop.f32.mrf.mxu1  ;;  %10321 = vmatprep.mubr.msk.f32.mxu0 %vm2660_vm3, %v4112_v23  ;;  %v2296_v26 = vcombine.low %v1595_v9, %v1603_v20  ;;  %v1605_v9 = vcombine.high %v1123_v29, %v1123_v29  ;;  %v1612_v56 = vrot.slane %v1123_v29, %v11747_v13 }
 0x167   : > { %15413 = vst [vmem:[#allocation26_spill] sm:$0xff] %v12371_v61  ;;  %10322 = vmatmul.mubr.msk.f32.gmra.mxu0 %vm2660_vm3, %v4113_v59  ;;  %v2318_v16 = vrot.slane %v1602_v21, %v11747_v13  ;;  %v1604_v44 = vcombine.high %v1602_v21, %v1602_v21  ;;  %v738_v59 = vadd.f32 %v12102_v3, %v12182_v43  ;;  %v12679_v61 = vld [vmem:[#allocation2 + $0xc2] sm:$0xff] }
 0x168   : > { %v10250_v58 = vpop.f32.mrf.mxu1  ;;  %v2310_v33 = vrot.slane %v2296_v26, %v11747_v13  ;;  %v1619_v6 = vrot.slane %v1605_v9, %v11747_v13  ;;  %v1620_v14 = vcombine.high %v1612_v56, %v1612_v56  ;;  %v743_v26 = vadd.f32 %v12102_v3, %v12209_v35  ;;  %15437 = vst [vmem:[#allocation50_spill] sm:$0xff] %v12679_v61 }
 0x169   : > { %2694 = vst.msk [vmem:[#allocation2 + $0x100] sm:$0x3] %vm2663_vm4, %v2318_v16  ;;  %v837_v47 = vmax.f32 %v738_v59, 0.0  ;;  %v2319_v21 = vcombine.low %v1604_v44, %v1612_v56 }
 0x16a   : > { %v12388_v58 = vpop.f32.mrf.mxu1  ;;  %v2311_v23 = vcombine.low %v2303_v52, %v2310_v33  ;;  %v2320_v16 = vcombine.low %v1620_v14, %v1619_v6  ;;  %v1621_v7 = vcombine.high %v1619_v6, %v1619_v6 }
 0x16b   : > { %15414 = vst [vmem:[#allocation27_spill] sm:$0xff] %v12388_v58  ;;  %v4080_v63 = vld [vmem:[#allocation2 + $0xf0] sm:$0xff]  ;;  %v1124_v50 = vmul.f32 %v11781_v32, %v837_v47  ;;  %v2327_v33 = vrot.slane %v2319_v21, %v11747_v13  ;;  %v838_v32 = vmax.f32 %v743_v26, 0.0  ;;  %v12673_v58 = vld [vmem:[#allocation2 + $0xd8] sm:$0xff] }
 0x16c   : > { %v10253_v19 = vpop.f32.mrf.mxu1  ;;  %10376 = vmatprep.mubr.msk.f32.mxu1 %vm2660_vm3, %v4080_v63  ;;  %2693 = vst.msk [vmem:[#allocation2 + $0xf8] sm:$0xff] %vm2660_vm3, %v2311_v23  ;;  %v2334_v29 = vrot.slane %v2320_v16, %v11747_v13  ;;  %15436 = vst [vmem:[#allocation49_spill] sm:$0xff] %v12673_v58 }
 0x16d   : > { %v1622_v52 = vcombine.high %v1124_v50, %v1124_v50  ;;  %v1629_v59 = vrot.slane %v1124_v50, %v11747_v13  ;;  %v1125_v16 = vmul.f32 %v11729_v2, %v838_v32  ;;  %v12429_v2 = vld [vmem:[%s15294_s5 + $0x58] sm:$0xff] }
 0x16e   : > { %v12399_v12 = vpop.f32.mrf.mxu1  ;;  %v2335_v9 = vcombine.low %v2327_v33, %v2334_v29  ;;  %10550 = vmatprep.subr.mxu1 %v12429_v2 }
 0x16f   : > { %15415 = vst [vmem:[#allocation28_spill] sm:$0xff] %v12399_v12  ;;  %v1636_v44 = vrot.slane %v1622_v52, %v11747_v13  ;;  %v1637_v56 = vcombine.high %v1629_v59, %v1629_v59  ;;  %v2336_v47 = vcombine.low %v1621_v7, %v1629_v59  ;;  %v1639_v52 = vcombine.high %v1125_v16, %v1125_v16  ;;  %v12671_v12 = vld [vmem:[#allocation2 + $0xb2] sm:$0xff] }
 0x170   : > { %v10256_v20 = vpop.f32.mrf.mxu1  ;;  %2695 = vst.msk [vmem:[#allocation2 + $0x108] sm:$0xff] %vm2660_vm3, %v2335_v9  ;;  %v1646_v29 = vrot.slane %v1125_v16, %v11747_v13 }
 0x171   : > { %v1638_v35 = vcombine.high %v1636_v44, %v1636_v44  ;;  %v2337_v21 = vcombine.low %v1637_v56, %v1636_v44  ;;  %v2344_v7 = vrot.slane %v2336_v47, %v11747_v13  ;;  %v1653_v32 = vrot.slane %v1639_v52, %v11747_v13 }
 0x172   : > { %v12406_v43 = vpop.f32.mrf.mxu1  ;;  %v1654_v9 = vcombine.high %v1646_v29, %v1646_v29  ;;  %v748_v56 = vadd.f32 %v12102_v3, %v12230_v11  ;;  %v753_v47 = vadd.f32 %v12102_v3, %v12250_v18 }
 0x173   : > { %15416 = vst [vmem:[#allocation29_spill] sm:$0xff] %v12406_v43  ;;  %v4114_v20 = vld [vmem:[#allocation2 + $0xf1] sm:$0xff]  ;;  %v4115_v14 = vld [vmem:[#allocation2 + $0xf9] sm:$0xff]  ;;  %v2359_v26 = vrot.slane %v1638_v35, %v11747_v13  ;;  %v1655_v35 = vcombine.high %v1653_v32, %v1653_v32  ;;  %v12667_v43 = vld [vmem:[#allocation2 + $0xc8] sm:$0xff] }
 0x174   : > { %v10259_v19 = vpop.f32.mrf.mxu1  ;;  %v4081_v6 = vld [vmem:[#allocation2 + $0xf8] sm:$0xff]  ;;  %10324 = vmatprep.mubr.msk.f32.mxu0 %vm2660_vm3, %v4114_v20  ;;  %v2360_v20 = vcombine.low %v1646_v29, %v1654_v9  ;;  %15435 = vst [vmem:[#allocation48_spill] sm:$0xff] %v12667_v43 }
 0x175   : > { %10377 = vmatmul.mubr.msk.f32.gmra.mxu1 %vm2660_vm3, %v4081_v6  ;;  %10325 = vmatmul.mubr.msk.f32.gmra.mxu0 %vm2660_vm3, %v4115_v14  ;;  %v2351_v19 = vrot.slane %v2337_v21, %v11747_v13  ;;  %2697 = vst.msk [vmem:[#allocation2 + $0x118] sm:$0x3] %vm2663_vm4, %v2359_v26  ;;  %v839_v14 = vmax.f32 %v748_v56, 0.0  ;;  %v2361_v16 = vcombine.low %v1653_v32, %v1655_v35 }
 0x176   : > { %v12413_v23 = vpop.f32.mrf.mxu1  ;;  %v2368_v52 = vrot.slane %v2360_v20, %v11747_v13 }
 0x177   : > { %15417 = vst [vmem:[#allocation30_spill] sm:$0xff] %v12413_v23  ;;  %v2352_v59 = vcombine.low %v2344_v7, %v2351_v19  ;;  %v4082_v6 = vld [vmem:[#allocation2 + $0x108] sm:$0xff]  ;;  %v1126_v26 = vmul.f32 %v11805_v30, %v839_v14  ;;  %v840_v7 = vmax.f32 %v753_v47, 0.0  ;;  %v2375_v11 = vrot.slane %v2361_v16, %v11747_v13 }
 0x178   : > { %v10262_v63 = vpop.f32.mrf.mxu1  ;;  %10379 = vmatprep.mubr.msk.f32.mxu1 %vm2660_vm3, %v4082_v6 }
 0x179   : > { %2696 = vst.msk [vmem:[#allocation2 + $0x110] sm:$0xff] %vm2660_vm3, %v2352_v59  ;;  %v1663_v18 = vrot.slane %v1126_v26, %v11747_v13  ;;  %v2376_v29 = vcombine.low %v2368_v52, %v2375_v11  ;;  %v1127_v30 = vmul.f32 %v11742_v5, %v840_v7 }
 0x17a   : > { %v12420_v50 = vpop.f32.mrf.mxu1 }
 0x17b   : > { %15418 = vst [vmem:[#allocation31_spill] sm:$0xff] %v12420_v50  ;;  %v1671_v35 = vcombine.high %v1663_v18, %v1663_v18  ;;  %2698 = vst.msk [vmem:[#allocation2 + $0x120] sm:$0xff] %vm2660_vm3, %v2376_v29  ;;  %v1673_v16 = vcombine.high %v1127_v30, %v1127_v30 }
 0x17c   : > { %v10265_v33 = vpop.f32.mrf.mxu1 }
 0x17d   : > { %v1656_v33 = vcombine.high %v1126_v26, %v1126_v26  ;;  %v2377_v6 = vcombine.low %v1663_v18, %v1671_v35  ;;  %v1680_v26 = vrot.slane %v1127_v30, %v11747_v13  ;;  %v1687_v18 = vrot.slane %v1673_v16, %v11747_v13 }
 0x17e   : > { %v12434_v44 = vpop.f32.mrf.mxu1 }
 0x17f   : > { %15419 = vst [vmem:[#allocation32_spill] sm:$0xff] %v12434_v44  ;;  %v1670_v32 = vrot.slane %v1656_v33, %v11747_v13  ;;  %v2400_v5 = vrot.slane %v1680_v26, %v11747_v13  ;;  %v2385_v7 = vrot.slane %v2377_v6, %v11747_v13  ;;  %v758_v33 = vadd.f32 %v12102_v3, %v12275_v4  ;;  %v12659_v44 = vld [vmem:[#allocation2 + $0xaa] sm:$0xff] }
 0x180   : > { %v10268_v63 = vpop.f32.mrf.mxu1  ;;  %v4116_v9 = vld [vmem:[#allocation2 + $0x109] sm:$0xff]  ;;  %v1688_v35 = vcombine.high %v1680_v26, %v1680_v26  ;;  %v763_v4 = vadd.f32 %v12102_v3, %v12296_v27  ;;  %v1689_v6 = vcombine.high %v1687_v18, %v1687_v18 }
 0x181   : > { %v12451_v56 = vld [vmem:[#allocation2 + $0x110] sm:$0xff]  ;;  %10327 = vmatprep.mubr.msk.f32.mxu0 %vm2660_vm3, %v4116_v9  ;;  %v1672_v20 = vcombine.high %v1670_v32, %v1670_v32  ;;  %2700 = vst.msk [vmem:[#allocation2 + $0x130] sm:$0x3] %vm2663_vm4, %v2400_v5  ;;  %v841_v30 = vmax.f32 %v758_v33, 0.0 }
 0x182   : > { %v12443_v21 = vpop.f32.mrf.mxu1  ;;  %v4117_v63 = vld [vmem:[#allocation2 + $0x111] sm:$0xff]  ;;  %10380 = vmatmul.mubr.msk.f32.gmra.mxu1 %vm2660_vm3, %v12451_v56  ;;  %v842_v26 = vmax.f32 %v763_v4, 0.0 }
 0x183   : > { %15420 = vst [vmem:[#allocation33_spill] sm:$0xff] %v12443_v21  ;;  %10328 = vmatmul.mubr.msk.f32.gmra.mxu0 %vm2660_vm3, %v4117_v63  ;;  %v12472_v63 = vld [vmem:[#allocation2 + $0x120] sm:$0xff] }
 0x184   : > { %v10271_v19 = vpop.f32.mrf.mxu1  ;;  %10382 = vmatprep.mubr.msk.f32.mxu1 %vm2660_vm3, %v12472_v63  ;;  %v12653_v21 = vld [vmem:[#allocation2 + $0xc0] sm:$0xff] }
 0x185   : > { %v2378_v19 = vcombine.low %v1670_v32, %v1672_v20  ;;  %v1128_v20 = vmul.f32 %v11832_v41, %v841_v30  ;;  %15434 = vst [vmem:[#allocation47_spill] sm:$0xff] %v12653_v21 }
 0x186   : > { %v12449_v59 = vpop.f32.mrf.mxu1 }
 0x187   : > { %15421 = vst [vmem:[#allocation34_spill] sm:$0xff] %v12449_v59  ;;  %v2392_v11 = vrot.slane %v2378_v19, %v11747_v13  ;;  %v2401_v19 = vcombine.low %v1688_v35, %v1687_v18  ;;  %v1697_v5 = vrot.slane %v1128_v20, %v11747_v13  ;;  %v12643_v59 = vld [vmem:[#allocation2 + $0x92] sm:$0xff] }
 0x188   : > { %v10274_v47 = vpop.f32.mrf.mxu1 }
 0x189   : > { %v2393_v9 = vcombine.low %v2385_v7, %v2392_v11  ;;  %v2402_v33 = vcombine.low %v1689_v6, %v1697_v5  ;;  %v2409_v0 = vrot.slane %v2401_v19, %v11747_v13 }
 0x18a   : > { %v12460_v14 = vpop.f32.mrf.mxu1 }
 0x18b   : > { %15422 = vst [vmem:[#allocation35_spill] sm:$0xff] %v12460_v14  ;;  %2699 = vst.msk [vmem:[#allocation2 + $0x128] sm:$0xff] %vm2660_vm3, %v2393_v9  ;;  %v2416_v27 = vrot.slane %v2402_v33, %v11747_v13  ;;  %v12651_v14 = vld [vmem:[#allocation2 + $0x9a] sm:$0xff] }
 0x18c   : > { %v10277_v52 = vpop.f32.mrf.mxu1 }
 0x18d   : > { %v1690_v52 = vcombine.high %v1128_v20, %v1128_v20  ;;  %v2417_v20 = vcombine.low %v2409_v0, %v2416_v27  ;;  %v1748_v0 = vrot.slane %v11763_v40, %v11747_v13 }
 0x18e   : > { %v12468_v29 = vpop.f32.mrf.mxu1 }
 0x18f   : > { %15423 = vst [vmem:[#allocation36_spill] sm:$0xff] %v12468_v29  ;;  %v1704_v11 = vrot.slane %v1690_v52, %v11747_v13  ;;  %2701 = vst.msk [vmem:[#allocation2 + $0x138] sm:$0xff] %vm2660_vm3, %v2417_v20  ;;  %v12647_v29 = vld [vmem:[#allocation2 + $0xb0] sm:$0xff] }
 0x190   : > { %v10280_v32 = vpop.f32.mrf.mxu1  ;;  %15433 = vst [vmem:[#allocation46_spill] sm:$0xff] %v12647_v29 }
 0x191   : > { %v1705_v32 = vcombine.high %v1697_v5, %v1697_v5  ;;  %v1706_v35 = vcombine.high %v1704_v11, %v1704_v11 }
 0x192   : > { %v12479_v47 = vpop.f32.mrf.mxu1  ;;  %v4118_v41 = vld [vmem:[#allocation2 + $0x121] sm:$0xff]  ;;  %v4119_v18 = vld [vmem:[#allocation2 + $0x129] sm:$0xff] }
 0x193   : > { %15424 = vst [vmem:[#allocation37_spill] sm:$0xff] %v12479_v47  ;;  %v1129_v47 = vmul.f32 %v11750_v15, %v842_v26  ;;  %v12487_v30 = vld [vmem:[#allocation2 + $0x128] sm:$0xff]  ;;  %10330 = vmatprep.mubr.msk.f32.mxu0 %vm2660_vm3, %v4118_v41  ;;  %v768_v15 = vadd.f32 %v12102_v3, %v12318_v45  ;;  %v1756_v45 = vcombine.high %v1748_v0, %v1748_v0 }
 0x194   : > { %v10283_v16 = vpop.f32.mrf.mxu1  ;;  %10383 = vmatmul.mubr.msk.f32.gmra.mxu1 %vm2660_vm3, %v12487_v30  ;;  %10331 = vmatmul.mubr.msk.f32.gmra.mxu0 %vm2660_vm3, %v4119_v18 }
 0x195   : > { %v1707_v6 = vcombine.high %v1129_v47, %v1129_v47  ;;  %v2418_v16 = vcombine.low %v1705_v32, %v1704_v11  ;;  %v1714_v19 = vrot.slane %v1129_v47, %v11747_v13  ;;  %v843_v33 = vmax.f32 %v768_v15, 0.0 }
 0x196   : > { %v2990_v7 = vpop.f32.mrf.mxu1 }
 0x197   : > { %v1721_v5 = vrot.slane %v1707_v6, %v11747_v13  ;;  %v1722_v26 = vcombine.high %v1714_v19, %v1714_v19  ;;  %v2419_v7 = vcombine.low %v1706_v35, %v1714_v19  ;;  %v1130_v3 = vmul.f32 %v11858_v49, %v843_v33  ;;  %v12507_v35 = vld [vmem:[#allocation2 + $0x138] sm:$0xff] }
 0x198   : > { %v10286_v9 = vpop.f32.mrf.mxu1  ;;  %10385 = vmatprep.mubr.msk.f32.mxu1 %vm2660_vm3, %v12507_v35  ;;  %v2460_v6 = vcombine.low %v1748_v0, %v1756_v45  ;;  %v12533_v45 = vld [vmem:[#allocation2 + $0x168] sm:$0xff] }
 0x199   : > { %v2426_v9 = vrot.slane %v2418_v16, %v11747_v13  ;;  %v2433_v11 = vrot.slane %v2419_v7, %v11747_v13  ;;  %v2441_v47 = vrot.slane %v1722_v26, %v11747_v13  ;;  %v1723_v32 = vcombine.high %v1721_v5, %v1721_v5 }
 0x19a   : > { %v2994_v4 = vpop.f32.mrf.mxu1  ;;  %v1724_v41 = vcombine.high %v1130_v3, %v1130_v3  ;;  %v1731_v18 = vrot.slane %v1130_v3, %v11747_v13 }
 0x19b   : > { %v2434_v27 = vcombine.low %v2426_v9, %v2433_v11  ;;  %2703 = vst.msk [vmem:[#allocation2 + $0x148] sm:$0x3] %vm2663_vm4, %v2441_v47  ;;  %v2442_v40 = vcombine.low %v1721_v5, %v1723_v32  ;;  %v2474_v9 = vrot.slane %v2460_v6, %v11747_v13  ;;  %v5161_v6 = vld [vmem:[#allocation2 + $0x20] sm:$0xff] }
 0x19c   : > { %v10289_v52 = vpop.f32.mrf.mxu1  ;;  %v1738_v4 = vrot.slane %v1724_v41, %v11747_v13  ;;  %v1739_v20 = vcombine.high %v1731_v18, %v1731_v18  ;;  %v4124_v41 = vld [vmem:[#allocation2 + $0x169] sm:$0xff] }
 0x19d   : > { %2702 = vst.msk [vmem:[#allocation2 + $0x140] sm:$0xff] %vm2660_vm3, %v2434_v27  ;;  %v2450_v49 = vrot.slane %v2442_v40, %v11747_v13  ;;  %v4125_v40 = vld [vmem:[#allocation2 + $0x171] sm:$0xff] }
 0x19e   : > { %v1740_v16 = vcombine.high %v1738_v4, %v1738_v4  ;;  %v2443_v19 = vcombine.low %v1731_v18, %v1739_v20  ;;  %v12539_v18 = vld [vmem:[#allocation2 + $0x170] sm:$0xff]  ;;  %v4771_v20 = vld [vmem:[#allocation2 + $0x2] sm:$0xff] }
 0x1a0   : > { %v2457_v15 = vrot.slane %v2443_v19, %v11747_v13  ;;  %v2459_v52 = vcombine.low %v1738_v4, %v1740_v16  ;;  %v5160_v4 = vld [vmem:[#allocation2 + $0x18] sm:$0xff]  ;;  %v4772_v16 = vld [vmem:[#allocation2 + $0xa] sm:$0xff] }
 0x1a1   : > { %v5162_v19 = vld [vmem:[#allocation2 + $0x30] sm:$0xff] }
 0x1a2   : > { %v2458_v11 = vcombine.low %v2450_v49, %v2457_v15  ;;  %v2467_v5 = vrot.slane %v2459_v52, %v11747_v13  ;;  %v9320_v49 = vld [vmem:[%s15294_s5 + $0x40] sm:$0xff]  ;;  %v5163_v52 = vld [vmem:[#allocation2 + $0x38] sm:$0xff] }
 0x1a3   : > { %v12552_v15 = vld [vmem:[#allocation2 + $0x1a] sm:$0xff] }
 0x1a4   : > { %v4120_v26 = vld [vmem:[#allocation2 + $0x139] sm:$0xff]  ;;  %v4121_v33 = vld [vmem:[#allocation2 + $0x141] sm:$0xff]  ;;  %v2475_v0 = vcombine.low %v2467_v5, %v2474_v9  ;;  %2704 = vst.msk [vmem:[#allocation2 + $0x150] sm:$0xff] %vm2660_vm3, %v2458_v11  ;;  %v12581_v5 = vld [vmem:[#allocation2 + $0x50] sm:$0xff] }
 0x1a5   : > { %v12514_v7 = vld [vmem:[#allocation2 + $0x140] sm:$0xff]  ;;  %10333 = vmatprep.mubr.msk.f32.mxu0 %vm2660_vm3, %v4120_v26  ;;  %v9354_v26 = vld [vmem:[%s15294_s5 + $0x50] sm:$0xff]  ;;  %v5164_v9 = vld [vmem:[#allocation2 + $0x48] sm:$0xff]  ;;  %15425 = vst [vmem:[#allocation38_spill] sm:$0xff] %v12581_v5 }
 0x1a6   : > { %10386 = vmatmul.mubr.msk.f32.gmra.mxu1 %vm2660_vm3, %v12514_v7  ;;  %10334 = vmatmul.mubr.msk.f32.gmra.mxu0 %vm2660_vm3, %v4121_v33  ;;  %2705 = vst.msk [vmem:[#allocation2 + $0x158] sm:$0xff] %vm2660_vm3, %v2475_v0  ;;  %v12562_v33 = vld [vmem:[#allocation2 + $0x22] sm:$0xff]  ;;  %v12577_v11 = vld [vmem:[%s15294_s5 + $0x78] sm:$0xff] }
 0x1a7   : > { %v12586_v0 = vld [vmem:[#allocation2 + $0x3a] sm:$0xff] }
 0x1ab   : > { %v12524_v47 = vld [vmem:[#allocation2 + $0x150] sm:$0xff] }
 0x1ac   : > { %10388 = vmatprep.mubr.msk.f32.mxu1 %vm2660_vm3, %v12524_v47 }
 0x1ad   : > { %v4122_v32 = vld [vmem:[#allocation2 + $0x151] sm:$0xff]  ;;  %v4123_v3 = vld [vmem:[#allocation2 + $0x159] sm:$0xff] }
 0x1ae   : > { %v12528_v27 = vld [vmem:[#allocation2 + $0x158] sm:$0xff]  ;;  %10336 = vmatprep.mubr.msk.f32.mxu0 %vm2660_vm3, %v4122_v32  ;;  %v12588_v32 = vld [vmem:[#allocation2 + $0x60] sm:$0xff] }
 0x1af   : > { %10389 = vmatmul.mubr.msk.f32.gmra.mxu1 %vm2660_vm3, %v12528_v27  ;;  %10337 = vmatmul.mubr.msk.f32.gmra.mxu0 %vm2660_vm3, %v4123_v3  ;;  %15426 = vst [vmem:[#allocation39_spill] sm:$0xff] %v12588_v32  ;;  %v12595_v3 = vld [vmem:[#allocation2 + $0x4a] sm:$0xff] }
 0x1b0   : > { %10391 = vmatprep.mubr.msk.f32.mxu1 %vm2660_vm3, %v12533_v45  ;;  %10339 = vmatprep.mubr.msk.f32.mxu0 %vm2660_vm3, %v4124_v41  ;;  %v12599_v41 = vld [vmem:[#allocation2 + $0x68] sm:$0xff] }
 0x1b1   : > { %15427 = vst [vmem:[#allocation40_spill] sm:$0xff] %v12599_v41 }
 0x1b3   : > { %10392 = vmatmul.mubr.msk.f32.gmra.mxu1 %vm2660_vm3, %v12539_v18  ;;  %10340 = vmatmul.mubr.msk.f32.gmra.mxu0 %vm2660_vm3, %v4125_v40  ;;  %v12603_v40 = vld [vmem:[#allocation2 + $0x52] sm:$0xff] }
 0x1b4   : > { %10450 = vmatprep.mubr.msk.f32.mxu1 %vm2660_vm3, %v5160_v4  ;;  %10398 = vmatprep.mubr.msk.f32.mxu0 %vm2660_vm3, %v4771_v20  ;;  %v12605_v4 = vld [vmem:[#allocation2 + $0x78] sm:$0xff]  ;;  %v12611_v20 = vld [vmem:[#allocation2 + $0x62] sm:$0xff] }
 0x1b5   : > { %15428 = vst [vmem:[#allocation41_spill] sm:$0xff] %v12605_v4 }
 0x1b6   : > { %v12661_v50 = vpop.f32.mrf.mxu1  ;;  %v12663_v23 = vpop.f32.mrf.mxu0 }
 0x1b7   : > { %10451 = vmatmul.mubr.msk.f32.vlgmr.msra.gmra.mxu1 %vm2660_vm3, %v5161_v6  ;;  %10399 = vmatmul.mubr.msk.f32.vlgmr.msra.gmra.mxu0 %vm2660_vm3, %v4772_v16  ;;  %v12615_v6 = vld [vmem:[#allocation2 + $0x80] sm:$0xff]  ;;  %v12619_v16 = vld [vmem:[#allocation2 + $0x6a] sm:$0xff] }
 0x1b8   : > { %10453 = vmatprep.mubr.msk.f32.mxu1 %vm2660_vm3, %v5162_v19  ;;  %10499 = vmatpush3.msra.mxu0 %v12269_v37  ;;  %v12567_v37 = vld [vmem:[%s15294_s5 + $0x68] sm:$0xff]  ;;  %15429 = vst [vmem:[#allocation42_spill] sm:$0xff] %v12615_v6  ;;  %v12621_v19 = vld [vmem:[#allocation2 + $0x90] sm:$0xff]  ;;  %v12681_v39 = vpop.f32.mrf.mxu1  ;;  %v12683_v57 = vpop.f32.mrf.mxu0 }
 0x1b9   : > { %10401 = vmatprep.mubr.msk.f32.mxu0 %vm2660_vm3, %v12552_v15  ;;  %10500 = vmatprep.subr.mxu0 %v9320_v49  ;;  %15430 = vst [vmem:[#allocation43_spill] sm:$0xff] %v12621_v19  ;;  %15438 = vst [vmem:[#allocation51_spill] sm:$0xff] %v12681_v39  ;;  %v12699_v39 = vld [vmem:[#allocation2 + $0xf0] sm:$0xff] }
 0x1ba   : > { %10551 = vmatpush3.msra.mxu1 %v12429_v2  ;;  %10501 = vmatpush3.msra.mxu0 %v9320_v49  ;;  %v12572_v2 = vld [vmem:[#allocation2 + $0x32] sm:$0xff]  ;;  %v12627_v49 = vld [vmem:[#allocation2 + $0x7a] sm:$0xff]  ;;  %15439 = vst [vmem:[#allocation52_spill] sm:$0xff] %v12683_v57  ;;  %15442 = vst [vmem:[#allocation55_spill] sm:$0xff] %v12699_v39 }
 0x1bb   : > { %10454 = vmatmul.mubr.msk.f32.gmra.mxu1 %vm2660_vm3, %v5163_v52  ;;  %10402 = vmatmul.mubr.msk.f32.gmra.mxu0 %vm2660_vm3, %v12562_v33  ;;  %v12631_v52 = vld [vmem:[#allocation2 + $0x98] sm:$0xff] }
 0x1bc   : > { %10456 = vmatprep.mubr.msk.f32.mxu1 %vm2660_vm3, %v5164_v9  ;;  %10404 = vmatprep.mubr.msk.f32.mxu0 %vm2660_vm3, %v12572_v2  ;;  %15431 = vst [vmem:[#allocation44_spill] sm:$0xff] %v12631_v52  ;;  %v12637_v9 = vld [vmem:[#allocation2 + $0xa8] sm:$0xff]  ;;  %v12701_v57 = vld [vmem:[#allocation2 + $0xda] sm:$0xff] }
 0x1bd   : > { %10552 = vmatprep.subr.mxu1 %v9354_v26  ;;  %10602 = vmatprep.subr.mxu0 %v12567_v37  ;;  %15432 = vst [vmem:[#allocation45_spill] sm:$0xff] %v12637_v9  ;;  %15443 = vst [vmem:[#allocation56_spill] sm:$0xff] %v12701_v57 }
 0x1be   : > { %10553 = vmatpush3.msra.mxu1 %v9354_v26  ;;  %v12635_v26 = vld [vmem:[#allocation2 + $0x82] sm:$0xff] }
 0x1bf   : > { %10457 = vmatmul.mubr.msk.f32.gmra.mxu1 %vm2660_vm3, %v12581_v5  ;;  %10654 = vmatprep.subr.mxu1 %v12577_v11 }
 0x1c0   : > { %10405 = vmatmul.mubr.msk.f32.gmra.mxu0 %vm2660_vm3, %v12586_v0  ;;  %10459 = vmatprep.mubr.msk.f32.mxu1 %vm2660_vm3, %v12588_v32 }
 0x1c1   : > { %10407 = vmatprep.mubr.msk.f32.mxu0 %vm2660_vm3, %v12595_v3 }
 0x1c3   : > { %10460 = vmatmul.mubr.msk.f32.gmra.mxu1 %vm2660_vm3, %v12599_v41 }
 0x1c4   : > { %10408 = vmatmul.mubr.msk.f32.gmra.mxu0 %vm2660_vm3, %v12603_v40  ;;  %10462 = vmatprep.mubr.msk.f32.mxu1 %vm2660_vm3, %v12605_v4 }
 0x1c5   : > { %10410 = vmatprep.mubr.msk.f32.mxu0 %vm2660_vm3, %v12611_v20 }
 0x1c7   : > { %10463 = vmatmul.mubr.msk.f32.gmra.mxu1 %vm2660_vm3, %v12615_v6  ;;  %v12717_v6 = vld [vmem:[#allocation2 + $0x108] sm:$0xff] }
 0x1c8   : > { %10411 = vmatmul.mubr.msk.f32.gmra.mxu0 %vm2660_vm3, %v12619_v16  ;;  %10465 = vmatprep.mubr.msk.f32.mxu1 %vm2660_vm3, %v12621_v19  ;;  %v12715_v19 = vld [vmem:[#allocation2 + $0xe2] sm:$0xff]  ;;  %15448 = vst [vmem:[#allocation61_spill] sm:$0xff] %v12717_v6 }
 0x1c9   : > { %10413 = vmatprep.mubr.msk.f32.mxu0 %vm2660_vm3, %v12627_v49  ;;  %15447 = vst [vmem:[#allocation60_spill] sm:$0xff] %v12715_v19 }
 0x1cb   : > { %10466 = vmatmul.mubr.msk.f32.gmra.mxu1 %vm2660_vm3, %v12631_v52 }
 0x1cc   : > { %10414 = vmatmul.mubr.msk.f32.gmra.mxu0 %vm2660_vm3, %v12635_v26  ;;  %10468 = vmatprep.mubr.msk.f32.mxu1 %vm2660_vm3, %v12637_v9  ;;  %v12695_v9 = vld [vmem:[#allocation2 + $0xca] sm:$0xff] }
 0x1cd   : > { %10416 = vmatprep.mubr.msk.f32.mxu0 %vm2660_vm3, %v12643_v59  ;;  %15441 = vst [vmem:[#allocation54_spill] sm:$0xff] %v12695_v9 }
 0x1cf   : > { %10469 = vmatmul.mubr.msk.f32.gmra.mxu1 %vm2660_vm3, %v12647_v29  ;;  %v12691_v29 = vpop.f32.mrf.mxu0 }
 0x1d0   : > { %10417 = vmatmul.mubr.msk.f32.gmra.mxu0 %vm2660_vm3, %v12651_v14  ;;  %10471 = vmatprep.mubr.msk.f32.mxu1 %vm2660_vm3, %v12653_v21  ;;  %v12689_v21 = vpop.f32.mrf.mxu1 }
 0x1d1   : > { %10419 = vmatprep.mubr.msk.f32.mxu0 %vm2660_vm3, %v12659_v44 }
 0x1d2   : > { %v12709_v52 = vpop.f32.mrf.mxu1 }
 0x1d3   : > { %10472 = vmatmul.mubr.msk.f32.gmra.mxu1 %vm2660_vm3, %v12667_v43  ;;  %v12687_v43 = vld [vmem:[#allocation2 + $0xe0] sm:$0xff]  ;;  %15445 = vst [vmem:[#allocation58_spill] sm:$0xff] %v12709_v52 }
 0x1d4   : > { %10420 = vmatmul.mubr.msk.f32.gmra.mxu0 %vm2660_vm3, %v12671_v12  ;;  %10474 = vmatprep.mubr.msk.f32.mxu1 %vm2660_vm3, %v12673_v58  ;;  %15440 = vst [vmem:[#allocation53_spill] sm:$0xff] %v12687_v43  ;;  %v12707_v58 = vld [vmem:[#allocation2 + $0xf8] sm:$0xff]  ;;  %v12725_v4 = vpop.f32.mrf.mxu1 }
 0x1d5   : > { %10422 = vmatprep.mubr.msk.f32.mxu0 %vm2660_vm3, %v12679_v61  ;;  %15444 = vst [vmem:[#allocation57_spill] sm:$0xff] %v12707_v58  ;;  %v12856_v61 = vld [vmem:[#allocation2 + $0x188] sm:$0xff] }
 0x1d7   : > { %10475 = vmatmul.mubr.msk.f32.gmra.mxu1 %vm2660_vm3, %v12687_v43  ;;  %v12711_v43 = vpop.f32.mrf.mxu0 }
 0x1d8   : > { %10423 = vmatmul.mubr.msk.f32.gmra.mxu0 %vm2660_vm3, %v12695_v9  ;;  %10477 = vmatprep.mubr.msk.f32.mxu1 %vm2660_vm3, %v12699_v39  ;;  %15446 = vst [vmem:[#allocation59_spill] sm:$0xff] %v12711_v43  ;;  %v12723_v39 = vld [vmem:[#allocation2 + $0xf2] sm:$0xff]  ;;  %v12733_v43 = vld [vmem:[#allocation2 + $0xfa] sm:$0xff] }
 0x1d9   : > { %10425 = vmatprep.mubr.msk.f32.mxu0 %vm2660_vm3, %v12701_v57  ;;  %15449 = vst [vmem:[#allocation62_spill] sm:$0xff] %v12723_v39  ;;  %v12727_v52 = vpop.f32.mrf.mxu0  ;;  %15450 = vst [vmem:[#allocation63_spill] sm:$0xff] %v12733_v43 }
 0x1db   : > { %10478 = vmatmul.mubr.msk.f32.gmra.mxu1 %vm2660_vm3, %v12707_v58  ;;  %v12741_v58 = vpop.f32.mrf.mxu1  ;;  %v12743_v41 = vpop.f32.mrf.mxu0 }
 0x1dc   : > { %10426 = vmatmul.mubr.msk.f32.gmra.mxu0 %vm2660_vm3, %v12715_v19  ;;  %10480 = vmatprep.mubr.msk.f32.mxu1 %vm2660_vm3, %v12717_v6  ;;  %v12739_v6 = vld [vmem:[#allocation2 + $0x10a] sm:$0xff]  ;;  %15452 = vst [vmem:[#allocation65_spill] sm:$0xff] %v12741_v58  ;;  %15453 = vst [vmem:[#allocation66_spill] sm:$0xff] %v12743_v41  ;;  %v12761_v58 = vld [vmem:[#allocation2 + $0x122] sm:$0xff] }
 0x1dd   : > { %10428 = vmatprep.mubr.msk.f32.mxu0 %vm2660_vm3, %v12723_v39  ;;  %15451 = vst [vmem:[#allocation64_spill] sm:$0xff] %v12739_v6  ;;  %v12749_v32 = vpop.f32.mrf.mxu1  ;;  %v12751_v5 = vpop.f32.mrf.mxu0  ;;  %15455 = vst [vmem:[#allocation68_spill] sm:$0xff] %v12761_v58 }
 0x1df   : > { %10481 = vmatmul.mubr.msk.f32.gmra.mxu1 %vm2660_vm3, %v12451_v56  ;;  %v3041_v56 = vrot.slane %v12038_v55, %v11747_v13  ;;  %v12765_v55 = vrot.slane %v12294_v24, %v11747_v13  ;;  %v12784_v24 = vld [vmem:[#allocation2 + $0x13a] sm:$0xff] }
 0x1e0   : > { %10429 = vmatmul.mubr.msk.f32.gmra.mxu0 %vm2660_vm3, %v12733_v43  ;;  %10483 = vmatprep.mubr.msk.f32.mxu1 %vm2660_vm3, %v12472_v63  ;;  %v12755_v63 = vld [vmem:[#allocation2 + $0x112] sm:$0xff]  ;;  %v12772_v43 = vpop.f32.mrf.mxu0  ;;  %15459 = vst [vmem:[#allocation72_spill] sm:$0xff] %v12784_v24 }
 0x1e1   : > { %10431 = vmatprep.mubr.msk.f32.mxu0 %vm2660_vm3, %v12739_v6  ;;  %15454 = vst [vmem:[#allocation67_spill] sm:$0xff] %v12755_v63  ;;  %v3049_v41 = vcombine.high %v3041_v56, %v3041_v56  ;;  %v12770_v6 = vpop.f32.mrf.mxu1  ;;  %15457 = vst [vmem:[#allocation70_spill] sm:$0xff] %v12772_v43 }
 0x1e2   : > { %15456 = vst [vmem:[#allocation69_spill] sm:$0xff] %v12770_v6  ;;  %v12788_v56 = vpop.f32.mrf.mxu0 }
 0x1e3   : > { %10484 = vmatmul.mubr.msk.f32.gmra.mxu1 %vm2660_vm3, %v12487_v30  ;;  %v3662_v30 = vrot.slane %v12063_v60, 7  ;;  %v12786_v60 = vpop.f32.mrf.mxu1  ;;  %v9170_v6 = vrot.slane %v3049_v41, 9  ;;  %v12808_v41 = vld [vmem:[#allocation2 + $0x152] sm:$0xff] }
 0x1e4   : > { %10432 = vmatmul.mubr.msk.f32.gmra.mxu0 %vm2660_vm3, %v12755_v63  ;;  %10486 = vmatprep.mubr.msk.f32.mxu1 %vm2660_vm3, %v12507_v35  ;;  %v12776_v35 = vld [vmem:[#allocation2 + $0x12a] sm:$0xff]  ;;  %v3100_v63 = vcombine.high %v12187_v8, %v12187_v8  ;;  %15461 = vst [vmem:[#allocation74_spill] sm:$0xff] %v12808_v41  ;;  %v12812_v19 = vpop.f32.mrf.mxu0 }
 0x1e5   : > { %10434 = vmatprep.mubr.msk.f32.mxu0 %vm2660_vm3, %v12761_v58  ;;  %15458 = vst [vmem:[#allocation71_spill] sm:$0xff] %v12776_v35  ;;  %v3664_v43 = vrot.slane %v3662_v30, 2  ;;  %v12800_v58 = vld [vmem:[#allocation2 + $0x142] sm:$0xff]  ;;  %15463 = vst [vmem:[#allocation76_spill] sm:$0xff] %v12812_v19 }
 0x1e6   : > { %15460 = vst [vmem:[#allocation73_spill] sm:$0xff] %v12800_v58  ;;  %v12802_v39 = vrot.slane %v3100_v63, 7  ;;  %v10311_v9 = vpop.f32.mrf.mxu0 }
 0x1e7   : > { %10487 = vmatmul.mubr.msk.f32.gmra.mxu1 %vm2660_vm3, %v12514_v7  ;;  %v3168_v7 = vcombine.high %v12765_v55, %v12765_v55  ;;  %v3666_v63 = vsel %vm12113_vm11, %v3664_v43, %v12081_v51  ;;  %v12845_v43 = vadd.f32 %v12661_v50, %v12663_v23  ;;  %v12860_v23 = vadd.f32 %v12689_v21, %v12691_v29 }
 0x1e8   : > { %10435 = vmatmul.mubr.msk.f32.gmra.mxu0 %vm2660_vm3, %v12776_v35  ;;  %10489 = vmatprep.mubr.msk.f32.mxu1 %vm2660_vm3, %v12524_v47  ;;  %v3117_v35 = vcombine.high %v12228_v53, %v12228_v53  ;;  %v3136_v47 = vcombine.high %v12273_v42, %v12273_v42  ;;  %v3674_v42 = vrot.slane %v12124_v25, 7  ;;  %v12828_v25 = vld [vmem:[#allocation2 + $0x15a] sm:$0xff]  ;;  %v3695_v51 = vrot.slane %v12802_v39, 2 }
 0x1e9   : > { %10437 = vmatprep.mubr.msk.f32.mxu0 %vm2660_vm3, %v12784_v24  ;;  %v12810_v24 = vpop.f32.mrf.mxu1  ;;  %v3737_v57 = vrot.slane %v3168_v7, 7  ;;  %15464 = vst [vmem:[#allocation77_spill] sm:$0xff] %v12828_v25  ;;  %v12830_v7 = vld [vmem:[#allocation2 + $0x180] sm:$0xff]  ;;  %v15470_v29 = vrot.slane %v12190_v31, 7 }
 0x1ea   : > { %15462 = vst [vmem:[#allocation75_spill] sm:$0xff] %v12810_v24  ;;  %v3673_v24 = vrot.slane %v12135_v46, 2  ;;  %v3150_v19 = vrot.slane %v3136_v47, %v11747_v13  ;;  %15465 = vst [vmem:[#allocation78_spill] sm:$0xff] %v12830_v7  ;;  %v12841_v46 = vld [vmem:[#allocation2 + $0x16a] sm:$0xff] }
 0x1eb   : > { %10490 = vmatmul.mubr.msk.f32.gmra.mxu1 %vm2660_vm3, %v12528_v27  ;;  %v3663_v27 = vsel %vm12113_vm11, %v9170_v6, %v3662_v30  ;;  %v15466_v6 = vrot.slane %v12187_v8, 7  ;;  %v9173_v8 = vrot.slane %v12765_v55, 9  ;;  %v3739_v47 = vrot.slane %v3737_v57, 2  ;;  %v12864_v55 = vpop.f32.mrf.mxu0 }
 0x1ec   : > { %10438 = vmatmul.mubr.msk.f32.gmra.mxu0 %vm2660_vm3, %v12800_v58  ;;  %10492 = vmatprep.mubr.msk.f32.mxu1 %vm2660_vm3, %v12533_v45  ;;  %v12822_v45 = vrot.slane %v3117_v35, 7  ;;  %v10363_v58 = vpop.f32.mrf.mxu1  ;;  %v3676_v35 = vrot.slane %v3674_v42, 2  ;;  %15469 = vst [vmem:[#allocation80_spill] sm:$0xff] %v12864_v55 }
 0x1ed   : > { %10440 = vmatprep.mubr.msk.f32.mxu0 %vm2660_vm3, %v12808_v41  ;;  %v12834_v30 = vrot.slane %v15466_v6, 2  ;;  %v15467_v6 = vrot.slane %v12228_v53, 7  ;;  %v3708_v41 = vrot.slane %v12243_v10, 7  ;;  %v3717_v53 = vrot.slane %v12302_v54, 2  ;;  %v12872_v10 = vld [vmem:[#allocation2 + $0x172] sm:$0xff] }
 0x1ee   : > { %v12862_v50 = vpop.f32.mrf.mxu1  ;;  %v5548_v54 = vld [vmem:[#allocation2 + $0x19] sm:$0xff]  ;;  %v12893_v31 = vsel %vm12113_vm11, %v9173_v8, %v3737_v57 }
 0x1ef   : > { %10493 = vmatmul.mubr.msk.f32.gmra.mxu1 %vm2660_vm3, %v12539_v18  ;;  %v12847_v18 = vcombine.low %v3663_v27, %v3666_v63  ;;  %15468 = vst [vmem:[#allocation79_spill] sm:$0xff] %v12862_v50  ;;  %v3675_v27 = vsel %vm12113_vm11, %v3673_v24, %v3674_v42  ;;  %v3152_v63 = vcombine.high %v3150_v19, %v3150_v19  ;;  %v3730_v42 = vrot.slane %v3150_v19, 7 }
 0x1f0   : > { %10441 = vmatmul.mubr.msk.f32.gmra.mxu0 %vm2660_vm3, %v12828_v25  ;;  %10495 = vmatprep.mubr.msk.f32.mxu1 %vm2660_vm3, %v12830_v7  ;;  %v3704_v25 = vrot.slane %v15467_v6, 2  ;;  %v3707_v7 = vrot.slane %v12822_v45, 2  ;;  %v3729_v6 = vrot.slane %v12329_v34, 2  ;;  %v3694_v21 = vsel %vm12113_vm11, %v12834_v30, %v12802_v39 }
 0x1f1   : > { %10443 = vmatprep.mubr.msk.f32.mxu0 %vm2660_vm3, %v12841_v46  ;;  %v3697_v24 = vsel %vm12113_vm11, %v3695_v51, %v15470_v29  ;;  %v12888_v34 = vadd.f32 %v12725_v4, %v12727_v52  ;;  %v3718_v39 = vrot.slane %v12286_v1, 7  ;;  %v15471_v19 = vrot.slane %v12348_v38, 7 }
 0x1f2   : > { %v3706_v1 = vsel %vm12113_vm11, %v3704_v25, %v12822_v45  ;;  %v3709_v57 = vsel %vm12113_vm11, %v3707_v7, %v3708_v41  ;;  %v12913_v38 = vadd.f32 %v12786_v60, %v12788_v56  ;;  %v12915_v4 = vadd.f32 %v10363_v58, %v10311_v9  ;;  %v5549_v45 = vld [vmem:[#allocation2 + $0x21] sm:$0xff]  ;;  %v12933_v9 = vld [vmem:[#allocation2 + $0x31] sm:$0xff] }
 0x1f3   : > { %10496 = vmatmul.mubr.msk.f32.gmra.mxu1 %vm2660_vm3, %v12856_v61  ;;  %v12899_v30 = vsel %vm12113_vm11, %v3739_v47, %v15471_v19  ;;  %v3719_v52 = vsel %vm12113_vm11, %v3717_v53, %v3718_v39  ;;  %v9388_v41 = vld [vmem:[%s15294_s5 + $0x60] sm:$0xff]  ;;  %v3732_v60 = vrot.slane %v3730_v42, 2  ;;  %v15472_v56 = vld [vmem:[#allocation11_spill] sm:$0xff]  ;;  %v7536_v8 = vrot.slane %v12847_v18, %v11747_v13 }
 0x1f4   : > { %10444 = vmatmul.mubr.msk.f32.gmra.mxu0 %vm2660_vm3, %v12872_v10  ;;  %10554 = vmatprep.mubr.msk.f32.mxu1 %vm2660_vm3, %v12552_v15  ;;  %v10366_v50 = vpop.f32.mrf.mxu1  ;;  %v10314_v55 = vpop.f32.mrf.mxu0  ;;  %v12904_v15 = vadd.f32 %v12749_v32, %v12751_v5  ;;  %v3731_v5 = vsel %vm12113_vm11, %v3729_v6, %v3730_v42  ;;  %v3733_v32 = vrot.slane %v3152_v63, 7  ;;  %v7630_v58 = vcombine.low %v12893_v31, %v12899_v30  ;;  %v12957_v18 = vld [vmem:[#allocation2 + $0x39] sm:$0xff] }
 0x1f5   : > { %10502 = vmatprep.mubr.msk.f32.mxu0 %vm2660_vm3, %v5548_v54  ;;  %v12926_v25 = vadd.f32 %v10366_v50, %v10314_v55  ;;  %v7560_v7 = vrot.slane %v15472_v56, %v11747_v13  ;;  %v3720_v53 = vrot.slane %v3718_v39, 2 }
 0x1f6   : > { %v12947_v50 = vpop.f32.mrf.mxu1  ;;  %v12959_v63 = vpop.f32.mrf.mxu0  ;;  %v3734_v30 = vsel %vm12113_vm11, %v3732_v60, %v3733_v32  ;;  %v12998_v32 = vld [vmem:[#allocation2 + $0x51] sm:$0xff] }
 0x1f7   : > { %10555 = vmatmul.mubr.msk.f32.vlgmr.msra.gmra.mxu1 %vm2660_vm3, %v12562_v33  ;;  %v3678_v33 = vsel %vm12113_vm11, %v3676_v35, %v12142_v62  ;;  %15474 = vst [vmem:[#allocation11_spill] sm:$0xff] %v12947_v50  ;;  %v9422_v62 = vld [vmem:[%s15294_s5 + $0x70] sm:$0xff]  ;;  %v15475_v35 = vld [vmem:[#allocation17_spill] sm:$0xff] }
 0x1f8   : > { %10503 = vmatmul.mubr.msk.f32.vlgmr.msra.gmra.mxu0 %vm2660_vm3, %v5549_v45  ;;  %10557 = vmatprep.mubr.msk.f32.mxu1 %vm2660_vm3, %v12572_v2  ;;  %v7545_v51 = vcombine.low %v3675_v27, %v3678_v33  ;;  %v15473_v2 = vld [vmem:[#allocation8_spill] sm:$0xff]  ;;  %v7587_v55 = vrot.slane %v15475_v35, %v11747_v13  ;;  %v7563_v27 = vcombine.low %v3694_v21, %v3697_v24  ;;  %v15478_v21 = vld [vmem:[#allocation13_spill] sm:$0xff]  ;;  %v15479_v24 = vld [vmem:[#allocation14_spill] sm:$0xff] }
 0x1f9   : > { %10603 = vmatpush3.msra.mxu0 %v12567_v37  ;;  %10505 = vmatprep.mubr.msk.f32.mxu0 %vm2660_vm3, %v12933_v9  ;;  %v7543_v47 = vrot.slane %v15473_v2, %v11747_v13  ;;  %v7580_v37 = vcombine.low %v3706_v1, %v3709_v57  ;;  %15476 = vst [vmem:[#allocation8_spill] sm:$0xff] %v12959_v63  ;;  %v9456_v50 = vld [vmem:[%s15294_s5 + $0x80] sm:$0xff] }
 0x1fa   : > { %10604 = vmatprep.subr.mxu0 %v9388_v41  ;;  %10655 = vmatpush3.msra.mxu1 %v12577_v11  ;;  %v12964_v11 = vld [vmem:[%s15294_s5 + $0x88] sm:$0xff]  ;;  %v7553_v6 = vrot.slane %v7545_v51, %v11747_v13  ;;  %v15480_v42 = vcombine.low %v15478_v21, %v15479_v24  ;;  %v7577_v19 = vrot.slane %v7563_v27, %v11747_v13  ;;  %v15492_v21 = vld [vmem:[#allocation60_spill] sm:$0xff] }
 0x1fb   : > { %10558 = vmatmul.mubr.msk.f32.gmra.mxu1 %vm2660_vm3, %v12586_v0  ;;  %10605 = vmatpush3.msra.mxu0 %v9388_v41  ;;  %v12967_v29 = vcombine.low %v7536_v8, %v7543_v47  ;;  %v12977_v0 = vld [vmem:[#allocation2 + $0x49] sm:$0xff]  ;;  %v7594_v31 = vrot.slane %v7580_v37, %v11747_v13  ;;  %v7614_v45 = vcombine.low %v3731_v5, %v3734_v30  ;;  %v13008_v5 = vld [vmem:[#allocation2 + $0x61] sm:$0xff] }
 0x1fc   : > { %v7570_v54 = vrot.slane %v15480_v42, %v11747_v13  ;;  %10506 = vmatmul.mubr.msk.f32.gmra.mxu0 %vm2660_vm3, %v12957_v18  ;;  %10560 = vmatprep.mubr.msk.f32.mxu1 %vm2660_vm3, %v12595_v3  ;;  %v12985_v57 = vcombine.low %v7553_v6, %v7560_v7  ;;  %v7621_v3 = vrot.slane %v12343_v48, %v11747_v13  ;;  %v15490_v27 = vld [vmem:[#allocation54_spill] sm:$0xff]  ;;  %v13086_v6 = vld [vmem:[#allocation2 + $0xd9] sm:$0xff] }
 0x1fd   : > { %15477 = vst [vmem:[#allocation17_spill] sm:$0xff] %v12967_v29  ;;  %10508 = vmatprep.mubr.msk.f32.mxu0 %vm2660_vm3, %v12977_v0  ;;  %10656 = vmatprep.subr.mxu1 %v9422_v62  ;;  %v12992_v33 = vcombine.low %v7587_v55, %v7594_v31  ;;  %v7628_v60 = vrot.slane %v7614_v45, %v11747_v13  ;;  %v13074_v55 = vld [vmem:[#allocation2 + $0xc1] sm:$0xff]  ;;  %v13104_v31 = vld [vmem:[#allocation2 + $0xf9] sm:$0xff]  ;;  %v13110_v30 = vld [vmem:[#allocation2 + $0x109] sm:$0xff] }
 0x1fe   : > { %15481 = vst [vmem:[#allocation13_spill] sm:$0xff] %v12985_v57  ;;  %10657 = vmatpush3.msra.mxu1 %v9422_v62  ;;  %10706 = vmatprep.subr.mxu0 %v12964_v11  ;;  %v12994_v56 = vcombine.low %v7570_v54, %v7577_v19  ;;  %v3722_v48 = vsel %vm12113_vm11, %v3720_v53, %v12312_v17  ;;  %v13080_v53 = vld [vmem:[#allocation2 + $0xc9] sm:$0xff]  ;;  %v13092_v24 = vld [vmem:[#allocation2 + $0xe1] sm:$0xff]  ;;  %v13098_v54 = vld [vmem:[#allocation2 + $0xf1] sm:$0xff] }
 0x1ff   : > { %15482 = vst [vmem:[#allocation14_spill] sm:$0xff] %v12992_v33  ;;  %10561 = vmatmul.mubr.msk.f32.gmra.mxu1 %vm2660_vm3, %v12603_v40  ;;  %v7597_v7 = vcombine.low %v3719_v52, %v3722_v48  ;;  %v7604_v40 = vrot.slane %v12316_v22, %v11747_v13  ;;  %v13014_v51 = vcombine.low %v7621_v3, %v7628_v60  ;;  %v13030_v22 = vld [vmem:[#allocation2 + $0x79] sm:$0xff]  ;;  %v15493_v42 = vld [vmem:[#allocation62_spill] sm:$0xff]  ;;  %v15496_v45 = vld [vmem:[#allocation67_spill] sm:$0xff] }
 0x200   : > { %15483 = vst [vmem:[#allocation81_spill] sm:$0xff] %v12994_v56  ;;  %10509 = vmatmul.mubr.msk.f32.gmra.mxu0 %vm2660_vm3, %v12998_v32  ;;  %10563 = vmatprep.mubr.msk.f32.mxu1 %vm2660_vm3, %v12611_v20  ;;  %v7638_v8 = vrot.slane %v7630_v58, %v11747_v13  ;;  %v7645_v17 = vrot.slane %v12390_v28, %v11747_v13  ;;  %v13022_v20 = vld [vmem:[#allocation2 + $0x69] sm:$0xff]  ;;  %v13038_v28 = vld [vmem:[#allocation2 + $0x81] sm:$0xff]  ;;  %v15495_v19 = vld [vmem:[#allocation64_spill] sm:$0xff] }
 0x201   : > { %10511 = vmatprep.mubr.msk.f32.mxu0 %vm2660_vm3, %v13008_v5  ;;  %15484 = vst [vmem:[#allocation82_spill] sm:$0xff] %v13014_v51  ;;  %v7611_v2 = vrot.slane %v7597_v7, %v11747_v13  ;;  %v13118_v3 = vld [vmem:[#allocation2 + $0x111] sm:$0xff]  ;;  %v13126_v7 = vld [vmem:[#allocation2 + $0x121] sm:$0xff]  ;;  %v13190_v29 = vld [vmem:[#allocation2 + $0x189] sm:$0xff] }
 0x202   : > { %v13024_v52 = vcombine.low %v7638_v8, %v7645_v17  ;;  %v15497_v48 = vld [vmem:[#allocation68_spill] sm:$0xff]  ;;  %v13186_v56 = vld [vmem:[#allocation2 + $0x18a] sm:$0xff] }
 0x203   : > { %10564 = vmatmul.mubr.msk.f32.gmra.mxu1 %vm2660_vm3, %v12619_v16  ;;  %v13032_v58 = vcombine.low %v7604_v40, %v7611_v2  ;;  %v13044_v16 = vld [vmem:[#allocation2 + $0x91] sm:$0xff] }
 0x204   : > { %v10369_v39 = vpop.f32.mrf.mxu1  ;;  %v10317_v1 = vpop.f32.mrf.mxu0  ;;  %15485 = vst [vmem:[#allocation83_spill] sm:$0xff] %v13024_v52  ;;  %10512 = vmatmul.mubr.msk.f32.gmra.mxu0 %vm2660_vm3, %v13022_v20  ;;  %10566 = vmatprep.mubr.msk.f32.mxu1 %vm2660_vm3, %v12627_v49  ;;  %v13050_v49 = vld [vmem:[#allocation2 + $0x99] sm:$0xff]  ;;  %v15498_v2 = vld [vmem:[#allocation71_spill] sm:$0xff]  ;;  %v13180_v52 = vld [vmem:[#allocation2 + $0x181] sm:$0xff] }
 0x205   : > { %v12989_v41 = vadd.f32 %v10369_v39, %v10317_v1  ;;  %15486 = vst [vmem:[#allocation84_spill] sm:$0xff] %v13032_v58  ;;  %10514 = vmatprep.mubr.msk.f32.mxu0 %vm2660_vm3, %v13030_v22  ;;  %v15494_v39 = vld [vmem:[#allocation63_spill] sm:$0xff] }
 0x206   : > { %v13052_v47 = vpop.f32.mrf.mxu1 }
 0x207   : > { %10567 = vmatmul.mubr.msk.f32.gmra.mxu1 %vm2660_vm3, %v12635_v26  ;;  %15487 = vst [vmem:[#allocation85_spill] sm:$0xff] %v13052_v47  ;;  %v13058_v26 = vld [vmem:[#allocation2 + $0xa9] sm:$0xff] }
 0x208   : > { %10515 = vmatmul.mubr.msk.f32.gmra.mxu0 %vm2660_vm3, %v13038_v28  ;;  %10569 = vmatprep.mubr.msk.f32.mxu1 %vm2660_vm3, %v12643_v59  ;;  %v13060_v59 = vpop.f32.mrf.mxu0  ;;  %v6325_v47 = vld [vmem:[#allocation2 + $0x30] sm:$0xff] }
 0x209   : > { %10517 = vmatprep.mubr.msk.f32.mxu0 %vm2660_vm3, %v13044_v16  ;;  %15488 = vst [vmem:[#allocation86_spill] sm:$0xff] %v13060_v59  ;;  %v6326_v59 = vld [vmem:[#allocation2 + $0x38] sm:$0xff] }
 0x20b   : > { %10570 = vmatmul.mubr.msk.f32.gmra.mxu1 %vm2660_vm3, %v12651_v14  ;;  %v13066_v14 = vld [vmem:[#allocation2 + $0xb1] sm:$0xff] }
 0x20c   : > { %10518 = vmatmul.mubr.msk.f32.gmra.mxu0 %vm2660_vm3, %v13050_v49  ;;  %10572 = vmatprep.mubr.msk.f32.mxu1 %vm2660_vm3, %v12659_v44  ;;  %v15489_v44 = vld [vmem:[#allocation50_spill] sm:$0xff] }
 0x20d   : > { %10520 = vmatprep.mubr.msk.f32.mxu0 %vm2660_vm3, %v13058_v26 }
 0x20f   : > { %10573 = vmatmul.mubr.msk.f32.gmra.mxu1 %vm2660_vm3, %v12671_v12  ;;  %v15491_v12 = vld [vmem:[#allocation56_spill] sm:$0xff] }
 0x210   : > { %10521 = vmatmul.mubr.msk.f32.gmra.mxu0 %vm2660_vm3, %v13066_v14  ;;  %10575 = vmatprep.mubr.msk.f32.mxu1 %vm2660_vm3, %v15489_v44  ;;  %v13140_v44 = vld [vmem:[#allocation2 + $0x139] sm:$0xff] }
 0x211   : > { %10523 = vmatprep.mubr.msk.f32.mxu0 %vm2660_vm3, %v13074_v55 }
 0x213   : > { %10576 = vmatmul.mubr.msk.f32.gmra.mxu1 %vm2660_vm3, %v15490_v27  ;;  %v15500_v27 = vld [vmem:[#allocation73_spill] sm:$0xff] }
 0x214   : > { %10524 = vmatmul.mubr.msk.f32.gmra.mxu0 %vm2660_vm3, %v13080_v53  ;;  %10578 = vmatprep.mubr.msk.f32.mxu1 %vm2660_vm3, %v15491_v12  ;;  %v13146_v12 = vld [vmem:[#allocation2 + $0x141] sm:$0xff] }
 0x215   : > { %v10372_v62 = vpop.f32.mrf.mxu1  ;;  %v10320_v37 = vpop.f32.mrf.mxu0  ;;  %10526 = vmatprep.mubr.msk.f32.mxu0 %vm2660_vm3, %v13086_v6 }
 0x216   : > { %v13068_v35 = vadd.f32 %v10372_v62, %v10320_v37  ;;  %v13134_v62 = vld [vmem:[#allocation2 + $0x129] sm:$0xff]  ;;  %v15499_v37 = vld [vmem:[#allocation72_spill] sm:$0xff] }
 0x217   : > { %10579 = vmatmul.mubr.msk.f32.gmra.mxu1 %vm2660_vm3, %v15492_v21  ;;  %v13114_v1 = vpop.f32.mrf.mxu1  ;;  %v13120_v60 = vpop.f32.mrf.mxu0  ;;  %v15501_v21 = vld [vmem:[#allocation74_spill] sm:$0xff] }
 0x218   : > { %10527 = vmatmul.mubr.msk.f32.gmra.mxu0 %vm2660_vm3, %v13092_v24  ;;  %10581 = vmatprep.mubr.msk.f32.mxu1 %vm2660_vm3, %v15493_v42  ;;  %v13152_v42 = vld [vmem:[#allocation2 + $0x151] sm:$0xff] }
 0x219   : > { %10529 = vmatprep.mubr.msk.f32.mxu0 %vm2660_vm3, %v13098_v54 }
 0x21b   : > { %10582 = vmatmul.mubr.msk.f32.gmra.mxu1 %vm2660_vm3, %v15494_v39  ;;  %v15502_v39 = vld [vmem:[#allocation77_spill] sm:$0xff] }
 0x21c   : > { %10530 = vmatmul.mubr.msk.f32.gmra.mxu0 %vm2660_vm3, %v13104_v31  ;;  %10584 = vmatprep.mubr.msk.f32.mxu1 %vm2660_vm3, %v15495_v19  ;;  %v13158_v19 = vld [vmem:[#allocation2 + $0x159] sm:$0xff] }
 0x21d   : > { %10532 = vmatprep.mubr.msk.f32.mxu0 %vm2660_vm3, %v13110_v30 }
 0x21f   : > { %10585 = vmatmul.mubr.msk.f32.gmra.mxu1 %vm2660_vm3, %v15496_v45  ;;  %v13164_v45 = vld [vmem:[#allocation2 + $0x169] sm:$0xff] }
 0x220   : > { %10533 = vmatmul.mubr.msk.f32.gmra.mxu0 %vm2660_vm3, %v13118_v3  ;;  %10587 = vmatprep.mubr.msk.f32.mxu1 %vm2660_vm3, %v15497_v48  ;;  %v13170_v48 = vld [vmem:[#allocation2 + $0x171] sm:$0xff] }
 0x221   : > { %10535 = vmatprep.mubr.msk.f32.mxu0 %vm2660_vm3, %v13126_v7 }
 0x223   : > { %10588 = vmatmul.mubr.msk.f32.gmra.mxu1 %vm2660_vm3, %v15498_v2 }
 0x224   : > { %10536 = vmatmul.mubr.msk.f32.gmra.mxu0 %vm2660_vm3, %v13134_v62  ;;  %10590 = vmatprep.mubr.msk.f32.mxu1 %vm2660_vm3, %v15499_v37 }
 0x225   : > { %v10375_v40 = vpop.f32.mrf.mxu1  ;;  %10538 = vmatprep.mubr.msk.f32.mxu0 %vm2660_vm3, %v13140_v44 }
 0x227   : > { %v10323_v8 = vpop.f32.mrf.mxu0  ;;  %10591 = vmatmul.mubr.msk.f32.gmra.mxu1 %vm2660_vm3, %v15500_v27 }
 0x228   : > { %v13130_v17 = vadd.f32 %v10375_v40, %v10323_v8  ;;  %10539 = vmatmul.mubr.msk.f32.gmra.mxu0 %vm2660_vm3, %v13146_v12  ;;  %10593 = vmatprep.mubr.msk.f32.mxu1 %vm2660_vm3, %v15501_v21  ;;  %v13172_v40 = vld [vmem:[#allocation2 + $0x182] sm:$0xff]  ;;  %v13174_v8 = vpop.f32.mrf.mxu1 }
 0x229   : > { %10541 = vmatprep.mubr.msk.f32.mxu0 %vm2660_vm3, %v13152_v42  ;;  %v13182_v58 = vpop.f32.mrf.mxu0 }
 0x22b   : > { %10594 = vmatmul.mubr.msk.f32.gmra.mxu1 %vm2660_vm3, %v15502_v39 }
 0x22c   : > { %10542 = vmatmul.mubr.msk.f32.gmra.mxu0 %vm2660_vm3, %v13158_v19  ;;  %10596 = vmatprep.mubr.msk.f32.mxu1 %vm2660_vm3, %v12841_v46 }
 0x22d   : > { %10544 = vmatprep.mubr.msk.f32.mxu0 %vm2660_vm3, %v13164_v45 }
 0x22f   : > { %10597 = vmatmul.mubr.msk.f32.gmra.mxu1 %vm2660_vm3, %v12872_v10 }
 0x230   : > { %10545 = vmatmul.mubr.msk.f32.gmra.mxu0 %vm2660_vm3, %v13170_v48  ;;  %10599 = vmatprep.mubr.msk.f32.mxu1 %vm2660_vm3, %v13172_v40 }
 0x231   : > { %10547 = vmatprep.mubr.msk.f32.mxu0 %vm2660_vm3, %v13180_v52 }
 0x233   : > { %10600 = vmatmul.mubr.msk.f32.gmra.mxu1 %vm2660_vm3, %v13186_v56 }
 0x234   : > { %10548 = vmatmul.mubr.msk.f32.gmra.mxu0 %vm2660_vm3, %v13190_v29  ;;  %10658 = vmatprep.mubr.msk.f32.mxu1 %vm2660_vm3, %v12933_v9  ;;  %v15503_v9 = vld [vmem:[#allocation38_spill] sm:$0xff] }
 0x235   : > { %v10378_v51 = vpop.f32.mrf.mxu1  ;;  %v10326_v33 = vpop.f32.mrf.mxu0  ;;  %10606 = vmatprep.mubr.msk.f32.mxu0 %vm2660_vm3, %v6325_v47  ;;  %v15507_v47 = vld [vmem:[#allocation40_spill] sm:$0xff] }
 0x236   : > { %v13192_v57 = vadd.f32 %v10378_v51, %v10326_v33  ;;  %v6327_v33 = vld [vmem:[#allocation2 + $0x48] sm:$0xff] }
 0x237   : > { %10659 = vmatmul.mubr.msk.f32.vlgmr.msra.gmra.mxu1 %vm2660_vm3, %v12957_v18  ;;  %v15504_v18 = vld [vmem:[#allocation39_spill] sm:$0xff]  ;;  %v13219_v51 = vpop.f32.mrf.mxu0 }
 0x238   : > { %10607 = vmatmul.mubr.msk.f32.vlgmr.msra.gmra.mxu0 %vm2660_vm3, %v6326_v59  ;;  %10661 = vmatprep.mubr.msk.f32.mxu1 %vm2660_vm3, %v12977_v0  ;;  %v13217_v0 = vpop.f32.mrf.mxu1  ;;  %15506 = vst [vmem:[#allocation54_spill] sm:$0xff] %v13219_v51  ;;  %v15509_v59 = vld [vmem:[#allocation42_spill] sm:$0xff] }
 0x239   : > { %10707 = vmatpush3.msra.mxu0 %v12964_v11  ;;  %10609 = vmatprep.mubr.msk.f32.mxu0 %vm2660_vm3, %v6327_v33  ;;  %15505 = vst [vmem:[#allocation50_spill] sm:$0xff] %v13217_v0  ;;  %v15512_v33 = vld [vmem:[#allocation45_spill] sm:$0xff] }
 0x23a   : > { %10708 = vmatprep.subr.mxu0 %v9456_v50 }
 0x23b   : > { %10662 = vmatmul.mubr.msk.f32.gmra.mxu1 %vm2660_vm3, %v12998_v32  ;;  %10709 = vmatpush3.msra.mxu0 %v9456_v50  ;;  %v15508_v32 = vld [vmem:[#allocation41_spill] sm:$0xff] }
 0x23c   : > { %10610 = vmatmul.mubr.msk.f32.gmra.mxu0 %vm2660_vm3, %v15503_v9  ;;  %10664 = vmatprep.mubr.msk.f32.mxu1 %vm2660_vm3, %v13008_v5  ;;  %v15518_v9 = vld [vmem:[#allocation49_spill] sm:$0xff] }
 0x23d   : > { %10612 = vmatprep.mubr.msk.f32.mxu0 %vm2660_vm3, %v15504_v18 }
 0x23f   : > { %10665 = vmatmul.mubr.msk.f32.gmra.mxu1 %vm2660_vm3, %v13022_v20  ;;  %v15510_v20 = vld [vmem:[#allocation43_spill] sm:$0xff] }
 0x240   : > { %10613 = vmatmul.mubr.msk.f32.gmra.mxu0 %vm2660_vm3, %v15507_v47  ;;  %10667 = vmatprep.mubr.msk.f32.mxu1 %vm2660_vm3, %v13030_v22  ;;  %v15511_v22 = vld [vmem:[#allocation44_spill] sm:$0xff]  ;;  %v15520_v47 = vld [vmem:[#allocation55_spill] sm:$0xff] }
 0x241   : > { %10615 = vmatprep.mubr.msk.f32.mxu0 %vm2660_vm3, %v15508_v32 }
 0x242   : > { %v10381_v11 = vpop.f32.mrf.mxu1 }
 0x243   : > { %v10329_v50 = vpop.f32.mrf.mxu0  ;;  %10668 = vmatmul.mubr.msk.f32.gmra.mxu1 %vm2660_vm3, %v13038_v28  ;;  %v15513_v28 = vld [vmem:[#allocation46_spill] sm:$0xff] }
 0x244   : > { %v13229_v5 = vadd.f32 %v10381_v11, %v10329_v50  ;;  %10616 = vmatmul.mubr.msk.f32.gmra.mxu0 %vm2660_vm3, %v15509_v59  ;;  %10670 = vmatprep.mubr.msk.f32.mxu1 %vm2660_vm3, %v13044_v16  ;;  %v15514_v16 = vld [vmem:[#allocation47_spill] sm:$0xff] }
 0x245   : > { %10618 = vmatprep.mubr.msk.f32.mxu0 %vm2660_vm3, %v15510_v20  ;;  %v6344_v50 = vld [vmem:[#allocation2 + $0x110] sm:$0xff] }
 0x247   : > { %10671 = vmatmul.mubr.msk.f32.gmra.mxu1 %vm2660_vm3, %v13050_v49  ;;  %v13257_v49 = vpop.f32.mrf.mxu1 }
 0x248   : > { %10619 = vmatmul.mubr.msk.f32.gmra.mxu0 %vm2660_vm3, %v15511_v22  ;;  %10673 = vmatprep.mubr.msk.f32.mxu1 %vm2660_vm3, %v13058_v26  ;;  %15515 = vst [vmem:[#allocation56_spill] sm:$0xff] %v13257_v49  ;;  %v15516_v26 = vld [vmem:[#allocation48_spill] sm:$0xff] }
 0x249   : > { %10621 = vmatprep.mubr.msk.f32.mxu0 %vm2660_vm3, %v15512_v33  ;;  %v6350_v22 = vld [vmem:[#allocation2 + $0x158] sm:$0xff] }
 0x24b   : > { %10674 = vmatmul.mubr.msk.f32.gmra.mxu1 %vm2660_vm3, %v13066_v14  ;;  %v13263_v14 = vpop.f32.mrf.mxu0 }
 0x24c   : > { %10622 = vmatmul.mubr.msk.f32.gmra.mxu0 %vm2660_vm3, %v15513_v28  ;;  %10676 = vmatprep.mubr.msk.f32.mxu1 %vm2660_vm3, %v13074_v55  ;;  %15517 = vst [vmem:[#allocation60_spill] sm:$0xff] %v13263_v14 }
 0x24d   : > { %10624 = vmatprep.mubr.msk.f32.mxu0 %vm2660_vm3, %v15514_v16  ;;  %v6743_v16 = vld [vmem:[#allocation2 + $0x199] sm:$0xff] }
 0x24f   : > { %10677 = vmatmul.mubr.msk.f32.gmra.mxu1 %vm2660_vm3, %v13080_v53  ;;  %v15519_v53 = vld [vmem:[#allocation53_spill] sm:$0xff] }
 0x250   : > { %10625 = vmatmul.mubr.msk.f32.gmra.mxu0 %vm2660_vm3, %v15516_v26  ;;  %10679 = vmatprep.mubr.msk.f32.mxu1 %vm2660_vm3, %v13086_v6  ;;  %v15521_v6 = vld [vmem:[#allocation57_spill] sm:$0xff] }
 0x251   : > { %10627 = vmatprep.mubr.msk.f32.mxu0 %vm2660_vm3, %v15518_v9 }
 0x253   : > { %10680 = vmatmul.mubr.msk.f32.gmra.mxu1 %vm2660_vm3, %v13092_v24  ;;  %v15522_v24 = vld [vmem:[#allocation61_spill] sm:$0xff] }
 0x254   : > { %v10384_v55 = vpop.f32.mrf.mxu1  ;;  %v10332_v18 = vpop.f32.mrf.mxu0  ;;  %10628 = vmatmul.mubr.msk.f32.gmra.mxu0 %vm2660_vm3, %v15519_v53  ;;  %10682 = vmatprep.mubr.msk.f32.mxu1 %vm2660_vm3, %v13098_v54  ;;  %v6345_v54 = vld [vmem:[#allocation2 + $0x120] sm:$0xff] }
 0x255   : > { %v13269_v11 = vadd.f32 %v10384_v55, %v10332_v18  ;;  %10630 = vmatprep.mubr.msk.f32.mxu0 %vm2660_vm3, %v15520_v47  ;;  %v6744_v18 = vld [vmem:[#allocation2 + $0x1a1] sm:$0xff] }
 0x256   : > { %v13299_v32 = vpop.f32.mrf.mxu0 }
 0x257   : > { %10683 = vmatmul.mubr.msk.f32.gmra.mxu1 %vm2660_vm3, %v13104_v31  ;;  %v6346_v31 = vld [vmem:[#allocation2 + $0x128] sm:$0xff] }
 0x258   : > { %10631 = vmatmul.mubr.msk.f32.gmra.mxu0 %vm2660_vm3, %v15521_v6  ;;  %10685 = vmatprep.mubr.msk.f32.mxu1 %vm2660_vm3, %v13110_v30  ;;  %v6347_v30 = vld [vmem:[#allocation2 + $0x138] sm:$0xff] }
 0x259   : > { %10633 = vmatprep.mubr.msk.f32.mxu0 %vm2660_vm3, %v15522_v24 }
 0x25b   : > { %10686 = vmatmul.mubr.msk.f32.gmra.mxu1 %vm2660_vm3, %v13118_v3  ;;  %v13296_v3 = vpop.f32.mrf.mxu1 }
 0x25c   : > { %10634 = vmatmul.mubr.msk.f32.gmra.mxu0 %vm2660_vm3, %v6344_v50  ;;  %10688 = vmatprep.mubr.msk.f32.mxu1 %vm2660_vm3, %v13126_v7  ;;  %v6348_v7 = vld [vmem:[#allocation2 + $0x140] sm:$0xff] }
 0x25d   : > { %10636 = vmatprep.mubr.msk.f32.mxu0 %vm2660_vm3, %v6345_v54 }
 0x25f   : > { %10689 = vmatmul.mubr.msk.f32.gmra.mxu1 %vm2660_vm3, %v13134_v62  ;;  %v6349_v62 = vld [vmem:[#allocation2 + $0x150] sm:$0xff] }
 0x260   : > { %10637 = vmatmul.mubr.msk.f32.gmra.mxu0 %vm2660_vm3, %v6346_v31  ;;  %10691 = vmatprep.mubr.msk.f32.mxu1 %vm2660_vm3, %v13140_v44  ;;  %v7102_v31 = vld [vmem:[#allocation2 + $0x3a] sm:$0xff] }
 0x261   : > { %10639 = vmatprep.mubr.msk.f32.mxu0 %vm2660_vm3, %v6347_v30 }
 0x263   : > { %10692 = vmatmul.mubr.msk.f32.gmra.mxu1 %vm2660_vm3, %v13146_v12  ;;  %v6351_v12 = vld [vmem:[#allocation2 + $0x168] sm:$0xff] }
 0x264   : > { %10640 = vmatmul.mubr.msk.f32.gmra.mxu0 %vm2660_vm3, %v6348_v7  ;;  %10694 = vmatprep.mubr.msk.f32.mxu1 %vm2660_vm3, %v13152_v42  ;;  %v6352_v42 = vld [vmem:[#allocation2 + $0x170] sm:$0xff] }
 0x265   : > { %10642 = vmatprep.mubr.msk.f32.mxu0 %vm2660_vm3, %v6349_v62  ;;  %v7103_v7 = vld [vmem:[#allocation2 + $0x4a] sm:$0xff] }
 0x266   : > { %v10387_v59 = vpop.f32.mrf.mxu1  ;;  %v10335_v20 = vpop.f32.mrf.mxu0 }
 0x267   : > { %v13307_v44 = vadd.f32 %v10387_v59, %v10335_v20  ;;  %10695 = vmatmul.mubr.msk.f32.gmra.mxu1 %vm2660_vm3, %v13158_v19  ;;  %v15523_v19 = vld [vmem:[#allocation78_spill] sm:$0xff] }
 0x268   : > { %10643 = vmatmul.mubr.msk.f32.gmra.mxu0 %vm2660_vm3, %v6350_v22  ;;  %10697 = vmatprep.mubr.msk.f32.mxu1 %vm2660_vm3, %v13164_v45  ;;  %v13320_v33 = vpop.f32.mrf.mxu1  ;;  %v13324_v28 = vpop.f32.mrf.mxu0 }
 0x269   : > { %10645 = vmatprep.mubr.msk.f32.mxu0 %vm2660_vm3, %v6351_v12  ;;  %v7104_v12 = vld [vmem:[#allocation2 + $0x52] sm:$0xff] }
 0x26b   : > { %10698 = vmatmul.mubr.msk.f32.gmra.mxu1 %vm2660_vm3, %v13170_v48  ;;  %v6355_v48 = vld [vmem:[#allocation2 + $0x198] sm:$0xff] }
 0x26c   : > { %10646 = vmatmul.mubr.msk.f32.gmra.mxu0 %vm2660_vm3, %v6352_v42  ;;  %10700 = vmatprep.mubr.msk.f32.mxu1 %vm2660_vm3, %v13180_v52 }
 0x26d   : > { %10648 = vmatprep.mubr.msk.f32.mxu0 %vm2660_vm3, %v15523_v19 }
 0x26f   : > { %v10390_v45 = vpop.f32.mrf.mxu1  ;;  %10701 = vmatmul.mubr.msk.f32.gmra.mxu1 %vm2660_vm3, %v13190_v29  ;;  %v10338_v26 = vpop.f32.mrf.mxu0  ;;  %v6356_v29 = vld [vmem:[#allocation2 + $0x1a0] sm:$0xff] }
 0x270   : > { %10649 = vmatmul.mubr.msk.f32.gmra.mxu0 %vm2660_vm3, %v12856_v61  ;;  %10703 = vmatprep.mubr.msk.f32.mxu1 %vm2660_vm3, %v6743_v16  ;;  %v13331_v52 = vadd.f32 %v10390_v45, %v10338_v26  ;;  %v7101_v61 = vld [vmem:[#allocation2 + $0x32] sm:$0xff]  ;;  %v7105_v45 = vld [vmem:[#allocation2 + $0x62] sm:$0xff] }
 0x271   : > { %v13333_v9 = vpop.f32.mrf.mxu1  ;;  %10651 = vmatprep.mubr.msk.f32.mxu0 %vm2660_vm3, %v6355_v48  ;;  %v13336_v55 = vpop.f32.mrf.mxu0 }
 0x273   : > { %v10393_v53 = vpop.f32.mrf.mxu1  ;;  %10704 = vmatmul.mubr.msk.f32.gmra.mxu1 %vm2660_vm3, %v6744_v18  ;;  %v10341_v47 = vpop.f32.mrf.mxu0  ;;  %v7106_v18 = vld [vmem:[#allocation2 + $0x6a] sm:$0xff] }
 0x274   : > { %10652 = vmatmul.mubr.msk.f32.gmra.mxu0 %vm2660_vm3, %v6356_v29  ;;  %v13340_v6 = vadd.f32 %v10393_v53, %v10341_v47  ;;  %v7107_v47 = vld [vmem:[#allocation2 + $0x7a] sm:$0xff] }
 0x275   : > { %v13342_v24 = vpop.f32.mrf.mxu1  ;;  %10710 = vmatprep.mubr.msk.f32.mxu0 %vm2660_vm3, %v7101_v61  ;;  %v13345_v50 = vpop.f32.mrf.mxu0 }
 0x277   : > { %v10452_v54 = vpop.f32.mrf.mxu1  ;;  %v10400_v30 = vpop.f32.mrf.mxu0 }
 0x278   : > { %10711 = vmatmul.mubr.msk.f32.vlgmr.msra.gmra.mxu0 %vm2660_vm3, %v7102_v31  ;;  %v5128_v59 = vadd.f32 %v10400_v30, %v12845_v43 }
 0x279   : > { %v13349_v62 = vpop.f32.mrf.mxu1  ;;  %10713 = vmatprep.mubr.msk.f32.mxu0 %vm2660_vm3, %v7103_v7  ;;  %v13352_v20 = vpop.f32.mrf.mxu0  ;;  %v7108_v7 = vld [vmem:[#allocation2 + $0x82] sm:$0xff] }
 0x27a   : > { %15524 = vst [vmem:[#allocation62_spill] sm:$0xff] %v13349_v62  ;;  %15525 = vst [vmem:[#allocation63_spill] sm:$0xff] %v13352_v20  ;;  %v13354_v42 = vadd.f32 %v10452_v54, %v5128_v59  ;;  %v7120_v62 = vld [vmem:[#allocation2 + $0x112] sm:$0xff] }
 0x27b   : > { %v10455_v22 = vpop.f32.mrf.mxu1  ;;  %v10403_v19 = vpop.f32.mrf.mxu0 }
 0x27c   : > { %10714 = vmatmul.mubr.msk.f32.gmra.mxu0 %vm2660_vm3, %v7104_v12  ;;  %v5130_v16 = vadd.f32 %v10403_v19, %v12860_v23  ;;  %v8137_v23 = vld [vmem:[%s15296_s7 + $0x8] sm:$0xff] }
 0x27d   : > { %v13358_v26 = vpop.f32.mrf.mxu1  ;;  %10716 = vmatprep.mubr.msk.f32.mxu0 %vm2660_vm3, %v7105_v45  ;;  %v13361_v43 = vpop.f32.mrf.mxu0  ;;  %10758 = vmatprep.subr.mxu1 %v8137_v23 }
 0x27e   : > { %15526 = vst [vmem:[#allocation64_spill] sm:$0xff] %v13358_v26  ;;  %15527 = vst [vmem:[#allocation67_spill] sm:$0xff] %v13361_v43  ;;  %v13363_v53 = vadd.f32 %v10455_v22, %v5130_v16  ;;  %10759 = vmatpush3.msra.mxu1 %v8137_v23 }
 0x27f   : > { %v10458_v48 = vpop.f32.mrf.mxu1 }
 0x280   : > { %v10406_v29 = vpop.f32.mrf.mxu0  ;;  %10717 = vmatmul.mubr.msk.f32.gmra.mxu0 %vm2660_vm3, %v7106_v18  ;;  %v7110_v18 = vld [vmem:[#allocation2 + $0x9a] sm:$0xff] }
 0x281   : > { %v5132_v61 = vadd.f32 %v10406_v29, %v12888_v34  ;;  %v13367_v54 = vpop.f32.mrf.mxu1  ;;  %10719 = vmatprep.mubr.msk.f32.mxu0 %vm2660_vm3, %v7107_v47  ;;  %v7109_v34 = vld [vmem:[#allocation2 + $0x92] sm:$0xff] }
 0x282   : > { %15528 = vst [vmem:[#allocation68_spill] sm:$0xff] %v13367_v54  ;;  %v13373_v31 = vpop.f32.mrf.mxu0 }
 0x283   : > { %15529 = vst [vmem:[#allocation71_spill] sm:$0xff] %v13373_v31  ;;  %v10461_v30 = vpop.f32.mrf.mxu1  ;;  %v13375_v59 = vadd.f32 %v10458_v48, %v5132_v61  ;;  %v7111_v48 = vld [vmem:[#allocation2 + $0xaa] sm:$0xff] }
 0x284   : > { %v10409_v22 = vpop.f32.mrf.mxu0  ;;  %10720 = vmatmul.mubr.msk.f32.gmra.mxu0 %vm2660_vm3, %v7108_v7 }
 0x285   : > { %v5134_v12 = vadd.f32 %v10409_v22, %v12904_v15  ;;  %v13379_v19 = vpop.f32.mrf.mxu1  ;;  %10722 = vmatprep.mubr.msk.f32.mxu0 %vm2660_vm3, %v7109_v34  ;;  %v7112_v22 = vld [vmem:[#allocation2 + $0xb2] sm:$0xff] }
 0x286   : > { %15530 = vst [vmem:[#allocation72_spill] sm:$0xff] %v13379_v19  ;;  %v13382_v45 = vpop.f32.mrf.mxu0 }
 0x287   : > { %15531 = vst [vmem:[#allocation73_spill] sm:$0xff] %v13382_v45  ;;  %v10464_v16 = vpop.f32.mrf.mxu1  ;;  %v13384_v29 = vadd.f32 %v10461_v30, %v5134_v12  ;;  %v7113_v30 = vld [vmem:[#allocation2 + $0xc2] sm:$0xff] }
 0x288   : > { %v10412_v47 = vpop.f32.mrf.mxu0  ;;  %10723 = vmatmul.mubr.msk.f32.gmra.mxu0 %vm2660_vm3, %v7110_v18 }
 0x289   : > { %v5136_v61 = vadd.f32 %v10412_v47, %v12913_v38  ;;  %v13388_v23 = vpop.f32.mrf.mxu1  ;;  %10725 = vmatprep.mubr.msk.f32.mxu0 %vm2660_vm3, %v7111_v48  ;;  %v7114_v48 = vld [vmem:[#allocation2 + $0xca] sm:$0xff] }
 0x28a   : > { %15532 = vst [vmem:[#allocation74_spill] sm:$0xff] %v13388_v23  ;;  %v13391_v15 = vpop.f32.mrf.mxu0 }
 0x28b   : > { %15533 = vst [vmem:[#allocation77_spill] sm:$0xff] %v13391_v15  ;;  %v10467_v7 = vpop.f32.mrf.mxu1  ;;  %v13393_v34 = vadd.f32 %v10464_v16, %v5136_v61  ;;  %v15536_v15 = vld [vmem:[#allocation23_spill] sm:$0xff] }
 0x28c   : > { %v10415_v19 = vpop.f32.mrf.mxu0  ;;  %10726 = vmatmul.mubr.msk.f32.gmra.mxu0 %vm2660_vm3, %v7112_v22  ;;  %v3170_v16 = vcombine.high %v15536_v15, %v15536_v15  ;;  %v7115_v22 = vld [vmem:[#allocation2 + $0xda] sm:$0xff] }
 0x28d   : > { %v5138_v12 = vadd.f32 %v10415_v19, %v12915_v4  ;;  %v13397_v18 = vpop.f32.mrf.mxu1  ;;  %10728 = vmatprep.mubr.msk.f32.mxu0 %vm2660_vm3, %v7113_v30 }
 0x28e   : > { %15534 = vst [vmem:[#allocation38_spill] sm:$0xff] %v13397_v18  ;;  %v13400_v38 = vpop.f32.mrf.mxu0  ;;  %v7116_v18 = vld [vmem:[#allocation2 + $0xe2] sm:$0xff] }
 0x28f   : > { %15535 = vst [vmem:[#allocation39_spill] sm:$0xff] %v13400_v38  ;;  %v10470_v47 = vpop.f32.mrf.mxu1  ;;  %v13402_v23 = vadd.f32 %v10467_v7, %v5138_v12  ;;  %v13416_v7 = vrot.slane %v3170_v16, %v11747_v13  ;;  %v7117_v12 = vld [vmem:[#allocation2 + $0xf2] sm:$0xff] }
 0x290   : > { %v10418_v61 = vpop.f32.mrf.mxu0  ;;  %10729 = vmatmul.mubr.msk.f32.gmra.mxu0 %vm2660_vm3, %v7114_v48  ;;  %v15539_v48 = vld [vmem:[#allocation3_spill] sm:$0xff] }
 0x291   : > { %v5140_v54 = vadd.f32 %v10418_v61, %v12926_v25  ;;  %v13408_v4 = vpop.f32.mrf.mxu1  ;;  %10731 = vmatprep.mubr.msk.f32.mxu0 %vm2660_vm3, %v7115_v22  ;;  %v13422_v25 = vld [vmem:[%s15293_s4] ss:$0 sm:$0xff]  ;;  %v3186_v26 = vcombine.high %v13416_v7, %v13416_v7 }
 0x292   : > { %15537 = vst [vmem:[#allocation40_spill] sm:$0xff] %v13408_v4  ;;  %v13411_v19 = vpop.f32.mrf.mxu0  ;;  %v2851_v61 = vadd.f32 %v13422_v25, %v15539_v48 }
 0x293   : > { %15538 = vst [vmem:[#allocation41_spill] sm:$0xff] %v13411_v19  ;;  %v10473_v30 = vpop.f32.mrf.mxu1  ;;  %v13413_v38 = vadd.f32 %v10470_v47, %v5140_v54  ;;  %v15542_v47 = vld [vmem:[#allocation4_spill] sm:$0xff]  ;;  %v3755_v20 = vrot.slane %v3186_v26, 7 }
 0x294   : > { %v10421_v15 = vpop.f32.mrf.mxu0  ;;  %10732 = vmatmul.mubr.msk.f32.gmra.mxu0 %vm2660_vm3, %v7116_v18  ;;  %v2856_v18 = vadd.f32 %v13422_v25, %v15542_v47  ;;  %v7118_v19 = vld [vmem:[#allocation2 + $0xfa] sm:$0xff]  ;;  %v3194_v63 = vrot.slane %v2851_v61, %v11747_v13 }
 0x295   : > { %v5142_v22 = vadd.f32 %v10421_v15, %v12989_v41  ;;  %v13427_v4 = vpop.f32.mrf.mxu1  ;;  %10734 = vmatprep.mubr.msk.f32.mxu0 %vm2660_vm3, %v7117_v12  ;;  %v7119_v41 = vld [vmem:[#allocation2 + $0x10a] sm:$0xff]  ;;  %v3187_v15 = vcombine.high %v2851_v61, %v2851_v61  ;;  %v3757_v51 = vrot.slane %v3755_v20, 2 }
 0x296   : > { %15540 = vst [vmem:[#allocation42_spill] sm:$0xff] %v13427_v4  ;;  %v13430_v54 = vpop.f32.mrf.mxu0  ;;  %v15544_v4 = vld [vmem:[#allocation25_spill] sm:$0xff] }
 0x297   : > { %15541 = vst [vmem:[#allocation43_spill] sm:$0xff] %v13430_v54  ;;  %v10476_v16 = vpop.f32.mrf.mxu1  ;;  %v13434_v45 = vadd.f32 %v10473_v30, %v5142_v22  ;;  %v3185_v47 = vcombine.high %v15544_v4, %v15544_v4  ;;  %v3204_v30 = vcombine.high %v2856_v18, %v2856_v18 }
 0x298   : > { %v10424_v31 = vpop.f32.mrf.mxu0  ;;  %10735 = vmatmul.mubr.msk.f32.gmra.mxu0 %vm2660_vm3, %v7118_v19  ;;  %v3752_v19 = vrot.slane %v13416_v7, 7 }
 0x299   : > { %v5144_v48 = vadd.f32 %v10424_v31, %v13068_v35  ;;  %v13440_v12 = vpop.f32.mrf.mxu1  ;;  %10737 = vmatprep.mubr.msk.f32.mxu0 %vm2660_vm3, %v7119_v41  ;;  %v7121_v31 = vld [vmem:[#allocation2 + $0x122] sm:$0xff]  ;;  %v13453_v41 = vrot.slane %v3187_v15, %v11747_v13  ;;  %v13466_v61 = vrot.slane %v3204_v30, %v11747_v13 }
 0x29a   : > { %15543 = vst [vmem:[#allocation44_spill] sm:$0xff] %v13440_v12  ;;  %v13445_v54 = vpop.f32.mrf.mxu0  ;;  %v3754_v15 = vrot.slane %v3752_v19, 2 }
 0x29b   : > { %v10479_v22 = vpop.f32.mrf.mxu1  ;;  %v13447_v43 = vadd.f32 %v10476_v16, %v5144_v48  ;;  %v13459_v16 = vrot.slane %v3185_v47, 7  ;;  %v15548_v48 = vld [vmem:[#allocation5_spill] sm:$0xff]  ;;  %v3202_v47 = vcombine.high %v3194_v63, %v3194_v63 }
 0x29c   : > { %v10427_v35 = vpop.f32.mrf.mxu0  ;;  %10738 = vmatmul.mubr.msk.f32.gmra.mxu0 %vm2660_vm3, %v7120_v62  ;;  %v2861_v26 = vadd.f32 %v13422_v25, %v15548_v48  ;;  %v3203_v48 = vcombine.high %v13453_v41, %v13453_v41 }
 0x29d   : > { %15545 = vst [vmem:[#allocation45_spill] sm:$0xff] %v13447_v43  ;;  %v5146_v49 = vadd.f32 %v10427_v35, %v13130_v17  ;;  %v13456_v14 = vpop.f32.mrf.mxu1  ;;  %10740 = vmatprep.mubr.msk.f32.mxu0 %vm2660_vm3, %v7121_v31  ;;  %15547 = vst [vmem:[#allocation47_spill] sm:$0xff] %v13459_v16  ;;  %v3758_v17 = vrot.slane %v3194_v63, 7  ;;  %v13471_v35 = vrot.slane %v2856_v18, %v11747_v13  ;;  %v15552_v18 = vrot.slane %v15544_v4, 7 }
 0x29e   : > { %15546 = vst [vmem:[#allocation46_spill] sm:$0xff] %v13456_v14  ;;  %v13463_v7 = vpop.f32.mrf.mxu0  ;;  %v3751_v63 = vrot.slane %v13459_v16, 2  ;;  %v3228_v12 = vrot.slane %v2861_v26, %v11747_v13  ;;  %v9174_v43 = vrot.slane %v3202_v47, 9 }
 0x29f   : > { %15549 = vst [vmem:[#allocation48_spill] sm:$0xff] %v13463_v7  ;;  %v10482_v62 = vpop.f32.mrf.mxu1  ;;  %v13468_v0 = vadd.f32 %v10479_v22, %v5146_v49  ;;  %v8136_v49 = vld [vmem:[%s15296_s7] sm:$0xff]  ;;  %v13487_v22 = vrot.slane %v15552_v18, 2  ;;  %v3759_v4 = vsel %vm12113_vm11, %v3757_v51, %v3758_v17  ;;  %v3219_v18 = vcombine.high %v13471_v35, %v13471_v35 }
 0x2a0   : > { %v10430_v31 = vpop.f32.mrf.mxu0  ;;  %10741 = vmatmul.mubr.msk.f32.gmra.mxu0 %vm2660_vm3, %v15498_v2  ;;  %v3221_v2 = vcombine.high %v2861_v26, %v2861_v26  ;;  %10760 = vmatprep.subr.mxu1 %v8136_v49  ;;  %v13505_v7 = vrot.slane %v3203_v48, 7 }
 0x2a1   : > { %15550 = vst [vmem:[#allocation49_spill] sm:$0xff] %v13468_v0  ;;  %v5148_v30 = vadd.f32 %v10430_v31, %v13192_v57  ;;  %v13478_v14 = vpop.f32.mrf.mxu1  ;;  %10743 = vmatprep.mubr.msk.f32.mxu0 %vm2660_vm3, %v15499_v37  ;;  %v3220_v57 = vcombine.high %v13466_v61, %v13466_v61  ;;  %10761 = vmatpush3.msra.mxu1 %v8136_v49  ;;  %v3771_v48 = vrot.slane %v3219_v18, 7  ;;  %v3774_v18 = vrot.slane %v13466_v61, 7 }
 0x2a2   : > { %15551 = vst [vmem:[#allocation53_spill] sm:$0xff] %v13478_v14  ;;  %v13490_v0 = vpop.f32.mrf.mxu0  ;;  %v3756_v37 = vsel %vm12113_vm11, %v3754_v15, %v3755_v20  ;;  %v13518_v20 = vsel %vm12113_vm11, %v3751_v63, %v3752_v19  ;;  %v13522_v26 = vrot.slane %v3221_v2, %v11747_v13  ;;  %v3236_v49 = vcombine.high %v3228_v12, %v3228_v12  ;;  %v15555_v63 = vld [vmem:[#allocation6_spill] sm:$0xff] }
 0x2a3   : > { %15553 = vst [vmem:[#allocation55_spill] sm:$0xff] %v13490_v0  ;;  %v10485_v31 = vpop.f32.mrf.mxu1  ;;  %v13494_v14 = vadd.f32 %v10482_v62, %v5148_v30  ;;  %v13527_v15 = vcombine.low %v3756_v37, %v3759_v4  ;;  %v3780_v19 = vrot.slane %v3228_v12, 7  ;;  %v3767_v2 = vrot.slane %v13505_v7, 2 }
 0x2a4   : > { %v10433_v0 = vpop.f32.mrf.mxu0  ;;  %10744 = vmatmul.mubr.msk.f32.gmra.mxu0 %vm2660_vm3, %v15500_v27  ;;  %v3768_v27 = vrot.slane %v13471_v35, 7  ;;  %v2866_v35 = vadd.f32 %v13422_v25, %v15555_v63  ;;  %v3773_v4 = vrot.slane %v3771_v48, 2 }
 0x2a5   : > { %v5150_v62 = vadd.f32 %v10433_v0, %v13229_v5  ;;  %v13508_v30 = vpop.f32.mrf.mxu1  ;;  %10746 = vmatprep.mubr.msk.f32.mxu0 %vm2660_vm3, %v15501_v21  ;;  %v3762_v5 = vrot.slane %v13453_v41, 7  ;;  %15554 = vst [vmem:[#allocation57_spill] sm:$0xff] %v13527_v15  ;;  %v13529_v21 = vrot.slane %v3220_v57, 7  ;;  %v4733_v57 = vadd.f32 %v13296_v3, %v13299_v32 }
 0x2a6   : > { %v13524_v0 = vpop.f32.mrf.mxu0  ;;  %v3770_v12 = vrot.slane %v3768_v27, 2  ;;  %v3769_v61 = vsel %vm12113_vm11, %v3767_v2, %v3768_v27 }
 0x2a7   : > { %v10488_v17 = vpop.f32.mrf.mxu1  ;;  %v13531_v47 = vadd.f32 %v10485_v31, %v5150_v62  ;;  %v13539_v41 = vsel %vm12113_vm11, %v9174_v43, %v3762_v5  ;;  %v13550_v62 = vrot.slane %v3762_v5, 2  ;;  %v3779_v63 = vrot.slane %v13529_v21, 2 }
 0x2a8   : > { %v10436_v51 = vpop.f32.mrf.mxu0  ;;  %10747 = vmatmul.mubr.msk.f32.gmra.mxu0 %vm2660_vm3, %v15502_v39  ;;  %15556 = vst [vmem:[#allocation61_spill] sm:$0xff] %v13539_v41  ;;  %v3237_v39 = vcombine.high %v13522_v26, %v13522_v26  ;;  %v3238_v41 = vcombine.high %v2866_v35, %v2866_v35  ;;  %v4743_v5 = vadd.f32 %v13320_v33, %v13324_v28  ;;  %v15558_v33 = vld [vmem:[#allocation7_spill] sm:$0xff] }
 0x2a9   : > { %v5152_v31 = vadd.f32 %v10436_v51, %v13269_v11  ;;  %v5477_v37 = vpop.f32.mrf.mxu1  ;;  %10749 = vmatprep.mubr.msk.f32.mxu0 %vm2660_vm3, %v12841_v46  ;;  %v3782_v11 = vrot.slane %v3780_v19, 2  ;;  %v3783_v51 = vrot.slane %v3236_v49, 7  ;;  %v3245_v46 = vrot.slane %v2866_v35, %v11747_v13 }
 0x2aa   : > { %v5088_v43 = vpop.f32.mrf.mxu0  ;;  %v3772_v49 = vsel %vm12113_vm11, %v3770_v12, %v3771_v48  ;;  %v13573_v35 = vrot.slane %v3774_v18, 2  ;;  %v3787_v27 = vrot.slane %v3237_v39, 7  ;;  %v2871_v28 = vadd.f32 %v13422_v25, %v15558_v33  ;;  %v15559_v12 = vld [vmem:[#allocation9_spill] sm:$0xff] }
 0x2ab   : > { %v5151_v15 = vadd.f32 %v5088_v43, %v4733_v57  ;;  %v10491_v3 = vpop.f32.mrf.mxu1  ;;  %v13553_v32 = vadd.f32 %v10488_v17, %v5152_v31  ;;  %v3784_v48 = vsel %vm12113_vm11, %v3782_v11, %v3783_v51  ;;  %v13584_v31 = vrot.slane %v3238_v41, %v11747_v13 }
 0x2ac   : > { %v10439_v16 = vpop.f32.mrf.mxu0  ;;  %10750 = vmatmul.mubr.msk.f32.gmra.mxu0 %vm2660_vm3, %v12872_v10  ;;  %v13571_v10 = vsel %vm12113_vm11, %v3773_v4, %v3774_v18  ;;  %v2876_v4 = vadd.f32 %v13422_v25, %v15559_v12  ;;  %v13590_v39 = vcombine.low %v3769_v61, %v3772_v49  ;;  %v9175_v51 = vrot.slane %v13522_v26, 9 }
 0x2ad   : > { %v5154_v57 = vadd.f32 %v10439_v16, %v13307_v44  ;;  %v5487_v43 = vpop.f32.mrf.mxu1  ;;  %10752 = vmatprep.mubr.msk.f32.mxu0 %vm2660_vm3, %v13172_v40  ;;  %v13565_v17 = vadd.f32 %v5477_v37, %v5151_v15  ;;  %15557 = vst [vmem:[#allocation78_spill] sm:$0xff] %v13571_v10  ;;  %v3781_v44 = vsel %vm12113_vm11, %v3779_v63, %v3780_v19  ;;  %v7131_v19 = vld [vmem:[#allocation2 + $0x19a] sm:$0xff] }
 0x2ae   : > { %v5098_v2 = vpop.f32.mrf.mxu0  ;;  %v3253_v37 = vcombine.high %v3245_v46, %v3245_v46  ;;  %15560 = vst [vmem:[#allocation23_spill] sm:$0xff] %v13590_v39  ;;  %v4753_v63 = vadd.f32 %v13333_v9, %v13336_v55  ;;  %v13601_v61 = vcombine.low %v3781_v44, %v3784_v48  ;;  %v3262_v49 = vrot.slane %v2871_v28, %v11747_v13 }
 0x2af   : > { %v5153_v40 = vadd.f32 %v5098_v2, %v4743_v5  ;;  %v10494_v16 = vpop.f32.mrf.mxu1  ;;  %v13579_v15 = vadd.f32 %v10491_v3, %v5154_v57  ;;  %v3789_v5 = vrot.slane %v3787_v27, 2  ;;  %v3254_v57 = vcombine.high %v13584_v31, %v13584_v31 }
 0x2b0   : > { %v10442_v18 = vpop.f32.mrf.mxu0  ;;  %10753 = vmatmul.mubr.msk.f32.gmra.mxu0 %vm2660_vm3, %v13186_v56  ;;  %v3790_v56 = vrot.slane %v3245_v46, 7  ;;  %15561 = vst [vmem:[#allocation3_spill] sm:$0xff] %v13601_v61  ;;  %v13606_v12 = vrot.slane %v3253_v37, 7  ;;  %v3255_v26 = vcombine.high %v2871_v28, %v2871_v28  ;;  %v3272_v46 = vcombine.high %v2876_v4, %v2876_v4 }
 0x2b1   : > { %v5156_v3 = vadd.f32 %v10442_v18, %v13331_v52  ;;  %v5497_v11 = vpop.f32.mrf.mxu1  ;;  %10755 = vmatprep.mubr.msk.f32.mxu0 %vm2660_vm3, %v7131_v19  ;;  %v13596_v41 = vadd.f32 %v5487_v43, %v5153_v40  ;;  %v7132_v52 = vld [vmem:[#allocation2 + $0x1a2] sm:$0xff]  ;;  %v3796_v43 = vrot.slane %v13584_v31, 7  ;;  %v13610_v40 = vrot.slane %v2876_v4, %v11747_v13 }
 0x2b2   : > { %v5108_v2 = vpop.f32.mrf.mxu0  ;;  %15562 = vst [vmem:[#allocation4_spill] sm:$0xff] %v13606_v12  ;;  %v4763_v44 = vadd.f32 %v13342_v24, %v13345_v50  ;;  %v13620_v37 = vsel %vm12113_vm11, %v9175_v51, %v3787_v27  ;;  %v13624_v28 = vsel %vm12113_vm11, %v3789_v5, %v3790_v56  ;;  %v13626_v31 = vrot.slane %v3790_v56, 2  ;;  %v15567_v5 = vld [vmem:[#allocation10_spill] sm:$0xff] }
 0x2b3   : > { %v5155_v9 = vadd.f32 %v5108_v2, %v4753_v63  ;;  %v10497_v55 = vpop.f32.mrf.mxu1  ;;  %v13604_v33 = vadd.f32 %v10494_v16, %v5156_v3  ;;  %15563 = vst [vmem:[#allocation25_spill] sm:$0xff] %v13620_v37  ;;  %15564 = vst [vmem:[#allocation5_spill] sm:$0xff] %v13624_v28  ;;  %v3799_v63 = vrot.slane %v3254_v57, 7  ;;  %v3798_v3 = vrot.slane %v3796_v43, 2 }
 0x2b4   : > { %v10445_v18 = vpop.f32.mrf.mxu0  ;;  %10756 = vmatmul.mubr.msk.f32.gmra.mxu0 %vm2660_vm3, %v7132_v52  ;;  %15565 = vst [vmem:[#allocation6_spill] sm:$0xff] %v13626_v31  ;;  %v3270_v2 = vcombine.high %v3262_v49, %v3262_v49  ;;  %v3269_v27 = vrot.slane %v3255_v26, %v11747_v13  ;;  %v3287_v51 = vcombine.high %v13610_v40, %v13610_v40  ;;  %v15568_v52 = vld [vmem:[#allocation12_spill] sm:$0xff] }
 0x2b5   : > { %v5158_v48 = vadd.f32 %v10445_v18, %v13340_v6  ;;  %v5507_v19 = vpop.f32.mrf.mxu1  ;;  %v13616_v16 = vadd.f32 %v5497_v11, %v5155_v9  ;;  %v3795_v11 = vrot.slane %v13606_v12, 2  ;;  %v2881_v56 = vadd.f32 %v13422_v25, %v15567_v5 }
 0x2b6   : > { %v5118_v4 = vpop.f32.mrf.mxu0  ;;  %v3286_v57 = vrot.slane %v3272_v46, %v11747_v13  ;;  %v2886_v18 = vadd.f32 %v13422_v25, %v15568_v52  ;;  %v3802_v46 = vrot.slane %v3262_v49, 7  ;;  %v3271_v52 = vcombine.high %v3269_v27, %v3269_v27 }
 0x2b7   : > { %v5157_v24 = vadd.f32 %v5118_v4, %v4763_v44  ;;  %v13628_v50 = vpop.f32.mrf.mxu1  ;;  %v13630_v6 = vadd.f32 %v10497_v55, %v5158_v48  ;;  %v3801_v4 = vrot.slane %v3799_v63, 2  ;;  %v13656_v39 = vrot.slane %v3270_v2, 7 }
 0x2b8   : > { %15566 = vst [vmem:[#allocation7_spill] sm:$0xff] %v13628_v50  ;;  %v10504_v9 = vpop.f32.mrf.mxu0  ;;  %v13665_v26 = vsel %vm12113_vm11, %v3795_v11, %v3796_v43  ;;  %v3296_v5 = vrot.slane %v2881_v56, %v11747_v13  ;;  %v13669_v49 = vrot.slane %v2886_v18, %v11747_v13  ;;  %v3800_v2 = vsel %vm12113_vm11, %v3798_v3, %v3799_v63 }
 0x2b9   : > { %v13642_v44 = vadd.f32 %v10504_v9, %v13354_v42  ;;  %v13644_v55 = vpop.f32.mrf.mxu1  ;;  %v13646_v48 = vadd.f32 %v5507_v19, %v5157_v24  ;;  %15572 = vst [vmem:[#allocation87_spill] sm:$0xff] %v13656_v39  ;;  %v3812_v42 = vrot.slane %v13610_v40, 7  ;;  %v15573_v9 = vld [vmem:[#allocation15_spill] sm:$0xff]  ;;  %15575 = vst [vmem:[#allocation88_spill] sm:$0xff] %v13665_v26  ;;  %v3288_v40 = vcombine.high %v3286_v57, %v3286_v57 }
 0x2ba   : > { %15570 = vst [vmem:[#allocation10_spill] sm:$0xff] %v13644_v55  ;;  %v13654_v50 = vpop.f32.mrf.mxu0  ;;  %v2891_v19 = vadd.f32 %v13422_v25, %v15573_v9  ;;  %v3815_v55 = vrot.slane %v3287_v51, 7  ;;  %v3803_v43 = vsel %vm12113_vm11, %v3801_v4, %v3802_v46  ;;  %v13680_v11 = vrot.slane %v3802_v46, 2 }
 0x2bb   : > { %15569 = vst [vmem:[#allocation9_spill] sm:$0xff] %v13642_v44  ;;  %15571 = vst [vmem:[#allocation12_spill] sm:$0xff] %v13654_v50  ;;  %v13661_v24 = vpop.f32.mrf.mxu1  ;;  %v3306_v50 = vcombine.high %v2886_v18, %v2886_v18  ;;  %v3808_v51 = vrot.slane %v3269_v27, 7  ;;  %v3289_v28 = vcombine.high %v2881_v56, %v2881_v56  ;;  %v3807_v61 = vrot.slane %v13656_v39, 2  ;;  %v15581_v56 = vld [vmem:[#allocation16_spill] sm:$0xff] }
 0x2bc   : > { %15574 = vst [vmem:[#allocation15_spill] sm:$0xff] %v13661_v24  ;;  %v10507_v44 = vpop.f32.mrf.mxu0  ;;  %v9176_v12 = vrot.slane %v3271_v52, 9  ;;  %v3814_v63 = vrot.slane %v3812_v42, 2  ;;  %v3323_v3 = vcombine.high %v2891_v19, %v2891_v19  ;;  %v13689_v46 = vrot.slane %v3288_v40, 7 }
 0x2bd   : > { %v13674_v9 = vadd.f32 %v10507_v44, %v13363_v53  ;;  %v13676_v24 = vpop.f32.mrf.mxu1  ;;  %v3817_v53 = vrot.slane %v3815_v55, 2  ;;  %v3818_v44 = vrot.slane %v3286_v57, 7  ;;  %v3320_v27 = vrot.slane %v3306_v50, %v11747_v13 }
 0x2be   : > { %15577 = vst [vmem:[#allocation90_spill] sm:$0xff] %v13676_v24  ;;  %v13682_v37 = vpop.f32.mrf.mxu0  ;;  %v3321_v24 = vcombine.high %v13669_v49, %v13669_v49  ;;  %15580 = vst [vmem:[#allocation93_spill] sm:$0xff] %v13689_v46  ;;  %v3303_v40 = vrot.slane %v3289_v28, %v11747_v13  ;;  %v3824_v26 = vrot.slane %v3296_v5, 7  ;;  %v3813_v50 = vsel %vm12113_vm11, %v9176_v12, %v3812_v42 }
 0x2bf   : > { %15576 = vst [vmem:[#allocation89_spill] sm:$0xff] %v13674_v9  ;;  %15578 = vst [vmem:[#allocation91_spill] sm:$0xff] %v13682_v37  ;;  %v13685_v18 = vpop.f32.mrf.mxu1  ;;  %v3304_v9 = vcombine.high %v3296_v5, %v3296_v5  ;;  %v2896_v37 = vadd.f32 %v13422_v25, %v15581_v56  ;;  %v13714_v56 = vrot.slane %v3323_v3, %v11747_v13  ;;  %v13722_v28 = vrot.slane %v3818_v44, 2 }
 0x2c0   : > { %15579 = vst [vmem:[#allocation92_spill] sm:$0xff] %v13685_v18  ;;  %v10510_v4 = vpop.f32.mrf.mxu0  ;;  %v13703_v18 = vcombine.low %v3800_v2, %v3803_v43  ;;  %v13720_v2 = vsel %vm12113_vm11, %v3807_v61, %v3808_v51  ;;  %v3837_v43 = vrot.slane %v3321_v24, 7  ;;  %v13726_v12 = vsel %vm12113_vm11, %v3817_v53, %v3818_v44  ;;  %v15593_v44 = vld [vmem:[#allocation18_spill] sm:$0xff] }
 0x2c1   : > { %v13695_v52 = vadd.f32 %v10510_v4, %v13375_v59  ;;  %v13697_v31 = vpop.f32.mrf.mxu1  ;;  %v3816_v59 = vsel %vm12113_vm11, %v3814_v63, %v3815_v55  ;;  %v3823_v4 = vrot.slane %v13689_v46, 2  ;;  %15587 = vst [vmem:[#allocation98_spill] sm:$0xff] %v13722_v28  ;;  %v3827_v5 = vrot.slane %v3304_v9, 7  ;;  %15588 = vst [vmem:[#allocation99_spill] sm:$0xff] %v13726_v12 }
 0x2c2   : > { %15583 = vst [vmem:[#allocation94_spill] sm:$0xff] %v13697_v31  ;;  %15584 = vst [vmem:[#allocation95_spill] sm:$0xff] %v13703_v18  ;;  %v13706_v10 = vpop.f32.mrf.mxu0  ;;  %v3322_v55 = vcombine.high %v3320_v27, %v3320_v27  ;;  %v3340_v42 = vcombine.high %v2896_v37, %v2896_v37  ;;  %v3305_v61 = vcombine.high %v3303_v40, %v3303_v40  ;;  %v3826_v51 = vrot.slane %v3824_v26, 2 }
 0x2c3   : > { %15582 = vst [vmem:[#allocation16_spill] sm:$0xff] %v13695_v52  ;;  %15585 = vst [vmem:[#allocation96_spill] sm:$0xff] %v13706_v10  ;;  %v13716_v31 = vpop.f32.mrf.mxu1  ;;  %v3830_v52 = vrot.slane %v3303_v40, 7  ;;  %v3825_v24 = vsel %vm12113_vm11, %v3823_v4, %v3824_v26  ;;  %v3330_v9 = vrot.slane %v2891_v19, %v11747_v13  ;;  %v3339_v53 = vcombine.high %v13714_v56, %v13714_v56 }
 0x2c4   : > { %15586 = vst [vmem:[#allocation97_spill] sm:$0xff] %v13716_v31  ;;  %v10513_v57 = vpop.f32.mrf.mxu0  ;;  %v13733_v31 = vcombine.low %v3813_v50, %v3816_v59  ;;  %v3829_v50 = vrot.slane %v3827_v5, 2  ;;  %v9177_v59 = vrot.slane %v13669_v49, 9  ;;  %v3840_v40 = vrot.slane %v3320_v27, 7 }
 0x2c5   : > { %v13729_v63 = vadd.f32 %v10513_v57, %v13384_v29  ;;  %v13731_v3 = vpop.f32.mrf.mxu1  ;;  %v2901_v29 = vadd.f32 %v13422_v25, %v15593_v44  ;;  %v13748_v26 = vrot.slane %v3340_v42, %v11747_v13  ;;  %v3828_v44 = vsel %vm12113_vm11, %v3826_v51, %v3827_v5  ;;  %v15599_v51 = vld [vmem:[#allocation19_spill] sm:$0xff] }
 0x2c6   : > { %15590 = vst [vmem:[#allocation101_spill] sm:$0xff] %v13731_v3  ;;  %15591 = vst [vmem:[#allocation102_spill] sm:$0xff] %v13733_v31  ;;  %v13735_v10 = vpop.f32.mrf.mxu0  ;;  %v3839_v3 = vrot.slane %v3837_v43, 2  ;;  %v3338_v31 = vcombine.high %v3330_v9, %v3330_v9  ;;  %v13759_v12 = vrot.slane %v3305_v61, 7  ;;  %v3852_v49 = vrot.slane %v13714_v56, 7 }
 0x2c7   : > { %15589 = vst [vmem:[#allocation100_spill] sm:$0xff] %v13729_v63  ;;  %15592 = vst [vmem:[#allocation103_spill] sm:$0xff] %v13735_v10  ;;  %v13744_v57 = vpop.f32.mrf.mxu1  ;;  %v3843_v10 = vrot.slane %v3322_v55, 7  ;;  %v3846_v55 = vrot.slane %v3330_v9, 7  ;;  %v3855_v18 = vrot.slane %v3339_v53, 7  ;;  %v3347_v42 = vrot.slane %v2896_v37, %v11747_v13 }
 0x2c8   : > { %15594 = vst [vmem:[#allocation18_spill] sm:$0xff] %v13744_v57  ;;  %v10516_v63 = vpop.f32.mrf.mxu0  ;;  %v13757_v57 = vrot.slane %v3830_v52, 2  ;;  %v3357_v28 = vcombine.high %v2901_v29, %v2901_v29  ;;  %v13773_v5 = vsel %vm12113_vm11, %v3839_v3, %v3840_v40  ;;  %v3842_v61 = vrot.slane %v3840_v40, 2 }
 0x2c9   : > { %v13751_v19 = vadd.f32 %v10516_v63, %v13393_v34  ;;  %v13753_v4 = vpop.f32.mrf.mxu1  ;;  %v13769_v63 = vsel %vm12113_vm11, %v9177_v59, %v3837_v43  ;;  %v2906_v56 = vadd.f32 %v13422_v25, %v15599_v51  ;;  %v3845_v9 = vrot.slane %v3843_v10, 2 }
 0x2ca   : > { %15596 = vst [vmem:[#allocation105_spill] sm:$0xff] %v13753_v4  ;;  %v13762_v27 = vpop.f32.mrf.mxu0  ;;  %v13777_v53 = vrot.slane %v3338_v31, 7  ;;  %v3356_v37 = vcombine.high %v13748_v26, %v13748_v26  ;;  %v13788_v3 = vsel %vm12113_vm11, %v3829_v50, %v3830_v52  ;;  %v13790_v59 = vcombine.low %v3825_v24, %v3828_v44 }
 0x2cb   : > { %15595 = vst [vmem:[#allocation104_spill] sm:$0xff] %v13751_v19  ;;  %15597 = vst [vmem:[#allocation106_spill] sm:$0xff] %v13762_v27  ;;  %v13765_v34 = vpop.f32.mrf.mxu1  ;;  %v13792_v40 = vrot.slane %v3846_v55, 2  ;;  %v3854_v51 = vrot.slane %v3852_v49, 2  ;;  %v3857_v31 = vrot.slane %v3855_v18, 2  ;;  %v3355_v27 = vcombine.high %v3347_v42, %v3347_v42 }
 0x2cc   : > { %15598 = vst [vmem:[#allocation107_spill] sm:$0xff] %v13765_v34  ;;  %v10519_v4 = vpop.f32.mrf.mxu0  ;;  %v3858_v46 = vrot.slane %v3347_v42, 7  ;;  %v13797_v39 = vrot.slane %v3357_v28, %v11747_v13  ;;  %v3844_v52 = vsel %vm12113_vm11, %v3842_v61, %v3843_v10  ;;  %v3364_v24 = vrot.slane %v2901_v29, %v11747_v13 }
 0x2cd   : > { %v13782_v34 = vadd.f32 %v10519_v4, %v13402_v23  ;;  %v13784_v43 = vpop.f32.mrf.mxu1  ;;  %v3374_v50 = vcombine.high %v2906_v56, %v2906_v56  ;;  %v3851_v42 = vrot.slane %v13777_v53, 2  ;;  %v3856_v29 = vsel %vm12113_vm11, %v3854_v51, %v3855_v18 }
 0x2ce   : > { %15601 = vst [vmem:[#allocation108_spill] sm:$0xff] %v13784_v43  ;;  %v13794_v19 = vpop.f32.mrf.mxu0  ;;  %v3847_v43 = vsel %vm12113_vm11, %v3845_v9, %v3846_v55  ;;  %v3862_v61 = vrot.slane %v13748_v26, 7  ;;  %v13824_v55 = vrot.slane %v2906_v56, %v11747_v13  ;;  %v4693_v4 = vadd.f32 %v13114_v1, %v13120_v60 }
 0x2cf   : > { %15600 = vst [vmem:[#allocation19_spill] sm:$0xff] %v13782_v34  ;;  %15602 = vst [vmem:[#allocation109_spill] sm:$0xff] %v13794_v19  ;;  %v13799_v23 = vpop.f32.mrf.mxu1  ;;  %v13809_v34 = vrot.slane %v3356_v37, 7  ;;  %v9178_v37 = vrot.slane %v3355_v27, 9  ;;  %v13836_v18 = vcombine.low %v3844_v52, %v3847_v43  ;;  %v3372_v26 = vcombine.high %v3364_v24, %v3364_v24 }
 0x2d0   : > { %15603 = vst [vmem:[#allocation110_spill] sm:$0xff] %v13799_v23  ;;  %v10522_v44 = vpop.f32.mrf.mxu0  ;;  %v3868_v51 = vrot.slane %v3364_v24, 7  ;;  %v13839_v56 = vrot.slane %v3374_v50, %v11747_v13  ;;  %v13852_v43 = vrot.slane %v3862_v61, 2  ;;  %v3389_v24 = vcombine.high %v13824_v55, %v13824_v55 }
 0x2d1   : > { %15604 = vst [vmem:[#allocation111_spill] sm:$0xff] %v13809_v34  ;;  %v13812_v28 = vadd.f32 %v10522_v44, %v13413_v38  ;;  %v13814_v23 = vpop.f32.mrf.mxu1  ;;  %v3859_v38 = vsel %vm12113_vm11, %v3857_v31, %v3858_v46  ;;  %v3373_v44 = vcombine.high %v13797_v39, %v13797_v39  ;;  %v13843_v46 = vsel %vm12113_vm11, %v3851_v42, %v3852_v49 }
 0x2d2   : > { %15606 = vst [vmem:[#allocation113_spill] sm:$0xff] %v13814_v23  ;;  %v13826_v9 = vpop.f32.mrf.mxu0  ;;  %v3867_v27 = vrot.slane %v13809_v34, 2  ;;  %v5143_v31 = vadd.f32 %v13445_v54, %v4693_v4  ;;  %15611 = vst [vmem:[#allocation118_spill] sm:$0xff] %v13852_v43  ;;  %v13854_v52 = vcombine.low %v3856_v29, %v3859_v38  ;;  %v3880_v50 = vrot.slane %v13824_v55, 7  ;;  %v15629_v34 = vld [vmem:[#allocation55_spill] sm:$0xff] }
 0x2d3   : > { %15605 = vst [vmem:[#allocation112_spill] sm:$0xff] %v13812_v28  ;;  %15607 = vst [vmem:[#allocation114_spill] sm:$0xff] %v13826_v9  ;;  %v13834_v10 = vpop.f32.mrf.mxu1  ;;  %v13863_v42 = vsel %vm12113_vm11, %v9178_v37, %v3862_v61  ;;  %v13865_v54 = vrot.slane %v3373_v44, 7  ;;  %v4703_v4 = vadd.f32 %v13174_v8, %v13182_v58  ;;  %v3870_v38 = vrot.slane %v3868_v51, 2  ;;  %v15618_v37 = vld [vmem:[#allocation48_spill] sm:$0xff] }
 0x2d4   : > { %15608 = vst [vmem:[#allocation115_spill] sm:$0xff] %v13834_v10  ;;  %v10525_v23 = vpop.f32.mrf.mxu0  ;;  %15612 = vst [vmem:[#allocation119_spill] sm:$0xff] %v13854_v52  ;;  %v3874_v55 = vrot.slane %v13797_v39, 7  ;;  %v3390_v10 = vcombine.high %v13839_v56, %v13839_v56  ;;  %v3869_v61 = vsel %vm12113_vm11, %v3867_v27, %v3868_v51  ;;  %v15622_v58 = vld [vmem:[#allocation44_spill] sm:$0xff]  ;;  %v15623_v39 = vld [vmem:[#allocation21_spill] sm:$0xff] }
 0x2d5   : > { %v13848_v1 = vadd.f32 %v10525_v23, %v13434_v45  ;;  %v13850_v60 = vpop.f32.mrf.mxu1  ;;  %15614 = vst [vmem:[#allocation121_spill] sm:$0xff] %v13863_v42  ;;  %15615 = vst [vmem:[#allocation122_spill] sm:$0xff] %v13865_v54  ;;  %v15616_v45 = vld [vmem:[#allocation20_spill] sm:$0xff]  ;;  %v5145_v44 = vadd.f32 %v15618_v37, %v4703_v4  ;;  %v5532_v8 = vadd.f32 %v15622_v58, %v5143_v31  ;;  %v3879_v43 = vrot.slane %v13865_v54, 2  ;;  %v15624_v27 = vld [vmem:[#allocation54_spill] sm:$0xff] }
 0x2d6   : > { %15610 = vst [vmem:[#allocation117_spill] sm:$0xff] %v13850_v60  ;;  %v13859_v49 = vpop.f32.mrf.mxu0  ;;  %v2911_v23 = vadd.f32 %v13422_v25, %v15616_v45  ;;  %v3871_v60 = vrot.slane %v3372_v26, 7  ;;  %v3883_v26 = vrot.slane %v3389_v24, 7  ;;  %v2916_v19 = vadd.f32 %v13422_v25, %v15623_v39  ;;  %v15625_v4 = vld [vmem:[#allocation50_spill] sm:$0xff] }
 0x2d7   : > { %15609 = vst [vmem:[#allocation116_spill] sm:$0xff] %v13848_v1  ;;  %15613 = vst [vmem:[#allocation120_spill] sm:$0xff] %v13859_v49  ;;  %v13871_v29 = vpop.f32.mrf.mxu1  ;;  %v15619_v49 = vld [vmem:[#allocation45_spill] sm:$0xff]  ;;  %v4713_v37 = vadd.f32 %v15625_v4, %v15624_v27  ;;  %v13897_v58 = vrot.slane %v3874_v55, 2 }
 0x2d8   : > { %15617 = vst [vmem:[#allocation20_spill] sm:$0xff] %v13871_v29  ;;  %v10528_v1 = vpop.f32.mrf.mxu0  ;;  %v3882_v29 = vrot.slane %v3880_v50, 2  ;;  %v3391_v9 = vcombine.high %v2911_v23, %v2911_v23  ;;  %v3398_v51 = vrot.slane %v2911_v23, %v11747_v13  ;;  %v3872_v31 = vsel %vm12113_vm11, %v3870_v38, %v3871_v60  ;;  %v15630_v23 = vld [vmem:[#allocation49_spill] sm:$0xff]  ;;  %v15634_v38 = vld [vmem:[#allocation22_spill] sm:$0xff] }
 0x2d9   : > { %v13880_v45 = vadd.f32 %v10528_v1, %v15619_v49  ;;  %v13882_v28 = vpop.f32.mrf.mxu1  ;;  %v3873_v24 = vrot.slane %v3871_v60, 2  ;;  %15628 = vst [vmem:[#allocation54_spill] sm:$0xff] %v13897_v58  ;;  %v5147_v52 = vadd.f32 %v15629_v34, %v4713_v37  ;;  %v3881_v37 = vsel %vm12113_vm11, %v3879_v43, %v3880_v50 }
 0x2da   : > { %15621 = vst [vmem:[#allocation45_spill] sm:$0xff] %v13882_v28  ;;  %v5825_v42 = vpop.f32.mrf.mxu0  ;;  %v3887_v28 = vrot.slane %v3390_v10, 7  ;;  %v3884_v4 = vsel %vm12113_vm11, %v3882_v29, %v3883_v26  ;;  %v13910_v60 = vrot.slane %v3391_v9, %v11747_v13  ;;  %v13913_v10 = vrot.slane %v2916_v19, %v11747_v13 }
 0x2db   : > { %15620 = vst [vmem:[#allocation48_spill] sm:$0xff] %v13880_v45  ;;  %v13891_v1 = vadd.f32 %v5825_v42, %v5532_v8  ;;  %v13893_v49 = vpop.f32.mrf.mxu1  ;;  %v9179_v45 = vrot.slane %v13839_v56, 9  ;;  %v15633_v42 = vld [vmem:[#allocation46_spill] sm:$0xff]  ;;  %v2921_v56 = vadd.f32 %v13422_v25, %v15634_v38  ;;  %v13925_v9 = vcombine.low %v3869_v61, %v3872_v31 }
 0x2dc   : > { %15627 = vst [vmem:[#allocation21_spill] sm:$0xff] %v13893_v49  ;;  %v10531_v39 = vpop.f32.mrf.mxu0  ;;  %v5534_v8 = vadd.f32 %v15633_v42, %v5145_v44  ;;  %v3889_v26 = vrot.slane %v3887_v28, 2  ;;  %v3407_v49 = vcombine.high %v13910_v60, %v13910_v60  ;;  %v13938_v61 = vsel %vm12113_vm11, %v3873_v24, %v3874_v55 }
 0x2dd   : > { %15626 = vst [vmem:[#allocation44_spill] sm:$0xff] %v13891_v1  ;;  %v13902_v54 = vadd.f32 %v10531_v39, %v15630_v23  ;;  %v13904_v27 = vpop.f32.mrf.mxu1  ;;  %v3406_v39 = vcombine.high %v3398_v51, %v3398_v51  ;;  %v15635_v23 = vld [vmem:[#allocation60_spill] sm:$0xff]  ;;  %v3890_v1 = vrot.slane %v3398_v51, 7  ;;  %v13940_v31 = vcombine.low %v3881_v37, %v3884_v4 }
 0x2de   : > { %15632 = vst [vmem:[#allocation55_spill] sm:$0xff] %v13904_v27  ;;  %v5835_v34 = vpop.f32.mrf.mxu0  ;;  %v15636_v27 = vld [vmem:[#allocation56_spill] sm:$0xff]  ;;  %v3899_v24 = vrot.slane %v3407_v49, 7 }
 0x2df   : > { %15631 = vst [vmem:[#allocation50_spill] sm:$0xff] %v13902_v54  ;;  %v4723_v44 = vadd.f32 %v15636_v27, %v15635_v23  ;;  %v13921_v42 = vadd.f32 %v5835_v34, %v5534_v8  ;;  %v13923_v29 = vpop.f32.mrf.mxu1  ;;  %v3408_v54 = vcombine.high %v2916_v19, %v2916_v19  ;;  %v15641_v27 = vld [vmem:[#allocation53_spill] sm:$0xff]  ;;  %v13944_v19 = vsel %vm12113_vm11, %v9179_v45, %v3887_v28  ;;  %v15650_v49 = vld [vmem:[#allocation24_spill] sm:$0xff] }
 0x2e0   : > { %15638 = vst [vmem:[#allocation46_spill] sm:$0xff] %v13923_v29  ;;  %v10534_v38 = vpop.f32.mrf.mxu0  ;;  %v5536_v8 = vadd.f32 %v15641_v27, %v5147_v52  ;;  %15642 = vst [vmem:[#allocation56_spill] sm:$0xff] %v13944_v19  ;;  %v3902_v34 = vrot.slane %v13913_v10, 7  ;;  %v3425_v23 = vcombine.high %v2921_v56, %v2921_v56  ;;  %v13957_v55 = vsel %vm12113_vm11, %v3889_v26, %v3890_v1 }
 0x2e1   : > { %15637 = vst [vmem:[#allocation49_spill] sm:$0xff] %v13921_v42  ;;  %v5149_v58 = vadd.f32 %v13524_v0, %v4723_v44  ;;  %v13931_v43 = vadd.f32 %v10534_v38, %v13494_v14  ;;  %v13933_v50 = vpop.f32.mrf.mxu1  ;;  %v3423_v0 = vcombine.high %v13913_v10, %v13913_v10  ;;  %v13948_v14 = vrot.slane %v3406_v39, 7  ;;  %15646 = vst [vmem:[#allocation125_spill] sm:$0xff] %v13957_v55 }
 0x2e2   : > { %15640 = vst [vmem:[#allocation60_spill] sm:$0xff] %v13933_v50  ;;  %v5845_v51 = vpop.f32.mrf.mxu0  ;;  %v3422_v28 = vrot.slane %v3408_v54, %v11747_v13  ;;  %v3432_v45 = vrot.slane %v2921_v56, %v11747_v13  ;;  %v13961_v37 = vrot.slane %v3890_v1, 2  ;;  %v3896_v39 = vrot.slane %v13910_v60, 7 }
 0x2e3   : > { %15639 = vst [vmem:[#allocation22_spill] sm:$0xff] %v13931_v43  ;;  %15643 = vst [vmem:[#allocation53_spill] sm:$0xff] %v13948_v14  ;;  %v13951_v52 = vadd.f32 %v5845_v51, %v5536_v8  ;;  %v13953_v44 = vpop.f32.mrf.mxu1  ;;  %v5538_v27 = vadd.f32 %v13508_v30, %v5149_v58  ;;  %v13970_v26 = vrot.slane %v3423_v0, 7  ;;  %v2926_v54 = vadd.f32 %v13422_v25, %v15650_v49  ;;  %v15651_v51 = vld [vmem:[#allocation26_spill] sm:$0xff] }
 0x2e4   : > { %15645 = vst [vmem:[#allocation124_spill] sm:$0xff] %v13953_v44  ;;  %v10537_v4 = vpop.f32.mrf.mxu0  ;;  %15647 = vst [vmem:[#allocation126_spill] sm:$0xff] %v13961_v37  ;;  %v3424_v8 = vcombine.high %v3422_v28, %v3422_v28  ;;  %v2931_v56 = vadd.f32 %v13422_v25, %v15651_v51  ;;  %v3895_v44 = vrot.slane %v13948_v14, 2  ;;  %v13979_v60 = vrot.slane %v3902_v34, 2 }
 0x2e5   : > { %15644 = vst [vmem:[#allocation123_spill] sm:$0xff] %v13951_v52  ;;  %v13965_v10 = vadd.f32 %v10537_v4, %v13531_v47  ;;  %v13967_v38 = vpop.f32.mrf.mxu1  ;;  %v3898_v58 = vrot.slane %v3896_v39, 2  ;;  %v3901_v0 = vrot.slane %v3899_v24, 2  ;;  %v3440_v49 = vcombine.high %v3432_v45, %v3432_v45 }
 0x2e6   : > { %15649 = vst [vmem:[#allocation128_spill] sm:$0xff] %v13967_v38  ;;  %v5855_v1 = vpop.f32.mrf.mxu0  ;;  %v3439_v38 = vrot.slane %v3425_v23, %v11747_v13  ;;  %v3908_v50 = vrot.slane %v3422_v28, 7  ;;  %v3912_v52 = vrot.slane %v3432_v45, 7  ;;  %v3459_v23 = vcombine.high %v2931_v56, %v2931_v56  ;;  %v15659_v28 = vld [vmem:[#allocation27_spill] sm:$0xff] }
 0x2e7   : > { %15648 = vst [vmem:[#allocation127_spill] sm:$0xff] %v13965_v10  ;;  %v13981_v4 = vadd.f32 %v5855_v1, %v5538_v27  ;;  %v13983_v30 = vpop.f32.mrf.mxu1  ;;  %v3907_v1 = vrot.slane %v13970_v26, 2  ;;  %v13999_v43 = vsel %vm12113_vm11, %v3895_v44, %v3896_v39  ;;  %v3903_v51 = vsel %vm12113_vm11, %v3901_v0, %v3902_v34 }
 0x2e8   : > { %15653 = vst [vmem:[#allocation26_spill] sm:$0xff] %v13983_v30  ;;  %v10540_v10 = vpop.f32.mrf.mxu0  ;;  %v9180_v30 = vrot.slane %v3424_v8, 9  ;;  %15656 = vst [vmem:[#allocation131_spill] sm:$0xff] %v13999_v43  ;;  %v3900_v8 = vsel %vm12113_vm11, %v3898_v58, %v3899_v24  ;;  %v3915_v44 = vrot.slane %v3440_v49, 7  ;;  %v14015_v42 = vrot.slane %v2931_v56, %v11747_v13 }
 0x2e9   : > { %15652 = vst [vmem:[#allocation24_spill] sm:$0xff] %v13981_v4  ;;  %v13991_v47 = vadd.f32 %v10540_v10, %v13553_v32  ;;  %v13993_v27 = vpop.f32.mrf.mxu1  ;;  %v3449_v4 = vrot.slane %v2926_v54, %v11747_v13  ;;  %v3442_v32 = vcombine.high %v2926_v54, %v2926_v54  ;;  %v2936_v54 = vadd.f32 %v13422_v25, %v15659_v28  ;;  %v15662_v28 = vld [vmem:[#allocation28_spill] sm:$0xff] }
 0x2ea   : > { %15655 = vst [vmem:[#allocation130_spill] sm:$0xff] %v13993_v27  ;;  %v5865_v29 = vpop.f32.mrf.mxu0  ;;  %v3441_v27 = vcombine.high %v3439_v38, %v3439_v38  ;;  %v14026_v24 = vsel %vm12113_vm11, %v3907_v1, %v3908_v50  ;;  %v3918_v34 = vrot.slane %v3439_v38, 7  ;;  %v14029_v0 = vrot.slane %v3459_v23, %v11747_v13 }
 0x2eb   : > { %15654 = vst [vmem:[#allocation129_spill] sm:$0xff] %v13991_v47  ;;  %v14006_v45 = vadd.f32 %v5865_v29, %v13565_v17  ;;  %v14008_v10 = vpop.f32.mrf.mxu1  ;;  %v3914_v47 = vrot.slane %v3912_v52, 2  ;;  %v3457_v58 = vcombine.high %v3449_v4, %v3449_v4  ;;  %v14031_v56 = vcombine.low %v3900_v8, %v3903_v51 }
 0x2ec   : > { %15658 = vst [vmem:[#allocation133_spill] sm:$0xff] %v14008_v10  ;;  %v10543_v39 = vpop.f32.mrf.mxu0  ;;  %v3456_v10 = vrot.slane %v3442_v32, %v11747_v13  ;;  %v3913_v50 = vsel %vm12113_vm11, %v9180_v30, %v3912_v52  ;;  %v3917_v38 = vrot.slane %v3915_v44, 2  ;;  %v14043_v1 = vrot.slane %v3441_v27, 7 }
 0x2ed   : > { %15657 = vst [vmem:[#allocation132_spill] sm:$0xff] %v14006_v45  ;;  %v14020_v17 = vadd.f32 %v10543_v39, %v13579_v15  ;;  %v14022_v29 = vpop.f32.mrf.mxu1  ;;  %v2941_v15 = vadd.f32 %v13422_v25, %v15662_v28  ;;  %v3924_v23 = vrot.slane %v3449_v4, 7  ;;  %v3916_v51 = vsel %vm12113_vm11, %v3914_v47, %v3915_v44  ;;  %v15669_v44 = vld [vmem:[#allocation29_spill] sm:$0xff] }
 0x2ee   : > { %15661 = vst [vmem:[#allocation134_spill] sm:$0xff] %v14022_v29  ;;  %v5875_v49 = vpop.f32.mrf.mxu0  ;;  %15665 = vst [vmem:[#allocation136_spill] sm:$0xff] %v14043_v1  ;;  %v3474_v32 = vcombine.high %v14015_v42, %v14015_v42  ;;  %v3476_v8 = vcombine.high %v2936_v54, %v2936_v54  ;;  %v14054_v28 = vrot.slane %v3918_v34, 2  ;;  %v3923_v52 = vrot.slane %v14043_v1, 2 }
 0x2ef   : > { %15660 = vst [vmem:[#allocation27_spill] sm:$0xff] %v14020_v17  ;;  %v14037_v39 = vadd.f32 %v5875_v49, %v13596_v41  ;;  %v14039_v29 = vpop.f32.mrf.mxu1  ;;  %v3927_v30 = vrot.slane %v3457_v58, 7  ;;  %v3475_v4 = vcombine.high %v14029_v0, %v14029_v0  ;;  %v3493_v47 = vcombine.high %v2941_v15, %v2941_v15 }
 0x2f0   : > { %15664 = vst [vmem:[#allocation135_spill] sm:$0xff] %v14039_v29  ;;  %v10546_v17 = vpop.f32.mrf.mxu0  ;;  %15668 = vst [vmem:[#allocation139_spill] sm:$0xff] %v14054_v28  ;;  %v3930_v29 = vrot.slane %v3456_v10, 7  ;;  %v3458_v58 = vcombine.high %v3456_v10, %v3456_v10  ;;  %v3937_v1 = vrot.slane %v3474_v32, 7  ;;  %v3940_v55 = vrot.slane %v14029_v0, 7 }
 0x2f1   : > { %15663 = vst [vmem:[#allocation28_spill] sm:$0xff] %v14037_v39  ;;  %v14050_v41 = vadd.f32 %v10546_v17, %v13604_v33  ;;  %v14052_v49 = vpop.f32.mrf.mxu1  ;;  %v2946_v39 = vadd.f32 %v13422_v25, %v15669_v44  ;;  %v14068_v17 = vsel %vm12113_vm11, %v3917_v38, %v3918_v34  ;;  %v14074_v19 = vrot.slane %v3476_v8, %v11747_v13 }
 0x2f2   : > { %15667 = vst [vmem:[#allocation138_spill] sm:$0xff] %v14052_v49  ;;  %v5885_v27 = vpop.f32.mrf.mxu0  ;;  %15672 = vst [vmem:[#allocation141_spill] sm:$0xff] %v14068_v17  ;;  %v14070_v49 = vcombine.low %v3913_v50, %v3916_v51  ;;  %v3925_v34 = vsel %vm12113_vm11, %v3923_v52, %v3924_v23  ;;  %v3929_v38 = vrot.slane %v3927_v30, 2  ;;  %v3943_v50 = vrot.slane %v3475_v4, 7 }
 0x2f3   : > { %15666 = vst [vmem:[#allocation137_spill] sm:$0xff] %v14050_v41  ;;  %v14062_v45 = vadd.f32 %v5885_v27, %v13616_v16  ;;  %v14064_v33 = vpop.f32.mrf.mxu1  ;;  %v3926_v41 = vrot.slane %v3924_v23, 2  ;;  %v3483_v10 = vrot.slane %v2936_v54, %v11747_v13  ;;  %v14084_v44 = vrot.slane %v3930_v29, 2  ;;  %v15679_v23 = vld [vmem:[#allocation30_spill] sm:$0xff] }
 0x2f4   : > { %15671 = vst [vmem:[#allocation140_spill] sm:$0xff] %v14064_v33  ;;  %15673 = vst [vmem:[#allocation142_spill] sm:$0xff] %v14070_v49  ;;  %v10549_v28 = vpop.f32.mrf.mxu0  ;;  %v14087_v0 = vrot.slane %v3493_v47, %v11747_v13  ;;  %v3510_v32 = vcombine.high %v2946_v39, %v2946_v39  ;;  %v2951_v52 = vadd.f32 %v13422_v25, %v15679_v23  ;;  %v3939_v33 = vrot.slane %v3937_v1, 2 }
 0x2f5   : > { %15670 = vst [vmem:[#allocation29_spill] sm:$0xff] %v14062_v45  ;;  %v14077_v16 = vadd.f32 %v10549_v28, %v13630_v6  ;;  %v14079_v27 = vpop.f32.mrf.mxu1  ;;  %15676 = vst [vmem:[#allocation145_spill] sm:$0xff] %v14084_v44  ;;  %v14092_v6 = vrot.slane %v3458_v58, 7  ;;  %v9181_v28 = vrot.slane %v14015_v42, 9  ;;  %v3928_v47 = vsel %vm12113_vm11, %v3926_v41, %v3927_v30 }
 0x2f6   : > { %15675 = vst [vmem:[#allocation144_spill] sm:$0xff] %v14079_v27  ;;  %v5895_v51 = vpop.f32.mrf.mxu0  ;;  %v3491_v27 = vcombine.high %v3483_v10, %v3483_v10  ;;  %v3945_v58 = vrot.slane %v3943_v50, 2  ;;  %v3952_v42 = vrot.slane %v14074_v19, 7  ;;  %v14111_v25 = vsel %vm12113_vm11, %v3929_v38, %v3930_v29 }
 0x2f7   : > { %15674 = vst [vmem:[#allocation143_spill] sm:$0xff] %v14077_v16  ;;  %v14090_v8 = vadd.f32 %v5895_v51, %v13646_v48  ;;  %15678 = vst [vmem:[#allocation147_spill] sm:$0xff] %v14092_v6  ;;  %v14097_v4 = vpop.f32.mrf.mxu1  ;;  %v3942_v16 = vrot.slane %v3940_v55, 2  ;;  %v3492_v48 = vcombine.high %v14074_v19, %v14074_v19  ;;  %v3946_v51 = vrot.slane %v3483_v10, 7 }
 0x2f8   : > { %v14099_v54 = vpop.f32.mrf.mxu0  ;;  %15680 = vst [vmem:[#allocation30_spill] sm:$0xff] %v14111_v25  ;;  %v3500_v23 = vrot.slane %v2941_v15, %v11747_v13  ;;  %v3509_v41 = vcombine.high %v14087_v0, %v14087_v0  ;;  %v14117_v30 = vrot.slane %v3510_v32, %v11747_v13  ;;  %v14119_v17 = vcombine.low %v3925_v34, %v3928_v47 }
 0x2f9   : > { %15677 = vst [vmem:[#allocation146_spill] sm:$0xff] %v14090_v8  ;;  %v3517_v8 = vrot.slane %v2946_v39, %v11747_v13  ;;  %v14123_v19 = vsel %vm12113_vm11, %v9181_v28, %v3937_v1  ;;  %v14125_v39 = vrot.slane %v3491_v27, 7  ;;  %v3527_v10 = vcombine.high %v2951_v52, %v2951_v52  ;;  %v14127_v49 = vpop.f32.mrf.mxu1 }
 0x2fa   : > { %v14107_v45 = vpop.f32.mrf.mxu0  ;;  %15681 = vst [vmem:[#allocation148_spill] sm:$0xff] %v14119_v17  ;;  %15682 = vst [vmem:[#allocation149_spill] sm:$0xff] %v14123_v19  ;;  %v14133_v15 = vsel %vm12113_vm11, %v3939_v33, %v3940_v55  ;;  %v3944_v38 = vsel %vm12113_vm11, %v3942_v16, %v3943_v50  ;;  %v3955_v34 = vrot.slane %v3492_v48, 7  ;;  %v3508_v32 = vcombine.high %v3500_v23, %v3500_v23  ;;  %v14150_v16 = vld [vmem:[%s15293_s4] ss:$0 sm:$0xff]  ;;  %v15689_v50 = vld [vmem:[#allocation31_spill] sm:$0xff] }
 0x2fb   : > { %15683 = vst [vmem:[#allocation150_spill] sm:$0xff] %v14125_v39  ;;  %15684 = vst [vmem:[#allocation151_spill] sm:$0xff] %v14127_v49  ;;  %v3947_v1 = vsel %vm12113_vm11, %v3945_v58, %v3946_v51  ;;  %v14139_v28 = vrot.slane %v3946_v51, 2  ;;  %v3954_v27 = vrot.slane %v3952_v42, 2  ;;  %v3525_v47 = vcombine.high %v3517_v8, %v3517_v8  ;;  %v14161_v6 = vpop.f32.mrf.mxu1 }
 0x2fc   : > { %v14129_v29 = vpop.f32.mrf.mxu0  ;;  %15685 = vst [vmem:[#allocation152_spill] sm:$0xff] %v14133_v15  ;;  %v14143_v25 = vrot.slane %v3509_v41, 7  ;;  %v3526_v55 = vcombine.high %v14117_v30, %v14117_v30  ;;  %v3968_v33 = vrot.slane %v3517_v8, 7  ;;  %v2956_v48 = vadd.f32 %v14150_v16, %v15689_v50  ;;  %15690 = vst [vmem:[#allocation31_spill] sm:$0xff] %v14161_v6 }
 0x2fd   : > { %15686 = vst [vmem:[#allocation153_spill] sm:$0xff] %v14139_v28  ;;  %v3951_v51 = vrot.slane %v14125_v39, 2  ;;  %v3534_v41 = vrot.slane %v2951_v52, %v11747_v13  ;;  %v14159_v44 = vrot.slane %v3527_v10, %v11747_v13  ;;  %v3957_v49 = vrot.slane %v3955_v34, 2 }
 0x2fe   : > { %v14141_v17 = vpop.f32.mrf.mxu0  ;;  %15688 = vst [vmem:[#allocation155_spill] sm:$0xff] %v14143_v25  ;;  %v9182_v14 = vrot.slane %v3508_v32, 9  ;;  %v3544_v37 = vcombine.high %v2956_v48, %v2956_v48  ;;  %v14169_v58 = vcombine.low %v3944_v38, %v3947_v1  ;;  %v3956_v52 = vsel %vm12113_vm11, %v3954_v27, %v3955_v34  ;;  %v14182_v1 = vpop.f32.mrf.mxu1 }
 0x2ff   : > { %15687 = vst [vmem:[#allocation154_spill] sm:$0xff] %v14141_v17  ;;  %v3958_v17 = vrot.slane %v3500_v23, 7  ;;  %v3962_v10 = vrot.slane %v14087_v0, 7  ;;  %v3967_v19 = vrot.slane %v14143_v25, 2  ;;  %v3970_v6 = vrot.slane %v3968_v33, 2  ;;  %15694 = vst [vmem:[#allocation159_spill] sm:$0xff] %v14182_v1 }
 0x300   : > { %v14163_v8 = vpop.f32.mrf.mxu0  ;;  %15692 = vst [vmem:[#allocation157_spill] sm:$0xff] %v14169_v58  ;;  %v3971_v23 = vrot.slane %v3525_v47, 7  ;;  %v14177_v32 = vrot.slane %v3526_v55, 7  ;;  %v3543_v43 = vcombine.high %v14159_v44, %v14159_v44  ;;  %v3980_v50 = vrot.slane %v3534_v41, 7  ;;  %v15699_v58 = vld [vmem:[#allocation32_spill] sm:$0xff] }
 0x301   : > { %15691 = vst [vmem:[#allocation156_spill] sm:$0xff] %v14163_v8  ;;  %v3542_v8 = vcombine.high %v3534_v41, %v3534_v41  ;;  %v3551_v38 = vrot.slane %v2956_v48, %v11747_v13  ;;  %v14188_v0 = vsel %vm12113_vm11, %v3951_v51, %v3952_v42  ;;  %v3959_v27 = vsel %vm12113_vm11, %v3957_v49, %v3958_v17 }
 0x302   : > { %v14174_v15 = vpop.f32.mrf.mxu0  ;;  %15693 = vst [vmem:[#allocation158_spill] sm:$0xff] %v14177_v32  ;;  %15696 = vst [vmem:[#allocation161_spill] sm:$0xff] %v14188_v0  ;;  %v14194_v47 = vsel %vm12113_vm11, %v9182_v14, %v3962_v10  ;;  %v14197_v55 = vrot.slane %v3544_v37, %v11747_v13  ;;  %v14199_v41 = vrot.slane %v3962_v10, 2  ;;  %v3973_v48 = vrot.slane %v3971_v23, 2 }
 0x303   : > { %15697 = vst [vmem:[#allocation162_spill] sm:$0xff] %v14194_v47  ;;  %v3974_v25 = vrot.slane %v14117_v30, 7  ;;  %v2961_v39 = vadd.f32 %v14150_v16, %v15699_v58  ;;  %v3969_v49 = vsel %vm12113_vm11, %v3967_v19, %v3968_v33  ;;  %v3972_v14 = vsel %vm12113_vm11, %v3970_v6, %v3971_v23  ;;  %v15704_v33 = vld [vmem:[#allocation33_spill] sm:$0xff] }
 0x304   : > { %v14184_v34 = vpop.f32.mrf.mxu0  ;;  %15698 = vst [vmem:[#allocation163_spill] sm:$0xff] %v14199_v41  ;;  %v3979_v17 = vrot.slane %v14177_v32, 2  ;;  %v3560_v37 = vcombine.high %v14197_v55, %v14197_v55  ;;  %v3982_v51 = vrot.slane %v3980_v50, 2  ;;  %v3983_v10 = vrot.slane %v3542_v8, 7  ;;  %v14213_v41 = vpop.f32.mrf.mxu1  ;;  %v15707_v8 = vld [vmem:[#allocation35_spill] sm:$0xff] }
 0x305   : > { %15695 = vst [vmem:[#allocation160_spill] sm:$0xff] %v14184_v34  ;;  %v3987_v47 = vrot.slane %v3543_v43, 7  ;;  %v3559_v30 = vcombine.high %v3551_v38, %v3551_v38  ;;  %15701 = vst [vmem:[#allocation164_spill] sm:$0xff] %v14213_v41  ;;  %v14217_v28 = vcombine.low %v3956_v52, %v3959_v27  ;;  %v3990_v0 = vrot.slane %v3551_v38, 7 }
 0x306   : > { %v14204_v42 = vpop.f32.mrf.mxu0  ;;  %v3561_v19 = vcombine.high %v2961_v39, %v2961_v39  ;;  %v2966_v6 = vadd.f32 %v14150_v16, %v15704_v33  ;;  %v14223_v23 = vsel %vm12113_vm11, %v3973_v48, %v3974_v25  ;;  %v14225_v32 = vrot.slane %v3974_v25, 2 }
 0x307   : > { %15700 = vst [vmem:[#allocation32_spill] sm:$0xff] %v14204_v42  ;;  %15703 = vst [vmem:[#allocation166_spill] sm:$0xff] %v14217_v28  ;;  %v3568_v43 = vrot.slane %v2961_v39, %v11747_v13  ;;  %v2976_v42 = vadd.f32 %v14150_v16, %v15707_v8  ;;  %v14232_v52 = vcombine.low %v3969_v49, %v3972_v14  ;;  %v9183_v27 = vrot.slane %v14159_v44, 9 }
 0x308   : > { %v14215_v58 = vpop.f32.mrf.mxu0  ;;  %15705 = vst [vmem:[#allocation33_spill] sm:$0xff] %v14223_v23  ;;  %15706 = vst [vmem:[#allocation167_spill] sm:$0xff] %v14225_v32  ;;  %v3981_v38 = vsel %vm12113_vm11, %v3979_v17, %v3980_v50  ;;  %v3999_v33 = vrot.slane %v3560_v37, 7  ;;  %v3984_v48 = vsel %vm12113_vm11, %v3982_v51, %v3983_v10  ;;  %v3989_v25 = vrot.slane %v3987_v47, 2  ;;  %v14242_v32 = vpop.f32.mrf.mxu1  ;;  %v15714_v17 = vld [vmem:[#allocation36_spill] sm:$0xff] }
 0x309   : > { %15702 = vst [vmem:[#allocation165_spill] sm:$0xff] %v14215_v58  ;;  %15709 = vst [vmem:[#allocation168_spill] sm:$0xff] %v14232_v52  ;;  %v14239_v23 = vrot.slane %v3559_v30, 7  ;;  %v3996_v39 = vrot.slane %v14197_v55, 7  ;;  %v14246_v49 = vrot.slane %v3990_v0, 2  ;;  %v3575_v14 = vrot.slane %v3561_v19, %v11747_v13  ;;  %v15717_v58 = vld [vmem:[#allocation34_spill] sm:$0xff] }
 0x30a   : > { %v14230_v34 = vpop.f32.mrf.mxu0  ;;  %15711 = vst [vmem:[#allocation170_spill] sm:$0xff] %v14242_v32  ;;  %v3578_v50 = vcombine.high %v2966_v6, %v2966_v6  ;;  %v2981_v44 = vadd.f32 %v14150_v16, %v15714_v17  ;;  %v3576_v52 = vcombine.high %v3568_v43, %v3568_v43  ;;  %v4002_v51 = vrot.slane %v3568_v43, 7  ;;  %v14266_v41 = vpop.f32.mrf.mxu1 }
 0x30b   : > { %15708 = vst [vmem:[#allocation35_spill] sm:$0xff] %v14230_v34  ;;  %15710 = vst [vmem:[#allocation169_spill] sm:$0xff] %v14239_v23  ;;  %v3998_v37 = vrot.slane %v3996_v39, 2  ;;  %v3612_v10 = vcombine.high %v2976_v42, %v2976_v42  ;;  %v14253_v28 = vcombine.low %v3981_v38, %v3984_v48  ;;  %v4001_v55 = vrot.slane %v3999_v33, 2 }
 0x30c   : > { %v14244_v8 = vpop.f32.mrf.mxu0  ;;  %15713 = vst [vmem:[#allocation172_spill] sm:$0xff] %v14246_v49  ;;  %v3577_v34 = vcombine.high %v3575_v14, %v3575_v14  ;;  %v14259_v19 = vsel %vm12113_vm11, %v9183_v27, %v3987_v47  ;;  %v3995_v32 = vrot.slane %v14239_v23, 2  ;;  %v3585_v17 = vrot.slane %v2966_v6, %v11747_v13  ;;  %15719 = vst [vmem:[#allocation174_spill] sm:$0xff] %v14266_v41 }
 0x30d   : > { %15712 = vst [vmem:[#allocation171_spill] sm:$0xff] %v14244_v8  ;;  %15716 = vst [vmem:[#allocation173_spill] sm:$0xff] %v14253_v28  ;;  %v2971_v8 = vadd.f32 %v14150_v16, %v15717_v58  ;;  %v14264_v43 = vrot.slane %v2976_v42, %v11747_v13  ;;  %v14272_v48 = vsel %vm12113_vm11, %v3989_v25, %v3990_v0  ;;  %v14283_v27 = vrot.slane %v4002_v51, 2 }
 0x30e   : > { %v14251_v30 = vpop.f32.mrf.mxu0  ;;  %15718 = vst [vmem:[#allocation34_spill] sm:$0xff] %v14259_v19  ;;  %15721 = vst [vmem:[#allocation176_spill] sm:$0xff] %v14272_v48  ;;  %v14279_v58 = vrot.slane %v3578_v50, %v11747_v13  ;;  %v3629_v6 = vcombine.high %v2981_v44, %v2981_v44  ;;  %v4000_v42 = vsel %vm12113_vm11, %v3998_v37, %v3999_v33  ;;  %v14285_v28 = vrot.slane %v3576_v52, 7 }
 0x30f   : > { %15715 = vst [vmem:[#allocation36_spill] sm:$0xff] %v14251_v30  ;;  %15722 = vst [vmem:[#allocation177_spill] sm:$0xff] %v14283_v27  ;;  %v4003_v25 = vsel %vm12113_vm11, %v4001_v55, %v4002_v51  ;;  %v9184_v47 = vrot.slane %v3577_v34, 9  ;;  %v4012_v23 = vrot.slane %v3585_v17, 7  ;;  %v3602_v50 = vrot.slane %v2971_v8, %v11747_v13 }
 0x310   : > { %v14268_v38 = vpop.f32.mrf.mxu0  ;;  %15723 = vst [vmem:[#allocation178_spill] sm:$0xff] %v14285_v28  ;;  %v14297_v49 = vsel %vm12113_vm11, %v3995_v32, %v3996_v39  ;;  %v3593_v33 = vcombine.high %v3585_v17, %v3585_v17  ;;  %v3627_v37 = vcombine.high %v14264_v43, %v14264_v43  ;;  %v4008_v51 = vrot.slane %v3575_v14, 7 }
 0x311   : > { %15720 = vst [vmem:[#allocation175_spill] sm:$0xff] %v14268_v38  ;;  %v14288_v38 = vrot.slane %v3612_v10, %v11747_v13  ;;  %15725 = vst [vmem:[#allocation180_spill] sm:$0xff] %v14297_v49  ;;  %v14303_v10 = vpop.f32.mrf.mxu1  ;;  %v3594_v34 = vcombine.high %v14279_v58, %v14279_v58  ;;  %v3595_v55 = vcombine.high %v2971_v8, %v2971_v8  ;;  %v4007_v39 = vrot.slane %v14285_v28, 2 }
 0x312   : > { %v14290_v0 = vpop.f32.mrf.mxu0  ;;  %15726 = vst [vmem:[#allocation181_spill] sm:$0xff] %v14303_v10  ;;  %v14310_v30 = vrot.slane %v3629_v6, %v11747_v13  ;;  %v14317_v17 = vcombine.low %v4000_v42, %v4003_v25  ;;  %v4013_v8 = vsel %vm12113_vm11, %v9184_v47, %v4012_v23  ;;  %v4014_v48 = vrot.slane %v4012_v23, 2  ;;  %v15733_v23 = vld [vmem:[#allocation37_spill] sm:$0xff] }
 0x313   : > { %15724 = vst [vmem:[#allocation179_spill] sm:$0xff] %v14290_v0  ;;  %v3628_v52 = vcombine.high %v14288_v38, %v14288_v38  ;;  %v4018_v6 = vrot.slane %v14279_v58, 7  ;;  %v3610_v19 = vcombine.high %v3602_v50, %v3602_v50  ;;  %v4015_v49 = vrot.slane %v3593_v33, 7  ;;  %v14327_v28 = vpop.f32.mrf.mxu1 }
 0x314   : > { %v14305_v0 = vpop.f32.mrf.mxu0  ;;  %15728 = vst [vmem:[#allocation183_spill] sm:$0xff] %v14317_v17  ;;  %v4037_v10 = vrot.slane %v3627_v37, 7  ;;  %v3636_v32 = vrot.slane %v2981_v44, %v11747_v13  ;;  %15730 = vst [vmem:[#allocation185_spill] sm:$0xff] %v14327_v28  ;;  %v14331_v25 = vrot.slane %v3594_v34, 7  ;;  %v3609_v17 = vrot.slane %v3595_v55, %v11747_v13 }
 0x315   : > { %15727 = vst [vmem:[#allocation182_spill] sm:$0xff] %v14305_v0  ;;  %v4024_v0 = vrot.slane %v3602_v50, 7  ;;  %v3645_v47 = vcombine.high %v14310_v30, %v14310_v30  ;;  %v2986_v58 = vadd.f32 %v14150_v16, %v15733_v23  ;;  %v14340_v50 = vsel %vm12113_vm11, %v4007_v39, %v4008_v51  ;;  %v14351_v39 = vpop.f32.mrf.mxu1 }
 0x316   : > { %v14321_v14 = vpop.f32.mrf.mxu0  ;;  %15732 = vst [vmem:[#allocation187_spill] sm:$0xff] %v14331_v25  ;;  %15734 = vst [vmem:[#allocation37_spill] sm:$0xff] %v14340_v50  ;;  %v4040_v44 = vrot.slane %v14288_v38, 7  ;;  %v4043_v33 = vrot.slane %v3628_v52, 7  ;;  %v3644_v37 = vcombine.high %v3636_v32, %v3636_v32  ;;  %v4016_v34 = vsel %vm12113_vm11, %v4014_v48, %v4015_v49 }
 0x317   : > { %15729 = vst [vmem:[#allocation184_spill] sm:$0xff] %v14321_v14  ;;  %v14347_v55 = vrot.slane %v4018_v6, 2  ;;  %v4027_v14 = vrot.slane %v3610_v19, 7  ;;  %v4017_v28 = vrot.slane %v4015_v49, 2  ;;  %v4026_v16 = vrot.slane %v4024_v0, 2  ;;  %15737 = vst [vmem:[#allocation190_spill] sm:$0xff] %v14351_v39 }
 0x318   : > { %v14329_v42 = vpop.f32.mrf.mxu0  ;;  %v9185_v23 = vrot.slane %v14264_v43, 9  ;;  %v4039_v51 = vrot.slane %v4037_v10, 2  ;;  %v3611_v52 = vcombine.high %v3609_v17, %v3609_v17  ;;  %v4052_v50 = vrot.slane %v14310_v30, 7 }
 0x319   : > { %15731 = vst [vmem:[#allocation186_spill] sm:$0xff] %v14329_v42  ;;  %15736 = vst [vmem:[#allocation189_spill] sm:$0xff] %v14347_v55  ;;  %v4023_v42 = vrot.slane %v14331_v25, 2  ;;  %v3652_v48 = vrot.slane %v2986_v58, %v11747_v13  ;;  %v4042_v41 = vrot.slane %v4040_v44, 2  ;;  %v4045_v55 = vrot.slane %v4043_v33, 2 }
 0x31a   : > { %v14343_v27 = vpop.f32.mrf.mxu0  ;;  %v4046_v1 = vrot.slane %v3636_v32, 7  ;;  %v14357_v25 = vrot.slane %v3644_v37, 7  ;;  %v14361_v19 = vcombine.low %v4013_v8, %v4016_v34  ;;  %v4029_v39 = vrot.slane %v4027_v14, 2  ;;  %v14377_v8 = vpop.f32.mrf.mxu1 }
 0x31b   : > { %15735 = vst [vmem:[#allocation188_spill] sm:$0xff] %v14343_v27  ;;  %v4055_v27 = vrot.slane %v3645_v47, 7  ;;  %v4025_v43 = vsel %vm12113_vm11, %v4023_v42, %v4024_v0  ;;  %v4028_v30 = vsel %vm12113_vm11, %v4026_v16, %v4027_v14  ;;  %v14369_v47 = vsel %vm12113_vm11, %v9185_v23, %v4037_v10 }
 0x31c   : > { %v14353_v38 = vpop.f32.mrf.mxu0  ;;  %15739 = vst [vmem:[#allocation192_spill] sm:$0xff] %v14357_v25  ;;  %15740 = vst [vmem:[#allocation193_spill] sm:$0xff] %v14361_v19  ;;  %v14373_v32 = vsel %vm12113_vm11, %v4039_v51, %v4040_v44  ;;  %v14375_v58 = vrot.slane %v4046_v1, 2  ;;  %v14383_v0 = vsel %vm12113_vm11, %v4017_v28, %v4018_v6  ;;  %v4058_v42 = vrot.slane %v3652_v48, 7  ;;  %v14410_v48 = vpop.f32.mrf.mxu1 }
 0x31d   : > { %15738 = vst [vmem:[#allocation191_spill] sm:$0xff] %v14353_v38  ;;  %v4030_v38 = vrot.slane %v3609_v17, 7  ;;  %15741 = vst [vmem:[#allocation194_spill] sm:$0xff] %v14369_v47  ;;  %v4054_v17 = vrot.slane %v4052_v50, 2  ;;  %v4057_v14 = vrot.slane %v4055_v27, 2  ;;  %v14385_v34 = vrot.slane %v3611_v52, 7 }
 0x31e   : > { %v14359_v49 = vpop.f32.mrf.mxu0  ;;  %15742 = vst [vmem:[#allocation195_spill] sm:$0xff] %v14373_v32  ;;  %15743 = vst [vmem:[#allocation196_spill] sm:$0xff] %v14375_v58  ;;  %v4044_v10 = vsel %vm12113_vm11, %v4042_v41, %v4043_v33  ;;  %v4047_v44 = vsel %vm12113_vm11, %v4045_v55, %v4046_v1  ;;  %v4051_v16 = vrot.slane %v14357_v25, 2  ;;  %v14400_v6 = vcombine.low %v4025_v43, %v4028_v30  ;;  %v15749_v41 = vld [vmem:[#allocation52_spill] sm:$0xff]  ;;  %v15750_v33 = vld [vmem:[#allocation51_spill] sm:$0xff] }
 0x31f   : > { %15744 = vst [vmem:[#allocation197_spill] sm:$0xff] %v14383_v0  ;;  %15745 = vst [vmem:[#allocation198_spill] sm:$0xff] %v14385_v34  ;;  %v14396_v51 = vsel %vm12113_vm11, %v4029_v39, %v4030_v38  ;;  %v14398_v28 = vrot.slane %v4030_v38, 2  ;;  %v4613_v55 = vadd.f32 %v15750_v33, %v15749_v41  ;;  %v3778_v39 = vsel %vm12113_vm11, %v13573_v35, %v13529_v21  ;;  %v15752_v33 = vld [vmem:[#allocation59_spill] sm:$0xff]  ;;  %v15753_v52 = vld [vmem:[#allocation58_spill] sm:$0xff] }
 0x320   : > { %v14379_v37 = vpop.f32.mrf.mxu0  ;;  %15746 = vst [vmem:[#allocation199_spill] sm:$0xff] %v14396_v51  ;;  %15748 = vst [vmem:[#allocation201_spill] sm:$0xff] %v14400_v6  ;;  %v3766_v38 = vsel %vm12113_vm11, %v13550_v62, %v13505_v7  ;;  %v14422_v43 = vcombine.low %v4044_v10, %v4047_v44  ;;  %v4056_v30 = vsel %vm12113_vm11, %v4054_v17, %v4055_v27  ;;  %v15755_v21 = vld [vmem:[#allocation66_spill] sm:$0xff]  ;;  %v15756_v35 = vld [vmem:[#allocation65_spill] sm:$0xff] }
 0x321   : > { %15747 = vst [vmem:[#allocation200_spill] sm:$0xff] %v14398_v28  ;;  %v4059_v41 = vsel %vm12113_vm11, %v4057_v14, %v4058_v42  ;;  %v4623_v1 = vadd.f32 %v15753_v52, %v15752_v33  ;;  %v14432_v32 = vsel %vm12113_vm11, %v4051_v16, %v4052_v50  ;;  %v4633_v47 = vadd.f32 %v15756_v35, %v15755_v21  ;;  %v15757_v25 = vld [vmem:[#allocation70_spill] sm:$0xff]  ;;  %v15758_v7 = vld [vmem:[#allocation69_spill] sm:$0xff]  ;;  %v15759_v27 = vld [vmem:[#allocation47_spill] sm:$0xff] }
 0x322   : > { %v14392_v23 = vpop.f32.mrf.mxu0  ;;  %15751 = vst [vmem:[#allocation52_spill] sm:$0xff] %v14422_v43  ;;  %15754 = vst [vmem:[#allocation51_spill] sm:$0xff] %v14432_v32  ;;  %v14438_v62 = vadd.f32 %v15758_v7, %v15757_v25  ;;  %v15760_v17 = vsel %vm12113_vm11, %v13487_v22, %v15759_v27  ;;  %v15761_v42 = vld [vmem:[#allocation76_spill] sm:$0xff]  ;;  %v15762_v44 = vld [vmem:[#allocation75_spill] sm:$0xff]  ;;  %v3834_v25 = vsel %vm12113_vm11, %v13757_v57, %v13759_v12 }
 0x323   : > { %v7647_v14 = vcombine.low %v15760_v17, %v13518_v20  ;;  %v14450_v50 = vadd.f32 %v15762_v44, %v15761_v42  ;;  %v15763_v16 = vld [vmem:[#allocation78_spill] sm:$0xff]  ;;  %v15764_v33 = vld [vmem:[#allocation61_spill] sm:$0xff]  ;;  %v14458_v35 = vcombine.low %v4056_v30, %v4059_v41  ;;  %v15766_v7 = vld [vmem:[#allocation80_spill] sm:$0xff]  ;;  %v14468_v17 = vpop.f32.mrf.mxu1 }
 0x324   : > { %v14412_v19 = vpop.f32.mrf.mxu0  ;;  %v7681_v52 = vcombine.low %v15763_v16, %v3778_v39  ;;  %v7664_v21 = vcombine.low %v15764_v33, %v3766_v38  ;;  %v15767_v43 = vld [vmem:[#allocation79_spill] sm:$0xff]  ;;  %v15768_v22 = vld [vmem:[#allocation8_spill] sm:$0xff]  ;;  %v15772_v30 = vld [vmem:[#allocation86_spill] sm:$0xff] }
 0x325   : > { %15765 = vst [vmem:[#allocation59_spill] sm:$0xff] %v14458_v35  ;;  %v14462_v58 = vadd.f32 %v15767_v43, %v15766_v7  ;;  %v15769_v20 = vld [vmem:[#allocation11_spill] sm:$0xff]  ;;  %v15773_v41 = vld [vmem:[#allocation85_spill] sm:$0xff]  ;;  %v15775_v16 = vld [vmem:[#allocation88_spill] sm:$0xff] }
 0x326   : > { %v14440_v10 = vpop.f32.mrf.mxu0  ;;  %v14466_v27 = vadd.f32 %v15769_v20, %v15768_v22  ;;  %v15770_v38 = vld [vmem:[#allocation87_spill] sm:$0xff]  ;;  %v14480_v42 = vadd.f32 %v15773_v41, %v15772_v30  ;;  %v15776_v33 = vld [vmem:[#allocation6_spill] sm:$0xff]  ;;  %v15777_v7 = vld [vmem:[#allocation4_spill] sm:$0xff]  ;;  %v7750_v41 = vcombine.low %v13788_v3, %v3834_v25 }
 0x327   : > { %v15771_v12 = vsel %vm12113_vm11, %v13680_v11, %v15770_v38  ;;  %v15774_v43 = vld [vmem:[#allocation63_spill] sm:$0xff]  ;;  %v15778_v22 = vsel %vm12113_vm11, %v15776_v33, %v15777_v7  ;;  %v15779_v35 = vld [vmem:[#allocation93_spill] sm:$0xff]  ;;  %v15780_v32 = vld [vmem:[#allocation98_spill] sm:$0xff] }
 0x328   : > { %v14470_v39 = vpop.f32.mrf.mxu0  ;;  %v7716_v57 = vcombine.low %v15771_v12, %v13720_v2  ;;  %v5127_v44 = vadd.f32 %v15774_v43, %v4613_v55  ;;  %v7699_v20 = vcombine.low %v15778_v22, %v15775_v16  ;;  %v3822_v6 = vsel %vm12113_vm11, %v15780_v32, %v15779_v35  ;;  %v15782_v38 = vld [vmem:[#allocation57_spill] sm:$0xff]  ;;  %v15783_v55 = vld [vmem:[#allocation3_spill] sm:$0xff]  ;;  %v14507_v22 = vpop.f32.mrf.mxu1  ;;  %v15792_v34 = vld [vmem:[#allocation62_spill] sm:$0xff] }
 0x329   : > { %v7655_v2 = vrot.slane %v7647_v14, %v11747_v13  ;;  %v7662_v12 = vrot.slane %v15782_v38, %v11747_v13  ;;  %v7696_v30 = vrot.slane %v15783_v55, %v11747_v13  ;;  %v7689_v43 = vrot.slane %v7681_v52, %v11747_v13  ;;  %v15784_v33 = vld [vmem:[#allocation23_spill] sm:$0xff]  ;;  %v15787_v55 = vld [vmem:[#allocation25_spill] sm:$0xff]  ;;  %v15992_v36 = vld [vmem:[#allocation52_spill] sm:$0xff] }
 0x32a   : > { %v14493_v11 = vpop.f32.mrf.mxu0  ;;  %v7672_v16 = vrot.slane %v7664_v21, %v11747_v13  ;;  %v7679_v7 = vrot.slane %v15784_v33, %v11747_v13  ;;  %v15785_v32 = vld [vmem:[#allocation95_spill] sm:$0xff]  ;;  %v7730_v38 = vrot.slane %v7716_v57, %v11747_v13  ;;  %v15788_v51 = vld [vmem:[#allocation5_spill] sm:$0xff]  ;;  %v7757_v52 = vrot.slane %v13790_v59, %v11747_v13 }
 0x32b   : > { %15781 = vst [vmem:[#allocation58_spill] sm:$0xff] %v14493_v11  ;;  %v7723_v35 = vrot.slane %v15785_v32, %v11747_v13  ;;  %v15789_v3 = vcombine.low %v15787_v55, %v15788_v51  ;;  %v15790_v21 = vld [vmem:[#allocation99_spill] sm:$0xff]  ;;  %v5516_v32 = vadd.f32 %v15792_v34, %v5127_v44  ;;  %v7713_v11 = vrot.slane %v7699_v20, %v11747_v13  ;;  %v15797_v44 = vld [vmem:[#allocation54_spill] sm:$0xff] }
 0x32c   : > { %v14509_v14 = vpop.f32.mrf.mxu0  ;;  %v7733_v0 = vcombine.low %v15790_v21, %v3822_v6  ;;  %v15791_v33 = vld [vmem:[#allocation67_spill] sm:$0xff]  ;;  %v15793_v57 = vsel %vm12113_vm11, %v13792_v40, %v13777_v53  ;;  %v7764_v55 = vrot.slane %v7750_v41, %v11747_v13  ;;  %v15795_v59 = vcombine.low %v13769_v63, %v13773_v5  ;;  %v14549_v63 = vpop.f32.mrf.mxu1 }
 0x32d   : > { %15786 = vst [vmem:[#allocation66_spill] sm:$0xff] %v14509_v14  ;;  %v7706_v25 = vrot.slane %v15789_v3, %v11747_v13  ;;  %v5129_v28 = vadd.f32 %v15791_v33, %v4623_v1  ;;  %v7783_v14 = vcombine.low %v15793_v57, %v13843_v46  ;;  %v7781_v34 = vrot.slane %v13836_v18, %v11747_v13  ;;  %v15796_v1 = vld [vmem:[#allocation122_spill] sm:$0xff]  ;;  %v15798_v3 = vld [vmem:[#allocation12_spill] sm:$0xff]  ;;  %v15799_v21 = vld [vmem:[#allocation71_spill] sm:$0xff] }
 0x32e   : > { %v14528_v51 = vpop.f32.mrf.mxu0  ;;  %v7774_v6 = vrot.slane %v15795_v59, %v11747_v13  ;;  %v3878_v20 = vsel %vm12113_vm11, %v15797_v44, %v15796_v1  ;;  %v5904_v53 = vadd.f32 %v15798_v3, %v5516_v32  ;;  %v14542_v40 = vcombine.low %v7655_v2, %v7662_v12  ;;  %v15801_v18 = vld [vmem:[#allocation102_spill] sm:$0xff]  ;;  %v15802_v1 = vld [vmem:[#allocation119_spill] sm:$0xff]  ;;  %v15803_v2 = vld [vmem:[#allocation64_spill] sm:$0xff] }
 0x32f   : > { %15794 = vst [vmem:[#allocation65_spill] sm:$0xff] %v14528_v51  ;;  %v14544_v46 = vcombine.low %v7689_v43, %v7696_v30  ;;  %v14546_v41 = vcombine.low %v7672_v16, %v7679_v7  ;;  %v5131_v33 = vadd.f32 %v15799_v21, %v4633_v47  ;;  %v7740_v57 = vrot.slane %v15801_v18, %v11747_v13  ;;  %v15804_v30 = vld [vmem:[#allocation9_spill] sm:$0xff]  ;;  %v15805_v43 = vld [vmem:[#allocation7_spill] sm:$0xff] }
 0x330   : > { %v14551_v5 = vpop.f32.mrf.mxu0  ;;  %v7747_v59 = vrot.slane %v7733_v0, %v11747_v13  ;;  %v7798_v32 = vrot.slane %v15802_v1, %v11747_v13  ;;  %v5518_v12 = vadd.f32 %v15803_v2, %v5129_v28  ;;  %v6293_v16 = vadd.f32 %v15805_v43, %v15804_v30  ;;  %v15807_v1 = vld [vmem:[#allocation91_spill] sm:$0xff]  ;;  %v15808_v2 = vld [vmem:[#allocation10_spill] sm:$0xff] }
 0x331   : > { %15800 = vst [vmem:[#allocation70_spill] sm:$0xff] %v14551_v5  ;;  %v7791_v7 = vrot.slane %v7783_v14, %v11747_v13  ;;  %v7817_v47 = vcombine.low %v13938_v61, %v3878_v20  ;;  %v14565_v3 = vcombine.low %v7723_v35, %v7730_v38  ;;  %v14567_v21 = vcombine.low %v7706_v25, %v7713_v11  ;;  %v15809_v43 = vld [vmem:[#allocation111_spill] sm:$0xff]  ;;  %v15810_v14 = vld [vmem:[#allocation118_spill] sm:$0xff]  ;;  %v15811_v35 = vld [vmem:[#allocation73_spill] sm:$0xff] }
 0x332   : > { %v14563_v44 = vpop.f32.mrf.mxu0  ;;  %v14569_v18 = vcombine.low %v7757_v52, %v7764_v55  ;;  %v14571_v0 = vcombine.low %v7774_v6, %v7781_v34  ;;  %v5906_v5 = vadd.f32 %v15807_v1, %v5518_v12  ;;  %v6682_v28 = vadd.f32 %v14099_v54, %v6293_v16  ;;  %v15812_v11 = vld [vmem:[#allocation68_spill] sm:$0xff]  ;;  %v14583_v52 = vpop.f32.mrf.mxu1  ;;  %v15814_v20 = vld [vmem:[#allocation89_spill] sm:$0xff] }
 0x333   : > { %15806 = vst [vmem:[#allocation69_spill] sm:$0xff] %v14563_v44  ;;  %v6292_v30 = vadd.f32 %v15808_v2, %v5904_v53  ;;  %v3866_v61 = vsel %vm12113_vm11, %v15810_v14, %v15809_v43  ;;  %v5133_v38 = vadd.f32 %v15811_v35, %v14438_v62  ;;  %v5520_v25 = vadd.f32 %v15812_v11, %v5131_v33  ;;  %v15815_v53 = vld [vmem:[#allocation15_spill] sm:$0xff]  ;;  %v15816_v1 = vld [vmem:[#allocation96_spill] sm:$0xff]  ;;  %v15818_v43 = vld [vmem:[#allocation121_spill] sm:$0xff] }
 0x334   : > { %v14585_v55 = vpop.f32.mrf.mxu0  ;;  %v14587_v6 = vcombine.low %v7740_v57, %v7747_v59  ;;  %v7832_v54 = vrot.slane %v13940_v31, %v11747_v13  ;;  %v6295_v12 = vadd.f32 %v15815_v53, %v15814_v20  ;;  %v14594_v16 = vcombine.low %v7791_v7, %v7798_v32  ;;  %v15820_v32 = vld [vmem:[#allocation90_spill] sm:$0xff]  ;;  %v15822_v11 = vld [vmem:[#allocation72_spill] sm:$0xff]  ;;  %v15849_v44 = vld [vmem:[#allocation17_spill] sm:$0xff] }
 0x335   : > { %15813 = vst [vmem:[#allocation47_spill] sm:$0xff] %v14585_v55  ;;  %v6681_v34 = vadd.f32 %v14107_v45, %v6292_v30  ;;  %v7825_v62 = vrot.slane %v7817_v47, %v11747_v13  ;;  %v5908_v33 = vadd.f32 %v15816_v1, %v5520_v25  ;;  %v14601_v14 = vcombine.low %v15818_v43, %v3866_v61  ;;  %v15821_v61 = vld [vmem:[#allocation77_spill] sm:$0xff]  ;;  %v15823_v20 = vld [vmem:[#allocation16_spill] sm:$0xff]  ;;  %v15833_v57 = vld [vmem:[#allocation94_spill] sm:$0xff] }
 0x336   : > { %v14598_v2 = vpop.f32.mrf.mxu0  ;;  %v15819_v31 = vsel %vm12113_vm11, %v13979_v60, %v13970_v26  ;;  %v6684_v59 = vadd.f32 %v14129_v29, %v6295_v12  ;;  %v6294_v7 = vadd.f32 %v15820_v32, %v5906_v5  ;;  %v7070_v47 = vadd.f32 %v14097_v4, %v6682_v28  ;;  %v15824_v53 = vld [vmem:[#allocation92_spill] sm:$0xff]  ;;  %v14623_v26 = vpop.f32.mrf.mxu1  ;;  %v15825_v4 = vld [vmem:[#allocation131_spill] sm:$0xff]  ;;  %v15826_v29 = vld [vmem:[#allocation126_spill] sm:$0xff] }
 0x337   : > { %15817 = vst [vmem:[#allocation76_spill] sm:$0xff] %v14598_v2  ;;  %v14611_v45 = vcombine.low %v15819_v31, %v14026_v24  ;;  %v5135_v35 = vadd.f32 %v15821_v61, %v14450_v50  ;;  %v5522_v25 = vadd.f32 %v15822_v11, %v5133_v38  ;;  %v6297_v1 = vadd.f32 %v15824_v53, %v15823_v20  ;;  %v14628_v24 = vld [vmem:[%s15295_s6] ss:$0 sm:$0xff]  ;;  %v15829_v38 = vld [vmem:[#allocation154_spill] sm:$0xff]  ;;  %v15830_v31 = vld [vmem:[#allocation151_spill] sm:$0xff] }
 0x338   : > { %v10712_v60 = vpop.f32.mrf.mxu0  ;;  %v15827_v5 = vld [vmem:[#allocation53_spill] sm:$0xff]  ;;  %v6683_v12 = vadd.f32 %v15829_v38, %v6294_v7  ;;  %v7069_v32 = vadd.f32 %v15830_v31, %v6681_v34  ;;  %v14640_v61 = vcombine.low %v7825_v62, %v7832_v54  ;;  %v15831_v11 = vld [vmem:[#allocation103_spill] sm:$0xff]  ;;  %v15832_v53 = vld [vmem:[#allocation156_spill] sm:$0xff]  ;;  %v6296_v2 = vadd.f32 %v15833_v57, %v5908_v33 }
 0x339   : > { %v15828_v28 = vsel %vm12113_vm11, %v15826_v29, %v15827_v5  ;;  %v7458_v43 = vadd.f32 %v10712_v60, %v7070_v47  ;;  %v5910_v20 = vadd.f32 %v15831_v11, %v5522_v25  ;;  %v6686_v30 = vadd.f32 %v15832_v53, %v6297_v1  ;;  %v15834_v5 = vld [vmem:[#allocation31_spill] sm:$0xff]  ;;  %v15835_v47 = vld [vmem:[#allocation56_spill] sm:$0xff]  ;;  %v15836_v34 = vld [vmem:[#allocation125_spill] sm:$0xff] }
 0x33a   : > { %v14636_v50 = vcombine.low %v15828_v28, %v15825_v4  ;;  %v7298_v55 = vpop.f32.mrf.mxu0  ;;  %v7072_v7 = vadd.f32 %v15834_v5, %v6684_v59  ;;  %v15837_v54 = vcombine.low %v15835_v47, %v15836_v34  ;;  %v15838_v25 = vld [vmem:[#allocation39_spill] sm:$0xff]  ;;  %v15839_v60 = vld [vmem:[#allocation74_spill] sm:$0xff]  ;;  %v6685_v57 = vadd.f32 %v14174_v15, %v6296_v2  ;;  %v15840_v28 = vld [vmem:[#allocation100_spill] sm:$0xff] }
 0x33b   : > { %v7497_v4 = vadd.f32 %v14628_v24, %v7458_v43  ;;  %v7457_v29 = vadd.f32 %v7298_v55, %v7069_v32  ;;  %v5137_v1 = vadd.f32 %v15838_v25, %v14462_v58  ;;  %v5524_v33 = vadd.f32 %v15839_v60, %v5135_v35  ;;  %v15841_v38 = vld [vmem:[#allocation97_spill] sm:$0xff]  ;;  %v14661_v43 = vpop.f32.mrf.mxu1  ;;  %v15844_v5 = vld [vmem:[#allocation159_spill] sm:$0xff]  ;;  %v15845_v34 = vld [vmem:[#allocation106_spill] sm:$0xff] }
 0x33c   : > { %v14653_v62 = vrot.slane %v15837_v54, %v11747_v13  ;;  %v6299_v31 = vadd.f32 %v15841_v38, %v15840_v28  ;;  %v10715_v55 = vpop.f32.mrf.mxu0  ;;  %v15842_v59 = vld [vmem:[#allocation13_spill] sm:$0xff]  ;;  %v7071_v47 = vadd.f32 %v15844_v5, %v6683_v12  ;;  %v15847_v15 = vld [vmem:[#allocation164_spill] sm:$0xff]  ;;  %v15854_v5 = vld [vmem:[#allocation18_spill] sm:$0xff] }
 0x33d   : > { %v14664_v32 = vadd.f32 %v15842_v59, %v7497_v4  ;;  %v7496_v11 = vadd.f32 %v14628_v24, %v7457_v29  ;;  %v7460_v53 = vadd.f32 %v10715_v55, %v7072_v7  ;;  %v5912_v58 = vadd.f32 %v15845_v34, %v5524_v33  ;;  %v15846_v54 = vld [vmem:[#allocation101_spill] sm:$0xff]  ;;  %v15848_v28 = vld [vmem:[#allocation160_spill] sm:$0xff]  ;;  %v15852_v33 = vld [vmem:[#allocation38_spill] sm:$0xff] }
 0x33e   : > { %v6298_v35 = vadd.f32 %v15846_v54, %v5910_v20  ;;  %v7308_v25 = vpop.f32.mrf.mxu0  ;;  %v7074_v2 = vadd.f32 %v15847_v15, %v6686_v30  ;;  %v6688_v38 = vadd.f32 %v15848_v28, %v6299_v31  ;;  %v15851_v12 = vld [vmem:[#allocation41_spill] sm:$0xff]  ;;  %v5526_v59 = vadd.f32 %v15852_v33, %v5137_v1  ;;  %v15853_v20 = vld [vmem:[#allocation104_spill] sm:$0xff]  ;;  %v14683_v30 = vpop.f32.mrf.mxu1  ;;  %v15855_v15 = vld [vmem:[#allocation170_spill] sm:$0xff] }
 0x33f   : > { %15843 = vst [vmem:[#allocation75_spill] sm:$0xff] %v14664_v32  ;;  %v14675_v4 = vadd.f32 %v15849_v44, %v7496_v11  ;;  %v7499_v29 = vadd.f32 %v14628_v24, %v7460_v53  ;;  %v7459_v7 = vadd.f32 %v7308_v25, %v7071_v47  ;;  %v5139_v55 = vadd.f32 %v15851_v12, %v14466_v27  ;;  %v15856_v31 = vld [vmem:[#allocation32_spill] sm:$0xff]  ;;  %v15857_v44 = vld [vmem:[#allocation14_spill] sm:$0xff]  ;;  %v15859_v27 = vld [vmem:[#allocation109_spill] sm:$0xff] }
 0x340   : > { %v6301_v34 = vadd.f32 %v15854_v5, %v15853_v20  ;;  %v10718_v54 = vpop.f32.mrf.mxu0  ;;  %v7073_v60 = vadd.f32 %v15855_v15, %v6685_v57  ;;  %v6687_v28 = vadd.f32 %v15856_v31, %v6298_v35  ;;  %v5914_v1 = vadd.f32 %v15859_v27, %v5526_v59  ;;  %v15860_v25 = vld [vmem:[#allocation165_spill] sm:$0xff]  ;;  %v15865_v59 = vld [vmem:[#allocation43_spill] sm:$0xff]  ;;  %v15866_v31 = vld [vmem:[#allocation40_spill] sm:$0xff] }
 0x341   : > { %15850 = vst [vmem:[#allocation78_spill] sm:$0xff] %v14675_v4  ;;  %v14688_v11 = vadd.f32 %v15857_v44, %v7499_v29  ;;  %v7498_v53 = vadd.f32 %v14628_v24, %v7459_v7  ;;  %v7462_v47 = vadd.f32 %v10718_v54, %v7074_v2  ;;  %10762 = vmatprep.mubr.msk.f32.mxu1 %vm2660_vm3, %v14675_v4  ;;  %v15861_v33 = vld [vmem:[#allocation105_spill] sm:$0xff]  ;;  %v15864_v54 = vld [vmem:[#allocation174_spill] sm:$0xff]  ;;  %v15867_v44 = vld [vmem:[#allocation35_spill] sm:$0xff] }
 0x342   : > { %v6690_v12 = vadd.f32 %v15860_v25, %v6301_v34  ;;  %v6300_v20 = vadd.f32 %v15861_v33, %v5912_v58  ;;  %v7318_v5 = vpop.f32.mrf.mxu0  ;;  %10763 = vmatmul.mubr.msk.f32.vlgmr.msra.gmra.mxu1 %vm2660_vm3, %v14664_v32  ;;  %v7849_v57 = vrot.slane %v14636_v50, %v11747_v13  ;;  %v15862_v35 = vld [vmem:[#allocation81_spill] sm:$0xff]  ;;  %v7076_v15 = vadd.f32 %v15864_v54, %v6688_v38  ;;  %v15868_v25 = vld [vmem:[#allocation19_spill] sm:$0xff]  ;;  %v14711_v32 = vpop.f32.mrf.mxu1 }
 0x343   : > { %15858 = vst [vmem:[#allocation61_spill] sm:$0xff] %v14688_v11  ;;  %v14701_v29 = vadd.f32 %v15862_v35, %v7498_v53  ;;  %v7501_v2 = vadd.f32 %v14628_v24, %v7462_v47  ;;  %v7461_v7 = vadd.f32 %v7318_v5, %v7073_v60  ;;  %v5141_v34 = vadd.f32 %v15865_v59, %v14480_v42  ;;  %v15869_v33 = vld [vmem:[#allocation107_spill] sm:$0xff]  ;;  %v15870_v53 = vld [vmem:[#allocation82_spill] sm:$0xff]  ;;  %v15871_v42 = vld [vmem:[#allocation181_spill] sm:$0xff] }
 0x344   : > { %v5528_v58 = vadd.f32 %v15866_v31, %v5139_v55  ;;  %v6689_v27 = vadd.f32 %v15867_v44, %v6300_v20  ;;  %v6303_v4 = vadd.f32 %v15869_v33, %v15868_v25  ;;  %v10721_v50 = vpop.f32.mrf.mxu0  ;;  %v7075_v38 = vadd.f32 %v15871_v42, %v6687_v28  ;;  %v15872_v55 = vld [vmem:[#allocation114_spill] sm:$0xff]  ;;  %v15873_v20 = vld [vmem:[#allocation108_spill] sm:$0xff]  ;;  %v15874_v31 = vld [vmem:[#allocation185_spill] sm:$0xff] }
 0x345   : > { %15863 = vst [vmem:[#allocation80_spill] sm:$0xff] %v14701_v29  ;;  %v14714_v35 = vadd.f32 %v15870_v53, %v7501_v2  ;;  %v7500_v60 = vadd.f32 %v14628_v24, %v7461_v7  ;;  %v7464_v47 = vadd.f32 %v10721_v50, %v7076_v15  ;;  %10765 = vmatprep.mubr.msk.f32.mxu1 %vm2660_vm3, %v14701_v29  ;;  %v15875_v2 = vld [vmem:[#allocation147_spill] sm:$0xff]  ;;  %v15876_v25 = vld [vmem:[#allocation145_spill] sm:$0xff]  ;;  %v15878_v50 = vld [vmem:[#allocation84_spill] sm:$0xff] }
 0x346   : > { %v5916_v5 = vadd.f32 %v15872_v55, %v5528_v58  ;;  %v6302_v54 = vadd.f32 %v15873_v20, %v5914_v1  ;;  %v7328_v59 = vpop.f32.mrf.mxu0  ;;  %10766 = vmatmul.mubr.msk.f32.gmra.mxu1 %vm2660_vm3, %v14688_v11  ;;  %v7078_v44 = vadd.f32 %v15874_v31, %v6690_v12  ;;  %v3934_v7 = vsel %vm12113_vm11, %v15876_v25, %v15875_v2  ;;  %v15877_v15 = vld [vmem:[#allocation171_spill] sm:$0xff]  ;;  %v15879_v1 = vld [vmem:[#allocation42_spill] sm:$0xff]  ;;  %v15880_v55 = vld [vmem:[#allocation112_spill] sm:$0xff]  ;;  %v14737_v11 = vpop.f32.mrf.mxu1 }
 0x347   : > { %v6692_v33 = vadd.f32 %v15877_v15, %v6303_v4  ;;  %v14731_v53 = vadd.f32 %v15878_v50, %v7500_v60  ;;  %v7503_v28 = vadd.f32 %v14628_v24, %v7464_v47  ;;  %v7463_v58 = vadd.f32 %v7328_v59, %v7075_v38  ;;  %v15881_v20 = vld [vmem:[#allocation110_spill] sm:$0xff]  ;;  %v15885_v47 = vld [vmem:[#allocation36_spill] sm:$0xff]  ;;  %v15887_v50 = vld [vmem:[#allocation113_spill] sm:$0xff] }
 0x348   : > { %v5530_v42 = vadd.f32 %v15879_v1, %v5141_v34  ;;  %v6305_v29 = vadd.f32 %v15881_v20, %v15880_v55  ;;  %v10724_v12 = vpop.f32.mrf.mxu0  ;;  %v15882_v31 = vld [vmem:[#allocation190_spill] sm:$0xff]  ;;  %v15883_v2 = vrot.slane %v13925_v9, %v11747_v13  ;;  %v15884_v4 = vrot.slane %v14601_v14, %v11747_v13 }
 0x349   : > { %v7077_v51 = vadd.f32 %v15882_v31, %v6689_v27  ;;  %v6691_v38 = vadd.f32 %v15885_v47, %v6302_v54  ;;  %v14750_v34 = vadd.f32 %v14542_v40, %v7503_v28  ;;  %v7502_v59 = vadd.f32 %v14628_v24, %v7463_v58  ;;  %10768 = vmatprep.mubr.msk.f32.mxu1 %vm2660_vm3, %v14731_v53  ;;  %v15886_v27 = vld [vmem:[#allocation120_spill] sm:$0xff]  ;;  %v15888_v14 = vld [vmem:[#allocation30_spill] sm:$0xff]  ;;  %v15890_v28 = vld [vmem:[#allocation175_spill] sm:$0xff] }
 0x34a   : > { %v14746_v60 = vcombine.low %v15884_v4, %v15883_v2  ;;  %v7466_v25 = vadd.f32 %v10724_v12, %v7078_v44  ;;  %v5918_v15 = vadd.f32 %v15886_v27, %v5530_v42  ;;  %v6304_v9 = vadd.f32 %v15887_v50, %v5916_v5  ;;  %v7338_v1 = vpop.f32.mrf.mxu0  ;;  %10769 = vmatmul.mubr.msk.f32.gmra.mxu1 %vm2660_vm3, %v14714_v35  ;;  %v15889_v40 = vld [vmem:[#allocation148_spill] sm:$0xff]  ;;  %v15891_v44 = vld [vmem:[#allocation83_spill] sm:$0xff]  ;;  %v14771_v4 = vpop.f32.mrf.mxu1 }
 0x34b   : > { %v14760_v55 = vcombine.low %v15888_v14, %v3934_v7  ;;  %v7893_v54 = vrot.slane %v15889_v40, %v11747_v13  ;;  %v6694_v58 = vadd.f32 %v15890_v28, %v6305_v29  ;;  %v14766_v20 = vadd.f32 %v15891_v44, %v7502_v59  ;;  %v15892_v31 = vld [vmem:[#allocation116_spill] sm:$0xff]  ;;  %v15893_v5 = vld [vmem:[#allocation115_spill] sm:$0xff] }
 0x34c   : > { %v7465_v12 = vadd.f32 %v7338_v1, %v7077_v51  ;;  %v7080_v42 = vadd.f32 %v14377_v8, %v6692_v33  ;;  %v6307_v2 = vadd.f32 %v15893_v5, %v15892_v31  ;;  %v7505_v47 = vadd.f32 %v14628_v24, %v7466_v25  ;;  %v10727_v7 = vpop.f32.mrf.mxu0  ;;  %v15896_v59 = vld [vmem:[#allocation136_spill] sm:$0xff]  ;;  %v15897_v51 = vld [vmem:[#allocation139_spill] sm:$0xff]  ;;  %v15899_v25 = vld [vmem:[#allocation117_spill] sm:$0xff] }
 0x34d   : > { %v15894_v27 = vrot.slane %v14611_v45, %v11747_v13  ;;  %v15895_v29 = vrot.slane %v14031_v56, %v11747_v13  ;;  %v3922_v8 = vsel %vm12113_vm11, %v15897_v51, %v15896_v59  ;;  %v15898_v33 = vld [vmem:[#allocation179_spill] sm:$0xff]  ;;  %10771 = vmatprep.mubr.msk.f32.mxu1 %vm2660_vm3, %v14766_v20  ;;  %v7079_v45 = vadd.f32 %v14410_v48, %v6691_v38  ;;  %v15901_v31 = vld [vmem:[#allocation182_spill] sm:$0xff]  ;;  %v14808_v59 = vpop.f32.mrf.mxu1  ;;  %v15904_v51 = vld [vmem:[#allocation141_spill] sm:$0xff] }
 0x34e   : > { %v6693_v1 = vadd.f32 %v15898_v33, %v6304_v9  ;;  %v7504_v14 = vadd.f32 %v14628_v24, %v7465_v12  ;;  %v7468_v40 = vadd.f32 %v10727_v7, %v7080_v42  ;;  %v6306_v28 = vadd.f32 %v15899_v25, %v5918_v15  ;;  %v7348_v56 = vpop.f32.mrf.mxu0  ;;  %10772 = vmatmul.mubr.msk.f32.gmra.mxu1 %vm2660_vm3, %v14750_v34  ;;  %v15900_v12 = vld [vmem:[#allocation142_spill] sm:$0xff]  ;;  %v15902_v15 = vld [vmem:[#allocation48_spill] sm:$0xff]  ;;  %v15907_v25 = vld [vmem:[#allocation45_spill] sm:$0xff] }
 0x34f   : > { %v14780_v50 = vcombine.low %v15895_v29, %v15894_v27  ;;  %v14795_v44 = vcombine.low %v14653_v62, %v7849_v57  ;;  %v7900_v9 = vrot.slane %v14760_v55, %v11747_v13  ;;  %v6696_v5 = vadd.f32 %v15901_v31, %v6307_v2  ;;  %v15903_v27 = vld [vmem:[#allocation20_spill] sm:$0xff]  ;;  %v15917_v42 = vld [vmem:[#allocation50_spill] sm:$0xff] }
 0x350   : > { %v14803_v7 = vadd.f32 %v14546_v41, %v7504_v14  ;;  %v7467_v48 = vadd.f32 %v7348_v56, %v7079_v45  ;;  %v7082_v38 = vadd.f32 %v14468_v17, %v6694_v58  ;;  %v6309_v29 = vadd.f32 %v15903_v27, %v15902_v15  ;;  %v10730_v55 = vpop.f32.mrf.mxu0  ;;  %v15905_v2 = vld [vmem:[#allocation184_spill] sm:$0xff] }
 0x351   : > { %v14811_v62 = vadd.f32 %v14544_v46, %v7505_v47  ;;  %v7507_v57 = vadd.f32 %v14628_v24, %v7468_v40  ;;  %v14815_v33 = vcombine.low %v15904_v51, %v3922_v8  ;;  %v6695_v41 = vadd.f32 %v15905_v2, %v6306_v28  ;;  %v15906_v58 = vld [vmem:[#allocation44_spill] sm:$0xff]  ;;  %v15908_v40 = vld [vmem:[#allocation161_spill] sm:$0xff]  ;;  %v15910_v28 = vld [vmem:[#allocation150_spill] sm:$0xff] }
 0x352   : > { %v7506_v14 = vadd.f32 %v14628_v24, %v7467_v48  ;;  %v7470_v45 = vadd.f32 %v10730_v55, %v7082_v38  ;;  %10774 = vmatprep.mubr.msk.f32.mxu1 %vm2660_vm3, %v14803_v7  ;;  %v7081_v17 = vadd.f32 %v14507_v22, %v6693_v1  ;;  %v6308_v46 = vadd.f32 %v15907_v25, %v15906_v58  ;;  %v7358_v47 = vpop.f32.mrf.mxu0  ;;  %v15909_v8 = vld [vmem:[#allocation153_spill] sm:$0xff]  ;;  %v15912_v48 = vld [vmem:[#allocation166_spill] sm:$0xff]  ;;  %v15914_v1 = vld [vmem:[#allocation152_spill] sm:$0xff] }
 0x353   : > { %10775 = vmatmul.mubr.msk.f32.gmra.mxu1 %vm2660_vm3, %v14811_v62  ;;  %v15911_v56 = vsel %vm12113_vm11, %v15909_v8, %v15910_v28  ;;  %v15913_v22 = vld [vmem:[#allocation149_spill] sm:$0xff]  ;;  %v15916_v55 = vld [vmem:[#allocation186_spill] sm:$0xff]  ;;  %v7084_v25 = vadd.f32 %v14549_v63, %v6696_v5  ;;  %v14847_v28 = vpop.f32.mrf.mxu1  ;;  %v7083_v63 = vadd.f32 %v14583_v52, %v6695_v41  ;;  %v15922_v5 = vld [vmem:[#allocation55_spill] sm:$0xff] }
 0x354   : > { %v14832_v31 = vcombine.low %v15911_v56, %v15908_v40  ;;  %v15915_v15 = vcombine.low %v15913_v22, %v15914_v1  ;;  %v6698_v51 = vadd.f32 %v15916_v55, %v6309_v29  ;;  %v14842_v2 = vadd.f32 %v14567_v21, %v7506_v14  ;;  %v15918_v8 = vld [vmem:[#allocation21_spill] sm:$0xff]  ;;  %v10733_v22 = vpop.f32.mrf.mxu0  ;;  %v15924_v55 = vld [vmem:[#allocation167_spill] sm:$0xff] }
 0x355   : > { %v7469_v58 = vadd.f32 %v7358_v47, %v7081_v17  ;;  %v6311_v40 = vadd.f32 %v15918_v8, %v15917_v42  ;;  %v14850_v56 = vadd.f32 %v14565_v3, %v7507_v57  ;;  %v7509_v38 = vadd.f32 %v14628_v24, %v7470_v45  ;;  %v15919_v1 = vld [vmem:[#allocation157_spill] sm:$0xff]  ;;  %v15923_v47 = vld [vmem:[#allocation158_spill] sm:$0xff] }
 0x356   : > { %v7910_v27 = vrot.slane %v15915_v15, %v11747_v13  ;;  %v7917_v29 = vrot.slane %v15919_v1, %v11747_v13  ;;  %v15920_v15 = vld [vmem:[#allocation188_spill] sm:$0xff]  ;;  %v7472_v17 = vadd.f32 %v10733_v22, %v7084_v25  ;;  %10777 = vmatprep.mubr.msk.f32.mxu1 %vm2660_vm3, %v14842_v2  ;;  %v15921_v42 = vld [vmem:[#allocation49_spill] sm:$0xff]  ;;  %v7368_v57 = vpop.f32.mrf.mxu0  ;;  %v14864_v45 = vcombine.low %v7893_v54, %v7900_v9  ;;  %v15925_v25 = vld [vmem:[#allocation191_spill] sm:$0xff]  ;;  %v14879_v9 = vpop.f32.mrf.mxu1 }
 0x357   : > { %v6697_v21 = vadd.f32 %v15920_v15, %v6308_v46  ;;  %v7508_v14 = vadd.f32 %v14628_v24, %v7469_v58  ;;  %v6310_v3 = vadd.f32 %v15922_v5, %v15921_v42  ;;  %10778 = vmatmul.mubr.msk.f32.gmra.mxu1 %vm2660_vm3, %v14850_v56  ;;  %v7883_v46 = vrot.slane %v14815_v33, %v11747_v13  ;;  %v15926_v1 = vld [vmem:[#allocation22_spill] sm:$0xff] }
 0x358   : > { %v3978_v58 = vsel %vm12113_vm11, %v15924_v55, %v15923_v47  ;;  %v6700_v8 = vadd.f32 %v15925_v25, %v6311_v40  ;;  %v7471_v41 = vadd.f32 %v7368_v57, %v7083_v63  ;;  %v7086_v22 = vadd.f32 %v14623_v26, %v6698_v51  ;;  %v15927_v15 = vld [vmem:[#allocation46_spill] sm:$0xff]  ;;  %v10736_v5 = vpop.f32.mrf.mxu0  ;;  %v15928_v51 = vld [vmem:[#allocation123_spill] sm:$0xff]  ;;  %v15929_v57 = vld [vmem:[#allocation60_spill] sm:$0xff] }
 0x359   : > { %v14874_v52 = vadd.f32 %v14587_v6, %v7508_v14  ;;  %v6313_v54 = vadd.f32 %v15927_v15, %v15926_v1  ;;  %v14882_v33 = vadd.f32 %v14569_v18, %v7509_v38  ;;  %v7511_v42 = vadd.f32 %v14628_v24, %v7472_v17  ;;  %v14910_v15 = vpop.f32.mrf.mxu1 }
 0x35a   : > { %v7927_v40 = vrot.slane %v14832_v31, %v11747_v13  ;;  %v6699_v6 = vadd.f32 %v14359_v49, %v6310_v3  ;;  %v7510_v14 = vadd.f32 %v14628_v24, %v7471_v41  ;;  %v7474_v63 = vadd.f32 %v10736_v5, %v7086_v22  ;;  %v7378_v38 = vpop.f32.mrf.mxu0  ;;  %v15930_v31 = vld [vmem:[#allocation33_spill] sm:$0xff]  ;;  %v15932_v41 = vld [vmem:[#allocation127_spill] sm:$0xff]  ;;  %v15933_v22 = vld [vmem:[#allocation124_spill] sm:$0xff] }
 0x35b   : > { %10780 = vmatprep.mubr.msk.f32.mxu1 %vm2660_vm3, %v14874_v52  ;;  %v7085_v26 = vadd.f32 %v14661_v43, %v6697_v21  ;;  %v6312_v18 = vadd.f32 %v15929_v57, %v15928_v51  ;;  %v14896_v17 = vcombine.low %v7910_v27, %v7917_v29  ;;  %v14899_v47 = vcombine.low %v15930_v31, %v3978_v58  ;;  %v15931_v49 = vld [vmem:[#allocation173_spill] sm:$0xff]  ;;  %v15934_v5 = vld [vmem:[#allocation155_spill] sm:$0xff] }
 0x35c   : > { %10781 = vmatmul.mubr.msk.f32.gmra.mxu1 %vm2660_vm3, %v14882_v33  ;;  %v7968_v3 = vrot.slane %v15931_v49, %v11747_v13  ;;  %v6702_v55 = vadd.f32 %v14379_v37, %v6313_v54  ;;  %v14905_v25 = vadd.f32 %v14571_v0, %v7510_v14  ;;  %v7088_v21 = vadd.f32 %v14683_v30, %v6700_v8  ;;  %v10739_v58 = vpop.f32.mrf.mxu0  ;;  %v15935_v51 = vld [vmem:[#allocation163_spill] sm:$0xff] }
 0x35d   : > { %v7473_v43 = vadd.f32 %v7378_v38, %v7085_v26  ;;  %v6315_v1 = vadd.f32 %v15933_v22, %v15932_v41  ;;  %v14913_v27 = vadd.f32 %v14594_v16, %v7511_v42  ;;  %v7513_v29 = vadd.f32 %v14628_v24, %v7474_v63  ;;  %v15936_v16 = vld [vmem:[#allocation24_spill] sm:$0xff]  ;;  %v15942_v41 = vld [vmem:[#allocation26_spill] sm:$0xff] }
 0x35e   : > { %v3966_v37 = vsel %vm12113_vm11, %v15935_v51, %v15934_v5  ;;  %v6701_v0 = vadd.f32 %v14392_v23, %v6312_v18  ;;  %v7476_v8 = vadd.f32 %v10739_v58, %v7088_v21  ;;  %10783 = vmatprep.mubr.msk.f32.mxu1 %vm2660_vm3, %v14905_v25  ;;  %v7087_v54 = vadd.f32 %v14711_v32, %v6699_v6  ;;  %v15937_v42 = vld [vmem:[#allocation128_spill] sm:$0xff]  ;;  %v7388_v63 = vpop.f32.mrf.mxu0  ;;  %v15941_v21 = vld [vmem:[#allocation129_spill] sm:$0xff]  ;;  %v15944_v5 = vld [vmem:[#allocation130_spill] sm:$0xff] }
 0x35f   : > { %v7512_v30 = vadd.f32 %v14628_v24, %v7473_v43  ;;  %v6314_v14 = vadd.f32 %v15937_v42, %v15936_v16  ;;  %v15938_v26 = vrot.slane %v15900_v12, %v11747_v13  ;;  %v15939_v23 = vrot.slane %v15912_v48, %v11747_v13  ;;  %v15940_v38 = vld [vmem:[#allocation168_spill] sm:$0xff]  ;;  %v15945_v51 = vld [vmem:[#allocation162_spill] sm:$0xff]  ;;  %v15950_v42 = vld [vmem:[#allocation183_spill] sm:$0xff] }
 0x360   : > { %10784 = vmatmul.mubr.msk.f32.gmra.mxu1 %vm2660_vm3, %v14913_v27  ;;  %v7951_v31 = vrot.slane %v15940_v38, %v11747_v13  ;;  %v6704_v32 = vadd.f32 %v14412_v19, %v6315_v1  ;;  %v7475_v49 = vadd.f32 %v7388_v63, %v7087_v54  ;;  %v7090_v43 = vadd.f32 %v14737_v11, %v6702_v55  ;;  %v15943_v55 = vld [vmem:[#allocation132_spill] sm:$0xff] }
 0x361   : > { %v7884_v57 = vcombine.low %v15938_v26, %v7883_v46  ;;  %v14935_v18 = vcombine.low %v7927_v40, %v15939_v23  ;;  %v14941_v6 = vadd.f32 %v14746_v60, %v7512_v30  ;;  %v6317_v12 = vadd.f32 %v15942_v41, %v15941_v21  ;;  %v10699_v46 = vpop.f32.mrf.mxu1  ;;  %v10742_v40 = vpop.f32.mrf.mxu0  ;;  %v15952_v23 = vld [vmem:[#allocation133_spill] sm:$0xff] }
 0x362   : > { %v14947_v22 = vadd.f32 %v14640_v61, %v7513_v29  ;;  %v7515_v48 = vadd.f32 %v14628_v24, %v7476_v8  ;;  %v7961_v58 = vrot.slane %v14899_v47, %v11747_v13  ;;  %v6703_v19 = vadd.f32 %v14440_v10, %v6314_v14  ;;  %v15946_v47 = vld [vmem:[#allocation37_spill] sm:$0xff]  ;;  %v15948_v8 = vld [vmem:[#allocation178_spill] sm:$0xff] }
 0x363   : > { %v7514_v60 = vadd.f32 %v14628_v24, %v7475_v49  ;;  %v7478_v1 = vadd.f32 %v10742_v40, %v7090_v43  ;;  %10786 = vmatprep.mubr.msk.f32.mxu1 %vm2660_vm3, %v14941_v6  ;;  %v7089_v11 = vadd.f32 %v14771_v4, %v6701_v0  ;;  %v6316_v61 = vadd.f32 %v15944_v5, %v15943_v55  ;;  %v7398_v29 = vpop.f32.mrf.mxu0  ;;  %v15947_v10 = vld [vmem:[#allocation177_spill] sm:$0xff]  ;;  %v7040_v49 = vpop.f32.mrf.mxu1  ;;  %v15953_v40 = vld [vmem:[#allocation180_spill] sm:$0xff] }
 0x364   : > { %10787 = vmatmul.mubr.msk.f32.gmra.mxu1 %vm2660_vm3, %v14947_v22  ;;  %v7936_v30 = vcombine.low %v15945_v51, %v3966_v37  ;;  %v15949_v54 = vsel %vm12113_vm11, %v15947_v10, %v15948_v8  ;;  %v7995_v4 = vrot.slane %v15950_v42, %v11747_v13  ;;  %v6706_v0 = vadd.f32 %v14470_v39, %v6317_v12  ;;  %v15951_v37 = vld [vmem:[#allocation27_spill] sm:$0xff]  ;;  %v15954_v39 = vld [vmem:[#allocation172_spill] sm:$0xff]  ;;  %v15955_v12 = vld [vmem:[#allocation169_spill] sm:$0xff] }
 0x365   : > { %v14968_v16 = vcombine.low %v15949_v54, %v15946_v47  ;;  %v14974_v14 = vadd.f32 %v14795_v44, %v7514_v60  ;;  %v7477_v63 = vadd.f32 %v7398_v29, %v7089_v11  ;;  %v7092_v26 = vadd.f32 %v14808_v59, %v6704_v32  ;;  %v10745_v41 = vpop.f32.mrf.mxu0  ;;  %v15957_v11 = vld [vmem:[#allocation58_spill] sm:$0xff]  ;;  %v15961_v10 = vld [vmem:[#allocation176_spill] sm:$0xff] }
 0x366   : > { %v6319_v38 = vadd.f32 %v15952_v23, %v15951_v37  ;;  %v14980_v43 = vadd.f32 %v14780_v50, %v7515_v48  ;;  %v7517_v21 = vadd.f32 %v14628_v24, %v7478_v1  ;;  %v15956_v44 = vsel %vm12113_vm11, %v15954_v39, %v15955_v12  ;;  %v15958_v48 = vld [vmem:[#allocation28_spill] sm:$0xff]  ;;  %v15959_v1 = vld [vmem:[#allocation134_spill] sm:$0xff]  ;;  %v10702_v23 = vpop.f32.mrf.mxu1  ;;  %v15966_v12 = vld [vmem:[#allocation187_spill] sm:$0xff] }
 0x367   : > { %v7971_v60 = vcombine.low %v15956_v44, %v15953_v40  ;;  %v6705_v55 = vadd.f32 %v15957_v11, %v6316_v61  ;;  %v7516_v59 = vadd.f32 %v14628_v24, %v7477_v63  ;;  %v7480_v32 = vadd.f32 %v10745_v41, %v7092_v26  ;;  %10789 = vmatprep.mubr.msk.f32.mxu1 %vm2660_vm3, %v14974_v14  ;;  %v7408_v29 = vpop.f32.mrf.mxu0  ;;  %v15960_v61 = vld [vmem:[#allocation34_spill] sm:$0xff]  ;;  %v15964_v41 = vld [vmem:[#allocation137_spill] sm:$0xff]  ;;  %v15965_v40 = vld [vmem:[#allocation135_spill] sm:$0xff] }
 0x368   : > { %v7091_v50 = vadd.f32 %v14847_v28, %v6703_v19  ;;  %v6318_v5 = vadd.f32 %v15959_v1, %v15958_v48  ;;  %10790 = vmatmul.mubr.msk.f32.gmra.mxu1 %vm2660_vm3, %v14980_v43  ;;  %v7969_v51 = vcombine.low %v7961_v58, %v7968_v3  ;;  %v7944_v47 = vrot.slane %v7936_v30, %v11747_v13  ;;  %v15963_v63 = vld [vmem:[#allocation66_spill] sm:$0xff]  ;;  %v15967_v44 = vld [vmem:[#allocation189_spill] sm:$0xff] }
 0x369   : > { %v15962_v8 = vcombine.low %v15960_v61, %v15961_v10  ;;  %v6708_v26 = vadd.f32 %v15963_v63, %v6319_v38  ;;  %v15004_v37 = vadd.f32 %v7884_v57, %v7516_v59  ;;  %v7094_v19 = vadd.f32 %v14879_v9, %v6706_v0  ;;  %v10748_v30 = vpop.f32.mrf.mxu0  ;;  %v15968_v57 = vld [vmem:[#allocation65_spill] sm:$0xff]  ;;  %v15973_v10 = vld [vmem:[#allocation70_spill] sm:$0xff] }
 0x36a   : > { %v7479_v28 = vadd.f32 %v7408_v29, %v7091_v50  ;;  %v6321_v39 = vadd.f32 %v15965_v40, %v15964_v41  ;;  %v15010_v3 = vadd.f32 %v14864_v45, %v7517_v21  ;;  %v7519_v58 = vadd.f32 %v14628_v24, %v7480_v32  ;;  %v15969_v45 = vld [vmem:[#allocation29_spill] sm:$0xff]  ;;  %v15970_v21 = vld [vmem:[#allocation138_spill] sm:$0xff] }
 0x36b   : > { %v7978_v54 = vrot.slane %v15962_v8, %v11747_v13  ;;  %v4022_v38 = vsel %vm12113_vm11, %v15967_v44, %v15966_v12  ;;  %v6707_v11 = vadd.f32 %v15968_v57, %v6318_v5  ;;  %v7482_v9 = vadd.f32 %v10748_v30, %v7094_v19  ;;  %10792 = vmatprep.mubr.msk.f32.mxu1 %vm2660_vm3, %v15004_v37  ;;  %v7418_v32 = vpop.f32.mrf.mxu0  ;;  %v15971_v29 = vld [vmem:[#allocation198_spill] sm:$0xff]  ;;  %v15972_v5 = vld [vmem:[#allocation200_spill] sm:$0xff]  ;;  %v15974_v19 = vld [vmem:[#allocation143_spill] sm:$0xff] }
 0x36c   : > { %v7518_v59 = vadd.f32 %v14628_v24, %v7479_v28  ;;  %v7093_v0 = vadd.f32 %v14910_v15, %v6705_v55  ;;  %v6320_v50 = vadd.f32 %v15970_v21, %v15969_v45  ;;  %v7952_v48 = vcombine.low %v7944_v47, %v7951_v31  ;;  %10793 = vmatmul.mubr.msk.f32.gmra.mxu1 %vm2660_vm3, %v15010_v3  ;;  %v7050_v28 = vpop.f32.mrf.mxu1  ;;  %v15975_v31 = vld [vmem:[#allocation140_spill] sm:$0xff]  ;;  %v15976_v30 = vld [vmem:[#allocation197_spill] sm:$0xff] }
 0x36d   : > { %v7985_v1 = vrot.slane %v7971_v60, %v11747_v13  ;;  %v4034_v61 = vsel %vm12113_vm11, %v15972_v5, %v15971_v29  ;;  %v6710_v8 = vadd.f32 %v15973_v10, %v6321_v39  ;;  %v7096_v55 = vadd.f32 %v10699_v46, %v6708_v26  ;;  %v10751_v40 = vpop.f32.mrf.mxu0  ;;  %v15977_v44 = vld [vmem:[#allocation69_spill] sm:$0xff]  ;;  %v15978_v26 = vld [vmem:[#allocation146_spill] sm:$0xff] }
 0x36e   : > { %v15033_v63 = vadd.f32 %v14896_v17, %v7518_v59  ;;  %v7481_v15 = vadd.f32 %v7418_v32, %v7093_v0  ;;  %v6323_v47 = vadd.f32 %v15975_v31, %v15974_v19  ;;  %v15038_v41 = vadd.f32 %v14935_v18, %v7519_v58  ;;  %v15979_v59 = vld [vmem:[#allocation144_spill] sm:$0xff]  ;;  %v15981_v45 = vld [vmem:[#allocation193_spill] sm:$0xff]  ;;  %v10705_v5 = vpop.f32.mrf.mxu1 }
 0x36f   : > { %v7521_v60 = vadd.f32 %v14628_v24, %v7482_v9  ;;  %v8005_v12 = vcombine.low %v15976_v30, %v4022_v38  ;;  %v6709_v57 = vadd.f32 %v15977_v44, %v6320_v50  ;;  %v7484_v17 = vadd.f32 %v10751_v40, %v7096_v55  ;;  %v7428_v58 = vpop.f32.mrf.mxu0  ;;  %v15980_v38 = vld [vmem:[#allocation199_spill] sm:$0xff]  ;;  %v15983_v31 = vld [vmem:[#allocation76_spill] sm:$0xff] }
 0x370   : > { %v7520_v39 = vadd.f32 %v14628_v24, %v7481_v15  ;;  %10795 = vmatprep.mubr.msk.f32.mxu1 %vm2660_vm3, %v15033_v63  ;;  %v7095_v46 = vadd.f32 %v7040_v49, %v6707_v11  ;;  %v6322_v0 = vadd.f32 %v15979_v59, %v15978_v26  ;;  %v8002_v18 = vrot.slane %v14968_v16, %v11747_v13  ;;  %v15982_v50 = vld [vmem:[#allocation47_spill] sm:$0xff]  ;;  %v15989_v59 = vld [vmem:[#allocation194_spill] sm:$0xff] }
 0x371   : > { %10796 = vmatmul.mubr.msk.f32.gmra.mxu1 %vm2660_vm3, %v15038_v41  ;;  %v8022_v9 = vcombine.low %v15980_v38, %v4034_v61  ;;  %v8012_v21 = vrot.slane %v15981_v45, %v11747_v13  ;;  %v6712_v32 = vadd.f32 %v15982_v50, %v6323_v47  ;;  %v7098_v11 = vadd.f32 %v10702_v23, %v6710_v8  ;;  %v10754_v55 = vpop.f32.mrf.mxu0  ;;  %v15984_v23 = vld [vmem:[#allocation201_spill] sm:$0xff]  ;;  %v15985_v47 = vld [vmem:[#allocation51_spill] sm:$0xff] }
 0x372   : > { %v15056_v29 = vadd.f32 %v7952_v48, %v7520_v39  ;;  %v7483_v49 = vadd.f32 %v7428_v58, %v7095_v46  ;;  %v15058_v10 = vadd.f32 %v7969_v51, %v7521_v60  ;;  %v7523_v16 = vadd.f32 %v14628_v24, %v7484_v17  ;;  %v15986_v60 = vld [vmem:[#allocation196_spill] sm:$0xff]  ;;  %v7060_v39 = vpop.f32.mrf.mxu1 }
 0x373   : > { %v7986_v15 = vcombine.low %v7978_v54, %v7985_v1  ;;  %v8019_v19 = vrot.slane %v8005_v12, %v11747_v13  ;;  %v6711_v61 = vadd.f32 %v15983_v31, %v6322_v0  ;;  %v7486_v30 = vadd.f32 %v10754_v55, %v7098_v11  ;;  %v7438_v1 = vpop.f32.mrf.mxu0  ;;  %v15987_v12 = vld [vmem:[#allocation192_spill] sm:$0xff]  ;;  %v15990_v0 = vld [vmem:[#allocation195_spill] sm:$0xff] }
 0x374   : > { %v7522_v40 = vadd.f32 %v14628_v24, %v7483_v49  ;;  %10798 = vmatprep.mubr.msk.f32.mxu1 %vm2660_vm3, %v15056_v29  ;;  %v7097_v48 = vadd.f32 %v7050_v28, %v6709_v57  ;;  %v8003_v51 = vcombine.low %v7995_v4, %v8002_v18  ;;  %v8029_v8 = vrot.slane %v15984_v23, %v11747_v13 }
 0x375   : > { %v8036_v54 = vrot.slane %v8022_v9, %v11747_v13  ;;  %10799 = vmatmul.mubr.msk.f32.gmra.mxu1 %vm2660_vm3, %v15058_v10  ;;  %v15988_v44 = vsel %vm12113_vm11, %v15986_v60, %v15987_v12  ;;  %v7100_v4 = vadd.f32 %v10705_v5, %v6712_v32  ;;  %v7525_v46 = vadd.f32 %v14628_v24, %v7486_v30  ;;  %v10757_v26 = vpop.f32.mrf.mxu0  ;;  %v15993_v5 = vld [vmem:[#allocation59_spill] sm:$0xff] }
 0x376   : > { %v8055_v28 = vcombine.low %v15988_v44, %v15985_v47  ;;  %v15080_v57 = vadd.f32 %v7986_v15, %v7522_v40  ;;  %v7485_v42 = vadd.f32 %v7438_v1, %v7097_v48  ;;  %v15082_v17 = vadd.f32 %v8003_v51, %v7523_v16 }
 0x377   : > { %v15991_v18 = vcombine.low %v15989_v59, %v15990_v0  ;;  %v8053_v38 = vrot.slane %v15992_v36, %v11747_v13  ;;  %v8020_v45 = vcombine.low %v8012_v21, %v8019_v19  ;;  %v7488_v50 = vadd.f32 %v10757_v26, %v7100_v4  ;;  %v7448_v15 = vpop.f32.mrf.mxu0 }
 0x378   : > { %v7524_v9 = vadd.f32 %v14628_v24, %v7485_v42  ;;  %10801 = vmatprep.mubr.msk.f32.mxu1 %vm2660_vm3, %v15080_v57  ;;  %v7099_v32 = vadd.f32 %v7060_v39, %v6711_v61  ;;  %v8037_v49 = vcombine.low %v8029_v8, %v8036_v54  ;;  %v8063_v11 = vrot.slane %v8055_v28, %v11747_v13 }
 0x379   : > { %v8046_v58 = vrot.slane %v15991_v18, %v11747_v13  ;;  %v8070_v16 = vrot.slane %v15993_v5, %v11747_v13  ;;  %10802 = vmatmul.mubr.msk.f32.gmra.mxu1 %vm2660_vm3, %v15082_v17  ;;  %v7527_v21 = vadd.f32 %v14628_v24, %v7488_v50 }
 0x37a   : > { %v15099_v55 = vadd.f32 %v8020_v45, %v7524_v9  ;;  %v7487_v31 = vadd.f32 %v7448_v15, %v7099_v32  ;;  %v15101_v40 = vadd.f32 %v8037_v49, %v7525_v46 }
 0x37b   : > { %v8054_v61 = vcombine.low %v8046_v58, %v8053_v38  ;;  %v8071_v30 = vcombine.low %v8063_v11, %v8070_v16 }
 0x37c   : > { %v7526_v19 = vadd.f32 %v14628_v24, %v7487_v31  ;;  %10804 = vmatprep.mubr.msk.f32.mxu1 %vm2660_vm3, %v15099_v55  ;;  %v8532_v24 = vld [vmem:[%s15297_s8] sm:$0x3] }
 0x37d   : > { %10805 = vmatmul.mubr.msk.f32.gmra.mxu1 %vm2660_vm3, %v15101_v40  ;;  %v15111_v48 = vadd.f32 %v8071_v30, %v7527_v21  ;;  %10810 = vmatprep.subr.msk.mxu0 %vm8536_vm12, %v8532_v24 }
 0x37e   : > { %v15109_v13 = vadd.f32 %v8054_v61, %v7526_v19  ;;  %10811 = vmatpush3.msk.msra.mxu0 %vm8536_vm12, %v8532_v24 }
 0x380   : > { %10807 = vmatprep.mubr.msk.f32.mxu1 %vm2660_vm3, %v15109_v13 }
 0x381   : > { %10808 = vmatmul.mubr.msk.f32.gmra.mxu1 %vm2660_vm3, %v15111_v48 }
 0x402   : > { %v10764_v51 = vpop.f32.mrf.mxu1 }
 0x403   : > { %v8461_v1 = vsel %vm8459_vm13, %v10764_v51, 0.0 }
 0x404   : > { %v8300_v23 = vpop.f32.mrf.mxu1 }
 0x405   : > { %v8460_v8 = vsel %vm8459_vm13, %v8300_v23, 0.0 }
 0x406   : > { %v10767_v54 = vpop.f32.mrf.mxu1  ;;  %v8462_v47 = vadd.f32 %v8461_v1, %v8460_v8 }
 0x407   : > { %v8465_v42 = vsel %vm8459_vm13, %v10767_v54, 0.0 }
 0x408   : > { %v8310_v60 = vpop.f32.mrf.mxu1 }
 0x409   : > { %v8463_v12 = vsel %vm8459_vm13, %v8310_v60, 0.0 }
 0x40a   : > { %v8464_v44 = vadd.f32 %v8463_v12, %v8462_v47  ;;  %v10770_v28 = vpop.f32.mrf.mxu1 }
 0x40b   : > { %v8469_v0 = vsel %vm8459_vm13, %v10770_v28, 0.0 }
 0x40c   : > { %v8320_v4 = vpop.f32.mrf.mxu1  ;;  %v8466_v39 = vadd.f32 %v8465_v42, %v8464_v44 }
 0x40d   : > { %v8467_v46 = vsel %vm8459_vm13, %v8320_v4, 0.0 }
 0x40e   : > { %v8468_v26 = vadd.f32 %v8467_v46, %v8466_v39  ;;  %v10773_v59 = vpop.f32.mrf.mxu1 }
 0x40f   : > { %v8473_v45 = vsel %vm8459_vm13, %v10773_v59, 0.0 }
 0x410   : > { %v8330_v18 = vpop.f32.mrf.mxu1  ;;  %v8470_v58 = vadd.f32 %v8469_v0, %v8468_v26 }
 0x411   : > { %v8471_v36 = vsel %vm8459_vm13, %v8330_v18, 0.0 }
 0x412   : > { %v8472_v38 = vadd.f32 %v8471_v36, %v8470_v58 }
 0x413   : > { %v10776_v9 = vpop.f32.mrf.mxu1 }
 0x414   : > { %v8474_v32 = vadd.f32 %v8473_v45, %v8472_v38  ;;  %v8477_v16 = vsel %vm8459_vm13, %v10776_v9, 0.0 }
 0x415   : > { %v8340_v50 = vpop.f32.mrf.mxu1 }
 0x416   : > { %v8475_v49 = vsel %vm8459_vm13, %v8340_v50, 0.0 }
 0x417   : > { %v8476_v11 = vadd.f32 %v8475_v49, %v8474_v32  ;;  %v10779_v5 = vpop.f32.mrf.mxu1 }
 0x418   : > { %v8481_v30 = vsel %vm8459_vm13, %v10779_v5, 0.0 }
 0x419   : > { %v8350_v15 = vpop.f32.mrf.mxu1  ;;  %v8478_v31 = vadd.f32 %v8477_v16, %v8476_v11 }
 0x41a   : > { %v8479_v21 = vsel %vm8459_vm13, %v8350_v15, 0.0 }
 0x41b   : > { %v8480_v19 = vadd.f32 %v8479_v21, %v8478_v31 }
 0x41c   : > { %v10782_v61 = vpop.f32.mrf.mxu1 }
 0x41d   : > { %v8482_v51 = vadd.f32 %v8481_v30, %v8480_v19  ;;  %v8485_v1 = vsel %vm8459_vm13, %v10782_v61, 0.0 }
 0x41e   : > { %v8360_v24 = vpop.f32.mrf.mxu1 }
 0x41f   : > { %v8483_v23 = vsel %vm8459_vm13, %v8360_v24, 0.0 }
 0x420   : > { %v8484_v8 = vadd.f32 %v8483_v23, %v8482_v51  ;;  %v10785_v54 = vpop.f32.mrf.mxu1 }
 0x421   : > { %v8489_v42 = vsel %vm8459_vm13, %v10785_v54, 0.0 }
 0x422   : > { %v8370_v47 = vpop.f32.mrf.mxu1  ;;  %v8486_v60 = vadd.f32 %v8485_v1, %v8484_v8 }
 0x423   : > { %v8487_v12 = vsel %vm8459_vm13, %v8370_v47, 0.0 }
 0x424   : > { %v8488_v44 = vadd.f32 %v8487_v12, %v8486_v60  ;;  %v10788_v28 = vpop.f32.mrf.mxu1 }
 0x425   : > { %v8493_v0 = vsel %vm8459_vm13, %v10788_v28, 0.0 }
 0x426   : > { %v8380_v4 = vpop.f32.mrf.mxu1  ;;  %v8490_v39 = vadd.f32 %v8489_v42, %v8488_v44 }
 0x427   : > { %v8491_v46 = vsel %vm8459_vm13, %v8380_v4, 0.0 }
 0x428   : > { %v8492_v26 = vadd.f32 %v8491_v46, %v8490_v39  ;;  %v10791_v59 = vpop.f32.mrf.mxu1 }
 0x429   : > { %v8497_v45 = vsel %vm8459_vm13, %v10791_v59, 0.0 }
 0x42a   : > { %v8390_v18 = vpop.f32.mrf.mxu1  ;;  %v8494_v58 = vadd.f32 %v8493_v0, %v8492_v26 }
 0x42b   : > { %v8495_v36 = vsel %vm8459_vm13, %v8390_v18, 0.0 }
 0x42c   : > { %v8496_v38 = vadd.f32 %v8495_v36, %v8494_v58  ;;  %v10794_v9 = vpop.f32.mrf.mxu1 }
 0x42d   : > { %v8501_v16 = vsel %vm8459_vm13, %v10794_v9, 0.0 }
 0x42e   : > { %v8400_v50 = vpop.f32.mrf.mxu1  ;;  %v8498_v32 = vadd.f32 %v8497_v45, %v8496_v38 }
 0x42f   : > { %v8499_v49 = vsel %vm8459_vm13, %v8400_v50, 0.0 }
 0x430   : > { %v8500_v11 = vadd.f32 %v8499_v49, %v8498_v32 }
 0x431   : > { %v10797_v5 = vpop.f32.mrf.mxu1 }
 0x432   : > { %v8502_v31 = vadd.f32 %v8501_v16, %v8500_v11  ;;  %v8505_v30 = vsel %vm8459_vm13, %v10797_v5, 0.0 }
 0x433   : > { %v8410_v15 = vpop.f32.mrf.mxu1 }
 0x434   : > { %v8503_v21 = vsel %vm8459_vm13, %v8410_v15, 0.0 }
 0x435   : > { %v8504_v19 = vadd.f32 %v8503_v21, %v8502_v31  ;;  %v10800_v61 = vpop.f32.mrf.mxu1 }
 0x436   : > { %v8509_v1 = vsel %vm8459_vm13, %v10800_v61, 0.0 }
 0x437   : > { %v8420_v24 = vpop.f32.mrf.mxu1  ;;  %v8506_v51 = vadd.f32 %v8505_v30, %v8504_v19 }
 0x438   : > { %v8507_v23 = vsel %vm8459_vm13, %v8420_v24, 0.0 }
 0x439   : > { %v8508_v8 = vadd.f32 %v8507_v23, %v8506_v51  ;;  %v10803_v54 = vpop.f32.mrf.mxu1 }
 0x43a   : > { %v8513_v42 = vsel %vm8459_vm13, %v10803_v54, 0.0 }
 0x43b   : > { %v8430_v47 = vpop.f32.mrf.mxu1  ;;  %v8510_v60 = vadd.f32 %v8509_v1, %v8508_v8 }
 0x43c   : > { %v8511_v12 = vsel %vm8459_vm13, %v8430_v47, 0.0 }
 0x43d   : > { %v8512_v44 = vadd.f32 %v8511_v12, %v8510_v60  ;;  %v10806_v28 = vpop.f32.mrf.mxu1 }
 0x43e   : > { %v8517_v0 = vsel %vm8459_vm13, %v10806_v28, 0.0 }
 0x43f   : > { %v8440_v4 = vpop.f32.mrf.mxu1  ;;  %v8514_v39 = vadd.f32 %v8513_v42, %v8512_v44 }
 0x440   : > { %v8515_v46 = vsel %vm8459_vm13, %v8440_v4, 0.0 }
 0x441   : > { %v8516_v26 = vadd.f32 %v8515_v46, %v8514_v39  ;;  %v10809_v59 = vpop.f32.mrf.mxu1 }
 0x442   : > { %v8521_v9 = vsel %vm8459_vm13, %v10809_v59, 0.0 }
 0x443   : > { %v8450_v18 = vpop.f32.mrf.mxu1  ;;  %v8518_v58 = vadd.f32 %v8517_v0, %v8516_v26 }
 0x444   : > { %v8519_v36 = vsel %vm8459_vm13, %v8450_v18, 0.0 }
 0x445   : > { %v8520_v38 = vadd.f32 %v8519_v36, %v8518_v58 }
 0x447   : > { %v8522_v45 = vadd.f32 %v8521_v9, %v8520_v38 }
 0x449   : > { %v8523_v50 = vrot.slane %v8522_v45, 4 }
 0x44b   : > { %v8524_v32 = vadd.f32 %v8523_v50, %v8522_v45 }
 0x44d   : > { %v8525_v49 = vrot.slane %v8524_v32, 2 }
 0x44f   : > { %v8526_v11 = vadd.f32 %v8525_v49, %v8524_v32 }
 0x451   : > { %v8527_v5 = vrot.slane %v8526_v11, 1 }
 0x453   : > { %v8528_v16 = vadd.f32 %v8527_v5, %v8526_v11 }
 0x455   : > { %v8530_v15 = vmul.f32 0.00390625, %v8528_v16 }
 0x457   : > { %v8531_v31 = vmax.f32 %v8530_v15, 0.0 }
 0x459   : > { %10812 = vmatprep.mubr.msk.f32.mxu0 %vm8459_vm13, %v8531_v31 }
 0x45a   : > { %10813 = vmatmul.mubr.msk.f32.vlgmr.msra.gmra.mxu0 %vm8459_vm13, %v8531_v31 }
 0x45b   : > { %10815 = vmatprep.mubr.msk.f32.mxu0 %vm8459_vm13, %v8531_v31 }
 0x45e   : > { %10816 = vmatmul.mubr.msk.f32.gmra.mxu0 %vm8459_vm13, %v8531_v31 }
 0x45f   : > { %10818 = vmatprep.mubr.msk.f32.mxu0 %vm8459_vm13, %v8531_v31 }
 0x462   : > { %10819 = vmatmul.mubr.msk.f32.gmra.mxu0 %vm8459_vm13, %v8531_v31 }
 0x463   : > { %10821 = vmatprep.mubr.msk.f32.mxu0 %vm8459_vm13, %v8531_v31 }
 0x466   : > { %10822 = vmatmul.mubr.msk.f32.gmra.mxu0 %vm8459_vm13, %v8531_v31 }
 0x467   : > { %10824 = vmatprep.mubr.msk.f32.mxu0 %vm8459_vm13, %v8531_v31 }
 0x46a   : > { %10825 = vmatmul.mubr.msk.f32.gmra.mxu0 %vm8459_vm13, %v8531_v31 }
 0x46b   : > { %10827 = vmatprep.mubr.msk.f32.mxu0 %vm8459_vm13, %v8531_v31 }
 0x46e   : > { %10828 = vmatmul.mubr.msk.f32.gmra.mxu0 %vm8459_vm13, %v8531_v31 }
 0x46f   : > { %10830 = vmatprep.mubr.msk.f32.mxu0 %vm8459_vm13, %v8531_v31 }
 0x472   : > { %10831 = vmatmul.mubr.msk.f32.gmra.mxu0 %vm8459_vm13, %v8531_v31 }
 0x473   : > { %10833 = vmatprep.mubr.msk.f32.mxu0 %vm8459_vm13, %v8531_v31 }
 0x476   : > { %10834 = vmatmul.mubr.msk.f32.gmra.mxu0 %vm8459_vm13, %v8531_v31 }
 0x477   : > { %10836 = vmatprep.mubr.msk.f32.mxu0 %vm8459_vm13, %v8531_v31 }
 0x47a   : > { %10837 = vmatmul.mubr.msk.f32.gmra.mxu0 %vm8459_vm13, %v8531_v31 }
 0x47b   : > { %10839 = vmatprep.mubr.msk.f32.mxu0 %vm8459_vm13, %v8531_v31 }
 0x47e   : > { %10840 = vmatmul.mubr.msk.f32.gmra.mxu0 %vm8459_vm13, %v8531_v31 }
 0x47f   : > { %10842 = vmatprep.mubr.msk.f32.mxu0 %vm8459_vm13, %v8531_v31 }
 0x482   : > { %10843 = vmatmul.mubr.msk.f32.gmra.mxu0 %vm8459_vm13, %v8531_v31 }
 0x483   : > { %10845 = vmatprep.mubr.msk.f32.mxu0 %vm8459_vm13, %v8531_v31 }
 0x486   : > { %10846 = vmatmul.mubr.msk.f32.gmra.mxu0 %vm8459_vm13, %v8531_v31 }
 0x487   : > { %10848 = vmatprep.mubr.msk.f32.mxu0 %vm8459_vm13, %v8531_v31 }
 0x48a   : > { %10849 = vmatmul.mubr.msk.f32.gmra.mxu0 %vm8459_vm13, %v8531_v31 }
 0x48b   : > { %10851 = vmatprep.mubr.msk.f32.mxu0 %vm8459_vm13, %v8531_v31 }
 0x48e   : > { %10852 = vmatmul.mubr.msk.f32.gmra.mxu0 %vm8459_vm13, %v8531_v31 }
 0x48f   : > { %10854 = vmatprep.mubr.msk.f32.mxu0 %vm8459_vm13, %v8531_v31 }
 0x492   : > { %10855 = vmatmul.mubr.msk.f32.gmra.mxu0 %vm8459_vm13, %v8531_v31 }
 0x493   : > { %10857 = vmatprep.mubr.msk.f32.mxu0 %vm8459_vm13, %v8531_v31 }
 0x496   : > { %10858 = vmatmul.mubr.msk.f32.gmra.mxu0 %vm8459_vm13, %v8531_v31 }
 0x51a   : > { %v10814_v21 = vpop.f32.mrf.mxu0 }
 0x51b   : > { %v8766_v19 = vsub.f32 0.0, %v10814_v21 }
 0x51c   : > { %v8606_v61 = vpop.f32.mrf.mxu0 }
 0x51d   : > { %v8799_v30 = vmul.f32 1.442695, %v8766_v19  ;;  %v8765_v24 = vsub.f32 0.0, %v8606_v61 }
 0x51e   : > { %v10817_v51 = vpop.f32.mrf.mxu0 }
 0x51f   : > { %10885 = vpow2.f32 %v8799_v30  ;;  %v8797_v23 = vmul.f32 1.442695, %v8765_v24  ;;  %v8768_v8 = vsub.f32 0.0, %v10817_v51 }
 0x520   : > { %v8616_v54 = vpop.f32.mrf.mxu0 }
 0x521   : > { %10887 = vpow2.f32 %v8797_v23  ;;  %v8803_v1 = vmul.f32 1.442695, %v8768_v8  ;;  %v8767_v47 = vsub.f32 0.0, %v8616_v54 }
 0x522   : > { %v10820_v60 = vpop.f32.mrf.mxu0 }
 0x523   : > { %10889 = vpow2.f32 %v8803_v1  ;;  %v8801_v12 = vmul.f32 1.442695, %v8767_v47  ;;  %v8770_v44 = vsub.f32 0.0, %v10820_v60 }
 0x524   : > { %v8626_v28 = vpop.f32.mrf.mxu0 }
 0x525   : > { %10891 = vpow2.f32 %v8801_v12  ;;  %v8807_v42 = vmul.f32 1.442695, %v8770_v44  ;;  %v8769_v4 = vsub.f32 0.0, %v8626_v28 }
 0x526   : > { %v10823_v39 = vpop.f32.mrf.mxu0 }
 0x527   : > { %10893 = vpow2.f32 %v8807_v42  ;;  %v8805_v46 = vmul.f32 1.442695, %v8769_v4  ;;  %v8772_v26 = vsub.f32 0.0, %v10823_v39 }
 0x528   : > { %v8636_v59 = vpop.f32.mrf.mxu0 }
 0x529   : > { %10895 = vpow2.f32 %v8805_v46  ;;  %v8811_v0 = vmul.f32 1.442695, %v8772_v26  ;;  %v8771_v18 = vsub.f32 0.0, %v8636_v59 }
 0x52a   : > { %v10826_v58 = vpop.f32.mrf.mxu0 }
 0x52b   : > { %10897 = vpow2.f32 %v8811_v0  ;;  %v8809_v36 = vmul.f32 1.442695, %v8771_v18  ;;  %v8774_v38 = vsub.f32 0.0, %v10826_v58 }
 0x52c   : > { %v10886_v9 = vpop.eup %10885  ;;  %v8646_v45 = vpop.f32.mrf.mxu0 }
 0x52d   : > { %v8862_v50 = vadd.f32 1.0, %v10886_v9  ;;  %10899 = vpow2.f32 %v8809_v36  ;;  %v8815_v32 = vmul.f32 1.442695, %v8774_v38  ;;  %v8773_v49 = vsub.f32 0.0, %v8646_v45 }
 0x52e   : > { %v10888_v11 = vpop.eup %10887  ;;  %v10829_v5 = vpop.f32.mrf.mxu0 }
 0x52f   : > { %10901 = vrcp.f32 %v8862_v50  ;;  %v8861_v16 = vadd.f32 1.0, %v10888_v11  ;;  %v8813_v15 = vmul.f32 1.442695, %v8773_v49  ;;  %v8776_v31 = vsub.f32 0.0, %v10829_v5 }
 0x530   : > { %v10890_v21 = vpop.eup %10889  ;;  %10903 = vpow2.f32 %v8815_v32  ;;  %v8656_v19 = vpop.f32.mrf.mxu0 }
 0x531   : > { %10905 = vrcp.f32 %v8861_v16  ;;  %v8864_v61 = vadd.f32 1.0, %v10890_v21  ;;  %v8819_v30 = vmul.f32 1.442695, %v8776_v31  ;;  %v8775_v24 = vsub.f32 0.0, %v8656_v19  ;;  %v15994_v16 = vld [vmem:[#allocation75_spill] sm:$0xff] }
 0x532   : > { %v10892_v51 = vpop.eup %10891  ;;  %10907 = vpow2.f32 %v8813_v15  ;;  %v10832_v23 = vpop.f32.mrf.mxu0 }
 0x533   : > { %10909 = vrcp.f32 %v8864_v61  ;;  %v8863_v8 = vadd.f32 1.0, %v10892_v51  ;;  %v8817_v54 = vmul.f32 1.442695, %v8775_v24  ;;  %v8778_v1 = vsub.f32 0.0, %v10832_v23  ;;  %v15995_v51 = vld [vmem:[#allocation78_spill] sm:$0xff] }
 0x534   : > { %v10894_v47 = vpop.eup %10893  ;;  %10911 = vpow2.f32 %v8819_v30  ;;  %v8666_v60 = vpop.f32.mrf.mxu0 }
 0x535   : > { %10913 = vrcp.f32 %v8863_v8  ;;  %v8866_v12 = vadd.f32 1.0, %v10894_v47  ;;  %v8823_v44 = vmul.f32 1.442695, %v8778_v1  ;;  %v8777_v28 = vsub.f32 0.0, %v8666_v60 }
 0x536   : > { %v10896_v42 = vpop.eup %10895  ;;  %10915 = vpow2.f32 %v8817_v54  ;;  %v10835_v4 = vpop.f32.mrf.mxu0 }
 0x537   : > { %10917 = vrcp.f32 %v8866_v12  ;;  %v8865_v39 = vadd.f32 1.0, %v10896_v42  ;;  %v8821_v46 = vmul.f32 1.442695, %v8777_v28  ;;  %v8780_v26 = vsub.f32 0.0, %v10835_v4 }
 0x538   : > { %v10898_v59 = vpop.eup %10897  ;;  %10919 = vpow2.f32 %v8823_v44  ;;  %v8676_v0 = vpop.f32.mrf.mxu0  ;;  %v15996_v44 = vld [vmem:[#allocation61_spill] sm:$0xff] }
 0x539   : > { %10921 = vrcp.f32 %v8865_v39  ;;  %v8868_v18 = vadd.f32 1.0, %v10898_v59  ;;  %v8827_v58 = vmul.f32 1.442695, %v8780_v26  ;;  %v8779_v36 = vsub.f32 0.0, %v8676_v0  ;;  %v15997_v0 = vld [vmem:[#allocation80_spill] sm:$0xff] }
 0x53a   : > { %v10900_v38 = vpop.eup %10899  ;;  %10923 = vpow2.f32 %v8821_v46  ;;  %v10838_v9 = vpop.f32.mrf.mxu0 }
 0x53b   : > { %10925 = vrcp.f32 %v8868_v18  ;;  %v8867_v45 = vadd.f32 1.0, %v10900_v38  ;;  %v8825_v50 = vmul.f32 1.442695, %v8779_v36  ;;  %v8782_v32 = vsub.f32 0.0, %v10838_v9 }
 0x53c   : > { %v10902_v49 = vpop.eup %10901  ;;  %10927 = vpow2.f32 %v8827_v58  ;;  %v8686_v11 = vpop.f32.mrf.mxu0 }
 0x53d   : > { %v10904_v5 = vpop.eup %10903  ;;  %v8958_v15 = vmul.f32 %v10902_v49, %v15994_v16  ;;  %10929 = vrcp.f32 %v8867_v45  ;;  %v8831_v31 = vmul.f32 1.442695, %v8782_v32  ;;  %v8781_v21 = vsub.f32 0.0, %v8686_v11 }
 0x53e   : > { %v10906_v19 = vpop.eup %10905  ;;  %v8870_v61 = vadd.f32 1.0, %v10904_v5  ;;  %10931 = vpow2.f32 %v8825_v50  ;;  %v10841_v30 = vpop.f32.mrf.mxu0 }
 0x53f   : > { %v10908_v24 = vpop.eup %10907  ;;  %8990 = vst.msk [vmem:[%s15188_s21 + $0x8] sm:$0xff] %vm2660_vm3, %v8958_v15  ;;  %v8957_v23 = vmul.f32 %v10906_v19, %v15995_v51  ;;  %10933 = vpow2.f32 %v8831_v31  ;;  %v8829_v8 = vmul.f32 1.442695, %v8781_v21  ;;  %v8784_v54 = vsub.f32 0.0, %v10841_v30 }
 0x540   : > { %v10910_v1 = vpop.eup %10909  ;;  %10935 = vrcp.f32 %v8870_v61  ;;  %v8869_v47 = vadd.f32 1.0, %v10908_v24  ;;  %v8696_v60 = vpop.f32.mrf.mxu0 }
 0x541   : > { %v10912_v12 = vpop.eup %10911  ;;  %8989 = vst.msk [vmem:[%s15188_s21] sm:$0xff] %vm2660_vm3, %v8957_v23  ;;  %v8960_v28 = vmul.f32 %v10910_v1, %v15996_v44  ;;  %10937 = vpow2.f32 %v8829_v8  ;;  %v8835_v42 = vmul.f32 1.442695, %v8784_v54  ;;  %v8783_v4 = vsub.f32 0.0, %v8696_v60 }
 0x542   : > { %v10914_v39 = vpop.eup %10913  ;;  %10939 = vrcp.f32 %v8869_v47  ;;  %v8872_v46 = vadd.f32 1.0, %v10912_v12  ;;  %v10844_v26 = vpop.f32.mrf.mxu0 }
 0x543   : > { %v10916_v59 = vpop.eup %10915  ;;  %8992 = vst.msk [vmem:[%s15188_s21 + $0x18] sm:$0xff] %vm2660_vm3, %v8960_v28  ;;  %v8959_v18 = vmul.f32 %v10914_v39, %v15997_v0  ;;  %10941 = vpow2.f32 %v8835_v42  ;;  %v8833_v58 = vmul.f32 1.442695, %v8783_v4  ;;  %v8786_v36 = vsub.f32 0.0, %v10844_v26 }
 0x544   : > { %v10918_v38 = vpop.eup %10917  ;;  %10943 = vrcp.f32 %v8872_v46  ;;  %v8871_v9 = vadd.f32 1.0, %v10916_v59  ;;  %v8706_v45 = vpop.f32.mrf.mxu0 }
 0x545   : > { %v10920_v50 = vpop.eup %10919  ;;  %8991 = vst.msk [vmem:[%s15188_s21 + $0x10] sm:$0xff] %vm2660_vm3, %v8959_v18  ;;  %v8962_v32 = vmul.f32 %v10918_v38, %v14714_v35  ;;  %10945 = vpow2.f32 %v8833_v58  ;;  %v8839_v49 = vmul.f32 1.442695, %v8786_v36  ;;  %v8785_v11 = vsub.f32 0.0, %v8706_v45 }
 0x546   : > { %v10922_v5 = vpop.eup %10921  ;;  %10947 = vrcp.f32 %v8871_v9  ;;  %v8874_v16 = vadd.f32 1.0, %v10920_v50  ;;  %v10847_v15 = vpop.f32.mrf.mxu0 }
 0x547   : > { %v10924_v31 = vpop.eup %10923  ;;  %8994 = vst.msk [vmem:[%s15188_s21 + $0x28] sm:$0xff] %vm2660_vm3, %v8962_v32  ;;  %v8961_v21 = vmul.f32 %v10922_v5, %v14731_v53  ;;  %10949 = vpow2.f32 %v8839_v49  ;;  %v8837_v19 = vmul.f32 1.442695, %v8785_v11  ;;  %v8788_v61 = vsub.f32 0.0, %v10847_v15 }
 0x548   : > { %v10926_v30 = vpop.eup %10925  ;;  %10951 = vrcp.f32 %v8874_v16  ;;  %v8873_v35 = vadd.f32 1.0, %v10924_v31  ;;  %v8716_v24 = vpop.f32.mrf.mxu0 }
 0x549   : > { %v10928_v51 = vpop.eup %10927  ;;  %8993 = vst.msk [vmem:[%s15188_s21 + $0x20] sm:$0xff] %vm2660_vm3, %v8961_v21  ;;  %v8964_v23 = vmul.f32 %v10926_v30, %v14750_v34  ;;  %10953 = vpow2.f32 %v8837_v19  ;;  %v8843_v8 = vmul.f32 1.442695, %v8788_v61  ;;  %v8787_v54 = vsub.f32 0.0, %v8716_v24 }
 0x54a   : > { %v10930_v1 = vpop.eup %10929  ;;  %10955 = vrcp.f32 %v8873_v35  ;;  %v8876_v53 = vadd.f32 1.0, %v10928_v51  ;;  %v10850_v47 = vpop.f32.mrf.mxu0 }
 0x54b   : > { %v10932_v60 = vpop.eup %10931  ;;  %8996 = vst.msk [vmem:[%s15188_s21 + $0x38] sm:$0xff] %vm2660_vm3, %v8964_v23  ;;  %v8963_v12 = vmul.f32 %v10930_v1, %v14766_v20  ;;  %10957 = vpow2.f32 %v8843_v8  ;;  %v8841_v44 = vmul.f32 1.442695, %v8787_v54  ;;  %v8790_v28 = vsub.f32 0.0, %v10850_v47 }
 0x54c   : > { %v10934_v42 = vpop.eup %10933  ;;  %10959 = vrcp.f32 %v8876_v53  ;;  %v8875_v4 = vadd.f32 1.0, %v10932_v60  ;;  %v8726_v34 = vpop.f32.mrf.mxu0 }
 0x54d   : > { %v10936_v39 = vpop.eup %10935  ;;  %8995 = vst.msk [vmem:[%s15188_s21 + $0x30] sm:$0xff] %vm2660_vm3, %v8963_v12  ;;  %v8878_v46 = vadd.f32 1.0, %v10934_v42  ;;  %10961 = vpow2.f32 %v8841_v44  ;;  %v8847_v26 = vmul.f32 1.442695, %v8790_v28  ;;  %v8789_v59 = vsub.f32 0.0, %v8726_v34 }
 0x54e   : > { %v10938_v0 = vpop.eup %10937  ;;  %v8966_v18 = vmul.f32 %v10936_v39, %v14811_v62  ;;  %10963 = vrcp.f32 %v8875_v4  ;;  %v10853_v20 = vpop.f32.mrf.mxu0 }
 0x54f   : > { %v10940_v58 = vpop.eup %10939  ;;  %10965 = vrcp.f32 %v8878_v46  ;;  %v8877_v36 = vadd.f32 1.0, %v10938_v0  ;;  %v8845_v38 = vmul.f32 1.442695, %v8789_v59  ;;  %v8792_v9 = vsub.f32 0.0, %v10853_v20 }
 0x550   : > { %v10942_v45 = vpop.eup %10941  ;;  %8998 = vst.msk [vmem:[%s15188_s21 + $0x48] sm:$0xff] %vm2660_vm3, %v8966_v18  ;;  %v8965_v50 = vmul.f32 %v10940_v58, %v14803_v7  ;;  %10967 = vpow2.f32 %v8847_v26  ;;  %v8736_v32 = vpop.f32.mrf.mxu0 }
 0x551   : > { %v10944_v49 = vpop.eup %10943  ;;  %10969 = vrcp.f32 %v8877_v36  ;;  %v8880_v11 = vadd.f32 1.0, %v10942_v45  ;;  %v8851_v62 = vmul.f32 1.442695, %v8792_v9  ;;  %v8791_v5 = vsub.f32 0.0, %v8736_v32 }
 0x552   : > { %v10946_v16 = vpop.eup %10945  ;;  %8997 = vst.msk [vmem:[%s15188_s21 + $0x40] sm:$0xff] %vm2660_vm3, %v8965_v50  ;;  %v8968_v15 = vmul.f32 %v10944_v49, %v14850_v56  ;;  %10971 = vpow2.f32 %v8845_v38  ;;  %v10856_v31 = vpop.f32.mrf.mxu0 }
 0x553   : > { %v10948_v21 = vpop.eup %10947  ;;  %10973 = vrcp.f32 %v8880_v11  ;;  %v8879_v19 = vadd.f32 1.0, %v10946_v16  ;;  %v8849_v7 = vmul.f32 1.442695, %v8791_v5  ;;  %v8794_v61 = vsub.f32 0.0, %v10856_v31 }
 0x554   : > { %v10950_v30 = vpop.eup %10949  ;;  %9000 = vst.msk [vmem:[%s15188_s21 + $0x58] sm:$0xff] %vm2660_vm3, %v8968_v15  ;;  %v8967_v35 = vmul.f32 %v10948_v21, %v14842_v2  ;;  %10975 = vpow2.f32 %v8851_v62  ;;  %v8746_v24 = vpop.f32.mrf.mxu0 }
 0x555   : > { %v10952_v51 = vpop.eup %10951  ;;  %10977 = vrcp.f32 %v8879_v19  ;;  %v8882_v23 = vadd.f32 1.0, %v10950_v30  ;;  %v8855_v56 = vmul.f32 1.442695, %v8794_v61  ;;  %v8793_v8 = vsub.f32 0.0, %v8746_v24 }
 0x556   : > { %v10954_v54 = vpop.eup %10953  ;;  %8999 = vst.msk [vmem:[%s15188_s21 + $0x50] sm:$0xff] %vm2660_vm3, %v8967_v35  ;;  %v8970_v1 = vmul.f32 %v10952_v51, %v14882_v33  ;;  %10979 = vpow2.f32 %v8849_v7  ;;  %v10859_v53 = vpop.f32.mrf.mxu0 }
 0x557   : > { %v10956_v47 = vpop.eup %10955  ;;  %10981 = vrcp.f32 %v8882_v23  ;;  %v8881_v60 = vadd.f32 1.0, %v10954_v54  ;;  %v8853_v2 = vmul.f32 1.442695, %v8793_v8  ;;  %v8796_v12 = vsub.f32 0.0, %v10859_v53 }
 0x558   : > { %v10958_v44 = vpop.eup %10957  ;;  %9002 = vst.msk [vmem:[%s15188_s21 + $0x68] sm:$0xff] %vm2660_vm3, %v8970_v1  ;;  %v8969_v28 = vmul.f32 %v10956_v47, %v14874_v52  ;;  %10983 = vpow2.f32 %v8855_v56  ;;  %v8756_v42 = vpop.f32.mrf.mxu0 }
 0x559   : > { %v10960_v4 = vpop.eup %10959  ;;  %10985 = vrcp.f32 %v8881_v60  ;;  %v8884_v34 = vadd.f32 1.0, %v10958_v44  ;;  %v8859_v33 = vmul.f32 1.442695, %v8796_v12  ;;  %v8795_v39 = vsub.f32 0.0, %v8756_v42 }
 0x55a   : > { %v10962_v46 = vpop.eup %10961  ;;  %9001 = vst.msk [vmem:[%s15188_s21 + $0x60] sm:$0xff] %vm2660_vm3, %v8969_v28  ;;  %v8972_v26 = vmul.f32 %v10960_v4, %v14913_v27  ;;  %10987 = vpow2.f32 %v8853_v2 }
 0x55b   : > { %v10964_v59 = vpop.eup %10963  ;;  %10989 = vrcp.f32 %v8884_v34  ;;  %v8883_v0 = vadd.f32 1.0, %v10962_v46  ;;  %v8857_v52 = vmul.f32 1.442695, %v8795_v39 }
 0x55c   : > { %v10966_v18 = vpop.eup %10965  ;;  %9004 = vst.msk [vmem:[%s15188_s21 + $0x78] sm:$0xff] %vm2660_vm3, %v8972_v26  ;;  %v8971_v20 = vmul.f32 %v10964_v59, %v14905_v25  ;;  %10991 = vpow2.f32 %v8859_v33 }
 0x55d   : > { %v10968_v58 = vpop.eup %10967  ;;  %v8974_v36 = vmul.f32 %v10966_v18, %v14947_v22  ;;  %10993 = vrcp.f32 %v8883_v0 }
 0x55e   : > { %v10970_v38 = vpop.eup %10969  ;;  %9003 = vst.msk [vmem:[%s15188_s21 + $0x70] sm:$0xff] %vm2660_vm3, %v8971_v20  ;;  %v8886_v27 = vadd.f32 1.0, %v10968_v58  ;;  %10995 = vpow2.f32 %v8857_v52 }
 0x55f   : > { %v10972_v9 = vpop.eup %10971  ;;  %9006 = vst.msk [vmem:[%s15188_s21 + $0x88] sm:$0xff] %vm2660_vm3, %v8974_v36  ;;  %v8973_v45 = vmul.f32 %v10970_v38, %v14941_v6 }
 0x560   : > { %v10974_v50 = vpop.eup %10973  ;;  %10997 = vrcp.f32 %v8886_v27  ;;  %v8885_v25 = vadd.f32 1.0, %v10972_v9 }
 0x561   : > { %v10976_v32 = vpop.eup %10975  ;;  %9005 = vst.msk [vmem:[%s15188_s21 + $0x80] sm:$0xff] %vm2660_vm3, %v8973_v45  ;;  %v8976_v22 = vmul.f32 %v10974_v50, %v14980_v43 }
 0x562   : > { %v10978_v49 = vpop.eup %10977  ;;  %10999 = vrcp.f32 %v8885_v25  ;;  %v8888_v11 = vadd.f32 1.0, %v10976_v32 }
 0x563   : > { %v10980_v62 = vpop.eup %10979  ;;  %9008 = vst.msk [vmem:[%s15188_s21 + $0x98] sm:$0xff] %vm2660_vm3, %v8976_v22  ;;  %v8975_v5 = vmul.f32 %v10978_v49, %v14974_v14 }
 0x564   : > { %v10982_v16 = vpop.eup %10981  ;;  %11001 = vrcp.f32 %v8888_v11  ;;  %v8887_v6 = vadd.f32 1.0, %v10980_v62 }
 0x565   : > { %v10984_v15 = vpop.eup %10983  ;;  %9007 = vst.msk [vmem:[%s15188_s21 + $0x90] sm:$0xff] %vm2660_vm3, %v8975_v5  ;;  %v8978_v31 = vmul.f32 %v10982_v16, %v15010_v3 }
 0x566   : > { %v10986_v21 = vpop.eup %10985  ;;  %11003 = vrcp.f32 %v8887_v6  ;;  %v8890_v43 = vadd.f32 1.0, %v10984_v15 }
 0x567   : > { %v10988_v19 = vpop.eup %10987  ;;  %9010 = vst.msk [vmem:[%s15188_s21 + $0xa8] sm:$0xff] %vm2660_vm3, %v8978_v31  ;;  %v8977_v7 = vmul.f32 %v10986_v21, %v15004_v37 }
 0x568   : > { %v10990_v14 = vpop.eup %10989  ;;  %11005 = vrcp.f32 %v8890_v43  ;;  %v8889_v61 = vadd.f32 1.0, %v10988_v19 }
 0x569   : > { %v10992_v30 = vpop.eup %10991  ;;  %9009 = vst.msk [vmem:[%s15188_s21 + $0xa0] sm:$0xff] %vm2660_vm3, %v8977_v7  ;;  %v8980_v35 = vmul.f32 %v10990_v14, %v15038_v41 }
 0x56a   : > { %v10994_v3 = vpop.eup %10993  ;;  %11007 = vrcp.f32 %v8889_v61  ;;  %v8892_v24 = vadd.f32 1.0, %v10992_v30 }
 0x56b   : > { %v10996_v51 = vpop.eup %10995  ;;  %9012 = vst.msk [vmem:[%s15188_s21 + $0xb8] sm:$0xff] %vm2660_vm3, %v8980_v35  ;;  %v8979_v37 = vmul.f32 %v10994_v3, %v15033_v63 }
 0x56c   : > { %11009 = vrcp.f32 %v8892_v24  ;;  %v8891_v23 = vadd.f32 1.0, %v10996_v51 }
 0x56d   : > { %v10998_v56 = vpop.eup %10997  ;;  %9011 = vst.msk [vmem:[%s15188_s21 + $0xb0] sm:$0xff] %vm2660_vm3, %v8979_v37 }
 0x56e   : > { %v8982_v8 = vmul.f32 %v10998_v56, %v15058_v10  ;;  %11011 = vrcp.f32 %v8891_v23 }
 0x56f   : > { %v11000_v41 = vpop.eup %10999 }
 0x570   : > { %9014 = vst.msk [vmem:[%s15188_s21 + $0xc8] sm:$0xff] %vm2660_vm3, %v8982_v8  ;;  %v8981_v54 = vmul.f32 %v11000_v41, %v15056_v29 }
 0x571   : > { %v11002_v1 = vpop.eup %11001 }
 0x572   : > { %9013 = vst.msk [vmem:[%s15188_s21 + $0xc0] sm:$0xff] %vm2660_vm3, %v8981_v54  ;;  %v8984_v63 = vmul.f32 %v11002_v1, %v15082_v17 }
 0x573   : > { %v11004_v53 = vpop.eup %11003 }
 0x574   : > { %9016 = vst.msk [vmem:[%s15188_s21 + $0xd8] sm:$0xff] %vm2660_vm3, %v8984_v63  ;;  %v8983_v47 = vmul.f32 %v11004_v53, %v15080_v57 }
 0x575   : > { %v11006_v10 = vpop.eup %11005 }
 0x576   : > { %9015 = vst.msk [vmem:[%s15188_s21 + $0xd0] sm:$0xff] %vm2660_vm3, %v8983_v47  ;;  %v8986_v60 = vmul.f32 %v11006_v10, %v15101_v40 }
 0x577   : > { %v11008_v2 = vpop.eup %11007 }
 0x578   : > { %9018 = vst.msk [vmem:[%s15188_s21 + $0xe8] sm:$0xff] %vm2660_vm3, %v8986_v60  ;;  %v8985_v29 = vmul.f32 %v11008_v2, %v15099_v55 }
 0x579   : > { %v11010_v12 = vpop.eup %11009 }
 0x57a   : > { %9017 = vst.msk [vmem:[%s15188_s21 + $0xe0] sm:$0xff] %vm2660_vm3, %v8985_v29  ;;  %v8988_v17 = vmul.f32 %v11010_v12, %v15111_v48 }
 0x57b   : > { %v11012_v44 = vpop.eup %11011 }
 0x57c   : > { %9020 = vst.msk [vmem:[%s15188_s21 + $0xf8] sm:$0xff] %vm2660_vm3, %v8988_v17  ;;  %v8987_v57 = vmul.f32 %v11012_v44, %v15109_v13 }
 0x57e   : > { %9019 = vst.msk [vmem:[%s15188_s21 + $0xf0] sm:$0xff] %vm2660_vm3, %v8987_v57 }
 0x57f PF: > { %s20_s13 = sadd.s32 1, %s11022_s13  }
 0x580   : > { %p17_p4 = scmp.ge.s32.totalorder %s20_s13, 4  }
 0x582   :  { %19 = sbr.rel (!%p17_p4) target bundleno = 1 (0x1), region = 100 }

</bundles_post_ra>
